<compile_context>
chip_gen: v7x
topology: tpu7x:2x2x1
jax: 0.10.0
libtpu: 0.0.40
codegen_flags: <defaults>
</compile_context>

<pallas_src>
import numpy as np

import jax
import jax.numpy as jnp
from jax import lax
from jax.experimental import pallas as pl
from jax.experimental.pallas import tpu as pltpu

# ---------------- module-consistent (toy) hyper-parameters ----------------
BATCH     = 2
CHANNELS  = 4            # EEG channels
SAMPLES   = 384          # downsampling 3*2*2*2*2*2 = 96  ->  encoded T = 4
ENCODER_H = 32           # encoder_h (divisible by 16 for grouped conv / GroupNorm)
POOL      = 4            # pool_length
TARGETS   = 2

ENC_WIDTHS  = (3, 3, 3, 3, 3, 3)     # enc_width=(3,2,2,2,2,2) made odd ("centerable")
ENC_STRIDES = (3, 2, 2, 2, 2, 2)
GN_GROUPS   = ENCODER_H // 2         # group size = 2 channels
RP_KERNEL   = 25                     # EncodingAugment position encoder
RP_GROUPS   = 16
EPS = 1e-5

_INV_SQRT2 = 0.7071067811865476

assert all(w == 3 for w in ENC_WIDTHS)
assert ENC_STRIDES[0] == ENC_WIDTHS[0] and all(s == 2 for s in ENC_STRIDES[1:])


def _enc_time_sizes():
    t = SAMPLES
    out = []
    for w, s in zip(ENC_WIDTHS, ENC_STRIDES):
        t = (t + 2 * (w // 2) - w) // s + 1
        out.append(t)
    return tuple(out)


T_ENC = _enc_time_sizes()            # (128, 64, 32, 16, 8, 4)
T_FINAL = T_ENC[-1]


# ---------------- math helpers (usable both inside the kernel and in the reference) ----------------
def _erf(x):
    # A&S 7.1.26 rational approximation (abs err ~1.5e-7); exact lax.erf lowering is
    # not guaranteed in Mosaic.
    sgn = jnp.where(x >= 0.0, 1.0, -1.0)
    a = jnp.abs(x)
    t = 1.0 / (1.0 + 0.3275911 * a)
    poly = ((((1.061405429 * t - 1.453152027) * t + 1.421413741) * t
             - 0.284496736) * t + 0.254829592) * t
    return sgn * (1.0 - poly * jnp.exp(-a * a))


def _gelu(x):
    # PyTorch nn.GELU() default = exact (erf-based) GELU.
    return 0.5 * x * (1.0 + _erf(x * _INV_SQRT2))


# ---------------- in-kernel helpers ----------------
def _pair_swap(v):
    # v: (1, C).  Swap adjacent lanes (0<->1, 2<->3, ...) so each channel can see its
    # GroupNorm partner (group size == 2).  Pure VPU/lane ops, no MXU push.
    left = jnp.concatenate([v[:, 1:], v[:, :1]], axis=1)     # v[c+1]
    right = jnp.concatenate([v[:, -1:], v[:, :-1]], axis=1)  # v[c-1]
    lane = lax.broadcasted_iota(jnp.int32, v.shape, 1)
    return jnp.where((lane & 1) == 0, left, right)


def _groupnorm_gelu(y, gamma, beta):
    # y: (B*T, C) pre-activation of one encoder block.  GroupNorm(C//2 groups of 2
    # channels) per sample over (2 channels, T), centered two-pass variance, affine,
    # then GELU.  gamma/beta: (1, C).
    bt, _ = y.shape
    t = bt // BATCH
    inv_denom = 1.0 / (2.0 * t)
    outs = []
    for b in range(BATCH):
        yb = y[b * t:(b + 1) * t]                             # (T, C)
        s = jnp.sum(yb, axis=0, keepdims=True)                # per-channel sums (1, C)
        gmean = (s + _pair_swap(s)) * inv_denom               # per-channel group mean
        d = yb - gmean
        ss = jnp.sum(d * d, axis=0, keepdims=True)
        gvar = (ss + _pair_swap(ss)) * inv_denom              # biased variance (as GroupNorm)
        yn = d / jnp.sqrt(gvar + EPS) * gamma + beta
        outs.append(_gelu(yn))
    return jnp.concatenate(outs, axis=0)                      # (B*T, C)


# ---------------- the single fused kernel ----------------
def _fused_forward_kernel(
        # encoder
        p0_ref, w0_ref, wenc_ref, benc_ref, genc_ref, bte_ref,
        sel1_ref, sel2_ref, sel3_ref, sel4_ref, sel5_ref,
        # EncodingAugment
        saug_ref, maug_ref, rpb_ref, lng_ref, lnb_ref, w1_ref, b1_ref,
        # summarizer + extended classifier + classifier
        pool_ref, wext_ref, bext_ref, bns_ref, bnb_ref, wcls_ref, bcls_ref,
        # output
        out_ref):
    # ---------- encoder block 0 (stride == width -> patches precomputed host-side) ----------
    y = jnp.dot(p0_ref[...], w0_ref[...], preferred_element_type=jnp.float32) + benc_ref[0]
    x = _groupnorm_gelu(y, genc_ref[0], bte_ref[0])           # (B*128, 32)

    # ---------- encoder blocks 1..5 (width 3, stride 2, pad 1) ----------
    # Patches are built in-kernel from the VMEM-resident activation via constant
    # batch-block-diagonal 0/1 shift matrices (one MXU matmul), then one conv matmul.
    for l, sel_ref in enumerate((sel1_ref, sel2_ref, sel3_ref, sel4_ref, sel5_ref)):
        shifted = jnp.dot(sel_ref[...], x, preferred_element_type=jnp.float32)  # (3*B*T_out, C)
        bt = shifted.shape[0] // 3
        patches = jnp.concatenate(
            [shifted[0:bt], shifted[bt:2 * bt], shifted[2 * bt:3 * bt]], axis=1)  # (B*T_out, 3C)
        y = jnp.dot(patches, wenc_ref[l], preferred_element_type=jnp.float32) + benc_ref[l + 1]
        x = _groupnorm_gelu(y, genc_ref[l + 1], bte_ref[l + 1])

    # ---------- EncodingAugment (eval: no masking) ----------
    # relative_position: grouped Conv1d(k=25, groups=16) expressed as a sum over the
    # (few) in-range taps of  (shift_d @ x) @ M_d  with block-diagonal M_d.
    bt = x.shape[0]                                           # B * T_final
    c = x.shape[1]                                            # encoder_h
    shifted = jnp.dot(saug_ref[...], x, preferred_element_type=jnp.float32)  # (n_taps*B*T, C)
    maug = maug_ref[...]
    n_taps = shifted.shape[0] // bt
    rp = jnp.dot(shifted[0:bt], maug[0:c], preferred_element_type=jnp.float32)
    for k in range(1, n_taps):
        rp = rp + jnp.dot(shifted[k * bt:(k + 1) * bt], maug[k * c:(k + 1) * c],
                          preferred_element_type=jnp.float32)
    y = x + _gelu(rp + rpb_ref[...])                          # x + relative_position(x)

    # input_conditioning: LayerNorm over channels, then 1x1 conv C -> 3C
    mu = jnp.mean(y, axis=1, keepdims=True)
    var = jnp.mean((y - mu) ** 2, axis=1, keepdims=True)
    yn = (y - mu) / jnp.sqrt(var + EPS) * lng_ref[...] + lnb_ref[...]
    z = jnp.dot(yn, w1_ref[...], preferred_element_type=jnp.float32) + b1_ref[...]  # (B*T, 3C)

    # ---------- summarizer (AdaptiveAvgPool1d) + extended classifier ----------
    # The torch Flatten permutation (feature index = c*P + p) is folded into the
    # per-pool-bin slices of the (pre-permuted) extended-classifier weight.
    pool = pool_ref[...]                                      # (P*B, B*T)
    wext = wext_ref[...]                                      # (P*3C, H)
    c3 = z.shape[1]
    h = None
    for pb in range(POOL):
        pooled_p = jnp.dot(pool[pb * BATCH:(pb + 1) * BATCH], z,
                           preferred_element_type=jnp.float32)       # (B, 3C)
        term = jnp.dot(pooled_p, wext[pb * c3:(pb + 1) * c3],
                       preferred_element_type=jnp.float32)           # (B, H)
        h = term if h is None else h + term
    h = jnp.maximum(h + bext_ref[...], 0.0)                   # Linear -> (Dropout) -> ReLU
    h = h * bns_ref[...] + bnb_ref[...]                       # BatchNorm1d (eval, pre-folded)

    # ---------- classifier: the only HBM write ----------
    out_ref[...] = jnp.dot(h, wcls_ref[...], preferred_element_type=jnp.float32) + bcls_ref[...]


# ---------------- host-side constant builders (static shapes, numpy) ----------------
def _stride2_selection(t_in):
    # Stacked, batch-block-diagonal 0/1 shift matrices for a width-3 / stride-2 / pad-1
    # conv.  Row (w*B*T_out + b*T_out + t) selects input row (b*T_in + 2t + w - 1),
    # or is all-zero where the window hits padding.
    t_out = t_in // 2
    out = np.zeros((3 * BATCH * t_out, BATCH * t_in), np.float32)
    for w in range(3):
        for b in range(BATCH):
            for t in range(t_out):
                i = 2 * t + w - 1
                if 0 <= i < t_in:
                    out[w * BATCH * t_out + b * t_out + t, b * t_in + i] = 1.0
    return out


def _augment_shift_stack(t):
    # Stacked batch-block-diagonal shift matrices for the k=25 grouped conv; only taps
    # that can land inside the (tiny) encoded sequence are kept.
    r = min(RP_KERNEL // 2, t - 1)
    taps = list(range(-r, r + 1))
    out = np.zeros((len(taps) * BATCH * t, BATCH * t), np.float32)
    for k, d in enumerate(taps):
        for b in range(BATCH):
            for tt in range(t):
                i = tt + d
                if 0 <= i < t:
                    out[k * BATCH * t + b * t + tt, b * t + i] = 1.0
    return out, taps


def _pool_matrix(t, p_bins):
    # PyTorch AdaptiveAvgPool1d bin edges: [floor(i*t/p), ceil((i+1)*t/p)).
    m = np.zeros((p_bins, t), np.float32)
    for i in range(p_bins):
        s = (i * t) // p_bins
        e = -((-(i + 1) * t) // p_bins)
        m[i, s:e] = 1.0 / (e - s)
    return m


def _pool_rows(t, p_bins):
    pm = _pool_matrix(t, p_bins)
    out = np.zeros((p_bins * BATCH, BATCH * t), np.float32)
    for i in range(p_bins):
        for b in range(BATCH):
            out[i * BATCH + b, b * t:(b + 1) * t] = pm[i]
    return out


# ---------------- operand packing (parameter reshapes are tiny, one-time XLA) ----------------
def _conv_weight_as_mat(w):
    # torch Conv1d weight (Cout, Cin, K) -> (K*Cin, Cout), patch index = w*Cin + c.
    cout, cin, kw = w.shape
    return jnp.transpose(w, (2, 1, 0)).reshape(kw * cin, cout)


def _augment_weight_stack(rp_w, taps):
    # Effective grouped-conv weight as a stack of dense block-diagonal (C, C) matrices,
    # one per kept tap.  weight_norm is assumed pre-folded into rp_w (eval).
    # TODO(synk): weight_norm reparameterisation (g * v/||v||) must be folded by the caller.
    c = ENCODER_H
    cg = c // RP_GROUPS
    og = c // RP_GROUPS
    onehot = np.zeros((c, c, cg), np.float32)
    for o in range(c):
        g = o // og
        for j in range(cg):
            onehot[g * cg + j, o, j] = 1.0
    idx = jnp.asarray([RP_KERNEL // 2 + d for d in taps], jnp.int32)
    sub = jnp.take(rp_w, idx, axis=2)                              # (C, cg, n_taps)
    m = jnp.einsum("ioj,ojk->kio", jnp.asarray(onehot), sub)       # (n_taps, C, C)
    return m.reshape(len(taps) * c, c)


def _build_operands(x_ncl, p):
    b = x_ncl.shape[0]
    assert b == BATCH
    # layer-0 patches (stride == width): pad-by-1 + reshape of the raw input.
    x = jnp.transpose(x_ncl, (0, 2, 1)).astype(jnp.float32)        # (B, T, C) channels-last
    t0, c0 = SAMPLES, CHANNELS
    xp = jnp.concatenate([jnp.zeros((b, 1, c0), jnp.float32), x[:, :t0 - 1, :]], axis=1)
    p0 = xp.reshape(b, T_ENC[0], ENC_WIDTHS[0] * c0).reshape(b * T_ENC[0], ENC_WIDTHS[0] * c0)

    w0 = _conv_weight_as_mat(p["enc0_w"])                                       # (12, 32)
    wenc = jnp.stack([_conv_weight_as_mat(p[f"enc{i}_w"]) for i in range(1, 6)])  # (5, 96, 32)
    benc = jnp.stack([p[f"enc{i}_b"] for i in range(6)]).reshape(6, 1, ENCODER_H)
    genc = jnp.stack([p[f"enc{i}_g"] for i in range(6)]).reshape(6, 1, ENCODER_H)
    bte = jnp.stack([p[f"enc{i}_beta"] for i in range(6)]).reshape(6, 1, ENCODER_H)

    sels = [jnp.asarray(_stride2_selection(t_in)) for t_in in T_ENC[:-1]]

    saug_np, taps = _augment_shift_stack(T_FINAL)
    saug = jnp.asarray(saug_np)
    maug = _augment_weight_stack(p["rp_w"], taps)

    poolrows = jnp.asarray(_pool_rows(T_FINAL, POOL))              # (P*B, B*T)
    h_dim = p["ext_w"].shape[0]
    # fold the torch Flatten permutation (index c*P + p) into per-bin weight slices
    wext = jnp.transpose(p["ext_w"].reshape(h_dim, 3 * ENCODER_H, POOL),
                         (2, 1, 0)).reshape(POOL * 3 * ENCODER_H, h_dim)
    bn_scale = p["bn_g"] / jnp.sqrt(p["bn_var"] + EPS)
    bn_shift = p["bn_b"] - p["bn_mean"] * bn_scale

    return (p0, w0, wenc, benc, genc, bte,
            sels[0], sels[1], sels[2], sels[3], sels[4],
            saug, maug,
            p["rp_b"].reshape(1, -1), p["ln_g"].reshape(1, -1), p["ln_b"].reshape(1, -1),
            jnp.transpose(p["pc_w"][:, :, 0]), p["pc_b"].reshape(1, -1),
            poolrows, wext, p["ext_b"].reshape(1, -1),
            bn_scale.reshape(1, -1), bn_shift.reshape(1, -1),
            jnp.transpose(p["cls_w"]), p["cls_b"].reshape(1, -1))


@jax.jit
def linear_head_bendr_forward(x_ncl, params):
    # x_ncl: (B, channels, samples) — PyTorch NCL layout.
    ops = _build_operands(x_ncl, params)
    return pl.pallas_call(
        _fused_forward_kernel,
        out_shape=jax.ShapeDtypeStruct((BATCH, TARGETS), jnp.float32),
        in_specs=[pl.BlockSpec(memory_space=pltpu.MemorySpace.VMEM)] * len(ops),
        out_specs=pl.BlockSpec(memory_space=pltpu.MemorySpace.VMEM),
        cost_estimate=pl.CostEstimate(
            flops=11_000_000, transcendentals=17_000, bytes_accessed=900_000),
    )(*ops)


# ---------------- pure-JAX reference (for correctness self-check) ----------------
def _ref_conv1d(x, w, bias, stride, pad, groups=1):
    out = lax.conv_general_dilated(
        x, jnp.transpose(w, (2, 1, 0)),
        window_strides=(stride,), padding=[(pad, pad)],
        dimension_numbers=("NHC", "HIO", "NHC"),
        feature_group_count=groups)
    return out + bias


def _ref_groupnorm(x, gamma, beta, groups):
    b, t, c = x.shape
    xg = x.reshape(b, t, groups, c // groups)
    mu = jnp.mean(xg, axis=(1, 3), keepdims=True)
    var = jnp.mean((xg - mu) ** 2, axis=(1, 3), keepdims=True)
    xn = ((xg - mu) / jnp.sqrt(var + EPS)).reshape(b, t, c)
    return xn * gamma + beta


def _reference_forward(x_ncl, p):
    with jax.default_matmul_precision("float32"):
        h = jnp.transpose(x_ncl, (0, 2, 1)).astype(jnp.float32)       # (B, T, C)
        for i, (w, s) in enumerate(zip(ENC_WIDTHS, ENC_STRIDES)):
            h = _ref_conv1d(h, p[f"enc{i}_w"], p[f"enc{i}_b"], s, w // 2)
            h = _gelu(_ref_groupnorm(h, p[f"enc{i}_g"], p[f"enc{i}_beta"], GN_GROUPS))
        rp = _ref_conv1d(h, p["rp_w"], p["rp_b"], 1, RP_KERNEL // 2, groups=RP_GROUPS)
        y = h + _gelu(rp)
        mu = jnp.mean(y, axis=-1, keepdims=True)
        var = jnp.mean((y - mu) ** 2, axis=-1, keepdims=True)
        yn = (y - mu) / jnp.sqrt(var + EPS) * p["ln_g"] + p["ln_b"]
        z = yn @ jnp.transpose(p["pc_w"][:, :, 0]) + p["pc_b"]        # (B, T, 3C)
        pm = jnp.asarray(_pool_matrix(z.shape[1], POOL))              # (P, T)
        pooled = jnp.einsum("pt,btc->bpc", pm, z)                     # (B, P, 3C)
        feats = jnp.transpose(pooled, (0, 2, 1)).reshape(z.shape[0], -1)  # Flatten: c*P + p
        hid = feats @ jnp.transpose(p["ext_w"]) + p["ext_b"]
        hid = jnp.maximum(hid, 0.0)
        hid = (hid - p["bn_mean"]) / jnp.sqrt(p["bn_var"] + EPS) * p["bn_g"] + p["bn_b"]
        return hid @ jnp.transpose(p["cls_w"]) + p["cls_b"]


# ---------------- deterministic synthetic parameters ----------------
def init_params(key):
    p = {}
    ks = iter(jax.random.split(key, 64))
    cin = CHANNELS
    for i, kw in enumerate(ENC_WIDTHS):
        p[f"enc{i}_w"] = jax.random.normal(next(ks), (ENCODER_H, cin, kw), jnp.float32) / np.sqrt(cin * kw)
        p[f"enc{i}_b"] = 0.01 * jax.random.normal(next(ks), (ENCODER_H,), jnp.float32)
        p[f"enc{i}_g"] = 1.0 + 0.1 * jax.random.normal(next(ks), (ENCODER_H,), jnp.float32)
        p[f"enc{i}_beta"] = 0.1 * jax.random.normal(next(ks), (ENCODER_H,), jnp.float32)
        cin = ENCODER_H
    cg = ENCODER_H // RP_GROUPS
    p["rp_w"] = jax.random.normal(next(ks), (ENCODER_H, cg, RP_KERNEL), jnp.float32) * (2.0 / (3 * ENCODER_H))
    p["rp_b"] = jnp.zeros((ENCODER_H,), jnp.float32)
    p["ln_g"] = 1.0 + 0.1 * jax.random.normal(next(ks), (ENCODER_H,), jnp.float32)
    p["ln_b"] = 0.1 * jax.random.normal(next(ks), (ENCODER_H,), jnp.float32)
    p["pc_w"] = jax.random.normal(next(ks), (3 * ENCODER_H, ENCODER_H, 1), jnp.float32) / np.sqrt(ENCODER_H)
    p["pc_b"] = 0.01 * jax.random.normal(next(ks), (3 * ENCODER_H,), jnp.float32)
    f_in, f_hid = 3 * ENCODER_H * POOL, ENCODER_H * POOL
    p["ext_w"] = jax.random.normal(next(ks), (f_hid, f_in), jnp.float32) / np.sqrt(f_in)
    p["ext_b"] = 0.01 * jax.random.normal(next(ks), (f_hid,), jnp.float32)
    p["bn_g"] = 1.0 + 0.1 * jax.random.normal(next(ks), (f_hid,), jnp.float32)
    p["bn_b"] = 0.1 * jax.random.normal(next(ks), (f_hid,), jnp.float32)
    p["bn_mean"] = jnp.zeros((f_hid,), jnp.float32)   # fresh BatchNorm1d running stats (eval mode)
    p["bn_var"] = jnp.ones((f_hid,), jnp.float32)
    p["cls_w"] = jax.random.normal(next(ks), (TARGETS, f_hid), jnp.float32) * np.sqrt(2.0 / (f_hid + TARGETS))
    p["cls_b"] = jnp.zeros((TARGETS,), jnp.float32)   # classifier bias zeroed, as in the module
    return p


if __name__ == "__main__":
    key = jax.random.PRNGKey(0)
    pkey, xkey = jax.random.split(key)
    params = init_params(pkey)
    x = jax.random.normal(xkey, (BATCH, CHANNELS, SAMPLES), jnp.float32)   # (B, channels, samples)

    logits = linear_head_bendr_forward(x, params)
    logits = jax.block_until_ready(logits)
    assert logits.shape == (BATCH, TARGETS) and logits.dtype == jnp.float32
    assert bool(jnp.all(jnp.isfinite(logits)))

    # self-check against a plain-JAX reference of the same eval-mode forward
    ref = _reference_forward(x, params)
    err = float(jnp.max(jnp.abs(logits - ref)))
    scale = float(jnp.max(jnp.abs(ref))) + 1e-6
    assert err <= 0.1 * max(1.0, scale), f"kernel/reference mismatch: {err} (scale {scale})"

    print("KERNEL_OK")
</pallas_src>

<mosaic_0001>
module attributes {stable_mosaic.version = 11 : i64} {
  func.func @_fused_forward_kernel(%arg0: memref<256x12xf32, #tpu.memory_space<vmem>>, %arg1: memref<12x32xf32, #tpu.memory_space<vmem>>, %arg2: memref<5x96x32xf32, #tpu.memory_space<vmem>>, %arg3: memref<6x1x32xf32, #tpu.memory_space<vmem>>, %arg4: memref<6x1x32xf32, #tpu.memory_space<vmem>>, %arg5: memref<6x1x32xf32, #tpu.memory_space<vmem>>, %arg6: memref<384x256xf32, #tpu.memory_space<vmem>>, %arg7: memref<192x128xf32, #tpu.memory_space<vmem>>, %arg8: memref<96x64xf32, #tpu.memory_space<vmem>>, %arg9: memref<48x32xf32, #tpu.memory_space<vmem>>, %arg10: memref<24x16xf32, #tpu.memory_space<vmem>>, %arg11: memref<56x8xf32, #tpu.memory_space<vmem>>, %arg12: memref<224x32xf32, #tpu.memory_space<vmem>>, %arg13: memref<1x32xf32, #tpu.memory_space<vmem>>, %arg14: memref<1x32xf32, #tpu.memory_space<vmem>>, %arg15: memref<1x32xf32, #tpu.memory_space<vmem>>, %arg16: memref<32x96xf32, #tpu.memory_space<vmem>>, %arg17: memref<1x96xf32, #tpu.memory_space<vmem>>, %arg18: memref<8x8xf32, #tpu.memory_space<vmem>>, %arg19: memref<384x128xf32, #tpu.memory_space<vmem>>, %arg20: memref<1x128xf32, #tpu.memory_space<vmem>>, %arg21: memref<1x128xf32, #tpu.memory_space<vmem>>, %arg22: memref<1x128xf32, #tpu.memory_space<vmem>>, %arg23: memref<128x2xf32, #tpu.memory_space<vmem>>, %arg24: memref<1x2xf32, #tpu.memory_space<vmem>>, %arg25: memref<2x2xf32, #tpu.memory_space<vmem>>) attributes {dimension_semantics = [], scalar_prefetch = 0 : i64, scratch_operands = 0 : i64, tpu.core_type = #tpu.core_type<tc>} {
    %c0 = arith.constant 0 : index
    %c0_0 = arith.constant 0 : index
    %0 = vector.load %arg0[%c0, %c0_0] : memref<256x12xf32, #tpu.memory_space<vmem>>, vector<256x12xf32>
    %c0_1 = arith.constant 0 : index
    %c0_2 = arith.constant 0 : index
    %1 = vector.load %arg1[%c0_1, %c0_2] : memref<12x32xf32, #tpu.memory_space<vmem>>, vector<12x32xf32>
    %cst = arith.constant dense<0.000000e+00> : vector<256x32xf32>
    %2 = tpu.matmul %0, %1, %cst {dimension_numbers = #tpu.dot_dimension_numbers<[1], [0], [0], [1], [0, 0, 1, 1], [], []>} : vector<256x12xf32>, vector<12x32xf32>, vector<256x32xf32> -> vector<256x32xf32>
    %c0_3 = arith.constant 0 : index
    %c0_4 = arith.constant 0 : index
    %c0_5 = arith.constant 0 : index
    %3 = vector.load %arg3[%c0_3, %c0_4, %c0_5] : memref<6x1x32xf32, #tpu.memory_space<vmem>>, vector<1x1x32xf32>
    %4 = vector.shape_cast %3 : vector<1x1x32xf32> to vector<1x32xf32>
    %5 = vector.broadcast %4 : vector<1x32xf32> to vector<256x32xf32>
    %6 = arith.addf %2, %5 : vector<256x32xf32>
    %c0_6 = arith.constant 0 : index
    %c0_7 = arith.constant 0 : index
    %c0_8 = arith.constant 0 : index
    %7 = vector.load %arg4[%c0_6, %c0_7, %c0_8] : memref<6x1x32xf32, #tpu.memory_space<vmem>>, vector<1x1x32xf32>
    %8 = vector.shape_cast %7 : vector<1x1x32xf32> to vector<1x32xf32>
    %c0_9 = arith.constant 0 : index
    %c0_10 = arith.constant 0 : index
    %c0_11 = arith.constant 0 : index
    %9 = vector.load %arg5[%c0_9, %c0_10, %c0_11] : memref<6x1x32xf32, #tpu.memory_space<vmem>>, vector<1x1x32xf32>
    %10 = vector.shape_cast %9 : vector<1x1x32xf32> to vector<1x32xf32>
    %11 = vector.extract_strided_slice %6 {offsets = [0, 0], sizes = [128, 32], strides = [1, 1]} : vector<256x32xf32> to vector<128x32xf32>
    %cst_12 = arith.constant dense<0.000000e+00> : vector<32xf32>
    %12 = vector.multi_reduction <add>, %11, %cst_12 [0] : vector<128x32xf32> to vector<32xf32>
    %13 = vector.shape_cast %12 : vector<32xf32> to vector<1x32xf32>
    %14 = vector.extract_strided_slice %13 {offsets = [0, 1], sizes = [1, 31], strides = [1, 1]} : vector<1x32xf32> to vector<1x31xf32>
    %15 = vector.extract_strided_slice %13 {offsets = [0, 0], sizes = [1, 1], strides = [1, 1]} : vector<1x32xf32> to vector<1x1xf32>
    %16 = tpu.concatenate %14, %15 in 1 : vector<1x31xf32>, vector<1x1xf32> -> vector<1x32xf32>
    %17 = vector.extract_strided_slice %13 {offsets = [0, 31], sizes = [1, 1], strides = [1, 1]} : vector<1x32xf32> to vector<1x1xf32>
    %18 = vector.extract_strided_slice %13 {offsets = [0, 0], sizes = [1, 31], strides = [1, 1]} : vector<1x32xf32> to vector<1x31xf32>
    %19 = tpu.concatenate %17, %18 in 1 : vector<1x1xf32>, vector<1x31xf32> -> vector<1x32xf32>
    %20 = tpu.iota {dimensions = array<i32: 1>} : vector<1x32xi32>
    %c1_i32 = arith.constant 1 : i32
    %21 = vector.broadcast %c1_i32 : i32 to vector<1x32xi32>
    %22 = arith.andi %20, %21 : vector<1x32xi32>
    %c0_i32 = arith.constant 0 : i32
    %23 = vector.broadcast %c0_i32 : i32 to vector<1x32xi32>
    %24 = arith.cmpi eq, %22, %23 : vector<1x32xi32>
    %25 = arith.select %24, %16, %19 : vector<1x32xi1>, vector<1x32xf32>
    %26 = arith.addf %13, %25 : vector<1x32xf32>
    %cst_13 = arith.constant 3.906250e-03 : f32
    %27 = vector.broadcast %cst_13 : f32 to vector<1x32xf32>
    %28 = arith.mulf %26, %27 : vector<1x32xf32>
    %29 = vector.broadcast %28 : vector<1x32xf32> to vector<128x32xf32>
    %30 = arith.subf %11, %29 : vector<128x32xf32>
    %31 = arith.mulf %30, %30 : vector<128x32xf32>
    %cst_14 = arith.constant dense<0.000000e+00> : vector<32xf32>
    %32 = vector.multi_reduction <add>, %31, %cst_14 [0] : vector<128x32xf32> to vector<32xf32>
    %33 = vector.shape_cast %32 : vector<32xf32> to vector<1x32xf32>
    %34 = vector.extract_strided_slice %33 {offsets = [0, 1], sizes = [1, 31], strides = [1, 1]} : vector<1x32xf32> to vector<1x31xf32>
    %35 = vector.extract_strided_slice %33 {offsets = [0, 0], sizes = [1, 1], strides = [1, 1]} : vector<1x32xf32> to vector<1x1xf32>
    %36 = tpu.concatenate %34, %35 in 1 : vector<1x31xf32>, vector<1x1xf32> -> vector<1x32xf32>
    %37 = vector.extract_strided_slice %33 {offsets = [0, 31], sizes = [1, 1], strides = [1, 1]} : vector<1x32xf32> to vector<1x1xf32>
    %38 = vector.extract_strided_slice %33 {offsets = [0, 0], sizes = [1, 31], strides = [1, 1]} : vector<1x32xf32> to vector<1x31xf32>
    %39 = tpu.concatenate %37, %38 in 1 : vector<1x1xf32>, vector<1x31xf32> -> vector<1x32xf32>
    %40 = tpu.iota {dimensions = array<i32: 1>} : vector<1x32xi32>
    %c1_i32_15 = arith.constant 1 : i32
    %41 = vector.broadcast %c1_i32_15 : i32 to vector<1x32xi32>
    %42 = arith.andi %40, %41 : vector<1x32xi32>
    %c0_i32_16 = arith.constant 0 : i32
    %43 = vector.broadcast %c0_i32_16 : i32 to vector<1x32xi32>
    %44 = arith.cmpi eq, %42, %43 : vector<1x32xi32>
    %45 = arith.select %44, %36, %39 : vector<1x32xi1>, vector<1x32xf32>
    %46 = arith.addf %33, %45 : vector<1x32xf32>
    %cst_17 = arith.constant 3.906250e-03 : f32
    %47 = vector.broadcast %cst_17 : f32 to vector<1x32xf32>
    %48 = arith.mulf %46, %47 : vector<1x32xf32>
    %cst_18 = arith.constant 9.99999974E-6 : f32
    %49 = vector.broadcast %cst_18 : f32 to vector<1x32xf32>
    %50 = arith.addf %48, %49 : vector<1x32xf32>
    %51 = math.sqrt %50 : vector<1x32xf32>
    %52 = vector.broadcast %51 : vector<1x32xf32> to vector<128x32xf32>
    %53 = arith.divf %30, %52 : vector<128x32xf32>
    %54 = vector.broadcast %8 : vector<1x32xf32> to vector<128x32xf32>
    %55 = arith.mulf %53, %54 : vector<128x32xf32>
    %56 = vector.broadcast %10 : vector<1x32xf32> to vector<128x32xf32>
    %57 = arith.addf %55, %56 : vector<128x32xf32>
    %cst_19 = arith.constant 5.000000e-01 : f32
    %58 = vector.broadcast %cst_19 : f32 to vector<128x32xf32>
    %59 = arith.mulf %58, %57 : vector<128x32xf32>
    %cst_20 = arith.constant 0.707106769 : f32
    %60 = vector.broadcast %cst_20 : f32 to vector<128x32xf32>
    %61 = arith.mulf %57, %60 : vector<128x32xf32>
    %cst_21 = arith.constant 0.000000e+00 : f32
    %62 = vector.broadcast %cst_21 : f32 to vector<128x32xf32>
    %63 = arith.cmpf oge, %61, %62 : vector<128x32xf32>
    %cst_22 = arith.constant 1.000000e+00 : f32
    %cst_23 = arith.constant -1.000000e+00 : f32
    %64 = vector.broadcast %cst_22 : f32 to vector<128x32xf32>
    %65 = vector.broadcast %cst_23 : f32 to vector<128x32xf32>
    %66 = arith.select %63, %64, %65 : vector<128x32xi1>, vector<128x32xf32>
    %67 = math.absf %61 : vector<128x32xf32>
    %cst_24 = arith.constant 0.327591091 : f32
    %68 = vector.broadcast %cst_24 : f32 to vector<128x32xf32>
    %69 = arith.mulf %68, %67 : vector<128x32xf32>
    %cst_25 = arith.constant 1.000000e+00 : f32
    %70 = vector.broadcast %cst_25 : f32 to vector<128x32xf32>
    %71 = arith.addf %70, %69 : vector<128x32xf32>
    %cst_26 = arith.constant 1.000000e+00 : f32
    %72 = vector.broadcast %cst_26 : f32 to vector<128x32xf32>
    %73 = arith.divf %72, %71 : vector<128x32xf32>
    %cst_27 = arith.constant 1.06140542 : f32
    %74 = vector.broadcast %cst_27 : f32 to vector<128x32xf32>
    %75 = arith.mulf %74, %73 : vector<128x32xf32>
    %cst_28 = arith.constant 1.45315206 : f32
    %76 = vector.broadcast %cst_28 : f32 to vector<128x32xf32>
    %77 = arith.subf %75, %76 : vector<128x32xf32>
    %78 = arith.mulf %77, %73 : vector<128x32xf32>
    %cst_29 = arith.constant 1.42141378 : f32
    %79 = vector.broadcast %cst_29 : f32 to vector<128x32xf32>
    %80 = arith.addf %78, %79 : vector<128x32xf32>
    %81 = arith.mulf %80, %73 : vector<128x32xf32>
    %cst_30 = arith.constant 0.284496725 : f32
    %82 = vector.broadcast %cst_30 : f32 to vector<128x32xf32>
    %83 = arith.subf %81, %82 : vector<128x32xf32>
    %84 = arith.mulf %83, %73 : vector<128x32xf32>
    %cst_31 = arith.constant 0.254829586 : f32
    %85 = vector.broadcast %cst_31 : f32 to vector<128x32xf32>
    %86 = arith.addf %84, %85 : vector<128x32xf32>
    %87 = arith.mulf %86, %73 : vector<128x32xf32>
    %cst_32 = arith.constant 0.000000e+00 : f32
    %88 = vector.broadcast %cst_32 : f32 to vector<128x32xf32>
    %89 = arith.subf %88, %67 : vector<128x32xf32>
    %90 = arith.mulf %89, %67 : vector<128x32xf32>
    %91 = math.exp %90 : vector<128x32xf32>
    %92 = arith.mulf %87, %91 : vector<128x32xf32>
    %cst_33 = arith.constant 1.000000e+00 : f32
    %93 = vector.broadcast %cst_33 : f32 to vector<128x32xf32>
    %94 = arith.subf %93, %92 : vector<128x32xf32>
    %95 = arith.mulf %66, %94 : vector<128x32xf32>
    %cst_34 = arith.constant 1.000000e+00 : f32
    %96 = vector.broadcast %cst_34 : f32 to vector<128x32xf32>
    %97 = arith.addf %96, %95 : vector<128x32xf32>
    %98 = arith.mulf %59, %97 : vector<128x32xf32>
    %99 = vector.extract_strided_slice %6 {offsets = [128, 0], sizes = [128, 32], strides = [1, 1]} : vector<256x32xf32> to vector<128x32xf32>
    %cst_35 = arith.constant dense<0.000000e+00> : vector<32xf32>
    %100 = vector.multi_reduction <add>, %99, %cst_35 [0] : vector<128x32xf32> to vector<32xf32>
    %101 = vector.shape_cast %100 : vector<32xf32> to vector<1x32xf32>
    %102 = vector.extract_strided_slice %101 {offsets = [0, 1], sizes = [1, 31], strides = [1, 1]} : vector<1x32xf32> to vector<1x31xf32>
    %103 = vector.extract_strided_slice %101 {offsets = [0, 0], sizes = [1, 1], strides = [1, 1]} : vector<1x32xf32> to vector<1x1xf32>
    %104 = tpu.concatenate %102, %103 in 1 : vector<1x31xf32>, vector<1x1xf32> -> vector<1x32xf32>
    %105 = vector.extract_strided_slice %101 {offsets = [0, 31], sizes = [1, 1], strides = [1, 1]} : vector<1x32xf32> to vector<1x1xf32>
    %106 = vector.extract_strided_slice %101 {offsets = [0, 0], sizes = [1, 31], strides = [1, 1]} : vector<1x32xf32> to vector<1x31xf32>
    %107 = tpu.concatenate %105, %106 in 1 : vector<1x1xf32>, vector<1x31xf32> -> vector<1x32xf32>
    %108 = tpu.iota {dimensions = array<i32: 1>} : vector<1x32xi32>
    %c1_i32_36 = arith.constant 1 : i32
    %109 = vector.broadcast %c1_i32_36 : i32 to vector<1x32xi32>
    %110 = arith.andi %108, %109 : vector<1x32xi32>
    %c0_i32_37 = arith.constant 0 : i32
    %111 = vector.broadcast %c0_i32_37 : i32 to vector<1x32xi32>
    %112 = arith.cmpi eq, %110, %111 : vector<1x32xi32>
    %113 = arith.select %112, %104, %107 : vector<1x32xi1>, vector<1x32xf32>
    %114 = arith.addf %101, %113 : vector<1x32xf32>
    %cst_38 = arith.constant 3.906250e-03 : f32
    %115 = vector.broadcast %cst_38 : f32 to vector<1x32xf32>
    %116 = arith.mulf %114, %115 : vector<1x32xf32>
    %117 = vector.broadcast %116 : vector<1x32xf32> to vector<128x32xf32>
    %118 = arith.subf %99, %117 : vector<128x32xf32>
    %119 = arith.mulf %118, %118 : vector<128x32xf32>
    %cst_39 = arith.constant dense<0.000000e+00> : vector<32xf32>
    %120 = vector.multi_reduction <add>, %119, %cst_39 [0] : vector<128x32xf32> to vector<32xf32>
    %121 = vector.shape_cast %120 : vector<32xf32> to vector<1x32xf32>
    %122 = vector.extract_strided_slice %121 {offsets = [0, 1], sizes = [1, 31], strides = [1, 1]} : vector<1x32xf32> to vector<1x31xf32>
    %123 = vector.extract_strided_slice %121 {offsets = [0, 0], sizes = [1, 1], strides = [1, 1]} : vector<1x32xf32> to vector<1x1xf32>
    %124 = tpu.concatenate %122, %123 in 1 : vector<1x31xf32>, vector<1x1xf32> -> vector<1x32xf32>
    %125 = vector.extract_strided_slice %121 {offsets = [0, 31], sizes = [1, 1], strides = [1, 1]} : vector<1x32xf32> to vector<1x1xf32>
    %126 = vector.extract_strided_slice %121 {offsets = [0, 0], sizes = [1, 31], strides = [1, 1]} : vector<1x32xf32> to vector<1x31xf32>
    %127 = tpu.concatenate %125, %126 in 1 : vector<1x1xf32>, vector<1x31xf32> -> vector<1x32xf32>
    %128 = tpu.iota {dimensions = array<i32: 1>} : vector<1x32xi32>
    %c1_i32_40 = arith.constant 1 : i32
    %129 = vector.broadcast %c1_i32_40 : i32 to vector<1x32xi32>
    %130 = arith.andi %128, %129 : vector<1x32xi32>
    %c0_i32_41 = arith.constant 0 : i32
    %131 = vector.broadcast %c0_i32_41 : i32 to vector<1x32xi32>
    %132 = arith.cmpi eq, %130, %131 : vector<1x32xi32>
    %133 = arith.select %132, %124, %127 : vector<1x32xi1>, vector<1x32xf32>
    %134 = arith.addf %121, %133 : vector<1x32xf32>
    %cst_42 = arith.constant 3.906250e-03 : f32
    %135 = vector.broadcast %cst_42 : f32 to vector<1x32xf32>
    %136 = arith.mulf %134, %135 : vector<1x32xf32>
    %cst_43 = arith.constant 9.99999974E-6 : f32
    %137 = vector.broadcast %cst_43 : f32 to vector<1x32xf32>
    %138 = arith.addf %136, %137 : vector<1x32xf32>
    %139 = math.sqrt %138 : vector<1x32xf32>
    %140 = vector.broadcast %139 : vector<1x32xf32> to vector<128x32xf32>
    %141 = arith.divf %118, %140 : vector<128x32xf32>
    %142 = vector.broadcast %8 : vector<1x32xf32> to vector<128x32xf32>
    %143 = arith.mulf %141, %142 : vector<128x32xf32>
    %144 = vector.broadcast %10 : vector<1x32xf32> to vector<128x32xf32>
    %145 = arith.addf %143, %144 : vector<128x32xf32>
    %cst_44 = arith.constant 5.000000e-01 : f32
    %146 = vector.broadcast %cst_44 : f32 to vector<128x32xf32>
    %147 = arith.mulf %146, %145 : vector<128x32xf32>
    %cst_45 = arith.constant 0.707106769 : f32
    %148 = vector.broadcast %cst_45 : f32 to vector<128x32xf32>
    %149 = arith.mulf %145, %148 : vector<128x32xf32>
    %cst_46 = arith.constant 0.000000e+00 : f32
    %150 = vector.broadcast %cst_46 : f32 to vector<128x32xf32>
    %151 = arith.cmpf oge, %149, %150 : vector<128x32xf32>
    %cst_47 = arith.constant 1.000000e+00 : f32
    %cst_48 = arith.constant -1.000000e+00 : f32
    %152 = vector.broadcast %cst_47 : f32 to vector<128x32xf32>
    %153 = vector.broadcast %cst_48 : f32 to vector<128x32xf32>
    %154 = arith.select %151, %152, %153 : vector<128x32xi1>, vector<128x32xf32>
    %155 = math.absf %149 : vector<128x32xf32>
    %cst_49 = arith.constant 0.327591091 : f32
    %156 = vector.broadcast %cst_49 : f32 to vector<128x32xf32>
    %157 = arith.mulf %156, %155 : vector<128x32xf32>
    %cst_50 = arith.constant 1.000000e+00 : f32
    %158 = vector.broadcast %cst_50 : f32 to vector<128x32xf32>
    %159 = arith.addf %158, %157 : vector<128x32xf32>
    %cst_51 = arith.constant 1.000000e+00 : f32
    %160 = vector.broadcast %cst_51 : f32 to vector<128x32xf32>
    %161 = arith.divf %160, %159 : vector<128x32xf32>
    %cst_52 = arith.constant 1.06140542 : f32
    %162 = vector.broadcast %cst_52 : f32 to vector<128x32xf32>
    %163 = arith.mulf %162, %161 : vector<128x32xf32>
    %cst_53 = arith.constant 1.45315206 : f32
    %164 = vector.broadcast %cst_53 : f32 to vector<128x32xf32>
    %165 = arith.subf %163, %164 : vector<128x32xf32>
    %166 = arith.mulf %165, %161 : vector<128x32xf32>
    %cst_54 = arith.constant 1.42141378 : f32
    %167 = vector.broadcast %cst_54 : f32 to vector<128x32xf32>
    %168 = arith.addf %166, %167 : vector<128x32xf32>
    %169 = arith.mulf %168, %161 : vector<128x32xf32>
    %cst_55 = arith.constant 0.284496725 : f32
    %170 = vector.broadcast %cst_55 : f32 to vector<128x32xf32>
    %171 = arith.subf %169, %170 : vector<128x32xf32>
    %172 = arith.mulf %171, %161 : vector<128x32xf32>
    %cst_56 = arith.constant 0.254829586 : f32
    %173 = vector.broadcast %cst_56 : f32 to vector<128x32xf32>
    %174 = arith.addf %172, %173 : vector<128x32xf32>
    %175 = arith.mulf %174, %161 : vector<128x32xf32>
    %cst_57 = arith.constant 0.000000e+00 : f32
    %176 = vector.broadcast %cst_57 : f32 to vector<128x32xf32>
    %177 = arith.subf %176, %155 : vector<128x32xf32>
    %178 = arith.mulf %177, %155 : vector<128x32xf32>
    %179 = math.exp %178 : vector<128x32xf32>
    %180 = arith.mulf %175, %179 : vector<128x32xf32>
    %cst_58 = arith.constant 1.000000e+00 : f32
    %181 = vector.broadcast %cst_58 : f32 to vector<128x32xf32>
    %182 = arith.subf %181, %180 : vector<128x32xf32>
    %183 = arith.mulf %154, %182 : vector<128x32xf32>
    %cst_59 = arith.constant 1.000000e+00 : f32
    %184 = vector.broadcast %cst_59 : f32 to vector<128x32xf32>
    %185 = arith.addf %184, %183 : vector<128x32xf32>
    %186 = arith.mulf %147, %185 : vector<128x32xf32>
    %187 = tpu.concatenate %98, %186 in 0 : vector<128x32xf32>, vector<128x32xf32> -> vector<256x32xf32>
    %c0_60 = arith.constant 0 : index
    %c0_61 = arith.constant 0 : index
    %188 = vector.load %arg6[%c0_60, %c0_61] : memref<384x256xf32, #tpu.memory_space<vmem>>, vector<384x256xf32>
    %cst_62 = arith.constant dense<0.000000e+00> : vector<384x32xf32>
    %189 = tpu.matmul %188, %187, %cst_62 {dimension_numbers = #tpu.dot_dimension_numbers<[1], [0], [0], [1], [0, 0, 1, 1], [], []>} : vector<384x256xf32>, vector<256x32xf32>, vector<384x32xf32> -> vector<384x32xf32>
    %190 = vector.extract_strided_slice %189 {offsets = [0, 0], sizes = [128, 32], strides = [1, 1]} : vector<384x32xf32> to vector<128x32xf32>
    %191 = vector.extract_strided_slice %189 {offsets = [128, 0], sizes = [128, 32], strides = [1, 1]} : vector<384x32xf32> to vector<128x32xf32>
    %192 = vector.extract_strided_slice %189 {offsets = [256, 0], sizes = [128, 32], strides = [1, 1]} : vector<384x32xf32> to vector<128x32xf32>
    %193 = tpu.concatenate %190, %191, %192 in 1 : vector<128x32xf32>, vector<128x32xf32>, vector<128x32xf32> -> vector<128x96xf32>
    %c0_63 = arith.constant 0 : index
    %c0_64 = arith.constant 0 : index
    %c0_65 = arith.constant 0 : index
    %194 = vector.load %arg2[%c0_63, %c0_64, %c0_65] : memref<5x96x32xf32, #tpu.memory_space<vmem>>, vector<1x96x32xf32>
    %195 = vector.shape_cast %194 : vector<1x96x32xf32> to vector<96x32xf32>
    %cst_66 = arith.constant dense<0.000000e+00> : vector<128x32xf32>
    %196 = tpu.matmul %193, %195, %cst_66 {dimension_numbers = #tpu.dot_dimension_numbers<[1], [0], [0], [1], [0, 0, 1, 1], [], []>} : vector<128x96xf32>, vector<96x32xf32>, vector<128x32xf32> -> vector<128x32xf32>
    %c1 = arith.constant 1 : index
    %c0_67 = arith.constant 0 : index
    %c0_68 = arith.constant 0 : index
    %197 = vector.load %arg3[%c1, %c0_67, %c0_68] : memref<6x1x32xf32, #tpu.memory_space<vmem>>, vector<1x1x32xf32>
    %198 = vector.shape_cast %197 : vector<1x1x32xf32> to vector<1x32xf32>
    %199 = vector.broadcast %198 : vector<1x32xf32> to vector<128x32xf32>
    %200 = arith.addf %196, %199 : vector<128x32xf32>
    %c1_69 = arith.constant 1 : index
    %c0_70 = arith.constant 0 : index
    %c0_71 = arith.constant 0 : index
    %201 = vector.load %arg4[%c1_69, %c0_70, %c0_71] : memref<6x1x32xf32, #tpu.memory_space<vmem>>, vector<1x1x32xf32>
    %202 = vector.shape_cast %201 : vector<1x1x32xf32> to vector<1x32xf32>
    %c1_72 = arith.constant 1 : index
    %c0_73 = arith.constant 0 : index
    %c0_74 = arith.constant 0 : index
    %203 = vector.load %arg5[%c1_72, %c0_73, %c0_74] : memref<6x1x32xf32, #tpu.memory_space<vmem>>, vector<1x1x32xf32>
    %204 = vector.shape_cast %203 : vector<1x1x32xf32> to vector<1x32xf32>
    %205 = vector.extract_strided_slice %200 {offsets = [0, 0], sizes = [64, 32], strides = [1, 1]} : vector<128x32xf32> to vector<64x32xf32>
    %cst_75 = arith.constant dense<0.000000e+00> : vector<32xf32>
    %206 = vector.multi_reduction <add>, %205, %cst_75 [0] : vector<64x32xf32> to vector<32xf32>
    %207 = vector.shape_cast %206 : vector<32xf32> to vector<1x32xf32>
    %208 = vector.extract_strided_slice %207 {offsets = [0, 1], sizes = [1, 31], strides = [1, 1]} : vector<1x32xf32> to vector<1x31xf32>
    %209 = vector.extract_strided_slice %207 {offsets = [0, 0], sizes = [1, 1], strides = [1, 1]} : vector<1x32xf32> to vector<1x1xf32>
    %210 = tpu.concatenate %208, %209 in 1 : vector<1x31xf32>, vector<1x1xf32> -> vector<1x32xf32>
    %211 = vector.extract_strided_slice %207 {offsets = [0, 31], sizes = [1, 1], strides = [1, 1]} : vector<1x32xf32> to vector<1x1xf32>
    %212 = vector.extract_strided_slice %207 {offsets = [0, 0], sizes = [1, 31], strides = [1, 1]} : vector<1x32xf32> to vector<1x31xf32>
    %213 = tpu.concatenate %211, %212 in 1 : vector<1x1xf32>, vector<1x31xf32> -> vector<1x32xf32>
    %214 = tpu.iota {dimensions = array<i32: 1>} : vector<1x32xi32>
    %c1_i32_76 = arith.constant 1 : i32
    %215 = vector.broadcast %c1_i32_76 : i32 to vector<1x32xi32>
    %216 = arith.andi %214, %215 : vector<1x32xi32>
    %c0_i32_77 = arith.constant 0 : i32
    %217 = vector.broadcast %c0_i32_77 : i32 to vector<1x32xi32>
    %218 = arith.cmpi eq, %216, %217 : vector<1x32xi32>
    %219 = arith.select %218, %210, %213 : vector<1x32xi1>, vector<1x32xf32>
    %220 = arith.addf %207, %219 : vector<1x32xf32>
    %cst_78 = arith.constant 7.812500e-03 : f32
    %221 = vector.broadcast %cst_78 : f32 to vector<1x32xf32>
    %222 = arith.mulf %220, %221 : vector<1x32xf32>
    %223 = vector.broadcast %222 : vector<1x32xf32> to vector<64x32xf32>
    %224 = arith.subf %205, %223 : vector<64x32xf32>
    %225 = arith.mulf %224, %224 : vector<64x32xf32>
    %cst_79 = arith.constant dense<0.000000e+00> : vector<32xf32>
    %226 = vector.multi_reduction <add>, %225, %cst_79 [0] : vector<64x32xf32> to vector<32xf32>
    %227 = vector.shape_cast %226 : vector<32xf32> to vector<1x32xf32>
    %228 = vector.extract_strided_slice %227 {offsets = [0, 1], sizes = [1, 31], strides = [1, 1]} : vector<1x32xf32> to vector<1x31xf32>
    %229 = vector.extract_strided_slice %227 {offsets = [0, 0], sizes = [1, 1], strides = [1, 1]} : vector<1x32xf32> to vector<1x1xf32>
    %230 = tpu.concatenate %228, %229 in 1 : vector<1x31xf32>, vector<1x1xf32> -> vector<1x32xf32>
    %231 = vector.extract_strided_slice %227 {offsets = [0, 31], sizes = [1, 1], strides = [1, 1]} : vector<1x32xf32> to vector<1x1xf32>
    %232 = vector.extract_strided_slice %227 {offsets = [0, 0], sizes = [1, 31], strides = [1, 1]} : vector<1x32xf32> to vector<1x31xf32>
    %233 = tpu.concatenate %231, %232 in 1 : vector<1x1xf32>, vector<1x31xf32> -> vector<1x32xf32>
    %234 = tpu.iota {dimensions = array<i32: 1>} : vector<1x32xi32>
    %c1_i32_80 = arith.constant 1 : i32
    %235 = vector.broadcast %c1_i32_80 : i32 to vector<1x32xi32>
    %236 = arith.andi %234, %235 : vector<1x32xi32>
    %c0_i32_81 = arith.constant 0 : i32
    %237 = vector.broadcast %c0_i32_81 : i32 to vector<1x32xi32>
    %238 = arith.cmpi eq, %236, %237 : vector<1x32xi32>
    %239 = arith.select %238, %230, %233 : vector<1x32xi1>, vector<1x32xf32>
    %240 = arith.addf %227, %239 : vector<1x32xf32>
    %cst_82 = arith.constant 7.812500e-03 : f32
    %241 = vector.broadcast %cst_82 : f32 to vector<1x32xf32>
    %242 = arith.mulf %240, %241 : vector<1x32xf32>
    %cst_83 = arith.constant 9.99999974E-6 : f32
    %243 = vector.broadcast %cst_83 : f32 to vector<1x32xf32>
    %244 = arith.addf %242, %243 : vector<1x32xf32>
    %245 = math.sqrt %244 : vector<1x32xf32>
    %246 = vector.broadcast %245 : vector<1x32xf32> to vector<64x32xf32>
    %247 = arith.divf %224, %246 : vector<64x32xf32>
    %248 = vector.broadcast %202 : vector<1x32xf32> to vector<64x32xf32>
    %249 = arith.mulf %247, %248 : vector<64x32xf32>
    %250 = vector.broadcast %204 : vector<1x32xf32> to vector<64x32xf32>
    %251 = arith.addf %249, %250 : vector<64x32xf32>
    %cst_84 = arith.constant 5.000000e-01 : f32
    %252 = vector.broadcast %cst_84 : f32 to vector<64x32xf32>
    %253 = arith.mulf %252, %251 : vector<64x32xf32>
    %cst_85 = arith.constant 0.707106769 : f32
    %254 = vector.broadcast %cst_85 : f32 to vector<64x32xf32>
    %255 = arith.mulf %251, %254 : vector<64x32xf32>
    %cst_86 = arith.constant 0.000000e+00 : f32
    %256 = vector.broadcast %cst_86 : f32 to vector<64x32xf32>
    %257 = arith.cmpf oge, %255, %256 : vector<64x32xf32>
    %cst_87 = arith.constant 1.000000e+00 : f32
    %cst_88 = arith.constant -1.000000e+00 : f32
    %258 = vector.broadcast %cst_87 : f32 to vector<64x32xf32>
    %259 = vector.broadcast %cst_88 : f32 to vector<64x32xf32>
    %260 = arith.select %257, %258, %259 : vector<64x32xi1>, vector<64x32xf32>
    %261 = math.absf %255 : vector<64x32xf32>
    %cst_89 = arith.constant 0.327591091 : f32
    %262 = vector.broadcast %cst_89 : f32 to vector<64x32xf32>
    %263 = arith.mulf %262, %261 : vector<64x32xf32>
    %cst_90 = arith.constant 1.000000e+00 : f32
    %264 = vector.broadcast %cst_90 : f32 to vector<64x32xf32>
    %265 = arith.addf %264, %263 : vector<64x32xf32>
    %cst_91 = arith.constant 1.000000e+00 : f32
    %266 = vector.broadcast %cst_91 : f32 to vector<64x32xf32>
    %267 = arith.divf %266, %265 : vector<64x32xf32>
    %cst_92 = arith.constant 1.06140542 : f32
    %268 = vector.broadcast %cst_92 : f32 to vector<64x32xf32>
    %269 = arith.mulf %268, %267 : vector<64x32xf32>
    %cst_93 = arith.constant 1.45315206 : f32
    %270 = vector.broadcast %cst_93 : f32 to vector<64x32xf32>
    %271 = arith.subf %269, %270 : vector<64x32xf32>
    %272 = arith.mulf %271, %267 : vector<64x32xf32>
    %cst_94 = arith.constant 1.42141378 : f32
    %273 = vector.broadcast %cst_94 : f32 to vector<64x32xf32>
    %274 = arith.addf %272, %273 : vector<64x32xf32>
    %275 = arith.mulf %274, %267 : vector<64x32xf32>
    %cst_95 = arith.constant 0.284496725 : f32
    %276 = vector.broadcast %cst_95 : f32 to vector<64x32xf32>
    %277 = arith.subf %275, %276 : vector<64x32xf32>
    %278 = arith.mulf %277, %267 : vector<64x32xf32>
    %cst_96 = arith.constant 0.254829586 : f32
    %279 = vector.broadcast %cst_96 : f32 to vector<64x32xf32>
    %280 = arith.addf %278, %279 : vector<64x32xf32>
    %281 = arith.mulf %280, %267 : vector<64x32xf32>
    %cst_97 = arith.constant 0.000000e+00 : f32
    %282 = vector.broadcast %cst_97 : f32 to vector<64x32xf32>
    %283 = arith.subf %282, %261 : vector<64x32xf32>
    %284 = arith.mulf %283, %261 : vector<64x32xf32>
    %285 = math.exp %284 : vector<64x32xf32>
    %286 = arith.mulf %281, %285 : vector<64x32xf32>
    %cst_98 = arith.constant 1.000000e+00 : f32
    %287 = vector.broadcast %cst_98 : f32 to vector<64x32xf32>
    %288 = arith.subf %287, %286 : vector<64x32xf32>
    %289 = arith.mulf %260, %288 : vector<64x32xf32>
    %cst_99 = arith.constant 1.000000e+00 : f32
    %290 = vector.broadcast %cst_99 : f32 to vector<64x32xf32>
    %291 = arith.addf %290, %289 : vector<64x32xf32>
    %292 = arith.mulf %253, %291 : vector<64x32xf32>
    %293 = vector.extract_strided_slice %200 {offsets = [64, 0], sizes = [64, 32], strides = [1, 1]} : vector<128x32xf32> to vector<64x32xf32>
    %cst_100 = arith.constant dense<0.000000e+00> : vector<32xf32>
    %294 = vector.multi_reduction <add>, %293, %cst_100 [0] : vector<64x32xf32> to vector<32xf32>
    %295 = vector.shape_cast %294 : vector<32xf32> to vector<1x32xf32>
    %296 = vector.extract_strided_slice %295 {offsets = [0, 1], sizes = [1, 31], strides = [1, 1]} : vector<1x32xf32> to vector<1x31xf32>
    %297 = vector.extract_strided_slice %295 {offsets = [0, 0], sizes = [1, 1], strides = [1, 1]} : vector<1x32xf32> to vector<1x1xf32>
    %298 = tpu.concatenate %296, %297 in 1 : vector<1x31xf32>, vector<1x1xf32> -> vector<1x32xf32>
    %299 = vector.extract_strided_slice %295 {offsets = [0, 31], sizes = [1, 1], strides = [1, 1]} : vector<1x32xf32> to vector<1x1xf32>
    %300 = vector.extract_strided_slice %295 {offsets = [0, 0], sizes = [1, 31], strides = [1, 1]} : vector<1x32xf32> to vector<1x31xf32>
    %301 = tpu.concatenate %299, %300 in 1 : vector<1x1xf32>, vector<1x31xf32> -> vector<1x32xf32>
    %302 = tpu.iota {dimensions = array<i32: 1>} : vector<1x32xi32>
    %c1_i32_101 = arith.constant 1 : i32
    %303 = vector.broadcast %c1_i32_101 : i32 to vector<1x32xi32>
    %304 = arith.andi %302, %303 : vector<1x32xi32>
    %c0_i32_102 = arith.constant 0 : i32
    %305 = vector.broadcast %c0_i32_102 : i32 to vector<1x32xi32>
    %306 = arith.cmpi eq, %304, %305 : vector<1x32xi32>
    %307 = arith.select %306, %298, %301 : vector<1x32xi1>, vector<1x32xf32>
    %308 = arith.addf %295, %307 : vector<1x32xf32>
    %cst_103 = arith.constant 7.812500e-03 : f32
    %309 = vector.broadcast %cst_103 : f32 to vector<1x32xf32>
    %310 = arith.mulf %308, %309 : vector<1x32xf32>
    %311 = vector.broadcast %310 : vector<1x32xf32> to vector<64x32xf32>
    %312 = arith.subf %293, %311 : vector<64x32xf32>
    %313 = arith.mulf %312, %312 : vector<64x32xf32>
    %cst_104 = arith.constant dense<0.000000e+00> : vector<32xf32>
    %314 = vector.multi_reduction <add>, %313, %cst_104 [0] : vector<64x32xf32> to vector<32xf32>
    %315 = vector.shape_cast %314 : vector<32xf32> to vector<1x32xf32>
    %316 = vector.extract_strided_slice %315 {offsets = [0, 1], sizes = [1, 31], strides = [1, 1]} : vector<1x32xf32> to vector<1x31xf32>
    %317 = vector.extract_strided_slice %315 {offsets = [0, 0], sizes = [1, 1], strides = [1, 1]} : vector<1x32xf32> to vector<1x1xf32>
    %318 = tpu.concatenate %316, %317 in 1 : vector<1x31xf32>, vector<1x1xf32> -> vector<1x32xf32>
    %319 = vector.extract_strided_slice %315 {offsets = [0, 31], sizes = [1, 1], strides = [1, 1]} : vector<1x32xf32> to vector<1x1xf32>
    %320 = vector.extract_strided_slice %315 {offsets = [0, 0], sizes = [1, 31], strides = [1, 1]} : vector<1x32xf32> to vector<1x31xf32>
    %321 = tpu.concatenate %319, %320 in 1 : vector<1x1xf32>, vector<1x31xf32> -> vector<1x32xf32>
    %322 = tpu.iota {dimensions = array<i32: 1>} : vector<1x32xi32>
    %c1_i32_105 = arith.constant 1 : i32
    %323 = vector.broadcast %c1_i32_105 : i32 to vector<1x32xi32>
    %324 = arith.andi %322, %323 : vector<1x32xi32>
    %c0_i32_106 = arith.constant 0 : i32
    %325 = vector.broadcast %c0_i32_106 : i32 to vector<1x32xi32>
    %326 = arith.cmpi eq, %324, %325 : vector<1x32xi32>
    %327 = arith.select %326, %318, %321 : vector<1x32xi1>, vector<1x32xf32>
    %328 = arith.addf %315, %327 : vector<1x32xf32>
    %cst_107 = arith.constant 7.812500e-03 : f32
    %329 = vector.broadcast %cst_107 : f32 to vector<1x32xf32>
    %330 = arith.mulf %328, %329 : vector<1x32xf32>
    %cst_108 = arith.constant 9.99999974E-6 : f32
    %331 = vector.broadcast %cst_108 : f32 to vector<1x32xf32>
    %332 = arith.addf %330, %331 : vector<1x32xf32>
    %333 = math.sqrt %332 : vector<1x32xf32>
    %334 = vector.broadcast %333 : vector<1x32xf32> to vector<64x32xf32>
    %335 = arith.divf %312, %334 : vector<64x32xf32>
    %336 = vector.broadcast %202 : vector<1x32xf32> to vector<64x32xf32>
    %337 = arith.mulf %335, %336 : vector<64x32xf32>
    %338 = vector.broadcast %204 : vector<1x32xf32> to vector<64x32xf32>
    %339 = arith.addf %337, %338 : vector<64x32xf32>
    %cst_109 = arith.constant 5.000000e-01 : f32
    %340 = vector.broadcast %cst_109 : f32 to vector<64x32xf32>
    %341 = arith.mulf %340, %339 : vector<64x32xf32>
    %cst_110 = arith.constant 0.707106769 : f32
    %342 = vector.broadcast %cst_110 : f32 to vector<64x32xf32>
    %343 = arith.mulf %339, %342 : vector<64x32xf32>
    %cst_111 = arith.constant 0.000000e+00 : f32
    %344 = vector.broadcast %cst_111 : f32 to vector<64x32xf32>
    %345 = arith.cmpf oge, %343, %344 : vector<64x32xf32>
    %cst_112 = arith.constant 1.000000e+00 : f32
    %cst_113 = arith.constant -1.000000e+00 : f32
    %346 = vector.broadcast %cst_112 : f32 to vector<64x32xf32>
    %347 = vector.broadcast %cst_113 : f32 to vector<64x32xf32>
    %348 = arith.select %345, %346, %347 : vector<64x32xi1>, vector<64x32xf32>
    %349 = math.absf %343 : vector<64x32xf32>
    %cst_114 = arith.constant 0.327591091 : f32
    %350 = vector.broadcast %cst_114 : f32 to vector<64x32xf32>
    %351 = arith.mulf %350, %349 : vector<64x32xf32>
    %cst_115 = arith.constant 1.000000e+00 : f32
    %352 = vector.broadcast %cst_115 : f32 to vector<64x32xf32>
    %353 = arith.addf %352, %351 : vector<64x32xf32>
    %cst_116 = arith.constant 1.000000e+00 : f32
    %354 = vector.broadcast %cst_116 : f32 to vector<64x32xf32>
    %355 = arith.divf %354, %353 : vector<64x32xf32>
    %cst_117 = arith.constant 1.06140542 : f32
    %356 = vector.broadcast %cst_117 : f32 to vector<64x32xf32>
    %357 = arith.mulf %356, %355 : vector<64x32xf32>
    %cst_118 = arith.constant 1.45315206 : f32
    %358 = vector.broadcast %cst_118 : f32 to vector<64x32xf32>
    %359 = arith.subf %357, %358 : vector<64x32xf32>
    %360 = arith.mulf %359, %355 : vector<64x32xf32>
    %cst_119 = arith.constant 1.42141378 : f32
    %361 = vector.broadcast %cst_119 : f32 to vector<64x32xf32>
    %362 = arith.addf %360, %361 : vector<64x32xf32>
    %363 = arith.mulf %362, %355 : vector<64x32xf32>
    %cst_120 = arith.constant 0.284496725 : f32
    %364 = vector.broadcast %cst_120 : f32 to vector<64x32xf32>
    %365 = arith.subf %363, %364 : vector<64x32xf32>
    %366 = arith.mulf %365, %355 : vector<64x32xf32>
    %cst_121 = arith.constant 0.254829586 : f32
    %367 = vector.broadcast %cst_121 : f32 to vector<64x32xf32>
    %368 = arith.addf %366, %367 : vector<64x32xf32>
    %369 = arith.mulf %368, %355 : vector<64x32xf32>
    %cst_122 = arith.constant 0.000000e+00 : f32
    %370 = vector.broadcast %cst_122 : f32 to vector<64x32xf32>
    %371 = arith.subf %370, %349 : vector<64x32xf32>
    %372 = arith.mulf %371, %349 : vector<64x32xf32>
    %373 = math.exp %372 : vector<64x32xf32>
    %374 = arith.mulf %369, %373 : vector<64x32xf32>
    %cst_123 = arith.constant 1.000000e+00 : f32
    %375 = vector.broadcast %cst_123 : f32 to vector<64x32xf32>
    %376 = arith.subf %375, %374 : vector<64x32xf32>
    %377 = arith.mulf %348, %376 : vector<64x32xf32>
    %cst_124 = arith.constant 1.000000e+00 : f32
    %378 = vector.broadcast %cst_124 : f32 to vector<64x32xf32>
    %379 = arith.addf %378, %377 : vector<64x32xf32>
    %380 = arith.mulf %341, %379 : vector<64x32xf32>
    %381 = tpu.concatenate %292, %380 in 0 : vector<64x32xf32>, vector<64x32xf32> -> vector<128x32xf32>
    %c0_125 = arith.constant 0 : index
    %c0_126 = arith.constant 0 : index
    %382 = vector.load %arg7[%c0_125, %c0_126] : memref<192x128xf32, #tpu.memory_space<vmem>>, vector<192x128xf32>
    %cst_127 = arith.constant dense<0.000000e+00> : vector<192x32xf32>
    %383 = tpu.matmul %382, %381, %cst_127 {dimension_numbers = #tpu.dot_dimension_numbers<[1], [0], [0], [1], [0, 0, 1, 1], [], []>} : vector<192x128xf32>, vector<128x32xf32>, vector<192x32xf32> -> vector<192x32xf32>
    %384 = vector.extract_strided_slice %383 {offsets = [0, 0], sizes = [64, 32], strides = [1, 1]} : vector<192x32xf32> to vector<64x32xf32>
    %385 = vector.extract_strided_slice %383 {offsets = [64, 0], sizes = [64, 32], strides = [1, 1]} : vector<192x32xf32> to vector<64x32xf32>
    %386 = vector.extract_strided_slice %383 {offsets = [128, 0], sizes = [64, 32], strides = [1, 1]} : vector<192x32xf32> to vector<64x32xf32>
    %387 = tpu.concatenate %384, %385, %386 in 1 : vector<64x32xf32>, vector<64x32xf32>, vector<64x32xf32> -> vector<64x96xf32>
    %c1_128 = arith.constant 1 : index
    %c0_129 = arith.constant 0 : index
    %c0_130 = arith.constant 0 : index
    %388 = vector.load %arg2[%c1_128, %c0_129, %c0_130] : memref<5x96x32xf32, #tpu.memory_space<vmem>>, vector<1x96x32xf32>
    %389 = vector.shape_cast %388 : vector<1x96x32xf32> to vector<96x32xf32>
    %cst_131 = arith.constant dense<0.000000e+00> : vector<64x32xf32>
    %390 = tpu.matmul %387, %389, %cst_131 {dimension_numbers = #tpu.dot_dimension_numbers<[1], [0], [0], [1], [0, 0, 1, 1], [], []>} : vector<64x96xf32>, vector<96x32xf32>, vector<64x32xf32> -> vector<64x32xf32>
    %c2 = arith.constant 2 : index
    %c0_132 = arith.constant 0 : index
    %c0_133 = arith.constant 0 : index
    %391 = vector.load %arg3[%c2, %c0_132, %c0_133] : memref<6x1x32xf32, #tpu.memory_space<vmem>>, vector<1x1x32xf32>
    %392 = vector.shape_cast %391 : vector<1x1x32xf32> to vector<1x32xf32>
    %393 = vector.broadcast %392 : vector<1x32xf32> to vector<64x32xf32>
    %394 = arith.addf %390, %393 : vector<64x32xf32>
    %c2_134 = arith.constant 2 : index
    %c0_135 = arith.constant 0 : index
    %c0_136 = arith.constant 0 : index
    %395 = vector.load %arg4[%c2_134, %c0_135, %c0_136] : memref<6x1x32xf32, #tpu.memory_space<vmem>>, vector<1x1x32xf32>
    %396 = vector.shape_cast %395 : vector<1x1x32xf32> to vector<1x32xf32>
    %c2_137 = arith.constant 2 : index
    %c0_138 = arith.constant 0 : index
    %c0_139 = arith.constant 0 : index
    %397 = vector.load %arg5[%c2_137, %c0_138, %c0_139] : memref<6x1x32xf32, #tpu.memory_space<vmem>>, vector<1x1x32xf32>
    %398 = vector.shape_cast %397 : vector<1x1x32xf32> to vector<1x32xf32>
    %399 = vector.extract_strided_slice %394 {offsets = [0, 0], sizes = [32, 32], strides = [1, 1]} : vector<64x32xf32> to vector<32x32xf32>
    %cst_140 = arith.constant dense<0.000000e+00> : vector<32xf32>
    %400 = vector.multi_reduction <add>, %399, %cst_140 [0] : vector<32x32xf32> to vector<32xf32>
    %401 = vector.shape_cast %400 : vector<32xf32> to vector<1x32xf32>
    %402 = vector.extract_strided_slice %401 {offsets = [0, 1], sizes = [1, 31], strides = [1, 1]} : vector<1x32xf32> to vector<1x31xf32>
    %403 = vector.extract_strided_slice %401 {offsets = [0, 0], sizes = [1, 1], strides = [1, 1]} : vector<1x32xf32> to vector<1x1xf32>
    %404 = tpu.concatenate %402, %403 in 1 : vector<1x31xf32>, vector<1x1xf32> -> vector<1x32xf32>
    %405 = vector.extract_strided_slice %401 {offsets = [0, 31], sizes = [1, 1], strides = [1, 1]} : vector<1x32xf32> to vector<1x1xf32>
    %406 = vector.extract_strided_slice %401 {offsets = [0, 0], sizes = [1, 31], strides = [1, 1]} : vector<1x32xf32> to vector<1x31xf32>
    %407 = tpu.concatenate %405, %406 in 1 : vector<1x1xf32>, vector<1x31xf32> -> vector<1x32xf32>
    %408 = tpu.iota {dimensions = array<i32: 1>} : vector<1x32xi32>
    %c1_i32_141 = arith.constant 1 : i32
    %409 = vector.broadcast %c1_i32_141 : i32 to vector<1x32xi32>
    %410 = arith.andi %408, %409 : vector<1x32xi32>
    %c0_i32_142 = arith.constant 0 : i32
    %411 = vector.broadcast %c0_i32_142 : i32 to vector<1x32xi32>
    %412 = arith.cmpi eq, %410, %411 : vector<1x32xi32>
    %413 = arith.select %412, %404, %407 : vector<1x32xi1>, vector<1x32xf32>
    %414 = arith.addf %401, %413 : vector<1x32xf32>
    %cst_143 = arith.constant 1.562500e-02 : f32
    %415 = vector.broadcast %cst_143 : f32 to vector<1x32xf32>
    %416 = arith.mulf %414, %415 : vector<1x32xf32>
    %417 = vector.broadcast %416 : vector<1x32xf32> to vector<32x32xf32>
    %418 = arith.subf %399, %417 : vector<32x32xf32>
    %419 = arith.mulf %418, %418 : vector<32x32xf32>
    %cst_144 = arith.constant dense<0.000000e+00> : vector<32xf32>
    %420 = vector.multi_reduction <add>, %419, %cst_144 [0] : vector<32x32xf32> to vector<32xf32>
    %421 = vector.shape_cast %420 : vector<32xf32> to vector<1x32xf32>
    %422 = vector.extract_strided_slice %421 {offsets = [0, 1], sizes = [1, 31], strides = [1, 1]} : vector<1x32xf32> to vector<1x31xf32>
    %423 = vector.extract_strided_slice %421 {offsets = [0, 0], sizes = [1, 1], strides = [1, 1]} : vector<1x32xf32> to vector<1x1xf32>
    %424 = tpu.concatenate %422, %423 in 1 : vector<1x31xf32>, vector<1x1xf32> -> vector<1x32xf32>
    %425 = vector.extract_strided_slice %421 {offsets = [0, 31], sizes = [1, 1], strides = [1, 1]} : vector<1x32xf32> to vector<1x1xf32>
    %426 = vector.extract_strided_slice %421 {offsets = [0, 0], sizes = [1, 31], strides = [1, 1]} : vector<1x32xf32> to vector<1x31xf32>
    %427 = tpu.concatenate %425, %426 in 1 : vector<1x1xf32>, vector<1x31xf32> -> vector<1x32xf32>
    %428 = tpu.iota {dimensions = array<i32: 1>} : vector<1x32xi32>
    %c1_i32_145 = arith.constant 1 : i32
    %429 = vector.broadcast %c1_i32_145 : i32 to vector<1x32xi32>
    %430 = arith.andi %428, %429 : vector<1x32xi32>
    %c0_i32_146 = arith.constant 0 : i32
    %431 = vector.broadcast %c0_i32_146 : i32 to vector<1x32xi32>
    %432 = arith.cmpi eq, %430, %431 : vector<1x32xi32>
    %433 = arith.select %432, %424, %427 : vector<1x32xi1>, vector<1x32xf32>
    %434 = arith.addf %421, %433 : vector<1x32xf32>
    %cst_147 = arith.constant 1.562500e-02 : f32
    %435 = vector.broadcast %cst_147 : f32 to vector<1x32xf32>
    %436 = arith.mulf %434, %435 : vector<1x32xf32>
    %cst_148 = arith.constant 9.99999974E-6 : f32
    %437 = vector.broadcast %cst_148 : f32 to vector<1x32xf32>
    %438 = arith.addf %436, %437 : vector<1x32xf32>
    %439 = math.sqrt %438 : vector<1x32xf32>
    %440 = vector.broadcast %439 : vector<1x32xf32> to vector<32x32xf32>
    %441 = arith.divf %418, %440 : vector<32x32xf32>
    %442 = vector.broadcast %396 : vector<1x32xf32> to vector<32x32xf32>
    %443 = arith.mulf %441, %442 : vector<32x32xf32>
    %444 = vector.broadcast %398 : vector<1x32xf32> to vector<32x32xf32>
    %445 = arith.addf %443, %444 : vector<32x32xf32>
    %cst_149 = arith.constant 5.000000e-01 : f32
    %446 = vector.broadcast %cst_149 : f32 to vector<32x32xf32>
    %447 = arith.mulf %446, %445 : vector<32x32xf32>
    %cst_150 = arith.constant 0.707106769 : f32
    %448 = vector.broadcast %cst_150 : f32 to vector<32x32xf32>
    %449 = arith.mulf %445, %448 : vector<32x32xf32>
    %cst_151 = arith.constant 0.000000e+00 : f32
    %450 = vector.broadcast %cst_151 : f32 to vector<32x32xf32>
    %451 = arith.cmpf oge, %449, %450 : vector<32x32xf32>
    %cst_152 = arith.constant 1.000000e+00 : f32
    %cst_153 = arith.constant -1.000000e+00 : f32
    %452 = vector.broadcast %cst_152 : f32 to vector<32x32xf32>
    %453 = vector.broadcast %cst_153 : f32 to vector<32x32xf32>
    %454 = arith.select %451, %452, %453 : vector<32x32xi1>, vector<32x32xf32>
    %455 = math.absf %449 : vector<32x32xf32>
    %cst_154 = arith.constant 0.327591091 : f32
    %456 = vector.broadcast %cst_154 : f32 to vector<32x32xf32>
    %457 = arith.mulf %456, %455 : vector<32x32xf32>
    %cst_155 = arith.constant 1.000000e+00 : f32
    %458 = vector.broadcast %cst_155 : f32 to vector<32x32xf32>
    %459 = arith.addf %458, %457 : vector<32x32xf32>
    %cst_156 = arith.constant 1.000000e+00 : f32
    %460 = vector.broadcast %cst_156 : f32 to vector<32x32xf32>
    %461 = arith.divf %460, %459 : vector<32x32xf32>
    %cst_157 = arith.constant 1.06140542 : f32
    %462 = vector.broadcast %cst_157 : f32 to vector<32x32xf32>
    %463 = arith.mulf %462, %461 : vector<32x32xf32>
    %cst_158 = arith.constant 1.45315206 : f32
    %464 = vector.broadcast %cst_158 : f32 to vector<32x32xf32>
    %465 = arith.subf %463, %464 : vector<32x32xf32>
    %466 = arith.mulf %465, %461 : vector<32x32xf32>
    %cst_159 = arith.constant 1.42141378 : f32
    %467 = vector.broadcast %cst_159 : f32 to vector<32x32xf32>
    %468 = arith.addf %466, %467 : vector<32x32xf32>
    %469 = arith.mulf %468, %461 : vector<32x32xf32>
    %cst_160 = arith.constant 0.284496725 : f32
    %470 = vector.broadcast %cst_160 : f32 to vector<32x32xf32>
    %471 = arith.subf %469, %470 : vector<32x32xf32>
    %472 = arith.mulf %471, %461 : vector<32x32xf32>
    %cst_161 = arith.constant 0.254829586 : f32
    %473 = vector.broadcast %cst_161 : f32 to vector<32x32xf32>
    %474 = arith.addf %472, %473 : vector<32x32xf32>
    %475 = arith.mulf %474, %461 : vector<32x32xf32>
    %cst_162 = arith.constant 0.000000e+00 : f32
    %476 = vector.broadcast %cst_162 : f32 to vector<32x32xf32>
    %477 = arith.subf %476, %455 : vector<32x32xf32>
    %478 = arith.mulf %477, %455 : vector<32x32xf32>
    %479 = math.exp %478 : vector<32x32xf32>
    %480 = arith.mulf %475, %479 : vector<32x32xf32>
    %cst_163 = arith.constant 1.000000e+00 : f32
    %481 = vector.broadcast %cst_163 : f32 to vector<32x32xf32>
    %482 = arith.subf %481, %480 : vector<32x32xf32>
    %483 = arith.mulf %454, %482 : vector<32x32xf32>
    %cst_164 = arith.constant 1.000000e+00 : f32
    %484 = vector.broadcast %cst_164 : f32 to vector<32x32xf32>
    %485 = arith.addf %484, %483 : vector<32x32xf32>
    %486 = arith.mulf %447, %485 : vector<32x32xf32>
    %487 = vector.extract_strided_slice %394 {offsets = [32, 0], sizes = [32, 32], strides = [1, 1]} : vector<64x32xf32> to vector<32x32xf32>
    %cst_165 = arith.constant dense<0.000000e+00> : vector<32xf32>
    %488 = vector.multi_reduction <add>, %487, %cst_165 [0] : vector<32x32xf32> to vector<32xf32>
    %489 = vector.shape_cast %488 : vector<32xf32> to vector<1x32xf32>
    %490 = vector.extract_strided_slice %489 {offsets = [0, 1], sizes = [1, 31], strides = [1, 1]} : vector<1x32xf32> to vector<1x31xf32>
    %491 = vector.extract_strided_slice %489 {offsets = [0, 0], sizes = [1, 1], strides = [1, 1]} : vector<1x32xf32> to vector<1x1xf32>
    %492 = tpu.concatenate %490, %491 in 1 : vector<1x31xf32>, vector<1x1xf32> -> vector<1x32xf32>
    %493 = vector.extract_strided_slice %489 {offsets = [0, 31], sizes = [1, 1], strides = [1, 1]} : vector<1x32xf32> to vector<1x1xf32>
    %494 = vector.extract_strided_slice %489 {offsets = [0, 0], sizes = [1, 31], strides = [1, 1]} : vector<1x32xf32> to vector<1x31xf32>
    %495 = tpu.concatenate %493, %494 in 1 : vector<1x1xf32>, vector<1x31xf32> -> vector<1x32xf32>
    %496 = tpu.iota {dimensions = array<i32: 1>} : vector<1x32xi32>
    %c1_i32_166 = arith.constant 1 : i32
    %497 = vector.broadcast %c1_i32_166 : i32 to vector<1x32xi32>
    %498 = arith.andi %496, %497 : vector<1x32xi32>
    %c0_i32_167 = arith.constant 0 : i32
    %499 = vector.broadcast %c0_i32_167 : i32 to vector<1x32xi32>
    %500 = arith.cmpi eq, %498, %499 : vector<1x32xi32>
    %501 = arith.select %500, %492, %495 : vector<1x32xi1>, vector<1x32xf32>
    %502 = arith.addf %489, %501 : vector<1x32xf32>
    %cst_168 = arith.constant 1.562500e-02 : f32
    %503 = vector.broadcast %cst_168 : f32 to vector<1x32xf32>
    %504 = arith.mulf %502, %503 : vector<1x32xf32>
    %505 = vector.broadcast %504 : vector<1x32xf32> to vector<32x32xf32>
    %506 = arith.subf %487, %505 : vector<32x32xf32>
    %507 = arith.mulf %506, %506 : vector<32x32xf32>
    %cst_169 = arith.constant dense<0.000000e+00> : vector<32xf32>
    %508 = vector.multi_reduction <add>, %507, %cst_169 [0] : vector<32x32xf32> to vector<32xf32>
    %509 = vector.shape_cast %508 : vector<32xf32> to vector<1x32xf32>
    %510 = vector.extract_strided_slice %509 {offsets = [0, 1], sizes = [1, 31], strides = [1, 1]} : vector<1x32xf32> to vector<1x31xf32>
    %511 = vector.extract_strided_slice %509 {offsets = [0, 0], sizes = [1, 1], strides = [1, 1]} : vector<1x32xf32> to vector<1x1xf32>
    %512 = tpu.concatenate %510, %511 in 1 : vector<1x31xf32>, vector<1x1xf32> -> vector<1x32xf32>
    %513 = vector.extract_strided_slice %509 {offsets = [0, 31], sizes = [1, 1], strides = [1, 1]} : vector<1x32xf32> to vector<1x1xf32>
    %514 = vector.extract_strided_slice %509 {offsets = [0, 0], sizes = [1, 31], strides = [1, 1]} : vector<1x32xf32> to vector<1x31xf32>
    %515 = tpu.concatenate %513, %514 in 1 : vector<1x1xf32>, vector<1x31xf32> -> vector<1x32xf32>
    %516 = tpu.iota {dimensions = array<i32: 1>} : vector<1x32xi32>
    %c1_i32_170 = arith.constant 1 : i32
    %517 = vector.broadcast %c1_i32_170 : i32 to vector<1x32xi32>
    %518 = arith.andi %516, %517 : vector<1x32xi32>
    %c0_i32_171 = arith.constant 0 : i32
    %519 = vector.broadcast %c0_i32_171 : i32 to vector<1x32xi32>
    %520 = arith.cmpi eq, %518, %519 : vector<1x32xi32>
    %521 = arith.select %520, %512, %515 : vector<1x32xi1>, vector<1x32xf32>
    %522 = arith.addf %509, %521 : vector<1x32xf32>
    %cst_172 = arith.constant 1.562500e-02 : f32
    %523 = vector.broadcast %cst_172 : f32 to vector<1x32xf32>
    %524 = arith.mulf %522, %523 : vector<1x32xf32>
    %cst_173 = arith.constant 9.99999974E-6 : f32
    %525 = vector.broadcast %cst_173 : f32 to vector<1x32xf32>
    %526 = arith.addf %524, %525 : vector<1x32xf32>
    %527 = math.sqrt %526 : vector<1x32xf32>
    %528 = vector.broadcast %527 : vector<1x32xf32> to vector<32x32xf32>
    %529 = arith.divf %506, %528 : vector<32x32xf32>
    %530 = vector.broadcast %396 : vector<1x32xf32> to vector<32x32xf32>
    %531 = arith.mulf %529, %530 : vector<32x32xf32>
    %532 = vector.broadcast %398 : vector<1x32xf32> to vector<32x32xf32>
    %533 = arith.addf %531, %532 : vector<32x32xf32>
    %cst_174 = arith.constant 5.000000e-01 : f32
    %534 = vector.broadcast %cst_174 : f32 to vector<32x32xf32>
    %535 = arith.mulf %534, %533 : vector<32x32xf32>
    %cst_175 = arith.constant 0.707106769 : f32
    %536 = vector.broadcast %cst_175 : f32 to vector<32x32xf32>
    %537 = arith.mulf %533, %536 : vector<32x32xf32>
    %cst_176 = arith.constant 0.000000e+00 : f32
    %538 = vector.broadcast %cst_176 : f32 to vector<32x32xf32>
    %539 = arith.cmpf oge, %537, %538 : vector<32x32xf32>
    %cst_177 = arith.constant 1.000000e+00 : f32
    %cst_178 = arith.constant -1.000000e+00 : f32
    %540 = vector.broadcast %cst_177 : f32 to vector<32x32xf32>
    %541 = vector.broadcast %cst_178 : f32 to vector<32x32xf32>
    %542 = arith.select %539, %540, %541 : vector<32x32xi1>, vector<32x32xf32>
    %543 = math.absf %537 : vector<32x32xf32>
    %cst_179 = arith.constant 0.327591091 : f32
    %544 = vector.broadcast %cst_179 : f32 to vector<32x32xf32>
    %545 = arith.mulf %544, %543 : vector<32x32xf32>
    %cst_180 = arith.constant 1.000000e+00 : f32
    %546 = vector.broadcast %cst_180 : f32 to vector<32x32xf32>
    %547 = arith.addf %546, %545 : vector<32x32xf32>
    %cst_181 = arith.constant 1.000000e+00 : f32
    %548 = vector.broadcast %cst_181 : f32 to vector<32x32xf32>
    %549 = arith.divf %548, %547 : vector<32x32xf32>
    %cst_182 = arith.constant 1.06140542 : f32
    %550 = vector.broadcast %cst_182 : f32 to vector<32x32xf32>
    %551 = arith.mulf %550, %549 : vector<32x32xf32>
    %cst_183 = arith.constant 1.45315206 : f32
    %552 = vector.broadcast %cst_183 : f32 to vector<32x32xf32>
    %553 = arith.subf %551, %552 : vector<32x32xf32>
    %554 = arith.mulf %553, %549 : vector<32x32xf32>
    %cst_184 = arith.constant 1.42141378 : f32
    %555 = vector.broadcast %cst_184 : f32 to vector<32x32xf32>
    %556 = arith.addf %554, %555 : vector<32x32xf32>
    %557 = arith.mulf %556, %549 : vector<32x32xf32>
    %cst_185 = arith.constant 0.284496725 : f32
    %558 = vector.broadcast %cst_185 : f32 to vector<32x32xf32>
    %559 = arith.subf %557, %558 : vector<32x32xf32>
    %560 = arith.mulf %559, %549 : vector<32x32xf32>
    %cst_186 = arith.constant 0.254829586 : f32
    %561 = vector.broadcast %cst_186 : f32 to vector<32x32xf32>
    %562 = arith.addf %560, %561 : vector<32x32xf32>
    %563 = arith.mulf %562, %549 : vector<32x32xf32>
    %cst_187 = arith.constant 0.000000e+00 : f32
    %564 = vector.broadcast %cst_187 : f32 to vector<32x32xf32>
    %565 = arith.subf %564, %543 : vector<32x32xf32>
    %566 = arith.mulf %565, %543 : vector<32x32xf32>
    %567 = math.exp %566 : vector<32x32xf32>
    %568 = arith.mulf %563, %567 : vector<32x32xf32>
    %cst_188 = arith.constant 1.000000e+00 : f32
    %569 = vector.broadcast %cst_188 : f32 to vector<32x32xf32>
    %570 = arith.subf %569, %568 : vector<32x32xf32>
    %571 = arith.mulf %542, %570 : vector<32x32xf32>
    %cst_189 = arith.constant 1.000000e+00 : f32
    %572 = vector.broadcast %cst_189 : f32 to vector<32x32xf32>
    %573 = arith.addf %572, %571 : vector<32x32xf32>
    %574 = arith.mulf %535, %573 : vector<32x32xf32>
    %575 = tpu.concatenate %486, %574 in 0 : vector<32x32xf32>, vector<32x32xf32> -> vector<64x32xf32>
    %c0_190 = arith.constant 0 : index
    %c0_191 = arith.constant 0 : index
    %576 = vector.load %arg8[%c0_190, %c0_191] : memref<96x64xf32, #tpu.memory_space<vmem>>, vector<96x64xf32>
    %cst_192 = arith.constant dense<0.000000e+00> : vector<96x32xf32>
    %577 = tpu.matmul %576, %575, %cst_192 {dimension_numbers = #tpu.dot_dimension_numbers<[1], [0], [0], [1], [0, 0, 1, 1], [], []>} : vector<96x64xf32>, vector<64x32xf32>, vector<96x32xf32> -> vector<96x32xf32>
    %578 = vector.extract_strided_slice %577 {offsets = [0, 0], sizes = [32, 32], strides = [1, 1]} : vector<96x32xf32> to vector<32x32xf32>
    %579 = vector.extract_strided_slice %577 {offsets = [32, 0], sizes = [32, 32], strides = [1, 1]} : vector<96x32xf32> to vector<32x32xf32>
    %580 = vector.extract_strided_slice %577 {offsets = [64, 0], sizes = [32, 32], strides = [1, 1]} : vector<96x32xf32> to vector<32x32xf32>
    %581 = tpu.concatenate %578, %579, %580 in 1 : vector<32x32xf32>, vector<32x32xf32>, vector<32x32xf32> -> vector<32x96xf32>
    %c2_193 = arith.constant 2 : index
    %c0_194 = arith.constant 0 : index
    %c0_195 = arith.constant 0 : index
    %582 = vector.load %arg2[%c2_193, %c0_194, %c0_195] : memref<5x96x32xf32, #tpu.memory_space<vmem>>, vector<1x96x32xf32>
    %583 = vector.shape_cast %582 : vector<1x96x32xf32> to vector<96x32xf32>
    %cst_196 = arith.constant dense<0.000000e+00> : vector<32x32xf32>
    %584 = tpu.matmul %581, %583, %cst_196 {dimension_numbers = #tpu.dot_dimension_numbers<[1], [0], [0], [1], [0, 0, 1, 1], [], []>} : vector<32x96xf32>, vector<96x32xf32>, vector<32x32xf32> -> vector<32x32xf32>
    %c3 = arith.constant 3 : index
    %c0_197 = arith.constant 0 : index
    %c0_198 = arith.constant 0 : index
    %585 = vector.load %arg3[%c3, %c0_197, %c0_198] : memref<6x1x32xf32, #tpu.memory_space<vmem>>, vector<1x1x32xf32>
    %586 = vector.shape_cast %585 : vector<1x1x32xf32> to vector<1x32xf32>
    %587 = vector.broadcast %586 : vector<1x32xf32> to vector<32x32xf32>
    %588 = arith.addf %584, %587 : vector<32x32xf32>
    %c3_199 = arith.constant 3 : index
    %c0_200 = arith.constant 0 : index
    %c0_201 = arith.constant 0 : index
    %589 = vector.load %arg4[%c3_199, %c0_200, %c0_201] : memref<6x1x32xf32, #tpu.memory_space<vmem>>, vector<1x1x32xf32>
    %590 = vector.shape_cast %589 : vector<1x1x32xf32> to vector<1x32xf32>
    %c3_202 = arith.constant 3 : index
    %c0_203 = arith.constant 0 : index
    %c0_204 = arith.constant 0 : index
    %591 = vector.load %arg5[%c3_202, %c0_203, %c0_204] : memref<6x1x32xf32, #tpu.memory_space<vmem>>, vector<1x1x32xf32>
    %592 = vector.shape_cast %591 : vector<1x1x32xf32> to vector<1x32xf32>
    %593 = vector.extract_strided_slice %588 {offsets = [0, 0], sizes = [16, 32], strides = [1, 1]} : vector<32x32xf32> to vector<16x32xf32>
    %cst_205 = arith.constant dense<0.000000e+00> : vector<32xf32>
    %594 = vector.multi_reduction <add>, %593, %cst_205 [0] : vector<16x32xf32> to vector<32xf32>
    %595 = vector.shape_cast %594 : vector<32xf32> to vector<1x32xf32>
    %596 = vector.extract_strided_slice %595 {offsets = [0, 1], sizes = [1, 31], strides = [1, 1]} : vector<1x32xf32> to vector<1x31xf32>
    %597 = vector.extract_strided_slice %595 {offsets = [0, 0], sizes = [1, 1], strides = [1, 1]} : vector<1x32xf32> to vector<1x1xf32>
    %598 = tpu.concatenate %596, %597 in 1 : vector<1x31xf32>, vector<1x1xf32> -> vector<1x32xf32>
    %599 = vector.extract_strided_slice %595 {offsets = [0, 31], sizes = [1, 1], strides = [1, 1]} : vector<1x32xf32> to vector<1x1xf32>
    %600 = vector.extract_strided_slice %595 {offsets = [0, 0], sizes = [1, 31], strides = [1, 1]} : vector<1x32xf32> to vector<1x31xf32>
    %601 = tpu.concatenate %599, %600 in 1 : vector<1x1xf32>, vector<1x31xf32> -> vector<1x32xf32>
    %602 = tpu.iota {dimensions = array<i32: 1>} : vector<1x32xi32>
    %c1_i32_206 = arith.constant 1 : i32
    %603 = vector.broadcast %c1_i32_206 : i32 to vector<1x32xi32>
    %604 = arith.andi %602, %603 : vector<1x32xi32>
    %c0_i32_207 = arith.constant 0 : i32
    %605 = vector.broadcast %c0_i32_207 : i32 to vector<1x32xi32>
    %606 = arith.cmpi eq, %604, %605 : vector<1x32xi32>
    %607 = arith.select %606, %598, %601 : vector<1x32xi1>, vector<1x32xf32>
    %608 = arith.addf %595, %607 : vector<1x32xf32>
    %cst_208 = arith.constant 3.125000e-02 : f32
    %609 = vector.broadcast %cst_208 : f32 to vector<1x32xf32>
    %610 = arith.mulf %608, %609 : vector<1x32xf32>
    %611 = vector.broadcast %610 : vector<1x32xf32> to vector<16x32xf32>
    %612 = arith.subf %593, %611 : vector<16x32xf32>
    %613 = arith.mulf %612, %612 : vector<16x32xf32>
    %cst_209 = arith.constant dense<0.000000e+00> : vector<32xf32>
    %614 = vector.multi_reduction <add>, %613, %cst_209 [0] : vector<16x32xf32> to vector<32xf32>
    %615 = vector.shape_cast %614 : vector<32xf32> to vector<1x32xf32>
    %616 = vector.extract_strided_slice %615 {offsets = [0, 1], sizes = [1, 31], strides = [1, 1]} : vector<1x32xf32> to vector<1x31xf32>
    %617 = vector.extract_strided_slice %615 {offsets = [0, 0], sizes = [1, 1], strides = [1, 1]} : vector<1x32xf32> to vector<1x1xf32>
    %618 = tpu.concatenate %616, %617 in 1 : vector<1x31xf32>, vector<1x1xf32> -> vector<1x32xf32>
    %619 = vector.extract_strided_slice %615 {offsets = [0, 31], sizes = [1, 1], strides = [1, 1]} : vector<1x32xf32> to vector<1x1xf32>
    %620 = vector.extract_strided_slice %615 {offsets = [0, 0], sizes = [1, 31], strides = [1, 1]} : vector<1x32xf32> to vector<1x31xf32>
    %621 = tpu.concatenate %619, %620 in 1 : vector<1x1xf32>, vector<1x31xf32> -> vector<1x32xf32>
    %622 = tpu.iota {dimensions = array<i32: 1>} : vector<1x32xi32>
    %c1_i32_210 = arith.constant 1 : i32
    %623 = vector.broadcast %c1_i32_210 : i32 to vector<1x32xi32>
    %624 = arith.andi %622, %623 : vector<1x32xi32>
    %c0_i32_211 = arith.constant 0 : i32
    %625 = vector.broadcast %c0_i32_211 : i32 to vector<1x32xi32>
    %626 = arith.cmpi eq, %624, %625 : vector<1x32xi32>
    %627 = arith.select %626, %618, %621 : vector<1x32xi1>, vector<1x32xf32>
    %628 = arith.addf %615, %627 : vector<1x32xf32>
    %cst_212 = arith.constant 3.125000e-02 : f32
    %629 = vector.broadcast %cst_212 : f32 to vector<1x32xf32>
    %630 = arith.mulf %628, %629 : vector<1x32xf32>
    %cst_213 = arith.constant 9.99999974E-6 : f32
    %631 = vector.broadcast %cst_213 : f32 to vector<1x32xf32>
    %632 = arith.addf %630, %631 : vector<1x32xf32>
    %633 = math.sqrt %632 : vector<1x32xf32>
    %634 = vector.broadcast %633 : vector<1x32xf32> to vector<16x32xf32>
    %635 = arith.divf %612, %634 : vector<16x32xf32>
    %636 = vector.broadcast %590 : vector<1x32xf32> to vector<16x32xf32>
    %637 = arith.mulf %635, %636 : vector<16x32xf32>
    %638 = vector.broadcast %592 : vector<1x32xf32> to vector<16x32xf32>
    %639 = arith.addf %637, %638 : vector<16x32xf32>
    %cst_214 = arith.constant 5.000000e-01 : f32
    %640 = vector.broadcast %cst_214 : f32 to vector<16x32xf32>
    %641 = arith.mulf %640, %639 : vector<16x32xf32>
    %cst_215 = arith.constant 0.707106769 : f32
    %642 = vector.broadcast %cst_215 : f32 to vector<16x32xf32>
    %643 = arith.mulf %639, %642 : vector<16x32xf32>
    %cst_216 = arith.constant 0.000000e+00 : f32
    %644 = vector.broadcast %cst_216 : f32 to vector<16x32xf32>
    %645 = arith.cmpf oge, %643, %644 : vector<16x32xf32>
    %cst_217 = arith.constant 1.000000e+00 : f32
    %cst_218 = arith.constant -1.000000e+00 : f32
    %646 = vector.broadcast %cst_217 : f32 to vector<16x32xf32>
    %647 = vector.broadcast %cst_218 : f32 to vector<16x32xf32>
    %648 = arith.select %645, %646, %647 : vector<16x32xi1>, vector<16x32xf32>
    %649 = math.absf %643 : vector<16x32xf32>
    %cst_219 = arith.constant 0.327591091 : f32
    %650 = vector.broadcast %cst_219 : f32 to vector<16x32xf32>
    %651 = arith.mulf %650, %649 : vector<16x32xf32>
    %cst_220 = arith.constant 1.000000e+00 : f32
    %652 = vector.broadcast %cst_220 : f32 to vector<16x32xf32>
    %653 = arith.addf %652, %651 : vector<16x32xf32>
    %cst_221 = arith.constant 1.000000e+00 : f32
    %654 = vector.broadcast %cst_221 : f32 to vector<16x32xf32>
    %655 = arith.divf %654, %653 : vector<16x32xf32>
    %cst_222 = arith.constant 1.06140542 : f32
    %656 = vector.broadcast %cst_222 : f32 to vector<16x32xf32>
    %657 = arith.mulf %656, %655 : vector<16x32xf32>
    %cst_223 = arith.constant 1.45315206 : f32
    %658 = vector.broadcast %cst_223 : f32 to vector<16x32xf32>
    %659 = arith.subf %657, %658 : vector<16x32xf32>
    %660 = arith.mulf %659, %655 : vector<16x32xf32>
    %cst_224 = arith.constant 1.42141378 : f32
    %661 = vector.broadcast %cst_224 : f32 to vector<16x32xf32>
    %662 = arith.addf %660, %661 : vector<16x32xf32>
    %663 = arith.mulf %662, %655 : vector<16x32xf32>
    %cst_225 = arith.constant 0.284496725 : f32
    %664 = vector.broadcast %cst_225 : f32 to vector<16x32xf32>
    %665 = arith.subf %663, %664 : vector<16x32xf32>
    %666 = arith.mulf %665, %655 : vector<16x32xf32>
    %cst_226 = arith.constant 0.254829586 : f32
    %667 = vector.broadcast %cst_226 : f32 to vector<16x32xf32>
    %668 = arith.addf %666, %667 : vector<16x32xf32>
    %669 = arith.mulf %668, %655 : vector<16x32xf32>
    %cst_227 = arith.constant 0.000000e+00 : f32
    %670 = vector.broadcast %cst_227 : f32 to vector<16x32xf32>
    %671 = arith.subf %670, %649 : vector<16x32xf32>
    %672 = arith.mulf %671, %649 : vector<16x32xf32>
    %673 = math.exp %672 : vector<16x32xf32>
    %674 = arith.mulf %669, %673 : vector<16x32xf32>
    %cst_228 = arith.constant 1.000000e+00 : f32
    %675 = vector.broadcast %cst_228 : f32 to vector<16x32xf32>
    %676 = arith.subf %675, %674 : vector<16x32xf32>
    %677 = arith.mulf %648, %676 : vector<16x32xf32>
    %cst_229 = arith.constant 1.000000e+00 : f32
    %678 = vector.broadcast %cst_229 : f32 to vector<16x32xf32>
    %679 = arith.addf %678, %677 : vector<16x32xf32>
    %680 = arith.mulf %641, %679 : vector<16x32xf32>
    %681 = vector.extract_strided_slice %588 {offsets = [16, 0], sizes = [16, 32], strides = [1, 1]} : vector<32x32xf32> to vector<16x32xf32>
    %cst_230 = arith.constant dense<0.000000e+00> : vector<32xf32>
    %682 = vector.multi_reduction <add>, %681, %cst_230 [0] : vector<16x32xf32> to vector<32xf32>
    %683 = vector.shape_cast %682 : vector<32xf32> to vector<1x32xf32>
    %684 = vector.extract_strided_slice %683 {offsets = [0, 1], sizes = [1, 31], strides = [1, 1]} : vector<1x32xf32> to vector<1x31xf32>
    %685 = vector.extract_strided_slice %683 {offsets = [0, 0], sizes = [1, 1], strides = [1, 1]} : vector<1x32xf32> to vector<1x1xf32>
    %686 = tpu.concatenate %684, %685 in 1 : vector<1x31xf32>, vector<1x1xf32> -> vector<1x32xf32>
    %687 = vector.extract_strided_slice %683 {offsets = [0, 31], sizes = [1, 1], strides = [1, 1]} : vector<1x32xf32> to vector<1x1xf32>
    %688 = vector.extract_strided_slice %683 {offsets = [0, 0], sizes = [1, 31], strides = [1, 1]} : vector<1x32xf32> to vector<1x31xf32>
    %689 = tpu.concatenate %687, %688 in 1 : vector<1x1xf32>, vector<1x31xf32> -> vector<1x32xf32>
    %690 = tpu.iota {dimensions = array<i32: 1>} : vector<1x32xi32>
    %c1_i32_231 = arith.constant 1 : i32
    %691 = vector.broadcast %c1_i32_231 : i32 to vector<1x32xi32>
    %692 = arith.andi %690, %691 : vector<1x32xi32>
    %c0_i32_232 = arith.constant 0 : i32
    %693 = vector.broadcast %c0_i32_232 : i32 to vector<1x32xi32>
    %694 = arith.cmpi eq, %692, %693 : vector<1x32xi32>
    %695 = arith.select %694, %686, %689 : vector<1x32xi1>, vector<1x32xf32>
    %696 = arith.addf %683, %695 : vector<1x32xf32>
    %cst_233 = arith.constant 3.125000e-02 : f32
    %697 = vector.broadcast %cst_233 : f32 to vector<1x32xf32>
    %698 = arith.mulf %696, %697 : vector<1x32xf32>
    %699 = vector.broadcast %698 : vector<1x32xf32> to vector<16x32xf32>
    %700 = arith.subf %681, %699 : vector<16x32xf32>
    %701 = arith.mulf %700, %700 : vector<16x32xf32>
    %cst_234 = arith.constant dense<0.000000e+00> : vector<32xf32>
    %702 = vector.multi_reduction <add>, %701, %cst_234 [0] : vector<16x32xf32> to vector<32xf32>
    %703 = vector.shape_cast %702 : vector<32xf32> to vector<1x32xf32>
    %704 = vector.extract_strided_slice %703 {offsets = [0, 1], sizes = [1, 31], strides = [1, 1]} : vector<1x32xf32> to vector<1x31xf32>
    %705 = vector.extract_strided_slice %703 {offsets = [0, 0], sizes = [1, 1], strides = [1, 1]} : vector<1x32xf32> to vector<1x1xf32>
    %706 = tpu.concatenate %704, %705 in 1 : vector<1x31xf32>, vector<1x1xf32> -> vector<1x32xf32>
    %707 = vector.extract_strided_slice %703 {offsets = [0, 31], sizes = [1, 1], strides = [1, 1]} : vector<1x32xf32> to vector<1x1xf32>
    %708 = vector.extract_strided_slice %703 {offsets = [0, 0], sizes = [1, 31], strides = [1, 1]} : vector<1x32xf32> to vector<1x31xf32>
    %709 = tpu.concatenate %707, %708 in 1 : vector<1x1xf32>, vector<1x31xf32> -> vector<1x32xf32>
    %710 = tpu.iota {dimensions = array<i32: 1>} : vector<1x32xi32>
    %c1_i32_235 = arith.constant 1 : i32
    %711 = vector.broadcast %c1_i32_235 : i32 to vector<1x32xi32>
    %712 = arith.andi %710, %711 : vector<1x32xi32>
    %c0_i32_236 = arith.constant 0 : i32
    %713 = vector.broadcast %c0_i32_236 : i32 to vector<1x32xi32>
    %714 = arith.cmpi eq, %712, %713 : vector<1x32xi32>
    %715 = arith.select %714, %706, %709 : vector<1x32xi1>, vector<1x32xf32>
    %716 = arith.addf %703, %715 : vector<1x32xf32>
    %cst_237 = arith.constant 3.125000e-02 : f32
    %717 = vector.broadcast %cst_237 : f32 to vector<1x32xf32>
    %718 = arith.mulf %716, %717 : vector<1x32xf32>
    %cst_238 = arith.constant 9.99999974E-6 : f32
    %719 = vector.broadcast %cst_238 : f32 to vector<1x32xf32>
    %720 = arith.addf %718, %719 : vector<1x32xf32>
    %721 = math.sqrt %720 : vector<1x32xf32>
    %722 = vector.broadcast %721 : vector<1x32xf32> to vector<16x32xf32>
    %723 = arith.divf %700, %722 : vector<16x32xf32>
    %724 = vector.broadcast %590 : vector<1x32xf32> to vector<16x32xf32>
    %725 = arith.mulf %723, %724 : vector<16x32xf32>
    %726 = vector.broadcast %592 : vector<1x32xf32> to vector<16x32xf32>
    %727 = arith.addf %725, %726 : vector<16x32xf32>
    %cst_239 = arith.constant 5.000000e-01 : f32
    %728 = vector.broadcast %cst_239 : f32 to vector<16x32xf32>
    %729 = arith.mulf %728, %727 : vector<16x32xf32>
    %cst_240 = arith.constant 0.707106769 : f32
    %730 = vector.broadcast %cst_240 : f32 to vector<16x32xf32>
    %731 = arith.mulf %727, %730 : vector<16x32xf32>
    %cst_241 = arith.constant 0.000000e+00 : f32
    %732 = vector.broadcast %cst_241 : f32 to vector<16x32xf32>
    %733 = arith.cmpf oge, %731, %732 : vector<16x32xf32>
    %cst_242 = arith.constant 1.000000e+00 : f32
    %cst_243 = arith.constant -1.000000e+00 : f32
    %734 = vector.broadcast %cst_242 : f32 to vector<16x32xf32>
    %735 = vector.broadcast %cst_243 : f32 to vector<16x32xf32>
    %736 = arith.select %733, %734, %735 : vector<16x32xi1>, vector<16x32xf32>
    %737 = math.absf %731 : vector<16x32xf32>
    %cst_244 = arith.constant 0.327591091 : f32
    %738 = vector.broadcast %cst_244 : f32 to vector<16x32xf32>
    %739 = arith.mulf %738, %737 : vector<16x32xf32>
    %cst_245 = arith.constant 1.000000e+00 : f32
    %740 = vector.broadcast %cst_245 : f32 to vector<16x32xf32>
    %741 = arith.addf %740, %739 : vector<16x32xf32>
    %cst_246 = arith.constant 1.000000e+00 : f32
    %742 = vector.broadcast %cst_246 : f32 to vector<16x32xf32>
    %743 = arith.divf %742, %741 : vector<16x32xf32>
    %cst_247 = arith.constant 1.06140542 : f32
    %744 = vector.broadcast %cst_247 : f32 to vector<16x32xf32>
    %745 = arith.mulf %744, %743 : vector<16x32xf32>
    %cst_248 = arith.constant 1.45315206 : f32
    %746 = vector.broadcast %cst_248 : f32 to vector<16x32xf32>
    %747 = arith.subf %745, %746 : vector<16x32xf32>
    %748 = arith.mulf %747, %743 : vector<16x32xf32>
    %cst_249 = arith.constant 1.42141378 : f32
    %749 = vector.broadcast %cst_249 : f32 to vector<16x32xf32>
    %750 = arith.addf %748, %749 : vector<16x32xf32>
    %751 = arith.mulf %750, %743 : vector<16x32xf32>
    %cst_250 = arith.constant 0.284496725 : f32
    %752 = vector.broadcast %cst_250 : f32 to vector<16x32xf32>
    %753 = arith.subf %751, %752 : vector<16x32xf32>
    %754 = arith.mulf %753, %743 : vector<16x32xf32>
    %cst_251 = arith.constant 0.254829586 : f32
    %755 = vector.broadcast %cst_251 : f32 to vector<16x32xf32>
    %756 = arith.addf %754, %755 : vector<16x32xf32>
    %757 = arith.mulf %756, %743 : vector<16x32xf32>
    %cst_252 = arith.constant 0.000000e+00 : f32
    %758 = vector.broadcast %cst_252 : f32 to vector<16x32xf32>
    %759 = arith.subf %758, %737 : vector<16x32xf32>
    %760 = arith.mulf %759, %737 : vector<16x32xf32>
    %761 = math.exp %760 : vector<16x32xf32>
    %762 = arith.mulf %757, %761 : vector<16x32xf32>
    %cst_253 = arith.constant 1.000000e+00 : f32
    %763 = vector.broadcast %cst_253 : f32 to vector<16x32xf32>
    %764 = arith.subf %763, %762 : vector<16x32xf32>
    %765 = arith.mulf %736, %764 : vector<16x32xf32>
    %cst_254 = arith.constant 1.000000e+00 : f32
    %766 = vector.broadcast %cst_254 : f32 to vector<16x32xf32>
    %767 = arith.addf %766, %765 : vector<16x32xf32>
    %768 = arith.mulf %729, %767 : vector<16x32xf32>
    %769 = tpu.concatenate %680, %768 in 0 : vector<16x32xf32>, vector<16x32xf32> -> vector<32x32xf32>
    %c0_255 = arith.constant 0 : index
    %c0_256 = arith.constant 0 : index
    %770 = vector.load %arg9[%c0_255, %c0_256] : memref<48x32xf32, #tpu.memory_space<vmem>>, vector<48x32xf32>
    %cst_257 = arith.constant dense<0.000000e+00> : vector<48x32xf32>
    %771 = tpu.matmul %770, %769, %cst_257 {dimension_numbers = #tpu.dot_dimension_numbers<[1], [0], [0], [1], [0, 0, 1, 1], [], []>} : vector<48x32xf32>, vector<32x32xf32>, vector<48x32xf32> -> vector<48x32xf32>
    %772 = vector.extract_strided_slice %771 {offsets = [0, 0], sizes = [16, 32], strides = [1, 1]} : vector<48x32xf32> to vector<16x32xf32>
    %773 = vector.extract_strided_slice %771 {offsets = [16, 0], sizes = [16, 32], strides = [1, 1]} : vector<48x32xf32> to vector<16x32xf32>
    %774 = vector.extract_strided_slice %771 {offsets = [32, 0], sizes = [16, 32], strides = [1, 1]} : vector<48x32xf32> to vector<16x32xf32>
    %775 = tpu.concatenate %772, %773, %774 in 1 : vector<16x32xf32>, vector<16x32xf32>, vector<16x32xf32> -> vector<16x96xf32>
    %c3_258 = arith.constant 3 : index
    %c0_259 = arith.constant 0 : index
    %c0_260 = arith.constant 0 : index
    %776 = vector.load %arg2[%c3_258, %c0_259, %c0_260] : memref<5x96x32xf32, #tpu.memory_space<vmem>>, vector<1x96x32xf32>
    %777 = vector.shape_cast %776 : vector<1x96x32xf32> to vector<96x32xf32>
    %cst_261 = arith.constant dense<0.000000e+00> : vector<16x32xf32>
    %778 = tpu.matmul %775, %777, %cst_261 {dimension_numbers = #tpu.dot_dimension_numbers<[1], [0], [0], [1], [0, 0, 1, 1], [], []>} : vector<16x96xf32>, vector<96x32xf32>, vector<16x32xf32> -> vector<16x32xf32>
    %c4 = arith.constant 4 : index
    %c0_262 = arith.constant 0 : index
    %c0_263 = arith.constant 0 : index
    %779 = vector.load %arg3[%c4, %c0_262, %c0_263] : memref<6x1x32xf32, #tpu.memory_space<vmem>>, vector<1x1x32xf32>
    %780 = vector.shape_cast %779 : vector<1x1x32xf32> to vector<1x32xf32>
    %781 = vector.broadcast %780 : vector<1x32xf32> to vector<16x32xf32>
    %782 = arith.addf %778, %781 : vector<16x32xf32>
    %c4_264 = arith.constant 4 : index
    %c0_265 = arith.constant 0 : index
    %c0_266 = arith.constant 0 : index
    %783 = vector.load %arg4[%c4_264, %c0_265, %c0_266] : memref<6x1x32xf32, #tpu.memory_space<vmem>>, vector<1x1x32xf32>
    %784 = vector.shape_cast %783 : vector<1x1x32xf32> to vector<1x32xf32>
    %c4_267 = arith.constant 4 : index
    %c0_268 = arith.constant 0 : index
    %c0_269 = arith.constant 0 : index
    %785 = vector.load %arg5[%c4_267, %c0_268, %c0_269] : memref<6x1x32xf32, #tpu.memory_space<vmem>>, vector<1x1x32xf32>
    %786 = vector.shape_cast %785 : vector<1x1x32xf32> to vector<1x32xf32>
    %787 = vector.extract_strided_slice %782 {offsets = [0, 0], sizes = [8, 32], strides = [1, 1]} : vector<16x32xf32> to vector<8x32xf32>
    %cst_270 = arith.constant dense<0.000000e+00> : vector<32xf32>
    %788 = vector.multi_reduction <add>, %787, %cst_270 [0] : vector<8x32xf32> to vector<32xf32>
    %789 = vector.shape_cast %788 : vector<32xf32> to vector<1x32xf32>
    %790 = vector.extract_strided_slice %789 {offsets = [0, 1], sizes = [1, 31], strides = [1, 1]} : vector<1x32xf32> to vector<1x31xf32>
    %791 = vector.extract_strided_slice %789 {offsets = [0, 0], sizes = [1, 1], strides = [1, 1]} : vector<1x32xf32> to vector<1x1xf32>
    %792 = tpu.concatenate %790, %791 in 1 : vector<1x31xf32>, vector<1x1xf32> -> vector<1x32xf32>
    %793 = vector.extract_strided_slice %789 {offsets = [0, 31], sizes = [1, 1], strides = [1, 1]} : vector<1x32xf32> to vector<1x1xf32>
    %794 = vector.extract_strided_slice %789 {offsets = [0, 0], sizes = [1, 31], strides = [1, 1]} : vector<1x32xf32> to vector<1x31xf32>
    %795 = tpu.concatenate %793, %794 in 1 : vector<1x1xf32>, vector<1x31xf32> -> vector<1x32xf32>
    %796 = tpu.iota {dimensions = array<i32: 1>} : vector<1x32xi32>
    %c1_i32_271 = arith.constant 1 : i32
    %797 = vector.broadcast %c1_i32_271 : i32 to vector<1x32xi32>
    %798 = arith.andi %796, %797 : vector<1x32xi32>
    %c0_i32_272 = arith.constant 0 : i32
    %799 = vector.broadcast %c0_i32_272 : i32 to vector<1x32xi32>
    %800 = arith.cmpi eq, %798, %799 : vector<1x32xi32>
    %801 = arith.select %800, %792, %795 : vector<1x32xi1>, vector<1x32xf32>
    %802 = arith.addf %789, %801 : vector<1x32xf32>
    %cst_273 = arith.constant 6.250000e-02 : f32
    %803 = vector.broadcast %cst_273 : f32 to vector<1x32xf32>
    %804 = arith.mulf %802, %803 : vector<1x32xf32>
    %805 = vector.broadcast %804 : vector<1x32xf32> to vector<8x32xf32>
    %806 = arith.subf %787, %805 : vector<8x32xf32>
    %807 = arith.mulf %806, %806 : vector<8x32xf32>
    %cst_274 = arith.constant dense<0.000000e+00> : vector<32xf32>
    %808 = vector.multi_reduction <add>, %807, %cst_274 [0] : vector<8x32xf32> to vector<32xf32>
    %809 = vector.shape_cast %808 : vector<32xf32> to vector<1x32xf32>
    %810 = vector.extract_strided_slice %809 {offsets = [0, 1], sizes = [1, 31], strides = [1, 1]} : vector<1x32xf32> to vector<1x31xf32>
    %811 = vector.extract_strided_slice %809 {offsets = [0, 0], sizes = [1, 1], strides = [1, 1]} : vector<1x32xf32> to vector<1x1xf32>
    %812 = tpu.concatenate %810, %811 in 1 : vector<1x31xf32>, vector<1x1xf32> -> vector<1x32xf32>
    %813 = vector.extract_strided_slice %809 {offsets = [0, 31], sizes = [1, 1], strides = [1, 1]} : vector<1x32xf32> to vector<1x1xf32>
    %814 = vector.extract_strided_slice %809 {offsets = [0, 0], sizes = [1, 31], strides = [1, 1]} : vector<1x32xf32> to vector<1x31xf32>
    %815 = tpu.concatenate %813, %814 in 1 : vector<1x1xf32>, vector<1x31xf32> -> vector<1x32xf32>
    %816 = tpu.iota {dimensions = array<i32: 1>} : vector<1x32xi32>
    %c1_i32_275 = arith.constant 1 : i32
    %817 = vector.broadcast %c1_i32_275 : i32 to vector<1x32xi32>
    %818 = arith.andi %816, %817 : vector<1x32xi32>
    %c0_i32_276 = arith.constant 0 : i32
    %819 = vector.broadcast %c0_i32_276 : i32 to vector<1x32xi32>
    %820 = arith.cmpi eq, %818, %819 : vector<1x32xi32>
    %821 = arith.select %820, %812, %815 : vector<1x32xi1>, vector<1x32xf32>
    %822 = arith.addf %809, %821 : vector<1x32xf32>
    %cst_277 = arith.constant 6.250000e-02 : f32
    %823 = vector.broadcast %cst_277 : f32 to vector<1x32xf32>
    %824 = arith.mulf %822, %823 : vector<1x32xf32>
    %cst_278 = arith.constant 9.99999974E-6 : f32
    %825 = vector.broadcast %cst_278 : f32 to vector<1x32xf32>
    %826 = arith.addf %824, %825 : vector<1x32xf32>
    %827 = math.sqrt %826 : vector<1x32xf32>
    %828 = vector.broadcast %827 : vector<1x32xf32> to vector<8x32xf32>
    %829 = arith.divf %806, %828 : vector<8x32xf32>
    %830 = vector.broadcast %784 : vector<1x32xf32> to vector<8x32xf32>
    %831 = arith.mulf %829, %830 : vector<8x32xf32>
    %832 = vector.broadcast %786 : vector<1x32xf32> to vector<8x32xf32>
    %833 = arith.addf %831, %832 : vector<8x32xf32>
    %cst_279 = arith.constant 5.000000e-01 : f32
    %834 = vector.broadcast %cst_279 : f32 to vector<8x32xf32>
    %835 = arith.mulf %834, %833 : vector<8x32xf32>
    %cst_280 = arith.constant 0.707106769 : f32
    %836 = vector.broadcast %cst_280 : f32 to vector<8x32xf32>
    %837 = arith.mulf %833, %836 : vector<8x32xf32>
    %cst_281 = arith.constant 0.000000e+00 : f32
    %838 = vector.broadcast %cst_281 : f32 to vector<8x32xf32>
    %839 = arith.cmpf oge, %837, %838 : vector<8x32xf32>
    %cst_282 = arith.constant 1.000000e+00 : f32
    %cst_283 = arith.constant -1.000000e+00 : f32
    %840 = vector.broadcast %cst_282 : f32 to vector<8x32xf32>
    %841 = vector.broadcast %cst_283 : f32 to vector<8x32xf32>
    %842 = arith.select %839, %840, %841 : vector<8x32xi1>, vector<8x32xf32>
    %843 = math.absf %837 : vector<8x32xf32>
    %cst_284 = arith.constant 0.327591091 : f32
    %844 = vector.broadcast %cst_284 : f32 to vector<8x32xf32>
    %845 = arith.mulf %844, %843 : vector<8x32xf32>
    %cst_285 = arith.constant 1.000000e+00 : f32
    %846 = vector.broadcast %cst_285 : f32 to vector<8x32xf32>
    %847 = arith.addf %846, %845 : vector<8x32xf32>
    %cst_286 = arith.constant 1.000000e+00 : f32
    %848 = vector.broadcast %cst_286 : f32 to vector<8x32xf32>
    %849 = arith.divf %848, %847 : vector<8x32xf32>
    %cst_287 = arith.constant 1.06140542 : f32
    %850 = vector.broadcast %cst_287 : f32 to vector<8x32xf32>
    %851 = arith.mulf %850, %849 : vector<8x32xf32>
    %cst_288 = arith.constant 1.45315206 : f32
    %852 = vector.broadcast %cst_288 : f32 to vector<8x32xf32>
    %853 = arith.subf %851, %852 : vector<8x32xf32>
    %854 = arith.mulf %853, %849 : vector<8x32xf32>
    %cst_289 = arith.constant 1.42141378 : f32
    %855 = vector.broadcast %cst_289 : f32 to vector<8x32xf32>
    %856 = arith.addf %854, %855 : vector<8x32xf32>
    %857 = arith.mulf %856, %849 : vector<8x32xf32>
    %cst_290 = arith.constant 0.284496725 : f32
    %858 = vector.broadcast %cst_290 : f32 to vector<8x32xf32>
    %859 = arith.subf %857, %858 : vector<8x32xf32>
    %860 = arith.mulf %859, %849 : vector<8x32xf32>
    %cst_291 = arith.constant 0.254829586 : f32
    %861 = vector.broadcast %cst_291 : f32 to vector<8x32xf32>
    %862 = arith.addf %860, %861 : vector<8x32xf32>
    %863 = arith.mulf %862, %849 : vector<8x32xf32>
    %cst_292 = arith.constant 0.000000e+00 : f32
    %864 = vector.broadcast %cst_292 : f32 to vector<8x32xf32>
    %865 = arith.subf %864, %843 : vector<8x32xf32>
    %866 = arith.mulf %865, %843 : vector<8x32xf32>
    %867 = math.exp %866 : vector<8x32xf32>
    %868 = arith.mulf %863, %867 : vector<8x32xf32>
    %cst_293 = arith.constant 1.000000e+00 : f32
    %869 = vector.broadcast %cst_293 : f32 to vector<8x32xf32>
    %870 = arith.subf %869, %868 : vector<8x32xf32>
    %871 = arith.mulf %842, %870 : vector<8x32xf32>
    %cst_294 = arith.constant 1.000000e+00 : f32
    %872 = vector.broadcast %cst_294 : f32 to vector<8x32xf32>
    %873 = arith.addf %872, %871 : vector<8x32xf32>
    %874 = arith.mulf %835, %873 : vector<8x32xf32>
    %875 = vector.extract_strided_slice %782 {offsets = [8, 0], sizes = [8, 32], strides = [1, 1]} : vector<16x32xf32> to vector<8x32xf32>
    %cst_295 = arith.constant dense<0.000000e+00> : vector<32xf32>
    %876 = vector.multi_reduction <add>, %875, %cst_295 [0] : vector<8x32xf32> to vector<32xf32>
    %877 = vector.shape_cast %876 : vector<32xf32> to vector<1x32xf32>
    %878 = vector.extract_strided_slice %877 {offsets = [0, 1], sizes = [1, 31], strides = [1, 1]} : vector<1x32xf32> to vector<1x31xf32>
    %879 = vector.extract_strided_slice %877 {offsets = [0, 0], sizes = [1, 1], strides = [1, 1]} : vector<1x32xf32> to vector<1x1xf32>
    %880 = tpu.concatenate %878, %879 in 1 : vector<1x31xf32>, vector<1x1xf32> -> vector<1x32xf32>
    %881 = vector.extract_strided_slice %877 {offsets = [0, 31], sizes = [1, 1], strides = [1, 1]} : vector<1x32xf32> to vector<1x1xf32>
    %882 = vector.extract_strided_slice %877 {offsets = [0, 0], sizes = [1, 31], strides = [1, 1]} : vector<1x32xf32> to vector<1x31xf32>
    %883 = tpu.concatenate %881, %882 in 1 : vector<1x1xf32>, vector<1x31xf32> -> vector<1x32xf32>
    %884 = tpu.iota {dimensions = array<i32: 1>} : vector<1x32xi32>
    %c1_i32_296 = arith.constant 1 : i32
    %885 = vector.broadcast %c1_i32_296 : i32 to vector<1x32xi32>
    %886 = arith.andi %884, %885 : vector<1x32xi32>
    %c0_i32_297 = arith.constant 0 : i32
    %887 = vector.broadcast %c0_i32_297 : i32 to vector<1x32xi32>
    %888 = arith.cmpi eq, %886, %887 : vector<1x32xi32>
    %889 = arith.select %888, %880, %883 : vector<1x32xi1>, vector<1x32xf32>
    %890 = arith.addf %877, %889 : vector<1x32xf32>
    %cst_298 = arith.constant 6.250000e-02 : f32
    %891 = vector.broadcast %cst_298 : f32 to vector<1x32xf32>
    %892 = arith.mulf %890, %891 : vector<1x32xf32>
    %893 = vector.broadcast %892 : vector<1x32xf32> to vector<8x32xf32>
    %894 = arith.subf %875, %893 : vector<8x32xf32>
    %895 = arith.mulf %894, %894 : vector<8x32xf32>
    %cst_299 = arith.constant dense<0.000000e+00> : vector<32xf32>
    %896 = vector.multi_reduction <add>, %895, %cst_299 [0] : vector<8x32xf32> to vector<32xf32>
    %897 = vector.shape_cast %896 : vector<32xf32> to vector<1x32xf32>
    %898 = vector.extract_strided_slice %897 {offsets = [0, 1], sizes = [1, 31], strides = [1, 1]} : vector<1x32xf32> to vector<1x31xf32>
    %899 = vector.extract_strided_slice %897 {offsets = [0, 0], sizes = [1, 1], strides = [1, 1]} : vector<1x32xf32> to vector<1x1xf32>
    %900 = tpu.concatenate %898, %899 in 1 : vector<1x31xf32>, vector<1x1xf32> -> vector<1x32xf32>
    %901 = vector.extract_strided_slice %897 {offsets = [0, 31], sizes = [1, 1], strides = [1, 1]} : vector<1x32xf32> to vector<1x1xf32>
    %902 = vector.extract_strided_slice %897 {offsets = [0, 0], sizes = [1, 31], strides = [1, 1]} : vector<1x32xf32> to vector<1x31xf32>
    %903 = tpu.concatenate %901, %902 in 1 : vector<1x1xf32>, vector<1x31xf32> -> vector<1x32xf32>
    %904 = tpu.iota {dimensions = array<i32: 1>} : vector<1x32xi32>
    %c1_i32_300 = arith.constant 1 : i32
    %905 = vector.broadcast %c1_i32_300 : i32 to vector<1x32xi32>
    %906 = arith.andi %904, %905 : vector<1x32xi32>
    %c0_i32_301 = arith.constant 0 : i32
    %907 = vector.broadcast %c0_i32_301 : i32 to vector<1x32xi32>
    %908 = arith.cmpi eq, %906, %907 : vector<1x32xi32>
    %909 = arith.select %908, %900, %903 : vector<1x32xi1>, vector<1x32xf32>
    %910 = arith.addf %897, %909 : vector<1x32xf32>
    %cst_302 = arith.constant 6.250000e-02 : f32
    %911 = vector.broadcast %cst_302 : f32 to vector<1x32xf32>
    %912 = arith.mulf %910, %911 : vector<1x32xf32>
    %cst_303 = arith.constant 9.99999974E-6 : f32
    %913 = vector.broadcast %cst_303 : f32 to vector<1x32xf32>
    %914 = arith.addf %912, %913 : vector<1x32xf32>
    %915 = math.sqrt %914 : vector<1x32xf32>
    %916 = vector.broadcast %915 : vector<1x32xf32> to vector<8x32xf32>
    %917 = arith.divf %894, %916 : vector<8x32xf32>
    %918 = vector.broadcast %784 : vector<1x32xf32> to vector<8x32xf32>
    %919 = arith.mulf %917, %918 : vector<8x32xf32>
    %920 = vector.broadcast %786 : vector<1x32xf32> to vector<8x32xf32>
    %921 = arith.addf %919, %920 : vector<8x32xf32>
    %cst_304 = arith.constant 5.000000e-01 : f32
    %922 = vector.broadcast %cst_304 : f32 to vector<8x32xf32>
    %923 = arith.mulf %922, %921 : vector<8x32xf32>
    %cst_305 = arith.constant 0.707106769 : f32
    %924 = vector.broadcast %cst_305 : f32 to vector<8x32xf32>
    %925 = arith.mulf %921, %924 : vector<8x32xf32>
    %cst_306 = arith.constant 0.000000e+00 : f32
    %926 = vector.broadcast %cst_306 : f32 to vector<8x32xf32>
    %927 = arith.cmpf oge, %925, %926 : vector<8x32xf32>
    %cst_307 = arith.constant 1.000000e+00 : f32
    %cst_308 = arith.constant -1.000000e+00 : f32
    %928 = vector.broadcast %cst_307 : f32 to vector<8x32xf32>
    %929 = vector.broadcast %cst_308 : f32 to vector<8x32xf32>
    %930 = arith.select %927, %928, %929 : vector<8x32xi1>, vector<8x32xf32>
    %931 = math.absf %925 : vector<8x32xf32>
    %cst_309 = arith.constant 0.327591091 : f32
    %932 = vector.broadcast %cst_309 : f32 to vector<8x32xf32>
    %933 = arith.mulf %932, %931 : vector<8x32xf32>
    %cst_310 = arith.constant 1.000000e+00 : f32
    %934 = vector.broadcast %cst_310 : f32 to vector<8x32xf32>
    %935 = arith.addf %934, %933 : vector<8x32xf32>
    %cst_311 = arith.constant 1.000000e+00 : f32
    %936 = vector.broadcast %cst_311 : f32 to vector<8x32xf32>
    %937 = arith.divf %936, %935 : vector<8x32xf32>
    %cst_312 = arith.constant 1.06140542 : f32
    %938 = vector.broadcast %cst_312 : f32 to vector<8x32xf32>
    %939 = arith.mulf %938, %937 : vector<8x32xf32>
    %cst_313 = arith.constant 1.45315206 : f32
    %940 = vector.broadcast %cst_313 : f32 to vector<8x32xf32>
    %941 = arith.subf %939, %940 : vector<8x32xf32>
    %942 = arith.mulf %941, %937 : vector<8x32xf32>
    %cst_314 = arith.constant 1.42141378 : f32
    %943 = vector.broadcast %cst_314 : f32 to vector<8x32xf32>
    %944 = arith.addf %942, %943 : vector<8x32xf32>
    %945 = arith.mulf %944, %937 : vector<8x32xf32>
    %cst_315 = arith.constant 0.284496725 : f32
    %946 = vector.broadcast %cst_315 : f32 to vector<8x32xf32>
    %947 = arith.subf %945, %946 : vector<8x32xf32>
    %948 = arith.mulf %947, %937 : vector<8x32xf32>
    %cst_316 = arith.constant 0.254829586 : f32
    %949 = vector.broadcast %cst_316 : f32 to vector<8x32xf32>
    %950 = arith.addf %948, %949 : vector<8x32xf32>
    %951 = arith.mulf %950, %937 : vector<8x32xf32>
    %cst_317 = arith.constant 0.000000e+00 : f32
    %952 = vector.broadcast %cst_317 : f32 to vector<8x32xf32>
    %953 = arith.subf %952, %931 : vector<8x32xf32>
    %954 = arith.mulf %953, %931 : vector<8x32xf32>
    %955 = math.exp %954 : vector<8x32xf32>
    %956 = arith.mulf %951, %955 : vector<8x32xf32>
    %cst_318 = arith.constant 1.000000e+00 : f32
    %957 = vector.broadcast %cst_318 : f32 to vector<8x32xf32>
    %958 = arith.subf %957, %956 : vector<8x32xf32>
    %959 = arith.mulf %930, %958 : vector<8x32xf32>
    %cst_319 = arith.constant 1.000000e+00 : f32
    %960 = vector.broadcast %cst_319 : f32 to vector<8x32xf32>
    %961 = arith.addf %960, %959 : vector<8x32xf32>
    %962 = arith.mulf %923, %961 : vector<8x32xf32>
    %963 = tpu.concatenate %874, %962 in 0 : vector<8x32xf32>, vector<8x32xf32> -> vector<16x32xf32>
    %c0_320 = arith.constant 0 : index
    %c0_321 = arith.constant 0 : index
    %964 = vector.load %arg10[%c0_320, %c0_321] : memref<24x16xf32, #tpu.memory_space<vmem>>, vector<24x16xf32>
    %cst_322 = arith.constant dense<0.000000e+00> : vector<24x32xf32>
    %965 = tpu.matmul %964, %963, %cst_322 {dimension_numbers = #tpu.dot_dimension_numbers<[1], [0], [0], [1], [0, 0, 1, 1], [], []>} : vector<24x16xf32>, vector<16x32xf32>, vector<24x32xf32> -> vector<24x32xf32>
    %966 = vector.extract_strided_slice %965 {offsets = [0, 0], sizes = [8, 32], strides = [1, 1]} : vector<24x32xf32> to vector<8x32xf32>
    %967 = vector.extract_strided_slice %965 {offsets = [8, 0], sizes = [8, 32], strides = [1, 1]} : vector<24x32xf32> to vector<8x32xf32>
    %968 = vector.extract_strided_slice %965 {offsets = [16, 0], sizes = [8, 32], strides = [1, 1]} : vector<24x32xf32> to vector<8x32xf32>
    %969 = tpu.concatenate %966, %967, %968 in 1 : vector<8x32xf32>, vector<8x32xf32>, vector<8x32xf32> -> vector<8x96xf32>
    %c4_323 = arith.constant 4 : index
    %c0_324 = arith.constant 0 : index
    %c0_325 = arith.constant 0 : index
    %970 = vector.load %arg2[%c4_323, %c0_324, %c0_325] : memref<5x96x32xf32, #tpu.memory_space<vmem>>, vector<1x96x32xf32>
    %971 = vector.shape_cast %970 : vector<1x96x32xf32> to vector<96x32xf32>
    %cst_326 = arith.constant dense<0.000000e+00> : vector<8x32xf32>
    %972 = tpu.matmul %969, %971, %cst_326 {dimension_numbers = #tpu.dot_dimension_numbers<[1], [0], [0], [1], [0, 0, 1, 1], [], []>} : vector<8x96xf32>, vector<96x32xf32>, vector<8x32xf32> -> vector<8x32xf32>
    %c5 = arith.constant 5 : index
    %c0_327 = arith.constant 0 : index
    %c0_328 = arith.constant 0 : index
    %973 = vector.load %arg3[%c5, %c0_327, %c0_328] : memref<6x1x32xf32, #tpu.memory_space<vmem>>, vector<1x1x32xf32>
    %974 = vector.shape_cast %973 : vector<1x1x32xf32> to vector<1x32xf32>
    %975 = vector.broadcast %974 : vector<1x32xf32> to vector<8x32xf32>
    %976 = arith.addf %972, %975 : vector<8x32xf32>
    %c5_329 = arith.constant 5 : index
    %c0_330 = arith.constant 0 : index
    %c0_331 = arith.constant 0 : index
    %977 = vector.load %arg4[%c5_329, %c0_330, %c0_331] : memref<6x1x32xf32, #tpu.memory_space<vmem>>, vector<1x1x32xf32>
    %978 = vector.shape_cast %977 : vector<1x1x32xf32> to vector<1x32xf32>
    %c5_332 = arith.constant 5 : index
    %c0_333 = arith.constant 0 : index
    %c0_334 = arith.constant 0 : index
    %979 = vector.load %arg5[%c5_332, %c0_333, %c0_334] : memref<6x1x32xf32, #tpu.memory_space<vmem>>, vector<1x1x32xf32>
    %980 = vector.shape_cast %979 : vector<1x1x32xf32> to vector<1x32xf32>
    %981 = vector.extract_strided_slice %976 {offsets = [0, 0], sizes = [4, 32], strides = [1, 1]} : vector<8x32xf32> to vector<4x32xf32>
    %cst_335 = arith.constant dense<0.000000e+00> : vector<32xf32>
    %982 = vector.multi_reduction <add>, %981, %cst_335 [0] : vector<4x32xf32> to vector<32xf32>
    %983 = vector.shape_cast %982 : vector<32xf32> to vector<1x32xf32>
    %984 = vector.extract_strided_slice %983 {offsets = [0, 1], sizes = [1, 31], strides = [1, 1]} : vector<1x32xf32> to vector<1x31xf32>
    %985 = vector.extract_strided_slice %983 {offsets = [0, 0], sizes = [1, 1], strides = [1, 1]} : vector<1x32xf32> to vector<1x1xf32>
    %986 = tpu.concatenate %984, %985 in 1 : vector<1x31xf32>, vector<1x1xf32> -> vector<1x32xf32>
    %987 = vector.extract_strided_slice %983 {offsets = [0, 31], sizes = [1, 1], strides = [1, 1]} : vector<1x32xf32> to vector<1x1xf32>
    %988 = vector.extract_strided_slice %983 {offsets = [0, 0], sizes = [1, 31], strides = [1, 1]} : vector<1x32xf32> to vector<1x31xf32>
    %989 = tpu.concatenate %987, %988 in 1 : vector<1x1xf32>, vector<1x31xf32> -> vector<1x32xf32>
    %990 = tpu.iota {dimensions = array<i32: 1>} : vector<1x32xi32>
    %c1_i32_336 = arith.constant 1 : i32
    %991 = vector.broadcast %c1_i32_336 : i32 to vector<1x32xi32>
    %992 = arith.andi %990, %991 : vector<1x32xi32>
    %c0_i32_337 = arith.constant 0 : i32
    %993 = vector.broadcast %c0_i32_337 : i32 to vector<1x32xi32>
    %994 = arith.cmpi eq, %992, %993 : vector<1x32xi32>
    %995 = arith.select %994, %986, %989 : vector<1x32xi1>, vector<1x32xf32>
    %996 = arith.addf %983, %995 : vector<1x32xf32>
    %cst_338 = arith.constant 1.250000e-01 : f32
    %997 = vector.broadcast %cst_338 : f32 to vector<1x32xf32>
    %998 = arith.mulf %996, %997 : vector<1x32xf32>
    %999 = vector.broadcast %998 : vector<1x32xf32> to vector<4x32xf32>
    %1000 = arith.subf %981, %999 : vector<4x32xf32>
    %1001 = arith.mulf %1000, %1000 : vector<4x32xf32>
    %cst_339 = arith.constant dense<0.000000e+00> : vector<32xf32>
    %1002 = vector.multi_reduction <add>, %1001, %cst_339 [0] : vector<4x32xf32> to vector<32xf32>
    %1003 = vector.shape_cast %1002 : vector<32xf32> to vector<1x32xf32>
    %1004 = vector.extract_strided_slice %1003 {offsets = [0, 1], sizes = [1, 31], strides = [1, 1]} : vector<1x32xf32> to vector<1x31xf32>
    %1005 = vector.extract_strided_slice %1003 {offsets = [0, 0], sizes = [1, 1], strides = [1, 1]} : vector<1x32xf32> to vector<1x1xf32>
    %1006 = tpu.concatenate %1004, %1005 in 1 : vector<1x31xf32>, vector<1x1xf32> -> vector<1x32xf32>
    %1007 = vector.extract_strided_slice %1003 {offsets = [0, 31], sizes = [1, 1], strides = [1, 1]} : vector<1x32xf32> to vector<1x1xf32>
    %1008 = vector.extract_strided_slice %1003 {offsets = [0, 0], sizes = [1, 31], strides = [1, 1]} : vector<1x32xf32> to vector<1x31xf32>
    %1009 = tpu.concatenate %1007, %1008 in 1 : vector<1x1xf32>, vector<1x31xf32> -> vector<1x32xf32>
    %1010 = tpu.iota {dimensions = array<i32: 1>} : vector<1x32xi32>
    %c1_i32_340 = arith.constant 1 : i32
    %1011 = vector.broadcast %c1_i32_340 : i32 to vector<1x32xi32>
    %1012 = arith.andi %1010, %1011 : vector<1x32xi32>
    %c0_i32_341 = arith.constant 0 : i32
    %1013 = vector.broadcast %c0_i32_341 : i32 to vector<1x32xi32>
    %1014 = arith.cmpi eq, %1012, %1013 : vector<1x32xi32>
    %1015 = arith.select %1014, %1006, %1009 : vector<1x32xi1>, vector<1x32xf32>
    %1016 = arith.addf %1003, %1015 : vector<1x32xf32>
    %cst_342 = arith.constant 1.250000e-01 : f32
    %1017 = vector.broadcast %cst_342 : f32 to vector<1x32xf32>
    %1018 = arith.mulf %1016, %1017 : vector<1x32xf32>
    %cst_343 = arith.constant 9.99999974E-6 : f32
    %1019 = vector.broadcast %cst_343 : f32 to vector<1x32xf32>
    %1020 = arith.addf %1018, %1019 : vector<1x32xf32>
    %1021 = math.sqrt %1020 : vector<1x32xf32>
    %1022 = vector.broadcast %1021 : vector<1x32xf32> to vector<4x32xf32>
    %1023 = arith.divf %1000, %1022 : vector<4x32xf32>
    %1024 = vector.broadcast %978 : vector<1x32xf32> to vector<4x32xf32>
    %1025 = arith.mulf %1023, %1024 : vector<4x32xf32>
    %1026 = vector.broadcast %980 : vector<1x32xf32> to vector<4x32xf32>
    %1027 = arith.addf %1025, %1026 : vector<4x32xf32>
    %cst_344 = arith.constant 5.000000e-01 : f32
    %1028 = vector.broadcast %cst_344 : f32 to vector<4x32xf32>
    %1029 = arith.mulf %1028, %1027 : vector<4x32xf32>
    %cst_345 = arith.constant 0.707106769 : f32
    %1030 = vector.broadcast %cst_345 : f32 to vector<4x32xf32>
    %1031 = arith.mulf %1027, %1030 : vector<4x32xf32>
    %cst_346 = arith.constant 0.000000e+00 : f32
    %1032 = vector.broadcast %cst_346 : f32 to vector<4x32xf32>
    %1033 = arith.cmpf oge, %1031, %1032 : vector<4x32xf32>
    %cst_347 = arith.constant 1.000000e+00 : f32
    %cst_348 = arith.constant -1.000000e+00 : f32
    %1034 = vector.broadcast %cst_347 : f32 to vector<4x32xf32>
    %1035 = vector.broadcast %cst_348 : f32 to vector<4x32xf32>
    %1036 = arith.select %1033, %1034, %1035 : vector<4x32xi1>, vector<4x32xf32>
    %1037 = math.absf %1031 : vector<4x32xf32>
    %cst_349 = arith.constant 0.327591091 : f32
    %1038 = vector.broadcast %cst_349 : f32 to vector<4x32xf32>
    %1039 = arith.mulf %1038, %1037 : vector<4x32xf32>
    %cst_350 = arith.constant 1.000000e+00 : f32
    %1040 = vector.broadcast %cst_350 : f32 to vector<4x32xf32>
    %1041 = arith.addf %1040, %1039 : vector<4x32xf32>
    %cst_351 = arith.constant 1.000000e+00 : f32
    %1042 = vector.broadcast %cst_351 : f32 to vector<4x32xf32>
    %1043 = arith.divf %1042, %1041 : vector<4x32xf32>
    %cst_352 = arith.constant 1.06140542 : f32
    %1044 = vector.broadcast %cst_352 : f32 to vector<4x32xf32>
    %1045 = arith.mulf %1044, %1043 : vector<4x32xf32>
    %cst_353 = arith.constant 1.45315206 : f32
    %1046 = vector.broadcast %cst_353 : f32 to vector<4x32xf32>
    %1047 = arith.subf %1045, %1046 : vector<4x32xf32>
    %1048 = arith.mulf %1047, %1043 : vector<4x32xf32>
    %cst_354 = arith.constant 1.42141378 : f32
    %1049 = vector.broadcast %cst_354 : f32 to vector<4x32xf32>
    %1050 = arith.addf %1048, %1049 : vector<4x32xf32>
    %1051 = arith.mulf %1050, %1043 : vector<4x32xf32>
    %cst_355 = arith.constant 0.284496725 : f32
    %1052 = vector.broadcast %cst_355 : f32 to vector<4x32xf32>
    %1053 = arith.subf %1051, %1052 : vector<4x32xf32>
    %1054 = arith.mulf %1053, %1043 : vector<4x32xf32>
    %cst_356 = arith.constant 0.254829586 : f32
    %1055 = vector.broadcast %cst_356 : f32 to vector<4x32xf32>
    %1056 = arith.addf %1054, %1055 : vector<4x32xf32>
    %1057 = arith.mulf %1056, %1043 : vector<4x32xf32>
    %cst_357 = arith.constant 0.000000e+00 : f32
    %1058 = vector.broadcast %cst_357 : f32 to vector<4x32xf32>
    %1059 = arith.subf %1058, %1037 : vector<4x32xf32>
    %1060 = arith.mulf %1059, %1037 : vector<4x32xf32>
    %1061 = math.exp %1060 : vector<4x32xf32>
    %1062 = arith.mulf %1057, %1061 : vector<4x32xf32>
    %cst_358 = arith.constant 1.000000e+00 : f32
    %1063 = vector.broadcast %cst_358 : f32 to vector<4x32xf32>
    %1064 = arith.subf %1063, %1062 : vector<4x32xf32>
    %1065 = arith.mulf %1036, %1064 : vector<4x32xf32>
    %cst_359 = arith.constant 1.000000e+00 : f32
    %1066 = vector.broadcast %cst_359 : f32 to vector<4x32xf32>
    %1067 = arith.addf %1066, %1065 : vector<4x32xf32>
    %1068 = arith.mulf %1029, %1067 : vector<4x32xf32>
    %1069 = vector.extract_strided_slice %976 {offsets = [4, 0], sizes = [4, 32], strides = [1, 1]} : vector<8x32xf32> to vector<4x32xf32>
    %cst_360 = arith.constant dense<0.000000e+00> : vector<32xf32>
    %1070 = vector.multi_reduction <add>, %1069, %cst_360 [0] : vector<4x32xf32> to vector<32xf32>
    %1071 = vector.shape_cast %1070 : vector<32xf32> to vector<1x32xf32>
    %1072 = vector.extract_strided_slice %1071 {offsets = [0, 1], sizes = [1, 31], strides = [1, 1]} : vector<1x32xf32> to vector<1x31xf32>
    %1073 = vector.extract_strided_slice %1071 {offsets = [0, 0], sizes = [1, 1], strides = [1, 1]} : vector<1x32xf32> to vector<1x1xf32>
    %1074 = tpu.concatenate %1072, %1073 in 1 : vector<1x31xf32>, vector<1x1xf32> -> vector<1x32xf32>
    %1075 = vector.extract_strided_slice %1071 {offsets = [0, 31], sizes = [1, 1], strides = [1, 1]} : vector<1x32xf32> to vector<1x1xf32>
    %1076 = vector.extract_strided_slice %1071 {offsets = [0, 0], sizes = [1, 31], strides = [1, 1]} : vector<1x32xf32> to vector<1x31xf32>
    %1077 = tpu.concatenate %1075, %1076 in 1 : vector<1x1xf32>, vector<1x31xf32> -> vector<1x32xf32>
    %1078 = tpu.iota {dimensions = array<i32: 1>} : vector<1x32xi32>
    %c1_i32_361 = arith.constant 1 : i32
    %1079 = vector.broadcast %c1_i32_361 : i32 to vector<1x32xi32>
    %1080 = arith.andi %1078, %1079 : vector<1x32xi32>
    %c0_i32_362 = arith.constant 0 : i32
    %1081 = vector.broadcast %c0_i32_362 : i32 to vector<1x32xi32>
    %1082 = arith.cmpi eq, %1080, %1081 : vector<1x32xi32>
    %1083 = arith.select %1082, %1074, %1077 : vector<1x32xi1>, vector<1x32xf32>
    %1084 = arith.addf %1071, %1083 : vector<1x32xf32>
    %cst_363 = arith.constant 1.250000e-01 : f32
    %1085 = vector.broadcast %cst_363 : f32 to vector<1x32xf32>
    %1086 = arith.mulf %1084, %1085 : vector<1x32xf32>
    %1087 = vector.broadcast %1086 : vector<1x32xf32> to vector<4x32xf32>
    %1088 = arith.subf %1069, %1087 : vector<4x32xf32>
    %1089 = arith.mulf %1088, %1088 : vector<4x32xf32>
    %cst_364 = arith.constant dense<0.000000e+00> : vector<32xf32>
    %1090 = vector.multi_reduction <add>, %1089, %cst_364 [0] : vector<4x32xf32> to vector<32xf32>
    %1091 = vector.shape_cast %1090 : vector<32xf32> to vector<1x32xf32>
    %1092 = vector.extract_strided_slice %1091 {offsets = [0, 1], sizes = [1, 31], strides = [1, 1]} : vector<1x32xf32> to vector<1x31xf32>
    %1093 = vector.extract_strided_slice %1091 {offsets = [0, 0], sizes = [1, 1], strides = [1, 1]} : vector<1x32xf32> to vector<1x1xf32>
    %1094 = tpu.concatenate %1092, %1093 in 1 : vector<1x31xf32>, vector<1x1xf32> -> vector<1x32xf32>
    %1095 = vector.extract_strided_slice %1091 {offsets = [0, 31], sizes = [1, 1], strides = [1, 1]} : vector<1x32xf32> to vector<1x1xf32>
    %1096 = vector.extract_strided_slice %1091 {offsets = [0, 0], sizes = [1, 31], strides = [1, 1]} : vector<1x32xf32> to vector<1x31xf32>
    %1097 = tpu.concatenate %1095, %1096 in 1 : vector<1x1xf32>, vector<1x31xf32> -> vector<1x32xf32>
    %1098 = tpu.iota {dimensions = array<i32: 1>} : vector<1x32xi32>
    %c1_i32_365 = arith.constant 1 : i32
    %1099 = vector.broadcast %c1_i32_365 : i32 to vector<1x32xi32>
    %1100 = arith.andi %1098, %1099 : vector<1x32xi32>
    %c0_i32_366 = arith.constant 0 : i32
    %1101 = vector.broadcast %c0_i32_366 : i32 to vector<1x32xi32>
    %1102 = arith.cmpi eq, %1100, %1101 : vector<1x32xi32>
    %1103 = arith.select %1102, %1094, %1097 : vector<1x32xi1>, vector<1x32xf32>
    %1104 = arith.addf %1091, %1103 : vector<1x32xf32>
    %cst_367 = arith.constant 1.250000e-01 : f32
    %1105 = vector.broadcast %cst_367 : f32 to vector<1x32xf32>
    %1106 = arith.mulf %1104, %1105 : vector<1x32xf32>
    %cst_368 = arith.constant 9.99999974E-6 : f32
    %1107 = vector.broadcast %cst_368 : f32 to vector<1x32xf32>
    %1108 = arith.addf %1106, %1107 : vector<1x32xf32>
    %1109 = math.sqrt %1108 : vector<1x32xf32>
    %1110 = vector.broadcast %1109 : vector<1x32xf32> to vector<4x32xf32>
    %1111 = arith.divf %1088, %1110 : vector<4x32xf32>
    %1112 = vector.broadcast %978 : vector<1x32xf32> to vector<4x32xf32>
    %1113 = arith.mulf %1111, %1112 : vector<4x32xf32>
    %1114 = vector.broadcast %980 : vector<1x32xf32> to vector<4x32xf32>
    %1115 = arith.addf %1113, %1114 : vector<4x32xf32>
    %cst_369 = arith.constant 5.000000e-01 : f32
    %1116 = vector.broadcast %cst_369 : f32 to vector<4x32xf32>
    %1117 = arith.mulf %1116, %1115 : vector<4x32xf32>
    %cst_370 = arith.constant 0.707106769 : f32
    %1118 = vector.broadcast %cst_370 : f32 to vector<4x32xf32>
    %1119 = arith.mulf %1115, %1118 : vector<4x32xf32>
    %cst_371 = arith.constant 0.000000e+00 : f32
    %1120 = vector.broadcast %cst_371 : f32 to vector<4x32xf32>
    %1121 = arith.cmpf oge, %1119, %1120 : vector<4x32xf32>
    %cst_372 = arith.constant 1.000000e+00 : f32
    %cst_373 = arith.constant -1.000000e+00 : f32
    %1122 = vector.broadcast %cst_372 : f32 to vector<4x32xf32>
    %1123 = vector.broadcast %cst_373 : f32 to vector<4x32xf32>
    %1124 = arith.select %1121, %1122, %1123 : vector<4x32xi1>, vector<4x32xf32>
    %1125 = math.absf %1119 : vector<4x32xf32>
    %cst_374 = arith.constant 0.327591091 : f32
    %1126 = vector.broadcast %cst_374 : f32 to vector<4x32xf32>
    %1127 = arith.mulf %1126, %1125 : vector<4x32xf32>
    %cst_375 = arith.constant 1.000000e+00 : f32
    %1128 = vector.broadcast %cst_375 : f32 to vector<4x32xf32>
    %1129 = arith.addf %1128, %1127 : vector<4x32xf32>
    %cst_376 = arith.constant 1.000000e+00 : f32
    %1130 = vector.broadcast %cst_376 : f32 to vector<4x32xf32>
    %1131 = arith.divf %1130, %1129 : vector<4x32xf32>
    %cst_377 = arith.constant 1.06140542 : f32
    %1132 = vector.broadcast %cst_377 : f32 to vector<4x32xf32>
    %1133 = arith.mulf %1132, %1131 : vector<4x32xf32>
    %cst_378 = arith.constant 1.45315206 : f32
    %1134 = vector.broadcast %cst_378 : f32 to vector<4x32xf32>
    %1135 = arith.subf %1133, %1134 : vector<4x32xf32>
    %1136 = arith.mulf %1135, %1131 : vector<4x32xf32>
    %cst_379 = arith.constant 1.42141378 : f32
    %1137 = vector.broadcast %cst_379 : f32 to vector<4x32xf32>
    %1138 = arith.addf %1136, %1137 : vector<4x32xf32>
    %1139 = arith.mulf %1138, %1131 : vector<4x32xf32>
    %cst_380 = arith.constant 0.284496725 : f32
    %1140 = vector.broadcast %cst_380 : f32 to vector<4x32xf32>
    %1141 = arith.subf %1139, %1140 : vector<4x32xf32>
    %1142 = arith.mulf %1141, %1131 : vector<4x32xf32>
    %cst_381 = arith.constant 0.254829586 : f32
    %1143 = vector.broadcast %cst_381 : f32 to vector<4x32xf32>
    %1144 = arith.addf %1142, %1143 : vector<4x32xf32>
    %1145 = arith.mulf %1144, %1131 : vector<4x32xf32>
    %cst_382 = arith.constant 0.000000e+00 : f32
    %1146 = vector.broadcast %cst_382 : f32 to vector<4x32xf32>
    %1147 = arith.subf %1146, %1125 : vector<4x32xf32>
    %1148 = arith.mulf %1147, %1125 : vector<4x32xf32>
    %1149 = math.exp %1148 : vector<4x32xf32>
    %1150 = arith.mulf %1145, %1149 : vector<4x32xf32>
    %cst_383 = arith.constant 1.000000e+00 : f32
    %1151 = vector.broadcast %cst_383 : f32 to vector<4x32xf32>
    %1152 = arith.subf %1151, %1150 : vector<4x32xf32>
    %1153 = arith.mulf %1124, %1152 : vector<4x32xf32>
    %cst_384 = arith.constant 1.000000e+00 : f32
    %1154 = vector.broadcast %cst_384 : f32 to vector<4x32xf32>
    %1155 = arith.addf %1154, %1153 : vector<4x32xf32>
    %1156 = arith.mulf %1117, %1155 : vector<4x32xf32>
    %1157 = tpu.concatenate %1068, %1156 in 0 : vector<4x32xf32>, vector<4x32xf32> -> vector<8x32xf32>
    %c0_385 = arith.constant 0 : index
    %c0_386 = arith.constant 0 : index
    %1158 = vector.load %arg11[%c0_385, %c0_386] : memref<56x8xf32, #tpu.memory_space<vmem>>, vector<56x8xf32>
    %cst_387 = arith.constant dense<0.000000e+00> : vector<56x32xf32>
    %1159 = tpu.matmul %1158, %1157, %cst_387 {dimension_numbers = #tpu.dot_dimension_numbers<[1], [0], [0], [1], [0, 0, 1, 1], [], []>} : vector<56x8xf32>, vector<8x32xf32>, vector<56x32xf32> -> vector<56x32xf32>
    %c0_388 = arith.constant 0 : index
    %c0_389 = arith.constant 0 : index
    %1160 = vector.load %arg12[%c0_388, %c0_389] : memref<224x32xf32, #tpu.memory_space<vmem>>, vector<224x32xf32>
    %1161 = vector.extract_strided_slice %1159 {offsets = [0, 0], sizes = [8, 32], strides = [1, 1]} : vector<56x32xf32> to vector<8x32xf32>
    %1162 = vector.extract_strided_slice %1160 {offsets = [0, 0], sizes = [32, 32], strides = [1, 1]} : vector<224x32xf32> to vector<32x32xf32>
    %cst_390 = arith.constant dense<0.000000e+00> : vector<8x32xf32>
    %1163 = tpu.matmul %1161, %1162, %cst_390 {dimension_numbers = #tpu.dot_dimension_numbers<[1], [0], [0], [1], [0, 0, 1, 1], [], []>} : vector<8x32xf32>, vector<32x32xf32>, vector<8x32xf32> -> vector<8x32xf32>
    %1164 = vector.extract_strided_slice %1159 {offsets = [8, 0], sizes = [8, 32], strides = [1, 1]} : vector<56x32xf32> to vector<8x32xf32>
    %1165 = vector.extract_strided_slice %1160 {offsets = [32, 0], sizes = [32, 32], strides = [1, 1]} : vector<224x32xf32> to vector<32x32xf32>
    %cst_391 = arith.constant dense<0.000000e+00> : vector<8x32xf32>
    %1166 = tpu.matmul %1164, %1165, %cst_391 {dimension_numbers = #tpu.dot_dimension_numbers<[1], [0], [0], [1], [0, 0, 1, 1], [], []>} : vector<8x32xf32>, vector<32x32xf32>, vector<8x32xf32> -> vector<8x32xf32>
    %1167 = arith.addf %1163, %1166 : vector<8x32xf32>
    %1168 = vector.extract_strided_slice %1159 {offsets = [16, 0], sizes = [8, 32], strides = [1, 1]} : vector<56x32xf32> to vector<8x32xf32>
    %1169 = vector.extract_strided_slice %1160 {offsets = [64, 0], sizes = [32, 32], strides = [1, 1]} : vector<224x32xf32> to vector<32x32xf32>
    %cst_392 = arith.constant dense<0.000000e+00> : vector<8x32xf32>
    %1170 = tpu.matmul %1168, %1169, %cst_392 {dimension_numbers = #tpu.dot_dimension_numbers<[1], [0], [0], [1], [0, 0, 1, 1], [], []>} : vector<8x32xf32>, vector<32x32xf32>, vector<8x32xf32> -> vector<8x32xf32>
    %1171 = arith.addf %1167, %1170 : vector<8x32xf32>
    %1172 = vector.extract_strided_slice %1159 {offsets = [24, 0], sizes = [8, 32], strides = [1, 1]} : vector<56x32xf32> to vector<8x32xf32>
    %1173 = vector.extract_strided_slice %1160 {offsets = [96, 0], sizes = [32, 32], strides = [1, 1]} : vector<224x32xf32> to vector<32x32xf32>
    %cst_393 = arith.constant dense<0.000000e+00> : vector<8x32xf32>
    %1174 = tpu.matmul %1172, %1173, %cst_393 {dimension_numbers = #tpu.dot_dimension_numbers<[1], [0], [0], [1], [0, 0, 1, 1], [], []>} : vector<8x32xf32>, vector<32x32xf32>, vector<8x32xf32> -> vector<8x32xf32>
    %1175 = arith.addf %1171, %1174 : vector<8x32xf32>
    %1176 = vector.extract_strided_slice %1159 {offsets = [32, 0], sizes = [8, 32], strides = [1, 1]} : vector<56x32xf32> to vector<8x32xf32>
    %1177 = vector.extract_strided_slice %1160 {offsets = [128, 0], sizes = [32, 32], strides = [1, 1]} : vector<224x32xf32> to vector<32x32xf32>
    %cst_394 = arith.constant dense<0.000000e+00> : vector<8x32xf32>
    %1178 = tpu.matmul %1176, %1177, %cst_394 {dimension_numbers = #tpu.dot_dimension_numbers<[1], [0], [0], [1], [0, 0, 1, 1], [], []>} : vector<8x32xf32>, vector<32x32xf32>, vector<8x32xf32> -> vector<8x32xf32>
    %1179 = arith.addf %1175, %1178 : vector<8x32xf32>
    %1180 = vector.extract_strided_slice %1159 {offsets = [40, 0], sizes = [8, 32], strides = [1, 1]} : vector<56x32xf32> to vector<8x32xf32>
    %1181 = vector.extract_strided_slice %1160 {offsets = [160, 0], sizes = [32, 32], strides = [1, 1]} : vector<224x32xf32> to vector<32x32xf32>
    %cst_395 = arith.constant dense<0.000000e+00> : vector<8x32xf32>
    %1182 = tpu.matmul %1180, %1181, %cst_395 {dimension_numbers = #tpu.dot_dimension_numbers<[1], [0], [0], [1], [0, 0, 1, 1], [], []>} : vector<8x32xf32>, vector<32x32xf32>, vector<8x32xf32> -> vector<8x32xf32>
    %1183 = arith.addf %1179, %1182 : vector<8x32xf32>
    %1184 = vector.extract_strided_slice %1159 {offsets = [48, 0], sizes = [8, 32], strides = [1, 1]} : vector<56x32xf32> to vector<8x32xf32>
    %1185 = vector.extract_strided_slice %1160 {offsets = [192, 0], sizes = [32, 32], strides = [1, 1]} : vector<224x32xf32> to vector<32x32xf32>
    %cst_396 = arith.constant dense<0.000000e+00> : vector<8x32xf32>
    %1186 = tpu.matmul %1184, %1185, %cst_396 {dimension_numbers = #tpu.dot_dimension_numbers<[1], [0], [0], [1], [0, 0, 1, 1], [], []>} : vector<8x32xf32>, vector<32x32xf32>, vector<8x32xf32> -> vector<8x32xf32>
    %1187 = arith.addf %1183, %1186 : vector<8x32xf32>
    %c0_397 = arith.constant 0 : index
    %c0_398 = arith.constant 0 : index
    %1188 = vector.load %arg13[%c0_397, %c0_398] : memref<1x32xf32, #tpu.memory_space<vmem>>, vector<1x32xf32>
    %1189 = vector.broadcast %1188 : vector<1x32xf32> to vector<8x32xf32>
    %1190 = arith.addf %1187, %1189 : vector<8x32xf32>
    %cst_399 = arith.constant 5.000000e-01 : f32
    %1191 = vector.broadcast %cst_399 : f32 to vector<8x32xf32>
    %1192 = arith.mulf %1191, %1190 : vector<8x32xf32>
    %cst_400 = arith.constant 0.707106769 : f32
    %1193 = vector.broadcast %cst_400 : f32 to vector<8x32xf32>
    %1194 = arith.mulf %1190, %1193 : vector<8x32xf32>
    %cst_401 = arith.constant 0.000000e+00 : f32
    %1195 = vector.broadcast %cst_401 : f32 to vector<8x32xf32>
    %1196 = arith.cmpf oge, %1194, %1195 : vector<8x32xf32>
    %cst_402 = arith.constant 1.000000e+00 : f32
    %cst_403 = arith.constant -1.000000e+00 : f32
    %1197 = vector.broadcast %cst_402 : f32 to vector<8x32xf32>
    %1198 = vector.broadcast %cst_403 : f32 to vector<8x32xf32>
    %1199 = arith.select %1196, %1197, %1198 : vector<8x32xi1>, vector<8x32xf32>
    %1200 = math.absf %1194 : vector<8x32xf32>
    %cst_404 = arith.constant 0.327591091 : f32
    %1201 = vector.broadcast %cst_404 : f32 to vector<8x32xf32>
    %1202 = arith.mulf %1201, %1200 : vector<8x32xf32>
    %cst_405 = arith.constant 1.000000e+00 : f32
    %1203 = vector.broadcast %cst_405 : f32 to vector<8x32xf32>
    %1204 = arith.addf %1203, %1202 : vector<8x32xf32>
    %cst_406 = arith.constant 1.000000e+00 : f32
    %1205 = vector.broadcast %cst_406 : f32 to vector<8x32xf32>
    %1206 = arith.divf %1205, %1204 : vector<8x32xf32>
    %cst_407 = arith.constant 1.06140542 : f32
    %1207 = vector.broadcast %cst_407 : f32 to vector<8x32xf32>
    %1208 = arith.mulf %1207, %1206 : vector<8x32xf32>
    %cst_408 = arith.constant 1.45315206 : f32
    %1209 = vector.broadcast %cst_408 : f32 to vector<8x32xf32>
    %1210 = arith.subf %1208, %1209 : vector<8x32xf32>
    %1211 = arith.mulf %1210, %1206 : vector<8x32xf32>
    %cst_409 = arith.constant 1.42141378 : f32
    %1212 = vector.broadcast %cst_409 : f32 to vector<8x32xf32>
    %1213 = arith.addf %1211, %1212 : vector<8x32xf32>
    %1214 = arith.mulf %1213, %1206 : vector<8x32xf32>
    %cst_410 = arith.constant 0.284496725 : f32
    %1215 = vector.broadcast %cst_410 : f32 to vector<8x32xf32>
    %1216 = arith.subf %1214, %1215 : vector<8x32xf32>
    %1217 = arith.mulf %1216, %1206 : vector<8x32xf32>
    %cst_411 = arith.constant 0.254829586 : f32
    %1218 = vector.broadcast %cst_411 : f32 to vector<8x32xf32>
    %1219 = arith.addf %1217, %1218 : vector<8x32xf32>
    %1220 = arith.mulf %1219, %1206 : vector<8x32xf32>
    %cst_412 = arith.constant 0.000000e+00 : f32
    %1221 = vector.broadcast %cst_412 : f32 to vector<8x32xf32>
    %1222 = arith.subf %1221, %1200 : vector<8x32xf32>
    %1223 = arith.mulf %1222, %1200 : vector<8x32xf32>
    %1224 = math.exp %1223 : vector<8x32xf32>
    %1225 = arith.mulf %1220, %1224 : vector<8x32xf32>
    %cst_413 = arith.constant 1.000000e+00 : f32
    %1226 = vector.broadcast %cst_413 : f32 to vector<8x32xf32>
    %1227 = arith.subf %1226, %1225 : vector<8x32xf32>
    %1228 = arith.mulf %1199, %1227 : vector<8x32xf32>
    %cst_414 = arith.constant 1.000000e+00 : f32
    %1229 = vector.broadcast %cst_414 : f32 to vector<8x32xf32>
    %1230 = arith.addf %1229, %1228 : vector<8x32xf32>
    %1231 = arith.mulf %1192, %1230 : vector<8x32xf32>
    %1232 = arith.addf %1157, %1231 : vector<8x32xf32>
    %cst_415 = arith.constant dense<0.000000e+00> : vector<8xf32>
    %1233 = vector.multi_reduction <add>, %1232, %cst_415 [1] : vector<8x32xf32> to vector<8xf32>
    %1234 = vector.shape_cast %1233 : vector<8xf32> to vector<8x1xf32>
    %cst_416 = arith.constant 3.200000e+01 : f32
    %1235 = vector.broadcast %cst_416 : f32 to vector<8x1xf32>
    %1236 = arith.divf %1234, %1235 : vector<8x1xf32>
    %1237 = vector.broadcast %1236 : vector<8x1xf32> to vector<8x32xf32>
    %1238 = arith.subf %1232, %1237 : vector<8x32xf32>
    %1239 = arith.mulf %1238, %1238 : vector<8x32xf32>
    %cst_417 = arith.constant dense<0.000000e+00> : vector<8xf32>
    %1240 = vector.multi_reduction <add>, %1239, %cst_417 [1] : vector<8x32xf32> to vector<8xf32>
    %1241 = vector.shape_cast %1240 : vector<8xf32> to vector<8x1xf32>
    %cst_418 = arith.constant 3.200000e+01 : f32
    %1242 = vector.broadcast %cst_418 : f32 to vector<8x1xf32>
    %1243 = arith.divf %1241, %1242 : vector<8x1xf32>
    %1244 = vector.broadcast %1236 : vector<8x1xf32> to vector<8x32xf32>
    %1245 = arith.subf %1232, %1244 : vector<8x32xf32>
    %cst_419 = arith.constant 9.99999974E-6 : f32
    %1246 = vector.broadcast %cst_419 : f32 to vector<8x1xf32>
    %1247 = arith.addf %1243, %1246 : vector<8x1xf32>
    %1248 = math.sqrt %1247 : vector<8x1xf32>
    %1249 = vector.broadcast %1248 : vector<8x1xf32> to vector<8x32xf32>
    %1250 = arith.divf %1245, %1249 : vector<8x32xf32>
    %c0_420 = arith.constant 0 : index
    %c0_421 = arith.constant 0 : index
    %1251 = vector.load %arg14[%c0_420, %c0_421] : memref<1x32xf32, #tpu.memory_space<vmem>>, vector<1x32xf32>
    %1252 = vector.broadcast %1251 : vector<1x32xf32> to vector<8x32xf32>
    %1253 = arith.mulf %1250, %1252 : vector<8x32xf32>
    %c0_422 = arith.constant 0 : index
    %c0_423 = arith.constant 0 : index
    %1254 = vector.load %arg15[%c0_422, %c0_423] : memref<1x32xf32, #tpu.memory_space<vmem>>, vector<1x32xf32>
    %1255 = vector.broadcast %1254 : vector<1x32xf32> to vector<8x32xf32>
    %1256 = arith.addf %1253, %1255 : vector<8x32xf32>
    %c0_424 = arith.constant 0 : index
    %c0_425 = arith.constant 0 : index
    %1257 = vector.load %arg16[%c0_424, %c0_425] : memref<32x96xf32, #tpu.memory_space<vmem>>, vector<32x96xf32>
    %cst_426 = arith.constant dense<0.000000e+00> : vector<8x96xf32>
    %1258 = tpu.matmul %1256, %1257, %cst_426 {dimension_numbers = #tpu.dot_dimension_numbers<[1], [0], [0], [1], [0, 0, 1, 1], [], []>} : vector<8x32xf32>, vector<32x96xf32>, vector<8x96xf32> -> vector<8x96xf32>
    %c0_427 = arith.constant 0 : index
    %c0_428 = arith.constant 0 : index
    %1259 = vector.load %arg17[%c0_427, %c0_428] : memref<1x96xf32, #tpu.memory_space<vmem>>, vector<1x96xf32>
    %1260 = vector.broadcast %1259 : vector<1x96xf32> to vector<8x96xf32>
    %1261 = arith.addf %1258, %1260 : vector<8x96xf32>
    %c0_429 = arith.constant 0 : index
    %c0_430 = arith.constant 0 : index
    %1262 = vector.load %arg18[%c0_429, %c0_430] : memref<8x8xf32, #tpu.memory_space<vmem>>, vector<8x8xf32>
    %c0_431 = arith.constant 0 : index
    %c0_432 = arith.constant 0 : index
    %1263 = vector.load %arg19[%c0_431, %c0_432] : memref<384x128xf32, #tpu.memory_space<vmem>>, vector<384x128xf32>
    %1264 = vector.extract_strided_slice %1262 {offsets = [0, 0], sizes = [2, 8], strides = [1, 1]} : vector<8x8xf32> to vector<2x8xf32>
    %cst_433 = arith.constant dense<0.000000e+00> : vector<2x96xf32>
    %1265 = tpu.matmul %1264, %1261, %cst_433 {dimension_numbers = #tpu.dot_dimension_numbers<[1], [0], [0], [1], [0, 0, 1, 1], [], []>} : vector<2x8xf32>, vector<8x96xf32>, vector<2x96xf32> -> vector<2x96xf32>
    %1266 = vector.extract_strided_slice %1263 {offsets = [0, 0], sizes = [96, 128], strides = [1, 1]} : vector<384x128xf32> to vector<96x128xf32>
    %cst_434 = arith.constant dense<0.000000e+00> : vector<2x128xf32>
    %1267 = tpu.matmul %1265, %1266, %cst_434 {dimension_numbers = #tpu.dot_dimension_numbers<[1], [0], [0], [1], [0, 0, 1, 1], [], []>} : vector<2x96xf32>, vector<96x128xf32>, vector<2x128xf32> -> vector<2x128xf32>
    %1268 = vector.extract_strided_slice %1262 {offsets = [2, 0], sizes = [2, 8], strides = [1, 1]} : vector<8x8xf32> to vector<2x8xf32>
    %cst_435 = arith.constant dense<0.000000e+00> : vector<2x96xf32>
    %1269 = tpu.matmul %1268, %1261, %cst_435 {dimension_numbers = #tpu.dot_dimension_numbers<[1], [0], [0], [1], [0, 0, 1, 1], [], []>} : vector<2x8xf32>, vector<8x96xf32>, vector<2x96xf32> -> vector<2x96xf32>
    %1270 = vector.extract_strided_slice %1263 {offsets = [96, 0], sizes = [96, 128], strides = [1, 1]} : vector<384x128xf32> to vector<96x128xf32>
    %cst_436 = arith.constant dense<0.000000e+00> : vector<2x128xf32>
    %1271 = tpu.matmul %1269, %1270, %cst_436 {dimension_numbers = #tpu.dot_dimension_numbers<[1], [0], [0], [1], [0, 0, 1, 1], [], []>} : vector<2x96xf32>, vector<96x128xf32>, vector<2x128xf32> -> vector<2x128xf32>
    %1272 = arith.addf %1267, %1271 : vector<2x128xf32>
    %1273 = vector.extract_strided_slice %1262 {offsets = [4, 0], sizes = [2, 8], strides = [1, 1]} : vector<8x8xf32> to vector<2x8xf32>
    %cst_437 = arith.constant dense<0.000000e+00> : vector<2x96xf32>
    %1274 = tpu.matmul %1273, %1261, %cst_437 {dimension_numbers = #tpu.dot_dimension_numbers<[1], [0], [0], [1], [0, 0, 1, 1], [], []>} : vector<2x8xf32>, vector<8x96xf32>, vector<2x96xf32> -> vector<2x96xf32>
    %1275 = vector.extract_strided_slice %1263 {offsets = [192, 0], sizes = [96, 128], strides = [1, 1]} : vector<384x128xf32> to vector<96x128xf32>
    %cst_438 = arith.constant dense<0.000000e+00> : vector<2x128xf32>
    %1276 = tpu.matmul %1274, %1275, %cst_438 {dimension_numbers = #tpu.dot_dimension_numbers<[1], [0], [0], [1], [0, 0, 1, 1], [], []>} : vector<2x96xf32>, vector<96x128xf32>, vector<2x128xf32> -> vector<2x128xf32>
    %1277 = arith.addf %1272, %1276 : vector<2x128xf32>
    %1278 = vector.extract_strided_slice %1262 {offsets = [6, 0], sizes = [2, 8], strides = [1, 1]} : vector<8x8xf32> to vector<2x8xf32>
    %cst_439 = arith.constant dense<0.000000e+00> : vector<2x96xf32>
    %1279 = tpu.matmul %1278, %1261, %cst_439 {dimension_numbers = #tpu.dot_dimension_numbers<[1], [0], [0], [1], [0, 0, 1, 1], [], []>} : vector<2x8xf32>, vector<8x96xf32>, vector<2x96xf32> -> vector<2x96xf32>
    %1280 = vector.extract_strided_slice %1263 {offsets = [288, 0], sizes = [96, 128], strides = [1, 1]} : vector<384x128xf32> to vector<96x128xf32>
    %cst_440 = arith.constant dense<0.000000e+00> : vector<2x128xf32>
    %1281 = tpu.matmul %1279, %1280, %cst_440 {dimension_numbers = #tpu.dot_dimension_numbers<[1], [0], [0], [1], [0, 0, 1, 1], [], []>} : vector<2x96xf32>, vector<96x128xf32>, vector<2x128xf32> -> vector<2x128xf32>
    %1282 = arith.addf %1277, %1281 : vector<2x128xf32>
    %c0_441 = arith.constant 0 : index
    %c0_442 = arith.constant 0 : index
    %1283 = vector.load %arg20[%c0_441, %c0_442] : memref<1x128xf32, #tpu.memory_space<vmem>>, vector<1x128xf32>
    %1284 = vector.broadcast %1283 : vector<1x128xf32> to vector<2x128xf32>
    %1285 = arith.addf %1282, %1284 : vector<2x128xf32>
    %cst_443 = arith.constant 0.000000e+00 : f32
    %1286 = vector.broadcast %cst_443 : f32 to vector<2x128xf32>
    %1287 = arith.maximumf %1285, %1286 : vector<2x128xf32>
    %c0_444 = arith.constant 0 : index
    %c0_445 = arith.constant 0 : index
    %1288 = vector.load %arg21[%c0_444, %c0_445] : memref<1x128xf32, #tpu.memory_space<vmem>>, vector<1x128xf32>
    %1289 = vector.broadcast %1288 : vector<1x128xf32> to vector<2x128xf32>
    %1290 = arith.mulf %1287, %1289 : vector<2x128xf32>
    %c0_446 = arith.constant 0 : index
    %c0_447 = arith.constant 0 : index
    %1291 = vector.load %arg22[%c0_446, %c0_447] : memref<1x128xf32, #tpu.memory_space<vmem>>, vector<1x128xf32>
    %1292 = vector.broadcast %1291 : vector<1x128xf32> to vector<2x128xf32>
    %1293 = arith.addf %1290, %1292 : vector<2x128xf32>
    %c0_448 = arith.constant 0 : index
    %c0_449 = arith.constant 0 : index
    %1294 = vector.load %arg23[%c0_448, %c0_449] : memref<128x2xf32, #tpu.memory_space<vmem>>, vector<128x2xf32>
    %cst_450 = arith.constant dense<0.000000e+00> : vector<2x2xf32>
    %1295 = tpu.matmul %1293, %1294, %cst_450 {dimension_numbers = #tpu.dot_dimension_numbers<[1], [0], [0], [1], [0, 0, 1, 1], [], []>} : vector<2x128xf32>, vector<128x2xf32>, vector<2x2xf32> -> vector<2x2xf32>
    %c0_451 = arith.constant 0 : index
    %c0_452 = arith.constant 0 : index
    %1296 = vector.load %arg24[%c0_451, %c0_452] : memref<1x2xf32, #tpu.memory_space<vmem>>, vector<1x2xf32>
    %1297 = vector.broadcast %1296 : vector<1x2xf32> to vector<2x2xf32>
    %1298 = arith.addf %1295, %1297 : vector<2x2xf32>
    %c0_453 = arith.constant 0 : index
    %c0_454 = arith.constant 0 : index
    %1299 = vector.load %arg25[%c0_453, %c0_454] : memref<2x2xf32, #tpu.memory_space<vmem>>, vector<2x2xf32>
    tpu.vector_store %arg25[%c0_453, %c0_454], %1298 {strides = array<i32>} : memref<2x2xf32, #tpu.memory_space<vmem>>, vector<2x2xf32>,
    return
  }
}

</mosaic_0001>

<bundles_post_ra>
// kernel: linear_head_bendr_forward.1
= control target key start
LH: loop header
LB: loop body
LE: loop exit
PB: predicated region body
PF: predicated region fallthrough
CT: control target
= control target key end

     0   :  { %s13157_s0 = inlined_call_operand.vmem [shape: f32[256,12], index: 0, kind: input, shape index: {}]   ;;  %s13158_s1 = inlined_call_operand.vmem [shape: f32[12,32], index: 1, kind: input, shape index: {}]   ;;  %s13159_s2 = inlined_call_operand.vmem [shape: f32[5,96,32], index: 2, kind: input, shape index: {}]   ;;  %s13160_s3 = inlined_call_operand.vmem [shape: f32[6,1,32], index: 3, kind: input, shape index: {}]   ;;  %s13161_s4 = inlined_call_operand.vmem [shape: f32[6,1,32], index: 4, kind: input, shape index: {}]   ;;  %s13162_s5 = inlined_call_operand.vmem [shape: f32[6,1,32], index: 5, kind: input, shape index: {}]   ;;  %s13163_s6 = inlined_call_operand.vmem [shape: f32[384,256], index: 6, kind: input, shape index: {}]   ;;  %s13164_s7 = inlined_call_operand.vmem [shape: f32[192,128], index: 7, kind: input, shape index: {}]   ;;  %s13165_s8 = inlined_call_operand.vmem [shape: f32[96,64], index: 8, kind: input, shape index: {}]   ;;  %s13166_s9 = inlined_call_operand.vmem [shape: f32[48,32], index: 9, kind: input, shape index: {}]   ;;  %s13167_s10 = inlined_call_operand.vmem [shape: f32[24,16], index: 10, kind: input, shape index: {}]   ;;  %s13168_s11 = inlined_call_operand.vmem [shape: f32[56,8], index: 11, kind: input, shape index: {}]   ;;  %s13169_s12 = inlined_call_operand.vmem [shape: f32[224,32], index: 12, kind: input, shape index: {}]   ;;  %s13170_s13 = inlined_call_operand.vmem [shape: f32[1,32], index: 13, kind: input, shape index: {}]   ;;  %s13171_s14 = inlined_call_operand.vmem [shape: f32[1,32], index: 14, kind: input, shape index: {}]   ;;  %s13172_s15 = inlined_call_operand.vmem [shape: f32[1,32], index: 15, kind: input, shape index: {}]   ;;  %s13173_s16 = inlined_call_operand.vmem [shape: f32[32,96], index: 16, kind: input, shape index: {}]   ;;  %s13174_s17 = inlined_call_operand.vmem [shape: f32[1,96], index: 17, kind: input, shape index: {}]   ;;  %s13175_s18 = inlined_call_operand.vmem [shape: f32[8,8], index: 18, kind: input, shape index: {}]   ;;  %s13176_s19 = inlined_call_operand.vmem [shape: f32[384,128], index: 19, kind: input, shape index: {}]   ;;  %s13177_s20 = inlined_call_operand.vmem [shape: f32[1,128], index: 20, kind: input, shape index: {}]   ;;  %s13178_s21 = inlined_call_operand.vmem [shape: f32[1,128], index: 21, kind: input, shape index: {}]   ;;  %s13179_s22 = inlined_call_operand.vmem [shape: f32[1,128], index: 22, kind: input, shape index: {}]   ;;  %s13180_s23 = inlined_call_operand.vmem [shape: f32[128,2], index: 23, kind: input, shape index: {}]   ;;  %s13181_s24 = inlined_call_operand.vmem [shape: f32[1,2], index: 24, kind: input, shape index: {}]   ;;  %s13182_s25 = inlined_call_operand.hbm [shape: f32[2,2], index: 25, kind: output, shape index: {}]  }
   0x1   :  { %13229 = sst [smem:[#allocation22_spill]] %s13157_s0 }
   0x2   :  { %13230 = sst [smem:[#allocation23_spill]] %s13158_s1 }
   0x3   :  { %13231 = sst [smem:[#allocation24_spill]] %s13159_s2 }
   0x4   :  { %13232 = sst [smem:[#allocation25_spill]] %s13160_s3 }
   0x5   :  { %13233 = sst [smem:[#allocation26_spill]] %s13161_s4 }
   0x6   :  { %13234 = sst [smem:[#allocation27_spill]] %s13162_s5 }
   0x7   :  { %13235 = sst [smem:[#allocation28_spill]] %s13163_s6 }
   0x8   :  { %13236 = sst [smem:[#allocation29_spill]] %s13164_s7 }
   0x9   :  { %13237 = sst [smem:[#allocation30_spill]] %s13165_s8 }
   0xa   :  { %13238 = sst [smem:[#allocation31_spill]] %s13166_s9 }
   0xb   :  { %13239 = sst [smem:[#allocation32_spill]] %s13177_s20 }
   0xc   :  { %13240 = sst [smem:[#allocation33_spill]] %s13178_s21 }
   0xd   :  { %13241 = sst [smem:[#allocation34_spill]] %s13179_s22 }
   0xe   :  { %13242 = sst [smem:[#allocation35_spill]] %s13180_s23 }
   0xf   :  { %13243 = sst [smem:[#allocation36_spill]] %s13181_s24 }
  0x10   :  { %13244 = sst [smem:[#allocation37_spill]] %s13182_s25 }
  0x11   :  { %s13245_s6 = sld [smem:[#allocation23_spill]]  ;;  %vm219_vm0 = vcmask 1043456   ;;  %s13246_s1 = sld [smem:[#allocation22_spill]]  ;;  %vm9199_vm1 = vmmov 1   ;;  %vm122_vm3 = vcmask 97280  }
  0x12   :  { %vm8479_vm2 = vmpackc.low %vm219_vm0, %vm9199_vm1 }
  0x17   :  { %v113_v0 = vld [vmem:[%s13245_s6] sm:$0xff]  ;;  %v114_v1 = vld [vmem:[%s13245_s6 + $0x8] sm:$0xf]  ;;  %v83_v5 = vld [vmem:[%s13246_s1 + $0x10] sm:$0xff] }
  0x18   :  { %v81_v2 = vld [vmem:[%s13246_s1] sm:$0xff]  ;;  %v8478_v3 = vpack.c.bf16 %v114_v1, %v113_v0  ;;  %v82_v4 = vld [vmem:[%s13246_s1 + $0x8] sm:$0xff]  ;;  %v84_v6 = vld [vmem:[%s13246_s1 + $0x18] sm:$0xff] }
  0x19   :  { %7856 = vmatprep.mubr.msk.f32.mxu0 %vm122_vm3, %v81_v2  ;;  %v85_v7 = vld [vmem:[%s13246_s1 + $0x20] sm:$0xff] }
  0x1a   :  { %8480 = vmatprep.subr.msk.bf16.mxu0 %vm8479_vm2, %v8478_v3 }
  0x1b   :  { %8483 = vmatpush3.bf16.msk.msra.mxu0 %vm8479_vm2, %v8478_v3 }
  0x1e   :  { %7857 = vmatmul.mubr.msk.f32.vlgmr.msra.gmra.mrb[0].mxu0 %vm122_vm3, %v82_v4 }
  0x1f   :  { %7859 = vmatprep.mubr.msk.f32.mxu0 %vm122_vm3, %v83_v5 }
  0x22   :  { %7860 = vmatmul.mubr.msk.f32.gmra.mrb[2].mxu0 %vm122_vm3, %v84_v6 }
  0x23   :  { %30 = vsyncpa [#allocation3], 0  ;;  %7862 = vmatprep.mubr.msk.f32.mxu0 %vm122_vm3, %v85_v7  ;;  %v86_v8 = vld [vmem:[%s13246_s1 + $0x28] sm:$0xff]  ;;  %v87_v9 = vld [vmem:[%s13246_s1 + $0x30] sm:$0xff]  ;;  %s13247_s2 = sld [smem:[#allocation25_spill]]  ;;  %vm450_vm4 = vcmask 261120  }
  0x24   :  { %v88_v10 = vld [vmem:[%s13246_s1 + $0x38] sm:$0xff]  ;;  %v89_v11 = vld [vmem:[%s13246_s1 + $0x40] sm:$0xff]  ;;  %v90_v12 = vld [vmem:[%s13246_s1 + $0x48] sm:$0xff]  ;;  %s13221_s6 = smov 127   ;;  %s13215_s30 = smov 1   ;;  %vm503_vm5 = vcmask 7168  }
  0x25   :  { %v91_v13 = vld [vmem:[%s13246_s1 + $0x50] sm:$0xff]  ;;  %v92_v14 = vld [vmem:[%s13246_s1 + $0x58] sm:$0xff]  ;;  %v93_v15 = vld [vmem:[%s13246_s1 + $0x60] sm:$0xff]  ;;  %s13219_s7 = smov 31   ;;  %vm495_vm6 = vcmask 252928   ;;  %s13267_s8 = sld [smem:[#allocation26_spill]] }
  0x26   :  { %7863 = vmatmul.mubr.msk.f32.gmra.mrb[4].mxu0 %vm122_vm3, %v86_v8  ;;  %v94_v16 = vld [vmem:[%s13246_s1 + $0x68] sm:$0xff]  ;;  %v95_v17 = vld [vmem:[%s13246_s1 + $0x70] sm:$0xff]  ;;  %v96_v18 = vld [vmem:[%s13246_s1 + $0x78] sm:$0xff]  ;;  %s13268_s28 = sld [smem:[#allocation27_spill]]  ;;  %s13278_s27 = sld [smem:[#allocation28_spill]] }
  0x27   :  { %7865 = vmatprep.mubr.msk.f32.mxu0 %vm122_vm3, %v87_v9  ;;  %v97_v19 = vld [vmem:[%s13246_s1 + $0x80] sm:$0xff]  ;;  %v98_v20 = vld [vmem:[%s13246_s1 + $0x88] sm:$0xff]  ;;  %v99_v21 = vld [vmem:[%s13246_s1 + $0x90] sm:$0xff]  ;;  %s13223_s26 = smov 64   ;;  %s13290_s5 = smov 31  }
  0x28   :  { %v100_v22 = vld [vmem:[%s13246_s1 + $0x98] sm:$0xff]  ;;  %v101_v23 = vld [vmem:[%s13246_s1 + $0xa0] sm:$0xff]  ;;  %v102_v24 = vld [vmem:[%s13246_s1 + $0xa8] sm:$0xff]  ;;  %s13291_s0 = smov 97   ;;  %s13294_s3 = sld [smem:[#allocation29_spill]] }
  0x29   :  { %v103_v25 = vld [vmem:[%s13246_s1 + $0xb0] sm:$0xff]  ;;  %v104_v26 = vld [vmem:[%s13246_s1 + $0xb8] sm:$0xff]  ;;  %v105_v27 = vld [vmem:[%s13246_s1 + $0xc0] sm:$0xff]  ;;  %s13296_s24 = smov 64   ;;  %s13297_s9 = smov 127  }
  0x2a   :  { %7866 = vmatmul.mubr.msk.f32.gmra.mrb[6].mxu0 %vm122_vm3, %v88_v10  ;;  %v106_v28 = vld [vmem:[%s13246_s1 + $0xc8] sm:$0xff]  ;;  %v107_v29 = vld [vmem:[%s13246_s1 + $0xd0] sm:$0xff]  ;;  %v108_v30 = vld [vmem:[%s13246_s1 + $0xd8] sm:$0xff] }
  0x2b   :  { %7868 = vmatprep.mubr.msk.f32.mxu0 %vm122_vm3, %v89_v11  ;;  %v109_v31 = vld [vmem:[%s13246_s1 + $0xe0] sm:$0xff]  ;;  %v110_v32 = vld [vmem:[%s13246_s1 + $0xe8] sm:$0xff]  ;;  %v111_v33 = vld [vmem:[%s13246_s1 + $0xf0] sm:$0xff] }
  0x2c   :  { %v112_v34 = vld [vmem:[%s13246_s1 + $0xf8] sm:$0xff]  ;;  %v9479_v35 = vld [vmem:[%s13247_s2] ss:$0 sm:$0xff]  ;;  %s13217_s1 = smov 97  }
  0x2e   :  { %7869 = vmatmul.mubr.msk.f32.gmra.mrb[8].mxu0 %vm122_vm3, %v90_v12 }
  0x2f   :  { %7871 = vmatprep.mubr.msk.f32.mxu0 %vm122_vm3, %v91_v13 }
  0x32   :  { %7872 = vmatmul.mubr.msk.f32.gmra.mrb[10].mxu0 %vm122_vm3, %v92_v14 }
  0x33   :  { %7874 = vmatprep.mubr.msk.f32.mxu0 %vm122_vm3, %v93_v15 }
  0x36   :  { %7875 = vmatmul.mubr.msk.f32.gmra.mrb[12].mxu0 %vm122_vm3, %v94_v16 }
  0x37   :  { %7877 = vmatprep.mubr.msk.f32.mxu0 %vm122_vm3, %v95_v17 }
  0x3a   :  { %7878 = vmatmul.mubr.msk.f32.gmra.mrb[14].mxu0 %vm122_vm3, %v96_v18 }
  0x3b   :  { %7880 = vmatprep.mubr.msk.f32.mxu0 %vm122_vm3, %v97_v19 }
  0x3e   :  { %7881 = vmatmul.mubr.msk.f32.gmra.mrb[16].mxu0 %vm122_vm3, %v98_v20 }
  0x3f   :  { %7883 = vmatprep.mubr.msk.f32.mxu0 %vm122_vm3, %v99_v21 }
  0x42   :  { %7884 = vmatmul.mubr.msk.f32.gmra.mrb[18].mxu0 %vm122_vm3, %v100_v22 }
  0x43   :  { %7886 = vmatprep.mubr.msk.f32.mxu0 %vm122_vm3, %v101_v23 }
  0x46   :  { %7887 = vmatmul.mubr.msk.f32.gmra.mrb[20].mxu0 %vm122_vm3, %v102_v24 }
  0x47   :  { %7889 = vmatprep.mubr.msk.f32.mxu0 %vm122_vm3, %v103_v25 }
  0x4a   :  { %7890 = vmatmul.mubr.msk.f32.gmra.mrb[22].mxu0 %vm122_vm3, %v104_v26 }
  0x4b   :  { %7892 = vmatprep.mubr.msk.f32.mxu0 %vm122_vm3, %v105_v27 }
  0x4e   :  { %7893 = vmatmul.mubr.msk.f32.gmra.mrb[24].mxu0 %vm122_vm3, %v106_v28 }
  0x4f   :  { %7895 = vmatprep.mubr.msk.f32.mxu0 %vm122_vm3, %v107_v29 }
  0x52   :  { %7896 = vmatmul.mubr.msk.f32.gmra.mrb[26].mxu0 %vm122_vm3, %v108_v30 }
  0x53   :  { %7898 = vmatprep.mubr.msk.f32.mxu0 %vm122_vm3, %v109_v31 }
  0x56   :  { %7899 = vmatmul.mubr.msk.f32.gmra.mrb[28].mxu0 %vm122_vm3, %v110_v32 }
  0x57   :  { %7901 = vmatprep.mubr.msk.f32.mxu0 %vm122_vm3, %v111_v33 }
  0x5a   :  { %7902 = vmatmul.mubr.msk.f32.gmra.mrb[30].mxu0 %vm122_vm3, %v112_v34 }
  0xf1   :  { %v7858_v36 = vpop.f32.mrb[0].mxu0 }
  0xf2   :  { %v9482_v37 = vadd.f32 %v7858_v36, %v9479_v35  ;;  %v289_v38 = vpop.f32.mrb[1].mxu0 }
  0xf3   :  { %v9485_v39 = vadd.f32 %v9479_v35, %v289_v38 }
  0xf4   :  { %v452_v40 = vsel %vm450_vm4, %v9482_v37, 0.0 }
  0xf5   :  { %v451_v41 = vsel %vm450_vm4, %v9485_v39, 0.0  ;;  %v7861_v42 = vpop.f32.mrb[2].mxu0 }
  0xf6   :  { %v299_v43 = vpop.f32.mrb[3].mxu0  ;;  %v9492_v44 = vadd.f32 %v7861_v42, %v9479_v35  ;;  %v453_v46 = vadd.f32 %v452_v40, %v451_v41 }
  0xf7   :  { %v9495_v45 = vadd.f32 %v9479_v35, %v299_v43 }
  0xf8   :  { %v456_v51 = vsel %vm450_vm4, %v9492_v44, 0.0 }
  0xf9   :  { %v454_v47 = vsel %vm450_vm4, %v9495_v45, 0.0  ;;  %v7864_v48 = vpop.f32.mrb[4].mxu0 }
  0xfa   :  { %v455_v49 = vadd.f32 %v454_v47, %v453_v46  ;;  %v309_v50 = vpop.f32.mrb[5].mxu0  ;;  %v9502_v52 = vadd.f32 %v7864_v48, %v9479_v35 }
  0xfb   :  { %v9505_v53 = vadd.f32 %v9479_v35, %v309_v50 }
  0xfc   :  { %v457_v54 = vadd.f32 %v456_v51, %v455_v49  ;;  %v460_v59 = vsel %vm450_vm4, %v9502_v52, 0.0 }
  0xfd   :  { %v458_v55 = vsel %vm450_vm4, %v9505_v53, 0.0  ;;  %v7867_v56 = vpop.f32.mrb[6].mxu0 }
  0xfe   :  { %v459_v57 = vadd.f32 %v458_v55, %v457_v54  ;;  %v319_v58 = vpop.f32.mrb[7].mxu0  ;;  %v9512_v60 = vadd.f32 %v7867_v56, %v9479_v35 }
  0xff   :  { %v9515_v61 = vadd.f32 %v9479_v35, %v319_v58 }
 0x100   :  { %v461_v62 = vadd.f32 %v460_v59, %v459_v57  ;;  %v464_v3 = vsel %vm450_vm4, %v9512_v60, 0.0 }
 0x101   :  { %v462_v63 = vsel %vm450_vm4, %v9515_v61, 0.0  ;;  %v7870_v0 = vpop.f32.mrb[8].mxu0 }
 0x102   :  { %v463_v1 = vadd.f32 %v462_v63, %v461_v62  ;;  %v329_v2 = vpop.f32.mrb[9].mxu0  ;;  %v9522_v4 = vadd.f32 %v7870_v0, %v9479_v35 }
 0x103   :  { %v9525_v5 = vadd.f32 %v9479_v35, %v329_v2 }
 0x104   :  { %v465_v6 = vadd.f32 %v464_v3, %v463_v1  ;;  %v468_v11 = vsel %vm450_vm4, %v9522_v4, 0.0 }
 0x105   :  { %v466_v7 = vsel %vm450_vm4, %v9525_v5, 0.0  ;;  %v7873_v8 = vpop.f32.mrb[10].mxu0 }
 0x106   :  { %v467_v9 = vadd.f32 %v466_v7, %v465_v6  ;;  %v339_v10 = vpop.f32.mrb[11].mxu0  ;;  %v9532_v12 = vadd.f32 %v7873_v8, %v9479_v35 }
 0x107   :  { %v9535_v13 = vadd.f32 %v9479_v35, %v339_v10 }
 0x108   :  { %v469_v14 = vadd.f32 %v468_v11, %v467_v9  ;;  %v472_v19 = vsel %vm450_vm4, %v9532_v12, 0.0 }
 0x109   :  { %v470_v15 = vsel %vm450_vm4, %v9535_v13, 0.0  ;;  %v7876_v16 = vpop.f32.mrb[12].mxu0 }
 0x10a   :  { %v471_v17 = vadd.f32 %v470_v15, %v469_v14  ;;  %v349_v18 = vpop.f32.mrb[13].mxu0  ;;  %v9542_v20 = vadd.f32 %v7876_v16, %v9479_v35 }
 0x10b   :  { %v9545_v21 = vadd.f32 %v9479_v35, %v349_v18 }
 0x10c   :  { %v473_v22 = vadd.f32 %v472_v19, %v471_v17  ;;  %v476_v27 = vsel %vm450_vm4, %v9542_v20, 0.0 }
 0x10d   :  { %v474_v23 = vsel %vm450_vm4, %v9545_v21, 0.0  ;;  %v7879_v24 = vpop.f32.mrb[14].mxu0 }
 0x10e   :  { %v475_v25 = vadd.f32 %v474_v23, %v473_v22  ;;  %v359_v26 = vpop.f32.mrb[15].mxu0  ;;  %v9552_v28 = vadd.f32 %v7879_v24, %v9479_v35 }
 0x10f   :  { %v9555_v29 = vadd.f32 %v9479_v35, %v359_v26 }
 0x110   :  { %v477_v30 = vadd.f32 %v476_v27, %v475_v25  ;;  %v480_v38 = vsel %vm450_vm4, %v9552_v28, 0.0 }
 0x111   :  { %v478_v31 = vsel %vm450_vm4, %v9555_v29, 0.0  ;;  %v7882_v32 = vpop.f32.mrb[16].mxu0 }
 0x112   :  { %v479_v33 = vadd.f32 %v478_v31, %v477_v30  ;;  %v9560_v34 = vadd.f32 %v7882_v32, %v9479_v35  ;;  %v369_v36 = vpop.f32.mrb[17].mxu0 }
 0x113   :  { %v9565_v40 = vadd.f32 %v9479_v35, %v369_v36 }
 0x114   :  { %v481_v41 = vadd.f32 %v480_v38, %v479_v33  ;;  %v1109_v42 = vsel %vm450_vm4, %v9560_v34, 0.0 }
 0x115   :  { %v1108_v43 = vsel %vm450_vm4, %v9565_v40, 0.0  ;;  %v7885_v46 = vpop.f32.mrb[18].mxu0 }
 0x116   :  { %v482_v47 = vrot.slane %v481_v41, 4  ;;  %v379_v48 = vpop.f32.mrb[19].mxu0  ;;  %v9572_v49 = vadd.f32 %v7885_v46, %v9479_v35  ;;  %v1110_v54 = vadd.f32 %v1109_v42, %v1108_v43 }
 0x117   :  { %v9575_v50 = vadd.f32 %v9479_v35, %v379_v48 }
 0x118   :  { %v483_v51 = vadd.f32 %v482_v47, %v481_v41  ;;  %v1113_v62 = vsel %vm450_vm4, %v9572_v49, 0.0 }
 0x119   :  { %v1111_v55 = vsel %vm450_vm4, %v9575_v50, 0.0  ;;  %v7888_v56 = vpop.f32.mrb[20].mxu0 }
 0x11a   :  { %v484_v57 = vrot.slane %v483_v51, 2  ;;  %v1112_v58 = vadd.f32 %v1111_v55, %v1110_v54  ;;  %v389_v59 = vpop.f32.mrb[21].mxu0  ;;  %v9582_v63 = vadd.f32 %v7888_v56, %v9479_v35 }
 0x11b   :  { %v9585_v0 = vadd.f32 %v9479_v35, %v389_v59 }
 0x11c   :  { %v485_v1 = vadd.f32 %v484_v57, %v483_v51  ;;  %v1114_v2 = vadd.f32 %v1113_v62, %v1112_v58  ;;  %v1117_v10 = vsel %vm450_vm4, %v9582_v63, 0.0 }
 0x11d   :  { %v1115_v3 = vsel %vm450_vm4, %v9585_v0, 0.0  ;;  %v7891_v6 = vpop.f32.mrb[22].mxu0 }
 0x11e   :  { %v486_v7 = vrot.slane %v485_v1, 1  ;;  %v1116_v8 = vadd.f32 %v1115_v3, %v1114_v2  ;;  %v399_v9 = vpop.f32.mrb[23].mxu0  ;;  %v9592_v11 = vadd.f32 %v7891_v6, %v9479_v35 }
 0x11f   :  { %v9595_v14 = vadd.f32 %v9479_v35, %v399_v9 }
 0x120   :  { %v9597_v15 = vadd.f32 %v486_v7, %v485_v1  ;;  %v1118_v16 = vadd.f32 %v1117_v10, %v1116_v8  ;;  %v1121_v23 = vsel %vm450_vm4, %v9592_v11, 0.0 }
 0x121   :  { %v1119_v17 = vsel %vm450_vm4, %v9595_v14, 0.0  ;;  %v7894_v18 = vpop.f32.mrb[24].mxu0 }
 0x122   :  { %v1120_v19 = vadd.f32 %v1119_v17, %v1118_v16  ;;  %v409_v22 = vpop.f32.mrb[25].mxu0  ;;  %497 = vrot.lane.b32.xlu1 %v9597_v15, %s13217_s1  ;;  %489 = vrot.lane.b32.xlu0 %v9597_v15, %s13221_s6  ;;  %v9608_v24 = vadd.f32 %v7894_v18, %v9479_v35 }
 0x123   :  { %v9611_v25 = vadd.f32 %v9479_v35, %v409_v22 }
 0x124   :  { %v1122_v26 = vadd.f32 %v1121_v23, %v1120_v19  ;;  %v1125_v33 = vsel %vm450_vm4, %v9608_v24, 0.0 }
 0x125   :  { %v1123_v27 = vsel %vm450_vm4, %v9611_v25, 0.0  ;;  %v7897_v30 = vpop.f32.mrb[26].mxu0 }
 0x126   :  { %v1124_v31 = vadd.f32 %v1123_v27, %v1122_v26  ;;  %v419_v32 = vpop.f32.mrb[27].mxu0  ;;  %500 = vrot.lane.b32.xlu1 %v9597_v15, %s13215_s30  ;;  %492 = vrot.lane.b32.xlu0 %v9597_v15, %s13219_s7  ;;  %v9622_v36 = vadd.f32 %v7897_v30, %v9479_v35 }
 0x127   :  { %v9625_v38 = vadd.f32 %v9479_v35, %v419_v32 }
 0x128   :  { %v1126_v41 = vadd.f32 %v1125_v33, %v1124_v31  ;;  %v1129_v48 = vsel %vm450_vm4, %v9622_v36, 0.0  ;;  %v13248_v31 = vmov 0 }
 0x129   :  { %v1127_v42 = vsel %vm450_vm4, %v9625_v38, 0.0  ;;  %v7900_v43 = vpop.f32.mrb[28].mxu0 }
 0x12a   :  { %v1128_v46 = vadd.f32 %v1127_v42, %v1126_v41  ;;  %v429_v47 = vpop.f32.mrb[29].mxu0  ;;  %v9632_v51 = vadd.f32 %v7900_v43, %v9479_v35 }
 0x12b   :  { %v9635_v54 = vadd.f32 %v9479_v35, %v429_v47 }
 0x12c   :  { %v1130_v55 = vadd.f32 %v1129_v48, %v1128_v46  ;;  %v1133_v62 = vsel %vm450_vm4, %v9632_v51, 0.0 }
 0x12d   :  { %v1131_v56 = vsel %vm450_vm4, %v9635_v54, 0.0  ;;  %v7903_v57 = vpop.f32.mrb[30].mxu0 }
 0x12e   :  { %v1132_v58 = vadd.f32 %v1131_v56, %v1130_v55  ;;  %v439_v59 = vpop.f32.mrb[31].mxu0  ;;  %v9642_v1 = vadd.f32 %v7903_v57, %v9479_v35 }
 0x12f   :  { %v9645_v2 = vadd.f32 %v9479_v35, %v439_v59  ;;  %v505_v35 = vlaneseq }
 0x130   :  { %v1134_v3 = vadd.f32 %v1133_v62, %v1132_v58  ;;  %v1137_v8 = vsel %vm450_vm4, %v9642_v1, 0.0 }
 0x131   :  { %v1135_v6 = vsel %vm450_vm4, %v9645_v2, 0.0  ;;  %v506_v23 = vand.u32 127, %v505_v35  ;;  %v513_v32 = vshrl.u32 %v505_v35, 7 }
 0x132   :  { %v1136_v7 = vadd.f32 %v1135_v6, %v1134_v3 }
 0x133   :  { %v507_v26 = vand.u32 1, %v506_v23  ;;  %v9669_v47 = vsub.s32 0, %v513_v32 }
 0x134   :  { %v1138_v9 = vadd.f32 %v1137_v8, %v1136_v7 }
 0x135   :  { %vm9661_vm7 = vcmp.eq.s32.totalorder %v507_v26, 0 }
 0x136   :  { %v1139_v10 = vrot.slane %v1138_v9, 4  ;;  %v13249_v31 = vsel %vm9661_vm7, 4294967295, %v13248_v31 }
 0x137   :  { %13250 = vst [vmem:[#allocation5_spill] sm:$0xff] %v13249_v31  ;;  %v13269_v31 = vmov -1.0  }
 0x138   :  { %v1140_v16 = vadd.f32 %v1139_v10, %v1138_v9 }
 0x13a   :  { %v1141_v17 = vrot.slane %v1140_v16, 2 }
 0x13c   :  { %v1142_v18 = vadd.f32 %v1141_v17, %v1140_v16 }
 0x13e   :  { %v1143_v19 = vrot.slane %v1142_v18, 1 }
 0x140   :  { %v9651_v22 = vadd.f32 %v1143_v19, %v1142_v18 }
 0x142   :  { %1149 = vrot.lane.b32.xlu1 %v9651_v22, %s13219_s7  ;;  %1146 = vrot.lane.b32.xlu0 %v9651_v22, %s13221_s6 }
 0x146   :  { %1156 = vrot.lane.b32.xlu1 %v9651_v22, %s13215_s30  ;;  %1153 = vrot.lane.b32.xlu0 %v9651_v22, %s13217_s1 }
 0x194   :  { %v498_v27 = vpop.permute.xlu1 %497  ;;  %v490_v30 = vpop.permute.xlu0 %489 }
 0x198   :  { %v501_v33 = vpop.permute.xlu1 %500  ;;  %v493_v41 = vpop.permute.xlu0 %492 }
 0x199   :  { %v504_v42 = vsel %vm503_vm5, %v498_v27, %v501_v33  ;;  %v496_v43 = vsel %vm495_vm6, %v490_v30, %v493_v41 }
 0x19a   :  { %v509_v46 = vsel %vm9661_vm7, %v496_v43, %v504_v42 }
 0x19b   :  { %v510_v48 = vadd.f32 %v509_v46, %v9597_v15 }
 0x19d   :  { %v511_v55 = vmul.f32 0.00390625, %v510_v48 }
 0x19f   :  { %v515_v56 = vrot.slane %v511_v55, %v9669_v47 }
 0x1a1   :  { %v9674_v57 = vsub.f32 %v9485_v39, %v515_v56  ;;  %v9677_v58 = vsub.f32 %v9482_v37, %v515_v56  ;;  %v9680_v59 = vsub.f32 %v9495_v45, %v515_v56  ;;  %v9683_v62 = vsub.f32 %v9492_v44, %v515_v56 }
 0x1a2   :  { %v9690_v6 = vsub.f32 %v9505_v53, %v515_v56  ;;  %v9695_v37 = vsub.f32 %v9502_v52, %v515_v56  ;;  %v9702_v9 = vsub.f32 %v9515_v61, %v515_v56  ;;  %v9708_v52 = vsub.f32 %v9512_v60, %v515_v56 }
 0x1a3   :  { %v532_v3 = vmul.f32 %v9674_v57, %v9674_v57  ;;  %v533_v15 = vmul.f32 %v9677_v58, %v9677_v58  ;;  %v534_v39 = vmul.f32 %v9680_v59, %v9680_v59  ;;  %v535_v45 = vmul.f32 %v9683_v62, %v9683_v62 }
 0x1a4   :  { %v536_v53 = vmul.f32 %v9690_v6, %v9690_v6  ;;  %v537_v17 = vmul.f32 %v9695_v37, %v9695_v37  ;;  %v9714_v35 = vsub.f32 %v9525_v5, %v515_v56  ;;  %v538_v61 = vmul.f32 %v9702_v9, %v9702_v9 }
 0x1a5   :  { %v548_v44 = vsel %vm450_vm4, %v532_v3, 0.0  ;;  %v549_v7 = vsel %vm450_vm4, %v533_v15, 0.0  ;;  %v551_v10 = vsel %vm450_vm4, %v534_v39, 0.0  ;;  %v553_v18 = vsel %vm450_vm4, %v535_v45, 0.0 }
 0x1a6   :  { %v550_v8 = vadd.f32 %v549_v7, %v548_v44  ;;  %v555_v23 = vsel %vm450_vm4, %v536_v53, 0.0  ;;  %v9720_v27 = vsub.f32 %v9522_v4, %v515_v56  ;;  %v539_v60 = vmul.f32 %v9708_v52, %v9708_v52 }
 0x1a7   :  { %v557_v30 = vsel %vm450_vm4, %v537_v17, 0.0  ;;  %v9726_v33 = vsub.f32 %v9535_v13, %v515_v56  ;;  %v540_v5 = vmul.f32 %v9714_v35, %v9714_v35  ;;  %v559_v41 = vsel %vm450_vm4, %v538_v61, 0.0 }
 0x1a8   :  { %v552_v16 = vadd.f32 %v551_v10, %v550_v8  ;;  %v9732_v4 = vsub.f32 %v9532_v12, %v515_v56  ;;  %v541_v48 = vmul.f32 %v9720_v27, %v9720_v27  ;;  %v561_v55 = vsel %vm450_vm4, %v539_v60, 0.0 }
 0x1a9   :  { %v9738_v13 = vsub.f32 %v9545_v21, %v515_v56  ;;  %v542_v15 = vmul.f32 %v9726_v33, %v9726_v33  ;;  %v563_v39 = vsel %vm450_vm4, %v540_v5, 0.0  ;;  %v9744_v7 = vsub.f32 %v9542_v20, %v515_v56 }
 0x1aa   :  { %v554_v19 = vadd.f32 %v553_v18, %v552_v16  ;;  %v543_v10 = vmul.f32 %v9732_v4, %v9732_v4  ;;  %v565_v21 = vsel %vm450_vm4, %v541_v48, 0.0  ;;  %v9761_v60 = vsub.f32 %v9552_v28, %v515_v56 }
 0x1ab   :  { %v544_v20 = vmul.f32 %v9738_v13, %v9738_v13  ;;  %v567_v61 = vsel %vm450_vm4, %v542_v15, 0.0 }
 0x1ac   :  { %v556_v26 = vadd.f32 %v555_v23, %v554_v19  ;;  %v9755_v19 = vsub.f32 %v9555_v29, %v515_v56 }
 0x1ae   :  { %v558_v32 = vadd.f32 %v557_v30, %v556_v26  ;;  %v545_v30 = vmul.f32 %v9744_v7, %v9744_v7  ;;  %v546_v29 = vmul.f32 %v9755_v19, %v9755_v19 }
 0x1b0   :  { %v560_v46 = vadd.f32 %v559_v41, %v558_v32  ;;  %v569_v32 = vsel %vm450_vm4, %v543_v10, 0.0  ;;  %v571_v41 = vsel %vm450_vm4, %v544_v20, 0.0  ;;  %v573_v28 = vsel %vm450_vm4, %v545_v30, 0.0 }
 0x1b2   :  { %v562_v3 = vadd.f32 %v561_v55, %v560_v46  ;;  %v575_v55 = vsel %vm450_vm4, %v546_v29, 0.0 }
 0x1b4   :  { %v1150_v42 = vpop.permute.xlu1 %1149  ;;  %v1147_v43 = vpop.permute.xlu0 %1146  ;;  %v564_v12 = vadd.f32 %v563_v39, %v562_v3 }
 0x1b5   :  { %v1152_v8 = vsel %vm495_vm6, %v1147_v43, %v1150_v42  ;;  %v547_v43 = vmul.f32 %v9761_v60, %v9761_v60 }
 0x1b6   :  { %v566_v17 = vadd.f32 %v565_v21, %v564_v12 }
 0x1b7   :  { %v577_v39 = vsel %vm450_vm4, %v547_v43, 0.0 }
 0x1b8   :  { %v1157_v45 = vpop.permute.xlu1 %1156  ;;  %v1154_v44 = vpop.permute.xlu0 %1153  ;;  %v568_v23 = vadd.f32 %v567_v61, %v566_v17 }
 0x1b9   :  { %v1159_v53 = vsel %vm503_vm5, %v1154_v44, %v1157_v45 }
 0x1ba   :  { %v1160_v16 = vsel %vm9661_vm7, %v1152_v8, %v1159_v53  ;;  %v570_v5 = vadd.f32 %v569_v32, %v568_v23 }
 0x1bb   :  { %v1161_v18 = vadd.f32 %v1160_v16, %v9651_v22 }
 0x1bc   :  { %v572_v42 = vadd.f32 %v571_v41, %v570_v5 }
 0x1bd   :  { %v1162_v26 = vmul.f32 0.00390625, %v1161_v18 }
 0x1be   :  { %v574_v56 = vadd.f32 %v573_v28, %v572_v42 }
 0x1bf   :  { %v9767_v22 = vrot.slane %v1162_v26, %v9669_v47 }
 0x1c0   :  { %v576_v3 = vadd.f32 %v575_v55, %v574_v56 }
 0x1c1   :  { %v9777_v46 = vsub.f32 %v9565_v40, %v9767_v22  ;;  %v9781_v48 = vsub.f32 %v9560_v34, %v9767_v22  ;;  %v9786_v15 = vsub.f32 %v9575_v50, %v9767_v22  ;;  %v9791_v44 = vsub.f32 %v9572_v49, %v9767_v22 }
 0x1c2   :  { %v578_v45 = vadd.f32 %v577_v39, %v576_v3  ;;  %v9799_v8 = vsub.f32 %v9585_v0, %v9767_v22  ;;  %v9805_v53 = vsub.f32 %v9582_v63, %v9767_v22  ;;  %v9813_v0 = vsub.f32 %v9595_v14, %v9767_v22 }
 0x1c3   :  { %13251 = vst [vmem:[#allocation6_spill] sm:$0xff] %v9777_v46  ;;  %13252 = vst [vmem:[#allocation7_spill] sm:$0xff] %v9781_v48  ;;  %v1183_v40 = vmul.f32 %v9777_v46, %v9777_v46  ;;  %v1184_v34 = vmul.f32 %v9781_v48, %v9781_v48  ;;  %v1185_v50 = vmul.f32 %v9786_v15, %v9786_v15 }
 0x1c4   :  { %13253 = vst [vmem:[#allocation8_spill] sm:$0xff] %v9786_v15  ;;  %13254 = vst [vmem:[#allocation9_spill] sm:$0xff] %v9791_v44  ;;  %v579_v12 = vrot.slane %v578_v45, 4  ;;  %v1186_v10 = vmul.f32 %v9791_v44, %v9791_v44  ;;  %v1187_v20 = vmul.f32 %v9799_v8, %v9799_v8  ;;  %v9820_v26 = vsub.f32 %v9592_v11, %v9767_v22 }
 0x1c5   :  { %13255 = vst [vmem:[#allocation10_spill] sm:$0xff] %v9799_v8  ;;  %13256 = vst [vmem:[#allocation11_spill] sm:$0xff] %v9805_v53  ;;  %v1199_v21 = vsel %vm450_vm4, %v1183_v40, 0.0  ;;  %v1200_v16 = vsel %vm450_vm4, %v1184_v34, 0.0  ;;  %v1202_v63 = vsel %vm450_vm4, %v1185_v50, 0.0  ;;  %v1188_v30 = vmul.f32 %v9805_v53, %v9805_v53 }
 0x1c6   :  { %v580_v49 = vadd.f32 %v579_v12, %v578_v45  ;;  %v1201_v17 = vadd.f32 %v1200_v16, %v1199_v21  ;;  %13257 = vst [vmem:[#allocation12_spill] sm:$0xff] %v9813_v0  ;;  %13258 = vst [vmem:[#allocation13_spill] sm:$0xff] %v9820_v26  ;;  %v1204_v32 = vsel %vm450_vm4, %v1186_v10, 0.0  ;;  %v9827_v14 = vsub.f32 %v9611_v25, %v9767_v22 }
 0x1c7   :  { %v1189_v41 = vmul.f32 %v9813_v0, %v9813_v0  ;;  %v1206_v42 = vsel %vm450_vm4, %v1187_v20, 0.0  ;;  %v9836_v11 = vsub.f32 %v9608_v24, %v9767_v22  ;;  %v1190_v56 = vmul.f32 %v9820_v26, %v9820_v26 }
 0x1c8   :  { %v581_v18 = vrot.slane %v580_v49, 2  ;;  %v1203_v61 = vadd.f32 %v1202_v63, %v1201_v17  ;;  %13259 = vst [vmem:[#allocation14_spill] sm:$0xff] %v9827_v14  ;;  %v1208_v55 = vsel %vm450_vm4, %v1188_v30, 0.0  ;;  %v9847_v25 = vsub.f32 %v9625_v38, %v9767_v22 }
 0x1c9   :  { %13260 = vst [vmem:[#allocation15_spill] sm:$0xff] %v9836_v11  ;;  %v1191_v24 = vmul.f32 %v9827_v14, %v9827_v14  ;;  %v1210_v39 = vsel %vm450_vm4, %v1189_v41, 0.0  ;;  %v9854_v40 = vsub.f32 %v9622_v36, %v9767_v22  ;;  %v1192_v34 = vmul.f32 %v9836_v11, %v9836_v11 }
 0x1ca   :  { %v582_v23 = vadd.f32 %v581_v18, %v580_v49  ;;  %v1205_v5 = vadd.f32 %v1204_v32, %v1203_v61  ;;  %13261 = vst [vmem:[#allocation16_spill] sm:$0xff] %v9847_v25  ;;  %v1212_v12 = vsel %vm450_vm4, %v1190_v56, 0.0  ;;  %v9865_v38 = vsub.f32 %v9635_v54, %v9767_v22 }
 0x1cb   :  { %13262 = vst [vmem:[#allocation17_spill] sm:$0xff] %v9854_v40  ;;  %v1193_v36 = vmul.f32 %v9847_v25, %v9847_v25  ;;  %v1214_v49 = vsel %vm450_vm4, %v1191_v24, 0.0  ;;  %v9872_v21 = vsub.f32 %v9632_v51, %v9767_v22  ;;  %v1194_v16 = vmul.f32 %v9854_v40, %v9854_v40 }
 0x1cc   :  { %v583_v29 = vrot.slane %v582_v23, 1  ;;  %v1207_v43 = vadd.f32 %v1206_v42, %v1205_v5  ;;  %13263 = vst [vmem:[#allocation18_spill] sm:$0xff] %v9865_v38  ;;  %v1216_v17 = vsel %vm450_vm4, %v1192_v34, 0.0  ;;  %v9879_v54 = vsub.f32 %v9645_v2, %v9767_v22 }
 0x1cd   :  { %13264 = vst [vmem:[#allocation19_spill] sm:$0xff] %v9872_v21  ;;  %v1195_v20 = vmul.f32 %v9865_v38, %v9865_v38  ;;  %v1218_v63 = vsel %vm450_vm4, %v1193_v36, 0.0  ;;  %v9886_v51 = vsub.f32 %v9642_v1, %v9767_v22  ;;  %v1220_v30 = vsel %vm450_vm4, %v1194_v16, 0.0 }
 0x1ce   :  { %v9832_v28 = vadd.f32 %v583_v29, %v582_v23  ;;  %v1209_v3 = vadd.f32 %v1208_v55, %v1207_v43  ;;  %13265 = vst [vmem:[#allocation20_spill] sm:$0xff] %v9879_v54  ;;  %v1196_v23 = vmul.f32 %v9872_v21, %v9872_v21  ;;  %v1197_v2 = vmul.f32 %v9879_v54, %v9879_v54 }
 0x1cf   :  { %13266 = vst [vmem:[#allocation21_spill] sm:$0xff] %v9886_v51  ;;  %v1222_v5 = vsel %vm450_vm4, %v1195_v20, 0.0  ;;  %v1198_v41 = vmul.f32 %v9886_v51, %v9886_v51 }
 0x1d0   :  { %589 = vrot.lane.b32.xlu1 %v9832_v28, %s13219_s7  ;;  %586 = vrot.lane.b32.xlu0 %v9832_v28, %s13221_s6  ;;  %v1211_v45 = vadd.f32 %v1210_v39, %v1209_v3  ;;  %v1224_v42 = vsel %vm450_vm4, %v1196_v23, 0.0  ;;  %v1226_v1 = vsel %vm450_vm4, %v1197_v2, 0.0 }
 0x1d1   :  { %v1228_v56 = vsel %vm450_vm4, %v1198_v41, 0.0 }
 0x1d2   :  { %v1213_v50 = vadd.f32 %v1212_v12, %v1211_v45 }
 0x1d4   :  { %596 = vrot.lane.b32.xlu1 %v9832_v28, %s13215_s30  ;;  %593 = vrot.lane.b32.xlu0 %v9832_v28, %s13217_s1  ;;  %v1215_v10 = vadd.f32 %v1214_v49, %v1213_v50  ;;  %v13193_v50 = vmov 0.0|0.0  }
 0x1d5   :  { %8484 = vmatprep.subr.bf16.mxu1 %v13193_v50 }
 0x1d6   :  { %v1217_v18 = vadd.f32 %v1216_v17, %v1215_v10 }
 0x1d8   :  { %v1219_v61 = vadd.f32 %v1218_v63, %v1217_v18 }
 0x1da   :  { %v1221_v32 = vadd.f32 %v1220_v30, %v1219_v61 }
 0x1dc   :  { %v1223_v29 = vadd.f32 %v1222_v5, %v1221_v32 }
 0x1de   :  { %v1225_v43 = vadd.f32 %v1224_v42, %v1223_v29 }
 0x1e0   :  { %v1227_v22 = vadd.f32 %v1226_v1, %v1225_v43 }
 0x1e2   :  { %v1229_v55 = vadd.f32 %v1228_v56, %v1227_v22 }
 0x1e4   :  { %v1230_v3 = vrot.slane %v1229_v55, 4 }
 0x1e6   :  { %v1231_v24 = vadd.f32 %v1230_v3, %v1229_v55 }
 0x1e8   :  { %v1232_v39 = vrot.slane %v1231_v24, 2 }
 0x1ea   :  { %v1233_v45 = vadd.f32 %v1232_v39, %v1231_v24  ;;  %v9919_v39 = vld [vmem:[%s13267_s8] ss:$0 sm:$0xff] }
 0x1ec   :  { %v1234_v34 = vrot.slane %v1233_v45, 1 }
 0x1ee   :  { %v1235_v12 = vadd.f32 %v1234_v34, %v1233_v45 }
 0x1f0   :  { %1240 = vrot.lane.b32.xlu1 %v1235_v12, %s13219_s7  ;;  %1237 = vrot.lane.b32.xlu0 %v1235_v12, %s13221_s6  ;;  %s13292_s7 = smov 1  }
 0x1f4   :  { %1247 = vrot.lane.b32.xlu1 %v1235_v12, %s13215_s30  ;;  %1244 = vrot.lane.b32.xlu0 %v1235_v12, %s13217_s1  ;;  %s13289_s1 = sld [smem:[#allocation24_spill]] }
 0x242   :  { %v590_v36 = vpop.permute.xlu1 %589  ;;  %v587_v49 = vpop.permute.xlu0 %586 }
 0x243   :  { %v592_v17 = vsel %vm495_vm6, %v587_v49, %v590_v36 }
 0x246   :  { %v597_v10 = vpop.permute.xlu1 %596  ;;  %v594_v16 = vpop.permute.xlu0 %593 }
 0x247   :  { %v599_v18 = vsel %vm503_vm5, %v594_v16, %v597_v10 }
 0x248   :  { %v600_v20 = vsel %vm9661_vm7, %v592_v17, %v599_v18 }
 0x249   :  { %v601_v63 = vadd.f32 %v600_v20, %v9832_v28 }
 0x24b   :  { %v602_v61 = vmul.f32 0.00390625, %v601_v63 }
 0x24d   :  { %v603_v23 = vadd.f32 1e-05, %v602_v61 }
 0x24f   :  { %8861 = vrsqrt.f32 %v603_v23  ;;  %vm606_vm8 = vcmp.eq.f32.partialorder %v603_v23, inf  ;;  %v609_v2 = vand.u32 2147483648, %v603_v23  ;;  %vm608_vm9 = vcmp.eq.f32.partialorder %v603_v23, 0.0 }
 0x259   :  { %v8862_v30 = vpop.eup %8861 }
 0x25a   :  { %v605_v32 = vmul.f32 %v8862_v30, %v603_v23 }
 0x25c   :  { %v607_v5 = vsel %vm606_vm8, %v603_v23, %v605_v32 }
 0x25d   :  { %v610_v29 = vsel %vm608_vm9, %v609_v2, %v607_v5 }
 0x25e   :  { %v614_v41 = vrot.slane %v610_v29, %v9669_v47 }
 0x260   :  { %8863 = vrcp.f32 %v614_v41 }
 0x262   :  { %v1241_v42 = vpop.permute.xlu1 %1240  ;;  %v1238_v43 = vpop.permute.xlu0 %1237 }
 0x263   :  { %v1243_v56 = vsel %vm495_vm6, %v1238_v43, %v1241_v42 }
 0x266   :  { %v1248_v1 = vpop.permute.xlu1 %1247  ;;  %v1245_v22 = vpop.permute.xlu0 %1244 }
 0x267   :  { %v1250_v28 = vsel %vm503_vm5, %v1245_v22, %v1248_v1 }
 0x268   :  { %v1251_v55 = vsel %vm9661_vm7, %v1243_v56, %v1250_v28 }
 0x269   :  { %v1252_v24 = vadd.f32 %v1251_v55, %v1235_v12  ;;  %v9932_v12 = vld [vmem:[%s13268_s28] ss:$0 sm:$0xff] }
 0x26a   :  { %v9914_v3 = vpop.eup %8863 }
 0x26b   :  { %v616_v45 = vmul.f32 %v9914_v3, %v9674_v57  ;;  %v617_v34 = vmul.f32 %v9914_v3, %v9677_v58  ;;  %v618_v36 = vmul.f32 %v9914_v3, %v9680_v59  ;;  %v619_v49 = vmul.f32 %v9914_v3, %v9683_v62 }
 0x26c   :  { %v1253_v10 = vmul.f32 0.00390625, %v1252_v24  ;;  %v620_v30 = vmul.f32 %v9914_v3, %v9690_v6  ;;  %v621_v41 = vmul.f32 %v9914_v3, %v9695_v37  ;;  %v625_v38 = vmul.f32 %v9914_v3, %v9720_v27 }
 0x26d   :  { %v638_v16 = vmul.f32 %v9919_v39, %v616_v45  ;;  %v639_v17 = vmul.f32 %v9919_v39, %v617_v34  ;;  %v640_v57 = vmul.f32 %v9919_v39, %v618_v36  ;;  %v641_v58 = vmul.f32 %v9919_v39, %v619_v49 }
 0x26e   :  { %v9938_v18 = vadd.f32 1e-05, %v1253_v10  ;;  %v642_v22 = vmul.f32 %v9919_v39, %v620_v30  ;;  %v643_v45 = vmul.f32 %v9919_v39, %v621_v41  ;;  %v622_v49 = vmul.f32 %v9914_v3, %v9702_v9 }
 0x26f   :  { %v660_v59 = vadd.f32 %v9932_v12, %v638_v16  ;;  %v661_v62 = vadd.f32 %v9932_v12, %v639_v17  ;;  %v662_v20 = vadd.f32 %v9932_v12, %v640_v57  ;;  %v663_v63 = vadd.f32 %v9932_v12, %v641_v58 }
 0x270   :  { %8865 = vrsqrt.f32 %v9938_v18  ;;  %v9960_v10 = vadd.f32 %v9932_v12, %v642_v22  ;;  %v623_v16 = vmul.f32 %v9914_v3, %v9708_v52  ;;  %vm1257_vm10 = vcmp.eq.f32.partialorder %v9938_v18, inf }
 0x271   :  { %v692_v61 = vmul.f32 0.70710677, %v660_v59  ;;  %v693_v23 = vmul.f32 0.70710677, %v661_v62  ;;  %v9947_v32 = vmul.f32 0.70710677, %v662_v20  ;;  %v9969_v9 = vadd.f32 %v9932_v12, %v643_v45 }
 0x272   :  { %v9949_v2 = vmul.f32 0.70710677, %v663_v63  ;;  %v1260_v30 = vand.u32 2147483648, %v9938_v18  ;;  %v9966_v41 = vmul.f32 0.5, %v660_v59  ;;  %v9976_v52 = vmul.f32 0.70710677, %v9960_v10 }
 0x273   :  { %v740_v5 = vand.u32 2147483647, %v692_v61  ;;  %v741_v29 = vand.u32 2147483647, %v693_v23  ;;  %v742_v28 = vand.u32 2147483647, %v9947_v32 }
 0x274   :  { %v743_v6 = vand.u32 2147483647, %v9949_v2  ;;  %vm708_vm11 = vcmp.ge.f32.partialorder %v692_v61, 0.0  ;;  %vm1259_vm12 = vcmp.eq.f32.partialorder %v9938_v18, 0.0  ;;  %vm709_vm13 = vcmp.ge.f32.partialorder %v693_v23, 0.0 }
 0x275   :  { %v756_v42 = vmul.f32 0.3275911, %v740_v5  ;;  %v757_v43 = vmul.f32 0.3275911, %v741_v29  ;;  %v964_v1 = vsub.f32 0.0, %v740_v5  ;;  %v965_v56 = vsub.f32 0.0, %v741_v29 }
 0x276   :  { %v758_v34 = vmul.f32 0.3275911, %v742_v28  ;;  %v759_v36 = vmul.f32 0.3275911, %v743_v6  ;;  %v967_v59 = vsub.f32 0.0, %v743_v6  ;;  %vm710_vm14 = vcmp.ge.f32.partialorder %v9947_v32, 0.0 }
 0x277   :  { %v772_v55 = vadd.f32 1.0, %v756_v42  ;;  %v773_v24 = vadd.f32 1.0, %v757_v43  ;;  %v980_v37 = vmul.f32 %v964_v1, %v740_v5  ;;  %v981_v17 = vmul.f32 %v965_v56, %v741_v29 }
 0x278   :  { %v774_v57 = vadd.f32 1.0, %v758_v34  ;;  %v775_v58 = vadd.f32 1.0, %v759_v36  ;;  %v966_v42 = vsub.f32 0.0, %v742_v28  ;;  %v9971_v43 = vmul.f32 0.5, %v661_v62 }
 0x279   :  { %8867 = vrcp.f32 %v772_v55  ;;  %v9973_v1 = vmul.f32 0.5, %v662_v20  ;;  %v996_v29 = vmul.f32 1.442695, %v980_v37  ;;  %v998_v22 = vmul.f32 1.442695, %v981_v17 }
 0x27a   :  { %8869 = vrcp.f32 %v773_v24  ;;  %v8866_v5 = vpop.eup %8865  ;;  %v9979_v56 = vmul.f32 0.5, %v663_v63  ;;  %v9982_v55 = vmul.f32 0.70710677, %v9969_v9  ;;  %v13195_v20 = vmov -1.0  }
 0x27b   :  { %8871 = vrcp.f32 %v774_v57  ;;  %v1256_v62 = vmul.f32 %v8866_v5, %v9938_v18  ;;  %v9986_v61 = vsel %vm708_vm11, 1.0, %v13195_v20  ;;  %v982_v24 = vmul.f32 %v966_v42, %v742_v28 }
 0x27c   :  { %8873 = vrcp.f32 %v775_v58  ;;  %v744_v45 = vand.u32 2147483647, %v9976_v52  ;;  %v9990_v23 = vsel %vm709_vm13, 1.0, %v13195_v20  ;;  %v745_v63 = vand.u32 2147483647, %v9982_v55 }
 0x27d   :  { %v644_v34 = vmul.f32 %v9919_v39, %v622_v49  ;;  %8875 = vpow2.f32 %v996_v29  ;;  %vm711_vm15 = vcmp.ge.f32.partialorder %v9949_v2, 0.0  ;;  %v983_v36 = vmul.f32 %v967_v59, %v743_v6 }
 0x27e   :  { %v760_v37 = vmul.f32 0.3275911, %v744_v45  ;;  %8877 = vpow2.f32 %v998_v22  ;;  %v761_v17 = vmul.f32 0.3275911, %v745_v63  ;;  %v968_v57 = vsub.f32 0.0, %v744_v45 }
 0x27f   :  { %v645_v28 = vmul.f32 %v9919_v39, %v623_v16  ;;  %v1258_v42 = vsel %vm1257_vm10, %v9938_v18, %v1256_v62  ;;  %v1000_v5 = vmul.f32 1.442695, %v982_v24  ;;  %v10003_v49 = vadd.f32 %v9932_v12, %v644_v34 }
 0x280   :  { %v776_v50 = vadd.f32 1.0, %v760_v37  ;;  %v777_v59 = vadd.f32 1.0, %v761_v17  ;;  %v969_v22 = vsub.f32 0.0, %v745_v63  ;;  %v10015_v62 = vsel %vm710_vm14, 1.0, %v13269_v31 }
 0x281   :  { %v10009_v20 = vadd.f32 %v9932_v12, %v645_v28  ;;  %v1002_v24 = vmul.f32 1.442695, %v983_v36  ;;  %v10019_v34 = vsel %vm1259_vm12, %v1260_v30, %v1258_v42  ;;  %v984_v17 = vmul.f32 %v968_v57, %v744_v45 }
 0x282   :  { %8879 = vrcp.f32 %v776_v50  ;;  %v10026_v54 = vsel %vm711_vm15, 1.0, %v13269_v31  ;;  %v10029_v32 = vmul.f32 0.70710677, %v10003_v49  ;;  %v985_v36 = vmul.f32 %v969_v22, %v745_v63 }
 0x283   :  { %v9997_v58 = vpop.eup %8867  ;;  %8881 = vrcp.f32 %v777_v59  ;;  %v10036_v45 = vmul.f32 0.70710677, %v10009_v20  ;;  %v1004_v59 = vmul.f32 1.442695, %v984_v17  ;;  %vm712_vm1 = vcmp.ge.f32.partialorder %v9976_v52, 0.0 }
 0x284   :  { %v10005_v29 = vpop.eup %8869  ;;  %v820_v6 = vmul.f32 1.0614054, %v9997_v58  ;;  %8883 = vpow2.f32 %v1000_v5  ;;  %v746_v22 = vand.u32 2147483647, %v10029_v32  ;;  %vm713_vm2 = vcmp.ge.f32.partialorder %v9982_v55, 0.0 }
 0x285   :  { %v821_v16 = vmul.f32 1.0614054, %v10005_v29  ;;  %v10021_v51 = vpop.eup %8871  ;;  %8885 = vpow2.f32 %v1002_v24  ;;  %v1006_v24 = vmul.f32 1.442695, %v985_v36  ;;  %vm714_vm3 = vcmp.ge.f32.partialorder %v10029_v32, 0.0 }
 0x286   :  { %v7236_v37 = vadd.f32 -1.4531521, %v820_v6  ;;  %v10031_v50 = vpop.eup %8873  ;;  %v822_v30 = vmul.f32 1.0614054, %v10021_v51  ;;  %8887 = vpow2.f32 %v1004_v59  ;;  %vm715_vm8 = vcmp.ge.f32.partialorder %v10036_v45, 0.0 }
 0x287   :  { %v7237_v28 = vadd.f32 -1.4531521, %v821_v16  ;;  %v823_v42 = vmul.f32 1.0614054, %v10031_v50  ;;  %v624_v16 = vmul.f32 %v9914_v3, %v9714_v35  ;;  %v683_v32 = vmul.f32 0.5, %v10009_v20 }
 0x288   :  { %v852_v18 = vmul.f32 %v9997_v58, %v7236_v37  ;;  %v7238_v6 = vadd.f32 -1.4531521, %v822_v30  ;;  %v8876_v37 = vpop.eup %8875  ;;  %v762_v30 = vmul.f32 0.3275911, %v746_v22 }
 0x289   :  { %v853_v2 = vmul.f32 %v10005_v29, %v7237_v28  ;;  %v7239_v63 = vadd.f32 -1.4531521, %v823_v42  ;;  %v8878_v57 = vpop.eup %8877 }
 0x28a   :  { %v868_v5 = vadd.f32 1.4214138, %v852_v18  ;;  %v854_v40 = vmul.f32 %v10021_v51, %v7238_v6  ;;  %v747_v18 = vand.u32 2147483647, %v10036_v45 }
 0x28b   :  { %v869_v21 = vadd.f32 1.4214138, %v853_v2  ;;  %v855_v35 = vmul.f32 %v10031_v50, %v7239_v63  ;;  %v970_v2 = vsub.f32 0.0, %v746_v22 }
 0x28c   :  { %v884_v28 = vmul.f32 %v9997_v58, %v868_v5  ;;  %v870_v25 = vadd.f32 1.4214138, %v854_v40  ;;  %v763_v11 = vmul.f32 0.3275911, %v747_v18  ;;  %v10052_v14 = vpop.eup %8879  ;;  %v778_v5 = vadd.f32 1.0, %v762_v30 }
 0x28d   :  { %v885_v17 = vmul.f32 %v10005_v29, %v869_v21  ;;  %v871_v26 = vadd.f32 1.4214138, %v855_v35  ;;  %v971_v0 = vsub.f32 0.0, %v747_v18  ;;  %v10054_v6 = vpop.eup %8881  ;;  %v824_v63 = vmul.f32 1.0614054, %v10052_v14 }
 0x28e   :  { %v7252_v42 = vadd.f32 -0.28449672, %v884_v28  ;;  %v886_v21 = vmul.f32 %v10021_v51, %v870_v25  ;;  %v779_v53 = vadd.f32 1.0, %v763_v11  ;;  %v8884_v8 = vpop.eup %8883  ;;  %v825_v28 = vmul.f32 1.0614054, %v10054_v6 }
 0x28f   :  { %v7253_v27 = vadd.f32 -0.28449672, %v885_v17  ;;  %v887_v59 = vmul.f32 %v10031_v50, %v871_v26  ;;  %8889 = vrcp.f32 %v778_v5  ;;  %v7240_v30 = vadd.f32 -1.4531521, %v824_v63  ;;  %v8886_v44 = vpop.eup %8885 }
 0x290   :  { %v916_v36 = vmul.f32 %v9997_v58, %v7252_v42  ;;  %v7254_v35 = vadd.f32 -0.28449672, %v886_v21  ;;  %8891 = vrcp.f32 %v779_v53  ;;  %v7241_v48 = vadd.f32 -1.4531521, %v825_v28 }
 0x291   :  { %v917_v40 = vmul.f32 %v10005_v29, %v7253_v27  ;;  %v7255_v42 = vadd.f32 -0.28449672, %v887_v59  ;;  %8893 = vpow2.f32 %v1006_v24  ;;  %v856_v27 = vmul.f32 %v10052_v14, %v7240_v30 }
 0x292   :  { %v932_v17 = vadd.f32 0.2548296, %v916_v36  ;;  %v918_v11 = vmul.f32 %v10021_v51, %v7254_v35  ;;  %v646_v26 = vmul.f32 %v9919_v39, %v624_v16  ;;  %v857_v36 = vmul.f32 %v10054_v6, %v7241_v48  ;;  %v8888_v35 = vpop.eup %8887 }
 0x293   :  { %v933_v15 = vadd.f32 0.2548296, %v917_v40  ;;  %v919_v5 = vmul.f32 %v10031_v50, %v7255_v42  ;;  %v647_v53 = vmul.f32 %v9919_v39, %v625_v38  ;;  %v872_v40 = vadd.f32 1.4214138, %v856_v27 }
 0x294   :  { %v948_v25 = vmul.f32 %v9997_v58, %v932_v17  ;;  %v934_v63 = vadd.f32 0.2548296, %v918_v11  ;;  %v986_v24 = vmul.f32 %v970_v2, %v746_v22  ;;  %v873_v28 = vadd.f32 1.4214138, %v857_v36 }
 0x295   :  { %v949_v46 = vmul.f32 %v10005_v29, %v933_v15  ;;  %v935_v58 = vadd.f32 0.2548296, %v919_v5  ;;  %v987_v17 = vmul.f32 %v971_v0, %v747_v18  ;;  %v888_v15 = vmul.f32 %v10052_v14, %v872_v40 }
 0x296   :  { %v1028_v21 = vmul.f32 %v8876_v37, %v948_v25  ;;  %v950_v16 = vmul.f32 %v10021_v51, %v934_v63  ;;  %v10073_v29 = vadd.f32 %v9932_v12, %v646_v26  ;;  %v889_v37 = vmul.f32 %v10054_v6, %v873_v28 }
 0x297   :  { %v1029_v59 = vmul.f32 %v8878_v57, %v949_v46  ;;  %v951_v38 = vmul.f32 %v10031_v50, %v935_v58  ;;  %v10079_v46 = vadd.f32 %v9932_v12, %v647_v53  ;;  %v7256_v22 = vadd.f32 -0.28449672, %v888_v15 }
 0x298   :  { %v1044_v30 = vsub.f32 1.0, %v1028_v21  ;;  %v1030_v57 = vmul.f32 %v8884_v8, %v950_v16  ;;  %v1008_v51 = vmul.f32 1.442695, %v986_v24  ;;  %v7257_v50 = vadd.f32 -0.28449672, %v889_v37 }
 0x299   :  { %v1045_v48 = vsub.f32 1.0, %v1029_v59  ;;  %v10082_v18 = vpop.eup %8889  ;;  %v1031_v42 = vmul.f32 %v8886_v44, %v951_v38  ;;  %v1010_v25 = vmul.f32 1.442695, %v987_v17  ;;  %v920_v5 = vmul.f32 %v10052_v14, %v7256_v22 }
 0x29a   :  { %v1060_v0 = vmul.f32 %v1044_v30, %v9986_v61  ;;  %v10086_v11 = vpop.eup %8891  ;;  %v1046_v26 = vsub.f32 1.0, %v1030_v57  ;;  %v826_v61 = vmul.f32 1.0614054, %v10082_v18  ;;  %v921_v21 = vmul.f32 %v10054_v6, %v7257_v50 }
 0x29b   :  { %v1061_v2 = vmul.f32 %v1045_v48, %v9990_v23  ;;  %v8894_v8 = vpop.eup %8893  ;;  %v1047_v53 = vsub.f32 1.0, %v1031_v42  ;;  %v827_v23 = vmul.f32 1.0614054, %v10086_v11  ;;  %v936_v40 = vadd.f32 0.2548296, %v920_v5 }
 0x29c   :  { %v1076_v27 = vadd.f32 1.0, %v1060_v0  ;;  %v1062_v63 = vmul.f32 %v1046_v26, %v10015_v62  ;;  %v7242_v24 = vadd.f32 -1.4531521, %v826_v61  ;;  %v937_v28 = vadd.f32 0.2548296, %v921_v21 }
 0x29d   :  { %v1077_v36 = vadd.f32 1.0, %v1061_v2  ;;  %v1063_v58 = vmul.f32 %v1047_v53, %v10026_v54  ;;  %v7243_v17 = vadd.f32 -1.4531521, %v827_v23  ;;  %v952_v16 = vmul.f32 %v10052_v14, %v936_v40 }
 0x29e   :  { %v1092_v44 = vmul.f32 %v1076_v27, %v9966_v41  ;;  %v1078_v30 = vadd.f32 1.0, %v1062_v63  ;;  %v858_v15 = vmul.f32 %v10082_v18, %v7242_v24  ;;  %v10099_v48 = vmul.f32 0.70710677, %v10073_v29 }
 0x29f   :  { %v1093_v59 = vmul.f32 %v1077_v36, %v9971_v43  ;;  %v1079_v41 = vadd.f32 1.0, %v1063_v58  ;;  %v953_v62 = vmul.f32 %v10054_v6, %v937_v28  ;;  %v859_v37 = vmul.f32 %v10086_v11, %v7243_v17 }
 0x2a0   :  { %v1094_v43 = vmul.f32 %v1078_v30, %v9973_v1  ;;  %v1032_v0 = vmul.f32 %v8888_v35, %v952_v16  ;;  %v874_v54 = vadd.f32 1.4214138, %v858_v15  ;;  %v10105_v57 = vmul.f32 0.70710677, %v10079_v46 }
 0x2a1   :  { %v8485_v38 = vpack.c.bf16 %v1093_v59, %v1092_v44  ;;  %v1095_v14 = vmul.f32 %v1079_v41, %v9979_v56  ;;  %v1033_v22 = vmul.f32 %v8894_v8, %v953_v62  ;;  %v875_v2 = vadd.f32 1.4214138, %v859_v37 }
 0x2a2   :  { %8895 = vpow2.f32 %v1008_v51  ;;  %v13270_v42 = vmov 0.0|0.0   ;;  %v728_v6 = vsel %vm712_vm1, 1.0, %v13269_v31  ;;  %v1048_v50 = vsub.f32 1.0, %v1032_v0 }
 0x2a3   :  { %8486 = vmatpush1.bf16.msra.mxu1 %v8485_v38  ;;  %v890_v1 = vmul.f32 %v10082_v18, %v874_v54  ;;  %8897 = vpow2.f32 %v1010_v25  ;;  %v8488_v35 = vpack.c.bf16 %v1095_v14, %v1094_v43  ;;  %v1049_v27 = vsub.f32 1.0, %v1033_v22 }
 0x2a4   :  { %8487 = vmatprep.subr.bf16.mxu1 %v13270_v42  ;;  %v891_v26 = vmul.f32 %v10086_v11, %v875_v2  ;;  %v10115_v5 = vand.u32 2147483647, %v10099_v48  ;;  %v729_v56 = vsel %vm713_vm2, 1.0, %v13269_v31  ;;  %v1064_v51 = vmul.f32 %v1048_v50, %v728_v6 }
 0x2a5   :  { %v7258_v61 = vadd.f32 -0.28449672, %v890_v1  ;;  %v10121_v52 = vand.u32 2147483647, %v10105_v57  ;;  %v680_v8 = vmul.f32 0.5, %v9960_v10  ;;  %v1065_v25 = vmul.f32 %v1049_v27, %v729_v56 }
 0x2a6   :  { %v7259_v36 = vadd.f32 -0.28449672, %v891_v26  ;;  %v764_v53 = vmul.f32 0.3275911, %v10115_v5  ;;  %v681_v21 = vmul.f32 0.5, %v9969_v9  ;;  %v1080_v23 = vadd.f32 1.0, %v1064_v51 }
 0x2a7   :  { %8489 = vmatpush1.bf16.msra.mxu1 %v8488_v35  ;;  %v922_v55 = vmul.f32 %v10082_v18, %v7258_v61  ;;  %v765_v44 = vmul.f32 0.3275911, %v10121_v52  ;;  %v1081_v63 = vadd.f32 1.0, %v1065_v25  ;;  %v626_v10 = vmul.f32 %v9914_v3, %v9726_v33 }
 0x2a8   :  { %8490 = vmatprep.subr.bf16.mxu1 %v13270_v42  ;;  %v923_v40 = vmul.f32 %v10086_v11, %v7259_v36  ;;  %v780_v24 = vadd.f32 1.0, %v764_v53  ;;  %v13271_v59 = vrot.slane %v10019_v34, %v9669_v47  ;;  %v1096_v58 = vmul.f32 %v1080_v23, %v680_v8 }
 0x2a9   :  { %v938_v28 = vadd.f32 0.2548296, %v922_v55  ;;  %v781_v17 = vadd.f32 1.0, %v765_v44  ;;  %v1097_v9 = vmul.f32 %v1081_v63, %v681_v21  ;;  %v627_v15 = vmul.f32 %v9914_v3, %v9732_v4 }
 0x2aa   :  { %8899 = vrcp.f32 %v13271_v59  ;;  %v939_v30 = vadd.f32 0.2548296, %v923_v40  ;;  %v682_v33 = vmul.f32 0.5, %v10003_v49  ;;  %v648_v34 = vmul.f32 %v9919_v39, %v626_v10 }
 0x2ab   :  { %8901 = vrcp.f32 %v780_v24  ;;  %v954_v16 = vmul.f32 %v10082_v18, %v938_v28  ;;  %v8491_v41 = vpack.c.bf16 %v1097_v9, %v1096_v58  ;;  %v649_v0 = vmul.f32 %v9919_v39, %v627_v15 }
 0x2ac   :  { %8903 = vrcp.f32 %v781_v17  ;;  %v8896_v38 = vpop.eup %8895  ;;  %v955_v62 = vmul.f32 %v10086_v11, %v939_v30  ;;  %v628_v18 = vmul.f32 %v9914_v3, %v9738_v13  ;;  %v10147_v54 = vadd.f32 %v9932_v12, %v648_v34 }
 0x2ad   :  { %v8898_v37 = vpop.eup %8897  ;;  %v1034_v43 = vmul.f32 %v8896_v38, %v954_v16  ;;  %8492 = vmatpush1.bf16.msra.mxu1 %v8491_v41  ;;  %v629_v49 = vmul.f32 %v9914_v3, %v9744_v7  ;;  %v972_v14 = vsub.f32 0.0, %v10115_v5  ;;  %v10155_v22 = vadd.f32 %v9932_v12, %v649_v0 }
 0x2ae   :  { %v1035_v4 = vmul.f32 %v8898_v37, %v955_v62  ;;  %8493 = vmatprep.subr.bf16.mxu1 %v13270_v42  ;;  %v730_v13 = vsel %vm714_vm3, 1.0, %v13269_v31  ;;  %v973_v2 = vsub.f32 0.0, %v10121_v52  ;;  %v10160_v6 = vmul.f32 0.70710677, %v10147_v54 }
 0x2af   :  { %v1050_v11 = vsub.f32 1.0, %v1034_v43  ;;  %v731_v7 = vsel %vm715_vm8, 1.0, %v13269_v31  ;;  %v10164_v1 = vmul.f32 0.70710677, %v10155_v22  ;;  %v650_v20 = vmul.f32 %v9919_v39, %v628_v18 }
 0x2b0   :  { %v1051_v45 = vsub.f32 1.0, %v1035_v4  ;;  %v10168_v27 = vmul.f32 0.5, %v10073_v29  ;;  %v750_v26 = vand.u32 2147483647, %v10160_v6  ;;  %v651_v56 = vmul.f32 %v9919_v39, %v629_v49 }
 0x2b1   :  { %v1066_v50 = vmul.f32 %v1050_v11, %v730_v13  ;;  %vm716_vm9 = vcmp.ge.f32.partialorder %v10099_v48, 0.0  ;;  %v988_v8 = vmul.f32 %v972_v14, %v10115_v5  ;;  %v751_v25 = vand.u32 2147483647, %v10164_v1 }
 0x2b2   :  { %v1067_v35 = vmul.f32 %v1051_v45, %v731_v7  ;;  %vm717_vm10 = vcmp.ge.f32.partialorder %v10105_v57, 0.0  ;;  %v989_v29 = vmul.f32 %v973_v2, %v10121_v52  ;;  %v766_v21 = vmul.f32 0.3275911, %v750_v26 }
 0x2b3   :  { %v1082_v61 = vadd.f32 1.0, %v1066_v50  ;;  %v767_v63 = vmul.f32 0.3275911, %v751_v25  ;;  %v10185_v40 = vadd.f32 %v9932_v12, %v650_v20  ;;  %v10189_v59 = vadd.f32 %v9932_v12, %v651_v56 }
 0x2b4   :  { %v10172_v51 = vpop.eup %8899  ;;  %v1083_v53 = vadd.f32 1.0, %v1067_v35  ;;  %v782_v10 = vadd.f32 1.0, %v766_v21  ;;  %v1012_v28 = vmul.f32 1.442695, %v988_v8  ;;  %v630_v17 = vmul.f32 %v9914_v3, %v9755_v19 }
 0x2b5   :  { %v10177_v36 = vpop.eup %8901  ;;  %v1098_v55 = vmul.f32 %v1082_v61, %v682_v33  ;;  %v783_v52 = vadd.f32 1.0, %v767_v63  ;;  %v631_v16 = vmul.f32 %v9914_v3, %v9761_v60  ;;  %v10196_v15 = vmul.f32 0.5, %v10079_v46 }
 0x2b6   :  { %v10181_v23 = vpop.eup %8903  ;;  %v828_v44 = vmul.f32 1.0614054, %v10177_v36  ;;  %v1099_v5 = vmul.f32 %v1083_v53, %v683_v32  ;;  %8905 = vrcp.f32 %v782_v10  ;;  %v1014_v41 = vmul.f32 1.442695, %v989_v29 }
 0x2b7   :  { %v829_v24 = vmul.f32 1.0614054, %v10181_v23  ;;  %8907 = vrcp.f32 %v783_v52  ;;  %v974_v62 = vsub.f32 0.0, %v750_v26  ;;  %v10201_v34 = vmul.f32 0.70710677, %v10185_v40 }
 0x2b8   :  { %v7244_v58 = vadd.f32 -1.4531521, %v828_v44  ;;  %v8494_v9 = vpack.c.bf16 %v1099_v5, %v1098_v55  ;;  %v10204_v19 = vmul.f32 0.70710677, %v10189_v59  ;;  %v10210_v60 = vsel %vm716_vm9, 1.0, %v13269_v31 }
 0x2b9   :  { %v7245_v30 = vadd.f32 -1.4531521, %v829_v24  ;;  %v10215_v3 = vsel %vm717_vm10, 1.0, %v13269_v31  ;;  %v652_v37 = vmul.f32 %v9919_v39, %v630_v17  ;;  %8909 = vpow2.f32 %v1012_v28 }
 0x2ba   :  { %v860_v38 = vmul.f32 %v10177_v36, %v7244_v58  ;;  %8495 = vmatpush1.bf16.msra.mxu1 %v8494_v9  ;;  %v752_v0 = vand.u32 2147483647, %v10201_v34  ;;  %v653_v18 = vmul.f32 %v9919_v39, %v631_v16  ;;  %8911 = vpow2.f32 %v1014_v41 }
 0x2bb   :  { %v861_v33 = vmul.f32 %v10181_v23, %v7245_v30  ;;  %8496 = vmatprep.subr.bf16.mxu1 %v13270_v42  ;;  %v975_v48 = vsub.f32 0.0, %v751_v25  ;;  %v753_v49 = vand.u32 2147483647, %v10204_v19  ;;  %v10224_v57 = vmul.f32 0.5, %v10147_v54 }
 0x2bc   :  { %v876_v46 = vadd.f32 1.4214138, %v860_v38  ;;  %v990_v11 = vmul.f32 %v974_v62, %v750_v26  ;;  %v768_v14 = vmul.f32 0.3275911, %v752_v0  ;;  %v10227_v45 = vmul.f32 0.5, %v10155_v22 }
 0x2bd   :  { %v877_v43 = vadd.f32 1.4214138, %v861_v33  ;;  %v769_v2 = vmul.f32 0.3275911, %v753_v49  ;;  %v10230_v7 = vadd.f32 %v9932_v12, %v652_v37  ;;  %v976_v35 = vsub.f32 0.0, %v752_v0 }
 0x2be   :  { %v892_v4 = vmul.f32 %v10177_v36, %v876_v46  ;;  %v784_v20 = vadd.f32 1.0, %v768_v14  ;;  %v10233_v56 = vadd.f32 %v9932_v12, %v653_v18  ;;  %vm718_vm11 = vcmp.ge.f32.partialorder %v10160_v6, 0.0 }
 0x2bf   :  { %v893_v32 = vmul.f32 %v10181_v23, %v877_v43  ;;  %v991_v54 = vmul.f32 %v975_v48, %v751_v25  ;;  %v785_v26 = vadd.f32 1.0, %v769_v2  ;;  %vm719_vm12 = vcmp.ge.f32.partialorder %v10164_v1, 0.0 }
 0x2c0   :  { %v7260_v13 = vadd.f32 -0.28449672, %v892_v4  ;;  %v10237_v8 = vpop.eup %8905  ;;  %v1016_v53 = vmul.f32 1.442695, %v990_v11  ;;  %8913 = vrcp.f32 %v784_v20  ;;  %v10245_v44 = vmul.f32 0.70710677, %v10230_v7 }
 0x2c1   :  { %v7261_v50 = vadd.f32 -0.28449672, %v893_v32  ;;  %v10241_v29 = vpop.eup %8907  ;;  %v830_v55 = vmul.f32 1.0614054, %v10237_v8  ;;  %8915 = vrcp.f32 %v785_v26  ;;  %v992_v5 = vmul.f32 %v976_v35, %v752_v0 }
 0x2c2   :  { %v924_v61 = vmul.f32 %v10177_v36, %v7260_v13  ;;  %v831_v25 = vmul.f32 1.0614054, %v10241_v29  ;;  %v10249_v24 = vmul.f32 0.70710677, %v10233_v56  ;;  %v10255_v58 = vsel %vm718_vm11, 1.0, %v13269_v31 }
 0x2c3   :  { %v925_v22 = vmul.f32 %v10181_v23, %v7261_v50  ;;  %v7246_v28 = vadd.f32 -1.4531521, %v830_v55  ;;  %v1018_v52 = vmul.f32 1.442695, %v991_v54  ;;  %v8910_v17 = vpop.eup %8909  ;;  %v10261_v30 = vsel %vm719_vm12, 1.0, %v13269_v31 }
 0x2c4   :  { %v940_v21 = vadd.f32 0.2548296, %v924_v61  ;;  %v7247_v16 = vadd.f32 -1.4531521, %v831_v25  ;;  %v977_v38 = vsub.f32 0.0, %v753_v49  ;;  %v8912_v41 = vpop.eup %8911  ;;  %8917 = vpow2.f32 %v1016_v53 }
 0x2c5   :  { %v941_v63 = vadd.f32 0.2548296, %v925_v22  ;;  %v754_v6 = vand.u32 2147483647, %v10245_v44  ;;  %v1020_v37 = vmul.f32 1.442695, %v992_v5  ;;  %8919 = vpow2.f32 %v1018_v52 }
 0x2c6   :  { %v956_v10 = vmul.f32 %v10177_v36, %v940_v21  ;;  %v862_v36 = vmul.f32 %v10237_v8, %v7246_v28  ;;  %v863_v46 = vmul.f32 %v10241_v29, %v7247_v16  ;;  %v993_v48 = vmul.f32 %v977_v38, %v753_v49  ;;  %v13272_v5 = vld [vmem:[#allocation6_spill] sm:$0xff] }
 0x2c7   :  { %v957_v9 = vmul.f32 %v10181_v23, %v941_v63  ;;  %v755_v23 = vand.u32 2147483647, %v10249_v24  ;;  %v770_v1 = vmul.f32 0.3275911, %v754_v6  ;;  %v978_v2 = vsub.f32 0.0, %v754_v6 }
 0x2c8   :  { %v1036_v33 = vmul.f32 %v8910_v17, %v956_v10  ;;  %v878_v0 = vadd.f32 1.4214138, %v862_v36  ;;  %v879_v4 = vadd.f32 1.4214138, %v863_v46  ;;  %v1267_v10 = vmul.f32 %v10172_v51, %v13272_v5  ;;  %v13273_v36 = vld [vmem:[#allocation7_spill] sm:$0xff] }
 0x2c9   :  { %v1037_v62 = vmul.f32 %v8912_v41, %v957_v9  ;;  %v771_v32 = vmul.f32 0.3275911, %v755_v23  ;;  %v786_v13 = vadd.f32 1.0, %v770_v1  ;;  %v979_v54 = vsub.f32 0.0, %v755_v23 }
 0x2ca   :  { %v1052_v43 = vsub.f32 1.0, %v1036_v33  ;;  %v894_v14 = vmul.f32 %v10237_v8, %v878_v0  ;;  %v10269_v50 = vpop.eup %8913  ;;  %v895_v35 = vmul.f32 %v10241_v29, %v879_v4  ;;  %v1022_v9 = vmul.f32 1.442695, %v993_v48 }
 0x2cb   :  { %v1053_v18 = vsub.f32 1.0, %v1037_v62  ;;  %v787_v61 = vadd.f32 1.0, %v771_v32  ;;  %v10273_v26 = vpop.eup %8915  ;;  %v832_v49 = vmul.f32 1.0614054, %v10269_v50  ;;  %8921 = vrcp.f32 %v786_v13 }
 0x2cc   :  { %v1068_v11 = vmul.f32 %v1052_v43, %v10210_v60  ;;  %v7262_v53 = vadd.f32 -0.28449672, %v894_v14  ;;  %v7263_v21 = vadd.f32 -0.28449672, %v895_v35  ;;  %v833_v55 = vmul.f32 1.0614054, %v10273_v26 }
 0x2cd   :  { %v1069_v20 = vmul.f32 %v1053_v18, %v10215_v3  ;;  %8923 = vrcp.f32 %v787_v61  ;;  %v7248_v25 = vadd.f32 -1.4531521, %v832_v49  ;;  %v994_v33 = vmul.f32 %v978_v2, %v754_v6 }
 0x2ce   :  { %v1084_v22 = vadd.f32 1.0, %v1068_v11  ;;  %v926_v3 = vmul.f32 %v10237_v8, %v7262_v53  ;;  %v927_v52 = vmul.f32 %v10241_v29, %v7263_v21  ;;  %v7249_v17 = vadd.f32 -1.4531521, %v833_v55  ;;  %v8918_v16 = vpop.eup %8917 }
 0x2cf   :  { %v1085_v60 = vadd.f32 1.0, %v1069_v20  ;;  %v864_v41 = vmul.f32 %v10269_v50, %v7248_v25  ;;  %v995_v0 = vmul.f32 %v979_v54, %v755_v23  ;;  %v8920_v1 = vpop.eup %8919  ;;  %v1283_v4 = vmul.f32 %v9919_v39, %v1267_v10 }
 0x2d0   :  { %v1100_v63 = vmul.f32 %v1084_v22, %v10168_v27  ;;  %v942_v38 = vadd.f32 0.2548296, %v926_v3  ;;  %v1268_v27 = vmul.f32 %v10172_v51, %v13273_v36  ;;  %v943_v46 = vadd.f32 0.2548296, %v927_v52 }
 0x2d1   :  { %v1101_v28 = vmul.f32 %v1085_v60, %v10196_v15  ;;  %v865_v43 = vmul.f32 %v10273_v26, %v7249_v17  ;;  %v880_v18 = vadd.f32 1.4214138, %v864_v41  ;;  %v10292_v6 = vmul.f32 0.5, %v10185_v40  ;;  %v13274_v60 = vld [vmem:[#allocation8_spill] sm:$0xff]  ;;  %v13275_v41 = vld [vmem:[#allocation9_spill] sm:$0xff] }
 0x2d2   :  { %v958_v15 = vmul.f32 %v10237_v8, %v942_v38  ;;  %v1284_v48 = vmul.f32 %v9919_v39, %v1268_v27  ;;  %v959_v32 = vmul.f32 %v10241_v29, %v943_v46  ;;  %8925 = vpow2.f32 %v1020_v37 }
 0x2d3   :  { %v8497_v62 = vpack.c.bf16 %v1101_v28, %v1100_v63  ;;  %v881_v11 = vadd.f32 1.4214138, %v865_v43  ;;  %v896_v23 = vmul.f32 %v10269_v50, %v880_v18  ;;  %8927 = vpow2.f32 %v1022_v9 }
 0x2d4   :  { %v1038_v14 = vmul.f32 %v8918_v16, %v958_v15  ;;  %v10297_v8 = vadd.f32 %v9932_v12, %v1283_v4  ;;  %v1039_v13 = vmul.f32 %v8920_v1, %v959_v32  ;;  %v1024_v20 = vmul.f32 1.442695, %v994_v33 }
 0x2d5   :  { %8498 = vmatpush1.bf16.msra.mxu1 %v8497_v62  ;;  %v897_v2 = vmul.f32 %v10273_v26, %v881_v11  ;;  %v10301_v29 = vadd.f32 %v9932_v12, %v1284_v48  ;;  %v10303_v40 = vpop.eup %8921  ;;  %vm720_vm13 = vcmp.ge.f32.partialorder %v10201_v34, 0.0  ;;  %vm721_vm14 = vcmp.ge.f32.partialorder %v10204_v19, 0.0  ;;  %v10355_v34 = vld [vmem:[%s13268_s28] ss:$0 sm:$0xff] }
 0x2d6   :  { %8499 = vmatprep.subr.bf16.mxu1 %v13270_v42  ;;  %v1054_v35 = vsub.f32 1.0, %v1038_v14  ;;  %v7264_v37 = vadd.f32 -0.28449672, %v896_v23  ;;  %v1026_v61 = vmul.f32 1.442695, %v995_v0  ;;  %v1055_v22 = vsub.f32 1.0, %v1039_v13 }
 0x2d7   :  { %v10307_v54 = vpop.eup %8923  ;;  %v7265_v53 = vadd.f32 -0.28449672, %v897_v2  ;;  %v834_v49 = vmul.f32 1.0614054, %v10303_v40  ;;  %v1269_v21 = vmul.f32 %v10172_v51, %v13274_v60  ;;  %v10316_v3 = vmul.f32 0.70710677, %v10297_v8 }
 0x2d8   :  { %v1070_v12 = vmul.f32 %v1054_v35, %v10255_v58  ;;  %v928_v55 = vmul.f32 %v10269_v50, %v7264_v37  ;;  %v835_v63 = vmul.f32 1.0614054, %v10307_v54  ;;  %v1071_v25 = vmul.f32 %v1055_v22, %v10261_v30 }
 0x2d9   :  { %v929_v5 = vmul.f32 %v10273_v26, %v7265_v53  ;;  %v7250_v10 = vadd.f32 -1.4531521, %v834_v49  ;;  %v10321_v28 = vmul.f32 0.70710677, %v10301_v29  ;;  %8929 = vpow2.f32 %v1024_v20 }
 0x2da   :  { %v1086_v52 = vadd.f32 1.0, %v1070_v12  ;;  %v944_v17 = vadd.f32 0.2548296, %v928_v55  ;;  %v7251_v9 = vadd.f32 -1.4531521, %v835_v63  ;;  %v1087_v58 = vadd.f32 1.0, %v1071_v25 }
 0x2db   :  { %v945_v16 = vadd.f32 0.2548296, %v929_v5  ;;  %v866_v38 = vmul.f32 %v10303_v40, %v7250_v10  ;;  %v1270_v33 = vmul.f32 %v10172_v51, %v13275_v41  ;;  %8931 = vpow2.f32 %v1026_v61 }
 0x2dc   :  { %v1102_v36 = vmul.f32 %v1086_v52, %v10224_v57  ;;  %v960_v30 = vmul.f32 %v10269_v50, %v944_v17  ;;  %v867_v27 = vmul.f32 %v10307_v54, %v7251_v9  ;;  %v8926_v62 = vpop.eup %8925  ;;  %v1103_v46 = vmul.f32 %v1087_v58, %v10227_v45 }
 0x2dd   :  { %v961_v43 = vmul.f32 %v10273_v26, %v945_v16  ;;  %v882_v0 = vadd.f32 1.4214138, %v866_v38  ;;  %v1285_v1 = vmul.f32 %v9919_v39, %v1269_v21  ;;  %v8928_v15 = vpop.eup %8927  ;;  %v10333_v48 = vand.u32 2147483647, %v10316_v3 }
 0x2de   :  { %v1040_v18 = vmul.f32 %v8926_v62, %v960_v30  ;;  %v883_v4 = vadd.f32 1.4214138, %v867_v27  ;;  %v10336_v57 = vand.u32 2147483647, %v10321_v28  ;;  %v8500_v50 = vpack.c.bf16 %v1103_v46, %v1102_v36 }
 0x2df   :  { %v1041_v32 = vmul.f32 %v8928_v15, %v961_v43  ;;  %v898_v11 = vmul.f32 %v10303_v40, %v882_v0  ;;  %v1286_v45 = vmul.f32 %v9919_v39, %v1270_v33  ;;  %v1395_v23 = vmul.f32 0.3275911, %v10333_v48 }
 0x2e0   :  { %v1056_v14 = vsub.f32 1.0, %v1040_v18  ;;  %v899_v26 = vmul.f32 %v10307_v54, %v883_v4  ;;  %v1396_v13 = vmul.f32 0.3275911, %v10336_v57  ;;  %8501 = vmatpush1.bf16.msra.mxu1 %v8500_v50  ;;  %v736_v2 = vsel %vm720_vm13, 1.0, %v13269_v31  ;;  %v13277_v50 = vld [vmem:[#allocation11_spill] sm:$0xff] }
 0x2e1   :  { %v737_v20 = vsel %vm721_vm14, 1.0, %v13269_v31  ;;  %v1057_v35 = vsub.f32 1.0, %v1041_v32  ;;  %v7266_v37 = vadd.f32 -0.28449672, %v898_v11  ;;  %8502 = vmatprep.subr.bf16.mxu1 %v13270_v42  ;;  %v1411_v22 = vadd.f32 1.0, %v1395_v23 }
 0x2e2   :  { %v1072_v39 = vmul.f32 %v1056_v14, %v736_v2  ;;  %v7267_v61 = vadd.f32 -0.28449672, %v899_v26  ;;  %v1412_v53 = vadd.f32 1.0, %v1396_v13  ;;  %v689_v49 = vmul.f32 0.5, %v10189_v59 }
 0x2e3   :  { %v1073_v60 = vmul.f32 %v1057_v35, %v737_v20  ;;  %v930_v21 = vmul.f32 %v10303_v40, %v7266_v37  ;;  %v10358_v19 = vadd.f32 %v10355_v34, %v1285_v1  ;;  %v8930_v12 = vpop.eup %8929  ;;  %8933 = vrcp.f32 %v1411_v22  ;;  %v1748_v20 = vld [vmem:[%s13278_s27 + $0x8] sm:$0xff] }
 0x2e4   :  { %v1088_v55 = vadd.f32 1.0, %v1072_v39  ;;  %v931_v63 = vmul.f32 %v10307_v54, %v7267_v61  ;;  %v10362_v25 = vadd.f32 %v10355_v34, %v1286_v45  ;;  %vm722_vm15 = vcmp.ge.f32.partialorder %v10245_v44, 0.0  ;;  %v10404_v45 = vld [vmem:[%s13267_s8] ss:$0 sm:$0xff]  ;;  %1907 = vmatprep.mubr.f32.mxu1 %v1748_v20 }
 0x2e5   :  { %v1089_v59 = vadd.f32 1.0, %v1073_v60  ;;  %v946_v5 = vadd.f32 0.2548296, %v930_v21  ;;  %8935 = vrcp.f32 %v1412_v53  ;;  %v8932_v10 = vpop.eup %8931  ;;  %v690_v17 = vmul.f32 0.5, %v10230_v7 }
 0x2e6   :  { %v1104_v52 = vmul.f32 %v1088_v55, %v10292_v6  ;;  %v947_v9 = vadd.f32 0.2548296, %v931_v63  ;;  %vm723_vm1 = vcmp.ge.f32.partialorder %v10249_v24, 0.0  ;;  %v10370_v38 = vmul.f32 0.70710677, %v10358_v19  ;;  %v13276_v24 = vld [vmem:[#allocation10_spill] sm:$0xff] }
 0x2e7   :  { %v1105_v58 = vmul.f32 %v1089_v59, %v689_v49  ;;  %v962_v16 = vmul.f32 %v10303_v40, %v946_v5  ;;  %v691_v41 = vmul.f32 0.5, %v10233_v56  ;;  %v738_v44 = vsel %vm722_vm15, 1.0, %v13269_v31 }
 0x2e8   :  { %v963_v33 = vmul.f32 %v10307_v54, %v947_v9  ;;  %v10376_v36 = vmul.f32 0.70710677, %v10362_v25  ;;  %v10379_v30 = vand.u32 2147483647, %v10370_v38  ;;  %v1271_v40 = vmul.f32 %v10172_v51, %v13276_v24  ;;  %v13280_v24 = vld [vmem:[#allocation13_spill] sm:$0xff] }
 0x2e9   :  { %v8503_v6 = vpack.c.bf16 %v1105_v58, %v1104_v52  ;;  %v1042_v7 = vmul.f32 %v8930_v12, %v962_v16  ;;  %v739_v27 = vsel %vm723_vm1, 1.0, %v13269_v31  ;;  %v1603_v56 = vsub.f32 0.0, %v10333_v48 }
 0x2ea   :  { %v1043_v62 = vmul.f32 %v8932_v10, %v963_v33  ;;  %v10386_v46 = vand.u32 2147483647, %v10376_v36  ;;  %v10389_v43 = vmul.f32 0.5, %v10297_v8  ;;  %v1604_v0 = vsub.f32 0.0, %v10336_v57 }
 0x2eb   :  { %8504 = vmatpush1.bf16.msra.mxu1 %v8503_v6  ;;  %v1058_v54 = vsub.f32 1.0, %v1042_v7  ;;  %v1397_v1 = vmul.f32 0.3275911, %v10379_v30  ;;  %v10395_v18 = vmul.f32 0.5, %v10301_v29  ;;  %v1272_v32 = vmul.f32 %v10172_v51, %v13277_v50 }
 0x2ec   :  { %8505 = vmatprep.subr.bf16.mxu1 %v13270_v42  ;;  %v1059_v15 = vsub.f32 1.0, %v1043_v62  ;;  %v1398_v4 = vmul.f32 0.3275911, %v10386_v46  ;;  %vm1347_vm2 = vcmp.ge.f32.partialorder %v10316_v3, 0.0  ;;  %v1287_v14 = vmul.f32 %v10404_v45, %v1271_v40 }
 0x2ed   :  { %v1074_v11 = vmul.f32 %v1058_v54, %v738_v44  ;;  %v1413_v8 = vadd.f32 1.0, %v1397_v1  ;;  %v10407_v26 = vpop.eup %8933  ;;  %v1619_v23 = vmul.f32 %v1603_v56, %v10333_v48  ;;  %v1288_v2 = vmul.f32 %v10404_v45, %v1272_v32  ;;  %v13279_v44 = vld [vmem:[#allocation12_spill] sm:$0xff] }
 0x2ee   :  { %v1075_v29 = vmul.f32 %v1059_v15, %v739_v27  ;;  %v1414_v13 = vadd.f32 1.0, %v1398_v4  ;;  %v1459_v39 = vmul.f32 1.0614054, %v10407_v26  ;;  %v1620_v61 = vmul.f32 %v1604_v0, %v10336_v57 }
 0x2ef   :  { %v10414_v35 = vpop.eup %8935  ;;  %v1090_v37 = vadd.f32 1.0, %v1074_v11  ;;  %8937 = vrcp.f32 %v1413_v8  ;;  %vm1348_vm3 = vcmp.ge.f32.partialorder %v10321_v28, 0.0  ;;  %v10423_v49 = vsel %vm1347_vm2, 1.0, %v13269_v31 }
 0x2f0   :  { %v1091_v22 = vadd.f32 1.0, %v1075_v29  ;;  %v1460_v48 = vmul.f32 1.0614054, %v10414_v35  ;;  %8939 = vrcp.f32 %v1414_v13  ;;  %v7268_v60 = vadd.f32 -1.4531521, %v1459_v39 }
 0x2f1   :  { %v1106_v53 = vmul.f32 %v1090_v37, %v690_v17  ;;  %v10426_v21 = vadd.f32 %v10355_v34, %v1287_v14  ;;  %v1635_v55 = vmul.f32 1.442695, %v1619_v23  ;;  %v10429_v63 = vadd.f32 %v10355_v34, %v1288_v2 }
 0x2f2   :  { %v1107_v12 = vmul.f32 %v1091_v22, %v691_v41  ;;  %v7269_v57 = vadd.f32 -1.4531521, %v1460_v48  ;;  %v10432_v28 = vsel %vm1348_vm3, 1.0, %v13269_v31  ;;  %v1491_v59 = vmul.f32 %v10407_v26, %v7268_v60 }
 0x2f3   :  { %v1637_v5 = vmul.f32 1.442695, %v1620_v61  ;;  %v10436_v3 = vmul.f32 0.70710677, %v10426_v21  ;;  %v1605_v17 = vsub.f32 0.0, %v10379_v30  ;;  %v1606_v16 = vsub.f32 0.0, %v10386_v46 }
 0x2f4   :  { %v8506_v10 = vpack.c.bf16 %v1107_v12, %v1106_v53  ;;  %v1492_v52 = vmul.f32 %v10414_v35, %v7269_v57  ;;  %v10441_v9 = vmul.f32 0.70710677, %v10429_v63  ;;  %v1507_v58 = vadd.f32 1.4214138, %v1491_v59 }
 0x2f5   :  { %v1383_v41 = vand.u32 2147483647, %v10436_v3  ;;  %v1273_v33 = vmul.f32 %v10172_v51, %v13279_v44  ;;  %8941 = vpow2.f32 %v1635_v55  ;;  %v1274_v40 = vmul.f32 %v10172_v51, %v13280_v24 }
 0x2f6   :  { %8507 = vmatpush1.bf16.msra.mxu1 %v8506_v10  ;;  %v1508_v6 = vadd.f32 1.4214138, %v1492_v52  ;;  %v1384_v7 = vand.u32 2147483647, %v10441_v9  ;;  %v1523_v27 = vmul.f32 %v10407_v26, %v1507_v58  ;;  %8943 = vpow2.f32 %v1637_v5 }
 0x2f7   :  { %8508 = vmatprep.subr.bf16.mxu1 %v13270_v42  ;;  %v10453_v62 = vmul.f32 0.5, %v10358_v19  ;;  %v1399_v56 = vmul.f32 0.3275911, %v1383_v41  ;;  %v10457_v0 = vmul.f32 0.5, %v10362_v25  ;;  %v1621_v1 = vmul.f32 %v1605_v17, %v10379_v30 }
 0x2f8   :  { %v1524_v54 = vmul.f32 %v10414_v35, %v1508_v6  ;;  %v1400_v15 = vmul.f32 0.3275911, %v1384_v7  ;;  %v7284_v50 = vadd.f32 -0.28449672, %v1523_v27  ;;  %v1622_v32 = vmul.f32 %v1606_v16, %v10386_v46 }
 0x2f9   :  { %v10460_v4 = vpop.eup %8937  ;;  %v1415_v11 = vadd.f32 1.0, %v1399_v56  ;;  %v1289_v8 = vmul.f32 %v10404_v45, %v1273_v33  ;;  %v1290_v25 = vmul.f32 %v10404_v45, %v1274_v40  ;;  %v1607_v2 = vsub.f32 0.0, %v1383_v41 }
 0x2fa   :  { %v10464_v14 = vpop.eup %8939  ;;  %v7285_v19 = vadd.f32 -0.28449672, %v1524_v54  ;;  %v1461_v29 = vmul.f32 1.0614054, %v10460_v4  ;;  %v1416_v23 = vadd.f32 1.0, %v1400_v15  ;;  %v1555_v13 = vmul.f32 %v10407_v26, %v7284_v50 }
 0x2fb   :  { %v1462_v30 = vmul.f32 1.0614054, %v10464_v14  ;;  %8945 = vrcp.f32 %v1415_v11  ;;  %v1639_v37 = vmul.f32 1.442695, %v1621_v1  ;;  %v1608_v22 = vsub.f32 0.0, %v1384_v7 }
 0x2fc   :  { %v1556_v20 = vmul.f32 %v10414_v35, %v7285_v19  ;;  %v7270_v46 = vadd.f32 -1.4531521, %v1461_v29  ;;  %8947 = vrcp.f32 %v1416_v23  ;;  %v1571_v39 = vadd.f32 0.2548296, %v1555_v13 }
 0x2fd   :  { %v7271_v61 = vadd.f32 -1.4531521, %v1462_v30  ;;  %v10472_v48 = vadd.f32 %v10355_v34, %v1289_v8  ;;  %v1641_v12 = vmul.f32 1.442695, %v1622_v32  ;;  %v10476_v57 = vadd.f32 %v10355_v34, %v1290_v25 }
 0x2fe   :  { %v1572_v53 = vadd.f32 0.2548296, %v1556_v20  ;;  %v1493_v60 = vmul.f32 %v10460_v4, %v7270_v46  ;;  %v1587_v55 = vmul.f32 %v10407_v26, %v1571_v39  ;;  %v1623_v5 = vmul.f32 %v1607_v2, %v1383_v41 }
 0x2ff   :  { %v1494_v59 = vmul.f32 %v10464_v14, %v7271_v61  ;;  %v10481_v10 = vmul.f32 0.70710677, %v10472_v48  ;;  %v8942_v52 = vpop.eup %8941  ;;  %8949 = vpow2.f32 %v1639_v37  ;;  %v10485_v16 = vmul.f32 0.70710677, %v10476_v57 }
 0x300   :  { %v1588_v17 = vmul.f32 %v10414_v35, %v1572_v53  ;;  %v1509_v58 = vadd.f32 1.4214138, %v1493_v60  ;;  %v8944_v44 = vpop.eup %8943  ;;  %v1667_v33 = vmul.f32 %v8942_v52, %v1587_v55  ;;  %v1624_v24 = vmul.f32 %v1608_v22, %v1384_v7 }
 0x301   :  { %v1510_v6 = vadd.f32 1.4214138, %v1494_v59  ;;  %v10488_v26 = vand.u32 2147483647, %v10481_v10  ;;  %vm1349_vm8 = vcmp.ge.f32.partialorder %v10370_v38, 0.0  ;;  %8951 = vpow2.f32 %v1641_v12 }
 0x302   :  { %v1668_v40 = vmul.f32 %v8944_v44, %v1588_v17  ;;  %v1525_v41 = vmul.f32 %v10460_v4, %v1509_v58  ;;  %v1683_v27 = vsub.f32 1.0, %v1667_v33  ;;  %v1643_v56 = vmul.f32 1.442695, %v1623_v5 }
 0x303   :  { %v1526_v35 = vmul.f32 %v10464_v14, %v1510_v6  ;;  %v10494_v54 = vand.u32 2147483647, %v10485_v16  ;;  %vm1350_vm9 = vcmp.ge.f32.partialorder %v10376_v36, 0.0  ;;  %v1401_v15 = vmul.f32 0.3275911, %v10488_v26 }
 0x304   :  { %v1684_v1 = vsub.f32 1.0, %v1668_v40  ;;  %v7286_v7 = vadd.f32 -0.28449672, %v1525_v41  ;;  %v1699_v32 = vmul.f32 %v1683_v27, %v10423_v49  ;;  %v1645_v8 = vmul.f32 1.442695, %v1624_v24 }
 0x305   :  { %v10498_v50 = vpop.eup %8945  ;;  %v7287_v11 = vadd.f32 -0.28449672, %v1526_v35  ;;  %v1402_v19 = vmul.f32 0.3275911, %v10494_v54  ;;  %v1417_v30 = vadd.f32 1.0, %v1401_v15  ;;  %v1365_v55 = vsel %vm1349_vm8, 1.0, %v13269_v31 }
 0x306   :  { %v10502_v29 = vpop.eup %8947  ;;  %v1700_v23 = vmul.f32 %v1684_v1, %v10432_v28  ;;  %v1557_v25 = vmul.f32 %v10460_v4, %v7286_v7  ;;  %v1463_v13 = vmul.f32 1.0614054, %v10498_v50  ;;  %v1715_v2 = vadd.f32 1.0, %v1699_v32 }
 0x307   :  { %v1558_v20 = vmul.f32 %v10464_v14, %v7287_v11  ;;  %v1464_v46 = vmul.f32 1.0614054, %v10502_v29  ;;  %v1418_v37 = vadd.f32 1.0, %v1402_v19  ;;  %8953 = vrcp.f32 %v1417_v30 }
 0x308   :  { %v1716_v49 = vadd.f32 1.0, %v1700_v23  ;;  %v1573_v39 = vadd.f32 0.2548296, %v1557_v25  ;;  %v7272_v61 = vadd.f32 -1.4531521, %v1463_v13  ;;  %v1731_v22 = vmul.f32 %v1715_v2, %v10389_v43  ;;  %v13281_v43 = vld [vmem:[#allocation14_spill] sm:$0xff] }
 0x309   :  { %v1574_v53 = vadd.f32 0.2548296, %v1558_v20  ;;  %v7273_v60 = vadd.f32 -1.4531521, %v1464_v46  ;;  %8955 = vrcp.f32 %v1418_v37  ;;  %v8950_v28 = vpop.eup %8949  ;;  %v1275_v58 = vmul.f32 %v10172_v51, %v13281_v43 }
 0x30a   :  { %v1732_v12 = vmul.f32 %v1716_v49, %v10395_v18  ;;  %v1589_v59 = vmul.f32 %v10460_v4, %v1573_v39  ;;  %v1495_v5 = vmul.f32 %v10498_v50, %v7272_v61  ;;  %8957 = vpow2.f32 %v1643_v56  ;;  %v13282_v4 = vld [vmem:[#allocation15_spill] sm:$0xff] }
 0x30b   :  { %v1590_v52 = vmul.f32 %v10464_v14, %v1574_v53  ;;  %v1496_v17 = vmul.f32 %v10502_v29, %v7273_v60  ;;  %v8952_v44 = vpop.eup %8951  ;;  %8959 = vpow2.f32 %v1645_v8  ;;  %v1609_v40 = vsub.f32 0.0, %v10488_v26 }
 0x30c   :  { %v8509_v33 = vpack.c.bf16 %v1732_v12, %v1731_v22  ;;  %v1669_v6 = vmul.f32 %v8950_v28, %v1589_v59  ;;  %v1511_v18 = vadd.f32 1.4214138, %v1495_v5  ;;  %v1276_v41 = vmul.f32 %v10172_v51, %v13282_v4 }
 0x30d   :  { %v1670_v24 = vmul.f32 %v8952_v44, %v1590_v52  ;;  %v1512_v38 = vadd.f32 1.4214138, %v1496_v17  ;;  %v1610_v35 = vsub.f32 0.0, %v10494_v54  ;;  %v1291_v56 = vmul.f32 %v10404_v45, %v1275_v58 }
 0x30e   :  { %8510 = vmatpush1.bf16.msra.mxu1 %v8509_v33  ;;  %v1685_v14 = vsub.f32 1.0, %v1669_v6  ;;  %v1527_v27 = vmul.f32 %v10498_v50, %v1511_v18  ;;  %v1366_v1 = vsel %vm1350_vm9, 1.0, %v13269_v31  ;;  %v1292_v32 = vmul.f32 %v10404_v45, %v1276_v41  ;;  %v13283_v18 = vld [vmem:[#allocation16_spill] sm:$0xff]  ;;  %v13284_v41 = vld [vmem:[#allocation17_spill] sm:$0xff] }
 0x30f   :  { %8511 = vmatprep.subr.bf16.mxu1 %v13270_v42  ;;  %v1686_v7 = vsub.f32 1.0, %v1670_v24  ;;  %v1528_v15 = vmul.f32 %v10502_v29, %v1512_v38  ;;  %vm1351_vm10 = vcmp.ge.f32.partialorder %v10436_v3, 0.0  ;;  %v10534_v19 = vadd.f32 %v10355_v34, %v1291_v56 }
 0x310   :  { %v1701_v11 = vmul.f32 %v1685_v14, %v1365_v55  ;;  %v7288_v8 = vadd.f32 -0.28449672, %v1527_v27  ;;  %vm1352_vm11 = vcmp.ge.f32.partialorder %v10441_v9, 0.0  ;;  %v10538_v13 = vadd.f32 %v10355_v34, %v1292_v32 }
 0x311   :  { %v1702_v23 = vmul.f32 %v1686_v7, %v1366_v1  ;;  %v7289_v25 = vadd.f32 -0.28449672, %v1528_v15  ;;  %v10540_v36 = vpop.eup %8953  ;;  %v1625_v20 = vmul.f32 %v1609_v40, %v10488_v26  ;;  %v1626_v46 = vmul.f32 %v1610_v35, %v10494_v54 }
 0x312   :  { %v1717_v30 = vadd.f32 1.0, %v1701_v11  ;;  %v1559_v2 = vmul.f32 %v10498_v50, %v7288_v8  ;;  %v1465_v61 = vmul.f32 1.0614054, %v10540_v36  ;;  %v10550_v22 = vmul.f32 0.70710677, %v10534_v19 }
 0x313   :  { %v10545_v37 = vpop.eup %8955  ;;  %v1718_v49 = vadd.f32 1.0, %v1702_v23  ;;  %v1560_v39 = vmul.f32 %v10502_v29, %v7289_v25  ;;  %v10555_v12 = vmul.f32 0.70710677, %v10538_v13  ;;  %v1367_v55 = vsel %vm1351_vm10, 1.0, %v13269_v31 }
 0x314   :  { %v1733_v53 = vmul.f32 %v1717_v30, %v10453_v62  ;;  %v1575_v60 = vadd.f32 0.2548296, %v1559_v2  ;;  %v1466_v28 = vmul.f32 1.0614054, %v10545_v37  ;;  %v8958_v26 = vpop.eup %8957  ;;  %v7274_v5 = vadd.f32 -1.4531521, %v1465_v61 }
 0x315   :  { %v1734_v54 = vmul.f32 %v1718_v49, %v10457_v0  ;;  %v1576_v59 = vadd.f32 0.2548296, %v1560_v39  ;;  %v8960_v52 = vpop.eup %8959  ;;  %v1647_v62 = vmul.f32 1.442695, %v1625_v20  ;;  %v1649_v58 = vmul.f32 1.442695, %v1626_v46 }
 0x316   :  { %v1591_v17 = vmul.f32 %v10498_v50, %v1575_v60  ;;  %v7275_v43 = vadd.f32 -1.4531521, %v1466_v28  ;;  %v1497_v6 = vmul.f32 %v10540_v36, %v7274_v5  ;;  %v1277_v0 = vmul.f32 %v10172_v51, %v13283_v18 }
 0x317   :  { %v8512_v44 = vpack.c.bf16 %v1734_v54, %v1733_v53  ;;  %v1592_v33 = vmul.f32 %v10502_v29, %v1576_v59  ;;  %v1387_v38 = vand.u32 2147483647, %v10550_v22  ;;  %v10569_v40 = vand.u32 2147483647, %v10555_v12 }
 0x318   :  { %v1671_v24 = vmul.f32 %v8958_v26, %v1591_v17  ;;  %v1498_v3 = vmul.f32 %v10545_v37, %v7275_v43  ;;  %v1368_v50 = vsel %vm1352_vm11, 1.0, %v13269_v31  ;;  %v1513_v29 = vadd.f32 1.4214138, %v1497_v6  ;;  %v13285_v6 = vld [vmem:[#allocation18_spill] sm:$0xff] }
 0x319   :  { %8513 = vmatpush1.bf16.msra.mxu1 %v8512_v44  ;;  %v1672_v4 = vmul.f32 %v8960_v52, %v1592_v33  ;;  %v1278_v14 = vmul.f32 %v10172_v51, %v13284_v41  ;;  %8961 = vpow2.f32 %v1647_v62  ;;  %v1403_v56 = vmul.f32 0.3275911, %v1387_v38 }
 0x31a   :  { %8514 = vmatprep.subr.bf16.mxu1 %v13270_v42  ;;  %v1687_v27 = vsub.f32 1.0, %v1671_v24  ;;  %v1514_v35 = vadd.f32 1.4214138, %v1498_v3  ;;  %v1529_v7 = vmul.f32 %v10540_v36, %v1513_v29  ;;  %8963 = vpow2.f32 %v1649_v58 }
 0x31b   :  { %v1688_v1 = vsub.f32 1.0, %v1672_v4  ;;  %v1404_v15 = vmul.f32 0.3275911, %v10569_v40  ;;  %v1419_v11 = vadd.f32 1.0, %v1403_v56  ;;  %v1293_v8 = vmul.f32 %v10404_v45, %v1277_v0 }
 0x31c   :  { %v1703_v32 = vmul.f32 %v1687_v27, %v1367_v55  ;;  %v1530_v9 = vmul.f32 %v10545_v37, %v1514_v35  ;;  %v7290_v25 = vadd.f32 -0.28449672, %v1529_v7  ;;  %v1294_v2 = vmul.f32 %v10404_v45, %v1278_v14 }
 0x31d   :  { %v1704_v23 = vmul.f32 %v1688_v1, %v1368_v50  ;;  %v1420_v30 = vadd.f32 1.0, %v1404_v15  ;;  %v1319_v20 = vmul.f32 0.5, %v10426_v21  ;;  %8965 = vrcp.f32 %v1419_v11 }
 0x31e   :  { %v1719_v46 = vadd.f32 1.0, %v1703_v32  ;;  %v7291_v49 = vadd.f32 -0.28449672, %v1530_v9  ;;  %v1320_v39 = vmul.f32 0.5, %v10429_v63  ;;  %v1561_v53 = vmul.f32 %v10540_v36, %v7290_v25 }
 0x31f   :  { %v1720_v61 = vadd.f32 1.0, %v1704_v23  ;;  %8967 = vrcp.f32 %v1420_v30  ;;  %v10587_v26 = vadd.f32 %v10355_v34, %v1293_v8  ;;  %v10590_v59 = vadd.f32 %v10355_v34, %v1294_v2 }
 0x320   :  { %v1735_v60 = vmul.f32 %v1719_v46, %v1319_v20  ;;  %v1562_v28 = vmul.f32 %v10545_v37, %v7291_v49  ;;  %v1577_v55 = vadd.f32 0.2548296, %v1561_v53  ;;  %vm1353_vm12 = vcmp.ge.f32.partialorder %v10481_v10, 0.0 }
 0x321   :  { %v1736_v54 = vmul.f32 %v1720_v61, %v1320_v39  ;;  %vm1354_vm13 = vcmp.ge.f32.partialorder %v10485_v16, 0.0  ;;  %v10595_v63 = vmul.f32 0.70710677, %v10587_v26  ;;  %v1611_v17 = vsub.f32 0.0, %v1387_v38 }
 0x322   :  { %v1578_v21 = vadd.f32 0.2548296, %v1562_v28  ;;  %v1593_v52 = vmul.f32 %v10540_v36, %v1577_v55  ;;  %v10599_v43 = vmul.f32 0.70710677, %v10590_v59  ;;  %v1612_v44 = vsub.f32 0.0, %v10569_v40  ;;  %v13286_v36 = vld [vmem:[#allocation19_spill] sm:$0xff] }
 0x323   :  { %v8515_v5 = vpack.c.bf16 %v1736_v54, %v1735_v60  ;;  %v8962_v62 = vpop.eup %8961  ;;  %v1389_v33 = vand.u32 2147483647, %v10595_v63  ;;  %v1279_v18 = vmul.f32 %v10172_v51, %v13285_v6  ;;  %v1280_v50 = vmul.f32 %v10172_v51, %v13286_v36 }
 0x324   :  { %v1594_v58 = vmul.f32 %v10545_v37, %v1578_v21  ;;  %v8964_v0 = vpop.eup %8963  ;;  %v1673_v24 = vmul.f32 %v8962_v62, %v1593_v52  ;;  %v10607_v3 = vand.u32 2147483647, %v10599_v43  ;;  %v1369_v37 = vsel %vm1353_vm12, 1.0, %v13269_v31 }
 0x325   :  { %8516 = vmatpush1.bf16.msra.mxu1 %v8515_v5  ;;  %v1405_v29 = vmul.f32 0.3275911, %v1389_v33  ;;  %v1370_v41 = vsel %vm1354_vm13, 1.0, %v13269_v31  ;;  %v1627_v27 = vmul.f32 %v1611_v17, %v1387_v38  ;;  %v1628_v7 = vmul.f32 %v1612_v44, %v10569_v40 }
 0x326   :  { %8517 = vmatprep.subr.bf16.mxu1 %v13270_v42  ;;  %v1674_v4 = vmul.f32 %v8964_v0, %v1594_v58  ;;  %v1689_v14 = vsub.f32 1.0, %v1673_v24  ;;  %v1406_v35 = vmul.f32 0.3275911, %v10607_v3  ;;  %v1295_v32 = vmul.f32 %v10404_v45, %v1279_v18  ;;  %v13287_v18 = vld [vmem:[#allocation20_spill] sm:$0xff] }
 0x327   :  { %v10619_v56 = vpop.eup %8965  ;;  %v1421_v15 = vadd.f32 1.0, %v1405_v29  ;;  %v1296_v16 = vmul.f32 %v10404_v45, %v1280_v50  ;;  %v1321_v38 = vmul.f32 0.5, %v10472_v48  ;;  %v1651_v40 = vmul.f32 1.442695, %v1627_v27 }
 0x328   :  { %v1690_v1 = vsub.f32 1.0, %v1674_v4  ;;  %v1705_v9 = vmul.f32 %v1689_v14, %v1369_v37  ;;  %v1467_v11 = vmul.f32 1.0614054, %v10619_v56  ;;  %v1422_v8 = vadd.f32 1.0, %v1406_v35 }
 0x329   :  { %v10623_v10 = vpop.eup %8967  ;;  %8969 = vrcp.f32 %v1421_v15  ;;  %v1322_v20 = vmul.f32 0.5, %v10476_v57  ;;  %v10631_v39 = vadd.f32 %v10355_v34, %v1295_v32  ;;  %v1653_v60 = vmul.f32 1.442695, %v1628_v7 }
 0x32a   :  { %v1706_v23 = vmul.f32 %v1690_v1, %v1370_v41  ;;  %v1468_v25 = vmul.f32 1.0614054, %v10623_v10  ;;  %v1721_v30 = vadd.f32 1.0, %v1705_v9  ;;  %v7276_v2 = vadd.f32 -1.4531521, %v1467_v11  ;;  %v13288_v1 = vld [vmem:[#allocation21_spill] sm:$0xff] }
 0x32b   :  { %8971 = vrcp.f32 %v1422_v8  ;;  %v10635_v48 = vadd.f32 %v10355_v34, %v1296_v16  ;;  %v1613_v55 = vsub.f32 0.0, %v1389_v33  ;;  %v10639_v21 = vmul.f32 0.70710677, %v10631_v39 }
 0x32c   :  { %v1722_v46 = vadd.f32 1.0, %v1706_v23  ;;  %v7277_v49 = vadd.f32 -1.4531521, %v1468_v25  ;;  %v1737_v61 = vmul.f32 %v1721_v30, %v1321_v38  ;;  %v1499_v53 = vmul.f32 %v10619_v56, %v7276_v2 }
 0x32d   :  { %8973 = vpow2.f32 %v1651_v40  ;;  %v10642_v5 = vmul.f32 0.70710677, %v10635_v48  ;;  %v1614_v62 = vsub.f32 0.0, %v10607_v3  ;;  %v1391_v58 = vand.u32 2147483647, %v10639_v21 }
 0x32e   :  { %v1738_v28 = vmul.f32 %v1722_v46, %v1322_v20  ;;  %v1500_v54 = vmul.f32 %v10623_v10, %v7277_v49  ;;  %v1515_v57 = vadd.f32 1.4214138, %v1499_v53  ;;  %8975 = vpow2.f32 %v1653_v60 }
 0x32f   :  { %v1392_v6 = vand.u32 2147483647, %v10642_v5  ;;  %v1281_v0 = vmul.f32 %v10172_v51, %v13287_v18  ;;  %v10651_v24 = vmul.f32 0.5, %v10534_v19  ;;  %v1629_v50 = vmul.f32 %v1613_v55, %v1389_v33 }
 0x330   :  { %v8518_v52 = vpack.c.bf16 %v1738_v28, %v1737_v61  ;;  %v1516_v17 = vadd.f32 1.4214138, %v1500_v54  ;;  %v1531_v44 = vmul.f32 %v10619_v56, %v1515_v57  ;;  %v1407_v37 = vmul.f32 0.3275911, %v1391_v58 }
 0x331   :  { %v10656_v4 = vmul.f32 0.5, %v10538_v13  ;;  %vm1355_vm14 = vcmp.ge.f32.partialorder %v10550_v22, 0.0  ;;  %v1408_v41 = vmul.f32 0.3275911, %v1392_v6  ;;  %v1630_v35 = vmul.f32 %v1614_v62, %v10607_v3 }
 0x332   :  { %8519 = vmatpush1.bf16.msra.mxu1 %v8518_v52  ;;  %v1532_v36 = vmul.f32 %v10623_v10, %v1516_v17  ;;  %v7292_v29 = vadd.f32 -0.28449672, %v1531_v44  ;;  %v1423_v19 = vadd.f32 1.0, %v1407_v37  ;;  %v1282_v7 = vmul.f32 %v10172_v51, %v13288_v1 }
 0x333   :  { %8520 = vmatprep.subr.bf16.mxu1 %v13270_v42  ;;  %v10659_v14 = vpop.eup %8969  ;;  %v1424_v32 = vadd.f32 1.0, %v1408_v41  ;;  %v1297_v9 = vmul.f32 %v10404_v45, %v1281_v0  ;;  %v1655_v16 = vmul.f32 1.442695, %v1629_v50  ;;  %vm1356_vm15 = vcmp.ge.f32.partialorder %v10555_v12, 0.0 }
 0x334   :  { %v7293_v27 = vadd.f32 -0.28449672, %v1532_v36  ;;  %v1563_v15 = vmul.f32 %v10619_v56, %v7292_v29  ;;  %v1469_v13 = vmul.f32 1.0614054, %v10659_v14  ;;  %8977 = vrcp.f32 %v1423_v19 }
 0x335   :  { %v10664_v33 = vpop.eup %8971  ;;  %8979 = vrcp.f32 %v1424_v32  ;;  %v1615_v25 = vsub.f32 0.0, %v1391_v58  ;;  %v1298_v30 = vmul.f32 %v10404_v45, %v1282_v7  ;;  %v1657_v46 = vmul.f32 1.442695, %v1630_v35 }
 0x336   :  { %v1564_v11 = vmul.f32 %v10623_v10, %v7293_v27  ;;  %v1470_v8 = vmul.f32 1.0614054, %v10664_v33  ;;  %v1579_v3 = vadd.f32 0.2548296, %v1563_v15  ;;  %v7278_v38 = vadd.f32 -1.4531521, %v1469_v13 }
 0x337   :  { %v8974_v2 = vpop.eup %8973  ;;  %v10676_v49 = vadd.f32 %v10355_v34, %v1297_v9  ;;  %8981 = vpow2.f32 %v1655_v16  ;;  %v10681_v60 = vadd.f32 %v10355_v34, %v1298_v30  ;;  %v1616_v55 = vsub.f32 0.0, %v1392_v6 }
 0x338   :  { %v1580_v51 = vadd.f32 0.2548296, %v1564_v11  ;;  %v7279_v23 = vadd.f32 -1.4531521, %v1470_v8  ;;  %v1595_v40 = vmul.f32 %v10619_v56, %v1579_v3  ;;  %v1501_v20 = vmul.f32 %v10659_v14, %v7278_v38  ;;  %v8976_v28 = vpop.eup %8975 }
 0x339   :  { %v10684_v56 = vmul.f32 0.70710677, %v10676_v49  ;;  %v1631_v17 = vmul.f32 %v1615_v25, %v1391_v58  ;;  %v10687_v62 = vmul.f32 0.70710677, %v10681_v60  ;;  %8983 = vpow2.f32 %v1657_v46 }
 0x33a   :  { %v1596_v61 = vmul.f32 %v10623_v10, %v1580_v51  ;;  %v1502_v53 = vmul.f32 %v10664_v33, %v7279_v23  ;;  %v1675_v54 = vmul.f32 %v8974_v2, %v1595_v40  ;;  %v1517_v45 = vadd.f32 1.4214138, %v1501_v20 }
 0x33b   :  { %v10691_v34 = vand.u32 2147483647, %v10684_v56  ;;  %v1371_v18 = vsel %vm1355_vm14, 1.0, %v13269_v31  ;;  %v1372_v0 = vsel %vm1356_vm15, 1.0, %v13269_v31  ;;  %v1632_v29 = vmul.f32 %v1616_v55, %v1392_v6 }
 0x33c   :  { %v1676_v57 = vmul.f32 %v8976_v28, %v1596_v61  ;;  %v1518_v52 = vadd.f32 1.4214138, %v1502_v53  ;;  %v1691_v10 = vsub.f32 1.0, %v1675_v54  ;;  %v1533_v44 = vmul.f32 %v10659_v14, %v1517_v45 }
 0x33d   :  { %v10701_v41 = vand.u32 2147483647, %v10687_v62  ;;  %v1659_v1 = vmul.f32 1.442695, %v1631_v17  ;;  %v1409_v22 = vmul.f32 0.3275911, %v10691_v34 }
 0x33e   :  { %v1692_v36 = vsub.f32 1.0, %v1676_v57  ;;  %v1534_v58 = vmul.f32 %v10664_v33, %v1518_v52  ;;  %v1707_v50 = vmul.f32 %v1691_v10, %v1371_v18  ;;  %v7294_v37 = vadd.f32 -0.28449672, %v1533_v44  ;;  %v10703_v27 = vpop.eup %8977 }
 0x33f   :  { %v10706_v7 = vpop.eup %8979  ;;  %v1471_v13 = vmul.f32 1.0614054, %v10703_v27  ;;  %v1410_v32 = vmul.f32 0.3275911, %v10701_v41  ;;  %v1425_v8 = vadd.f32 1.0, %v1409_v22  ;;  %vm1357_vm1 = vcmp.ge.f32.partialorder %v10595_v63, 0.0 }
 0x340   :  { %v1708_v35 = vmul.f32 %v1692_v36, %v1372_v0  ;;  %v7295_v19 = vadd.f32 -0.28449672, %v1534_v58  ;;  %v1723_v12 = vadd.f32 1.0, %v1707_v50  ;;  %v1565_v15 = vmul.f32 %v10659_v14, %v7294_v37 }
 0x341   :  { %v1472_v11 = vmul.f32 1.0614054, %v10706_v7  ;;  %v7280_v38 = vadd.f32 -1.4531521, %v1471_v13  ;;  %v1426_v51 = vadd.f32 1.0, %v1410_v32  ;;  %v8982_v23 = vpop.eup %8981  ;;  %8985 = vrcp.f32 %v1425_v8 }
 0x342   :  { %v1724_v6 = vadd.f32 1.0, %v1708_v35  ;;  %v1566_v9 = vmul.f32 %v10664_v33, %v7295_v19  ;;  %v1739_v16 = vmul.f32 %v1723_v12, %v10651_v24  ;;  %v1581_v3 = vadd.f32 0.2548296, %v1565_v15 }
 0x343   :  { %v7281_v2 = vadd.f32 -1.4531521, %v1472_v11  ;;  %v1503_v20 = vmul.f32 %v10703_v27, %v7280_v38  ;;  %v1661_v46 = vmul.f32 1.442695, %v1632_v29  ;;  %8987 = vrcp.f32 %v1426_v51  ;;  %v8984_v28 = vpop.eup %8983 }
 0x344   :  { %v1740_v25 = vmul.f32 %v1724_v6, %v10656_v4  ;;  %v1582_v30 = vadd.f32 0.2548296, %v1566_v9  ;;  %v1597_v40 = vmul.f32 %v10659_v14, %v1581_v3  ;;  %vm1358_vm2 = vcmp.ge.f32.partialorder %v10599_v43, 0.0 }
 0x345   :  { %v1504_v24 = vmul.f32 %v10706_v7, %v7281_v2  ;;  %v1519_v45 = vadd.f32 1.4214138, %v1503_v20  ;;  %8989 = vpow2.f32 %v1659_v1  ;;  %v1617_v63 = vsub.f32 0.0, %v10691_v34 }
 0x346   :  { %v8521_v61 = vpack.c.bf16 %v1740_v25, %v1739_v16  ;;  %v1598_v53 = vmul.f32 %v10664_v33, %v1582_v30  ;;  %v1677_v54 = vmul.f32 %v8982_v23, %v1597_v40  ;;  %8991 = vpow2.f32 %v1661_v46 }
 0x347   :  { %v1520_v55 = vadd.f32 1.4214138, %v1504_v24  ;;  %v1535_v57 = vmul.f32 %v10703_v27, %v1519_v45  ;;  %v1373_v33 = vsel %vm1357_vm1, 1.0, %v13269_v31  ;;  %v1374_v10 = vsel %vm1358_vm2, 1.0, %v13269_v31 }
 0x348   :  { %8522 = vmatpush1.bf16.msra.mxu1 %v8521_v61  ;;  %v1678_v4 = vmul.f32 %v8984_v28, %v1598_v53  ;;  %v1693_v14 = vsub.f32 1.0, %v1677_v54  ;;  %v1618_v18 = vsub.f32 0.0, %v10701_v41  ;;  %v1325_v58 = vmul.f32 0.5, %v10587_v26 }
 0x349   :  { %8523 = vmatprep.subr.bf16.mxu1 %v13270_v42  ;;  %v1536_v17 = vmul.f32 %v10706_v7, %v1520_v55  ;;  %v7296_v43 = vadd.f32 -0.28449672, %v1535_v57  ;;  %v1326_v35 = vmul.f32 0.5, %v10590_v59  ;;  %v1633_v22 = vmul.f32 %v1617_v63, %v10691_v34 }
 0x34a   :  { %v1694_v52 = vsub.f32 1.0, %v1678_v4  ;;  %v1709_v44 = vmul.f32 %v1693_v14, %v1373_v33  ;;  %v1634_v6 = vmul.f32 %v1618_v18, %v10701_v41  ;;  %vm1359_vm3 = vcmp.ge.f32.partialorder %v10639_v21, 0.0 }
 0x34b   :  { %v7297_v36 = vadd.f32 -0.28449672, %v1536_v17  ;;  %v1567_v37 = vmul.f32 %v10703_v27, %v7296_v43  ;;  %v8986_v29 = vpop.eup %8985  ;;  %v1663_v23 = vmul.f32 1.442695, %v1633_v22  ;;  %vm1360_vm8 = vcmp.ge.f32.partialorder %v10642_v5, 0.0 }
 0x34c   :  { %v1710_v0 = vmul.f32 %v1694_v52, %v1374_v10  ;;  %v1725_v50 = vadd.f32 1.0, %v1709_v44  ;;  %v1473_v32 = vmul.f32 1.0614054, %v8986_v29  ;;  %v1665_v2 = vmul.f32 1.442695, %v1634_v6 }
 0x34d   :  { %v1568_v1 = vmul.f32 %v10706_v7, %v7297_v36  ;;  %v8988_v12 = vpop.eup %8987  ;;  %v1583_v13 = vadd.f32 0.2548296, %v1567_v37  ;;  %v1375_v46 = vsel %vm1359_vm3, 1.0, %v13269_v31  ;;  %8993 = vpow2.f32 %v1663_v23  ;;  %v1759_v23 = vld [vmem:[%s13278_s27 + $0x60] sm:$0xff] }
 0x34e   :  { %v1726_v19 = vadd.f32 1.0, %v1710_v0  ;;  %v1741_v15 = vmul.f32 %v1725_v50, %v1325_v58  ;;  %v1474_v26 = vmul.f32 1.0614054, %v8988_v12  ;;  %v7282_v16 = vadd.f32 -1.4531521, %v1473_v32 }
 0x34f   :  { %v1584_v11 = vadd.f32 0.2548296, %v1568_v1  ;;  %v1599_v8 = vmul.f32 %v10703_v27, %v1583_v13  ;;  %v8990_v3 = vpop.eup %8989  ;;  %v1376_v53 = vsel %vm1360_vm8, 1.0, %v13269_v31  ;;  %8995 = vpow2.f32 %v1665_v2  ;;  %v1763_v2 = vld [vmem:[%s13278_s27 + $0x80] sm:$0xff] }
 0x350   :  { %v1742_v9 = vmul.f32 %v1726_v19, %v1326_v35  ;;  %v7283_v51 = vadd.f32 -1.4531521, %v1474_v26  ;;  %v8992_v25 = vpop.eup %8991  ;;  %v1505_v30 = vmul.f32 %v8986_v29, %v7282_v16  ;;  %v1327_v5 = vmul.f32 0.5, %v10631_v39  ;;  %v1754_v26 = vld [vmem:[%s13278_s27 + $0x38] sm:$0xff]  ;;  %v1756_v16 = vld [vmem:[%s13278_s27 + $0x48] sm:$0xff] }
 0x351   :  { %v1600_v59 = vmul.f32 %v10706_v7, %v1584_v11  ;;  %v1679_v34 = vmul.f32 %v8990_v3, %v1599_v8  ;;  %v1328_v55 = vmul.f32 0.5, %v10635_v48  ;;  %vm1361_vm9 = vcmp.ge.f32.partialorder %v10684_v56, 0.0  ;;  %v1751_v11 = vld [vmem:[%s13278_s27 + $0x20] sm:$0xff]  ;;  %v1753_v8 = vld [vmem:[%s13278_s27 + $0x30] sm:$0xff] }
 0x352   :  { %v8524_v38 = vpack.c.bf16 %v1742_v9, %v1741_v15  ;;  %v1506_v40 = vmul.f32 %v8988_v12, %v7283_v51  ;;  %v1521_v20 = vadd.f32 1.4214138, %v1505_v30  ;;  %vm1362_vm10 = vcmp.ge.f32.partialorder %v10687_v62, 0.0  ;;  %v1747_v62 = vld [vmem:[%s13278_s27] sm:$0xff]  ;;  %v1750_v9 = vld [vmem:[%s13278_s27 + $0x18] sm:$0xff]  ;;  %v1760_v51 = vld [vmem:[%s13278_s27 + $0x68] sm:$0xff] }
 0x353   :  { %v1680_v41 = vmul.f32 %v8992_v25, %v1600_v59  ;;  %v1695_v27 = vsub.f32 1.0, %v1679_v34  ;;  %v1377_v37 = vsel %vm1361_vm9, 1.0, %v13269_v31  ;;  %v1378_v19 = vsel %vm1362_vm10, 1.0, %v13269_v31  ;;  %v1755_v3 = vld [vmem:[%s13278_s27 + $0x40] sm:$0xff]  ;;  %v1757_v59 = vld [vmem:[%s13278_s27 + $0x50] sm:$0xff]  ;;  %v1762_v25 = vld [vmem:[%s13278_s27 + $0x78] sm:$0xff] }
 0x354   :  { %8525 = vmatpush1.bf16.msra.mxu1 %v8524_v38  ;;  %v1522_v61 = vadd.f32 1.4214138, %v1506_v40  ;;  %v1537_v24 = vmul.f32 %v8986_v29, %v1521_v20  ;;  %v1329_v22 = vmul.f32 0.5, %v10676_v49  ;;  %v1330_v15 = vmul.f32 0.5, %v10681_v60  ;;  %v1749_v49 = vld [vmem:[%s13278_s27 + $0x10] sm:$0xff]  ;;  %v1752_v60 = vld [vmem:[%s13278_s27 + $0x28] sm:$0xff] }
 0x355   :  { %8526 = vmatprep.subr.bf16.mxu1 %v13270_v42  ;;  %v1696_v7 = vsub.f32 1.0, %v1680_v41  ;;  %v1711_v21 = vmul.f32 %v1695_v27, %v1375_v46  ;;  %v1758_v38 = vld [vmem:[%s13278_s27 + $0x58] sm:$0xff]  ;;  %v1761_v34 = vld [vmem:[%s13278_s27 + $0x70] sm:$0xff]  ;;  %v1764_v30 = vld [vmem:[%s13278_s27 + $0x88] sm:$0xff]  ;;  %vm2292_vm11 = vcmask 523264   ;;  %vm2329_vm12 = vcmask 785408  }
 0x356   :  { %v1538_v54 = vmul.f32 %v8988_v12, %v1522_v61  ;;  %v7298_v4 = vadd.f32 -0.28449672, %v1537_v24  ;;  %v1766_v41 = vld [vmem:[%s13278_s27 + $0x98] sm:$0xff]  ;;  %v1765_v40 = vld [vmem:[%s13278_s27 + $0x90] sm:$0xff]  ;;  %v1768_v27 = vld [vmem:[%s13278_s27 + $0xa8] sm:$0xff] }
 0x357   :  { %v1712_v28 = vmul.f32 %v1696_v7, %v1376_v53  ;;  %v1727_v45 = vadd.f32 1.0, %v1711_v21  ;;  %v8994_v0 = vpop.eup %8993  ;;  %v1767_v20 = vld [vmem:[%s13278_s27 + $0xa0] sm:$0xff]  ;;  %v1770_v46 = vld [vmem:[%s13278_s27 + $0xb8] sm:$0xff]  ;;  %v1769_v7 = vld [vmem:[%s13278_s27 + $0xb0] sm:$0xff] }
 0x358   :  { %v7299_v57 = vadd.f32 -0.28449672, %v1538_v54  ;;  %v1569_v52 = vmul.f32 %v8986_v29, %v7298_v4  ;;  %v1772_v61 = vld [vmem:[%s13278_s27 + $0xc8] sm:$0xff]  ;;  %v1771_v53 = vld [vmem:[%s13278_s27 + $0xc0] sm:$0xff]  ;;  %v1774_v21 = vld [vmem:[%s13278_s27 + $0xd8] sm:$0xff] }
 0x359   :  { %v1728_v14 = vadd.f32 1.0, %v1712_v28  ;;  %v1743_v33 = vmul.f32 %v1727_v45, %v1327_v5  ;;  %v8996_v58 = vpop.eup %8995  ;;  %v1773_v24 = vld [vmem:[%s13278_s27 + $0xd0] sm:$0xff]  ;;  %v1776_v28 = vld [vmem:[%s13278_s27 + $0xe8] sm:$0xff]  ;;  %v1775_v54 = vld [vmem:[%s13278_s27 + $0xe0] sm:$0xff] }
 0x35a   :  { %v1570_v63 = vmul.f32 %v8988_v12, %v7299_v57  ;;  %v1585_v10 = vadd.f32 0.2548296, %v1569_v52  ;;  %v1778_v5 = vld [vmem:[%s13278_s27 + $0xf8] sm:$0xff]  ;;  %v1777_v45 = vld [vmem:[%s13278_s27 + $0xf0] sm:$0xff]  ;;  %v1780_v4 = vld [vmem:[%s13278_s27 + $0x108] sm:$0xff] }
 0x35b   :  { %v1744_v17 = vmul.f32 %v1728_v14, %v1328_v55  ;;  %v1779_v55 = vld [vmem:[%s13278_s27 + $0x100] sm:$0xff]  ;;  %v1782_v14 = vld [vmem:[%s13278_s27 + $0x118] sm:$0xff]  ;;  %v1781_v57 = vld [vmem:[%s13278_s27 + $0x110] sm:$0xff] }
 0x35c   :  { %v1586_v43 = vadd.f32 0.2548296, %v1570_v63  ;;  %v1601_v18 = vmul.f32 %v8986_v29, %v1585_v10  ;;  %v1783_v52 = vld [vmem:[%s13278_s27 + $0x120] sm:$0xff]  ;;  %v1785_v63 = vld [vmem:[%s13278_s27 + $0x130] sm:$0xff]  ;;  %v1788_v10 = vld [vmem:[%s13278_s27 + $0x148] sm:$0xff] }
 0x35d   :  { %v8527_v44 = vpack.c.bf16 %v1744_v17, %v1743_v33  ;;  %v1784_v33 = vld [vmem:[%s13278_s27 + $0x128] sm:$0xff]  ;;  %v1786_v17 = vld [vmem:[%s13278_s27 + $0x138] sm:$0xff] }
 0x35e   :  { %v1602_v36 = vmul.f32 %v8988_v12, %v1586_v43  ;;  %v1681_v39 = vmul.f32 %v8994_v0, %v1601_v18  ;;  %v1790_v43 = vld [vmem:[%s13278_s27 + $0x158] sm:$0xff]  ;;  %v1789_v18 = vld [vmem:[%s13278_s27 + $0x150] sm:$0xff]  ;;  %v1792_v0 = vld [vmem:[%s13278_s27 + $0x168] sm:$0xff] }
 0x35f   :  { %8528 = vmatpush1.bf16.msra.mxu1 %v8527_v44  ;;  %v1787_v44 = vld [vmem:[%s13278_s27 + $0x140] sm:$0xff] }
 0x360   :  { %8529 = vmatprep.subr.bf16.mxu1 %v13270_v42  ;;  %v1682_v48 = vmul.f32 %v8996_v58, %v1602_v36  ;;  %v1697_v50 = vsub.f32 1.0, %v1681_v39  ;;  %v1791_v36 = vld [vmem:[%s13278_s27 + $0x160] sm:$0xff]  ;;  %v1794_v58 = vld [vmem:[%s13278_s27 + $0x178] sm:$0xff]  ;;  %v1793_v39 = vld [vmem:[%s13278_s27 + $0x170] sm:$0xff] }
 0x362   :  { %v1698_v35 = vsub.f32 1.0, %v1682_v48  ;;  %v1713_v1 = vmul.f32 %v1697_v50, %v1377_v37  ;;  %v1796_v48 = vld [vmem:[%s13278_s27 + $0x188] sm:$0xff]  ;;  %v1795_v50 = vld [vmem:[%s13278_s27 + $0x180] sm:$0xff]  ;;  %v1798_v37 = vld [vmem:[%s13278_s27 + $0x198] sm:$0xff] }
 0x364   :  { %v1714_v29 = vmul.f32 %v1698_v35, %v1378_v19  ;;  %v1729_v12 = vadd.f32 1.0, %v1713_v1  ;;  %v1797_v35 = vld [vmem:[%s13278_s27 + $0x190] sm:$0xff]  ;;  %v1800_v19 = vld [vmem:[%s13278_s27 + $0x1a8] sm:$0xff]  ;;  %v1799_v1 = vld [vmem:[%s13278_s27 + $0x1a0] sm:$0xff] }
 0x366   :  { %v1730_v13 = vadd.f32 1.0, %v1714_v29  ;;  %v1745_v32 = vmul.f32 %v1729_v12, %v1329_v22  ;;  %v1802_v29 = vld [vmem:[%s13278_s27 + $0x1b8] sm:$0xff]  ;;  %v1801_v22 = vld [vmem:[%s13278_s27 + $0x1b0] sm:$0xff]  ;;  %v1804_v12 = vld [vmem:[%s13278_s27 + $0x1c8] sm:$0xff] }
 0x368   :  { %v1746_v56 = vmul.f32 %v1730_v13, %v1330_v15  ;;  %v1803_v15 = vld [vmem:[%s13278_s27 + $0x1c0] sm:$0xff]  ;;  %v1806_v13 = vld [vmem:[%s13278_s27 + $0x1d8] sm:$0xff] }
 0x36a   :  { %v8530_v6 = vpack.c.bf16 %v1746_v56, %v1745_v32  ;;  %v1805_v32 = vld [vmem:[%s13278_s27 + $0x1d0] sm:$0xff]  ;;  %v1808_v56 = vld [vmem:[%s13278_s27 + $0x1e8] sm:$0xff] }
 0x36c   :  { %8531 = vmatpush1.bf16.msra.mxu1 %v8530_v6  ;;  %v1807_v6 = vld [vmem:[%s13278_s27 + $0x1e0] sm:$0xff] }
 0x36d   :  { %8711 = vmatprep.subr.bf16.mxu1 %v13270_v42 }
 0x36f   :  { %1908 = vmatmul.mubr.f32.vlgmr.msra.gmra.mrb[0].mxu1 %v1747_v62  ;;  %v1810_v62 = vld [vmem:[%s13278_s27 + $0x1f8] sm:$0xff] }
 0x370   :  { %1912 = vmatprep.mubr.f32.mxu1 %v1750_v9  ;;  %v1809_v9 = vld [vmem:[%s13278_s27 + $0x1f0] sm:$0xff] }
 0x373   :  { %1913 = vmatmul.mubr.f32.gmra.mrb[2].mxu1 %v1749_v49  ;;  %v1812_v49 = vld [vmem:[%s13278_s27 + $0x208] sm:$0xff] }
 0x374   :  { %1917 = vmatprep.mubr.f32.mxu1 %v1752_v60  ;;  %v1811_v60 = vld [vmem:[%s13278_s27 + $0x200] sm:$0xff] }
 0x377   :  { %1918 = vmatmul.mubr.f32.gmra.mrb[4].mxu1 %v1751_v11  ;;  %v1814_v11 = vld [vmem:[%s13278_s27 + $0x218] sm:$0xff] }
 0x378   :  { %1922 = vmatprep.mubr.f32.mxu1 %v1754_v26  ;;  %v1813_v26 = vld [vmem:[%s13278_s27 + $0x210] sm:$0xff] }
 0x37b   :  { %1923 = vmatmul.mubr.f32.gmra.mrb[6].mxu1 %v1753_v8  ;;  %v1816_v8 = vld [vmem:[%s13278_s27 + $0x228] sm:$0xff] }
 0x37c   :  { %1927 = vmatprep.mubr.f32.mxu1 %v1756_v16  ;;  %v1815_v16 = vld [vmem:[%s13278_s27 + $0x220] sm:$0xff] }
 0x37f   :  { %1928 = vmatmul.mubr.f32.gmra.mrb[8].mxu1 %v1755_v3  ;;  %v1818_v3 = vld [vmem:[%s13278_s27 + $0x238] sm:$0xff] }
 0x380   :  { %1932 = vmatprep.mubr.f32.mxu1 %v1758_v38  ;;  %v1817_v38 = vld [vmem:[%s13278_s27 + $0x230] sm:$0xff] }
 0x383   :  { %1933 = vmatmul.mubr.f32.gmra.mrb[10].mxu1 %v1757_v59  ;;  %v1820_v59 = vld [vmem:[%s13278_s27 + $0x248] sm:$0xff] }
 0x384   :  { %1937 = vmatprep.mubr.f32.mxu1 %v1760_v51  ;;  %v1819_v51 = vld [vmem:[%s13278_s27 + $0x240] sm:$0xff] }
 0x387   :  { %1938 = vmatmul.mubr.f32.gmra.mrb[12].mxu1 %v1759_v23  ;;  %v1822_v23 = vld [vmem:[%s13278_s27 + $0x258] sm:$0xff] }
 0x388   :  { %1942 = vmatprep.mubr.f32.mxu1 %v1762_v25  ;;  %v1821_v25 = vld [vmem:[%s13278_s27 + $0x250] sm:$0xff] }
 0x38b   :  { %1943 = vmatmul.mubr.f32.gmra.mrb[14].mxu1 %v1761_v34  ;;  %v1824_v34 = vld [vmem:[%s13278_s27 + $0x268] sm:$0xff] }
 0x38c   :  { %1947 = vmatprep.mubr.f32.mxu1 %v1764_v30  ;;  %v1823_v30 = vld [vmem:[%s13278_s27 + $0x260] sm:$0xff] }
 0x38f   :  { %1948 = vmatmul.mubr.f32.gmra.mrb[16].mxu1 %v1763_v2  ;;  %v1826_v2 = vld [vmem:[%s13278_s27 + $0x278] sm:$0xff] }
 0x390   :  { %1952 = vmatprep.mubr.f32.mxu1 %v1766_v41  ;;  %v1825_v41 = vld [vmem:[%s13278_s27 + $0x270] sm:$0xff] }
 0x393   :  { %1953 = vmatmul.mubr.f32.gmra.mrb[18].mxu1 %v1765_v40  ;;  %v1828_v40 = vld [vmem:[%s13278_s27 + $0x288] sm:$0xff] }
 0x394   :  { %1957 = vmatprep.mubr.f32.mxu1 %v1768_v27  ;;  %v1827_v27 = vld [vmem:[%s13278_s27 + $0x280] sm:$0xff] }
 0x397   :  { %1958 = vmatmul.mubr.f32.gmra.mrb[20].mxu1 %v1767_v20  ;;  %v1830_v20 = vld [vmem:[%s13278_s27 + $0x298] sm:$0xff] }
 0x398   :  { %1962 = vmatprep.mubr.f32.mxu1 %v1770_v46  ;;  %v1829_v46 = vld [vmem:[%s13278_s27 + $0x290] sm:$0xff] }
 0x39b   :  { %1963 = vmatmul.mubr.f32.gmra.mrb[22].mxu1 %v1769_v7  ;;  %v1832_v7 = vld [vmem:[%s13278_s27 + $0x2a8] sm:$0xff] }
 0x39c   :  { %1967 = vmatprep.mubr.f32.mxu1 %v1772_v61  ;;  %v1831_v61 = vld [vmem:[%s13278_s27 + $0x2a0] sm:$0xff] }
 0x39f   :  { %1968 = vmatmul.mubr.f32.gmra.mrb[24].mxu1 %v1771_v53  ;;  %v1834_v53 = vld [vmem:[%s13278_s27 + $0x2b8] sm:$0xff] }
 0x3a0   :  { %1972 = vmatprep.mubr.f32.mxu1 %v1774_v21  ;;  %v1833_v21 = vld [vmem:[%s13278_s27 + $0x2b0] sm:$0xff] }
 0x3a3   :  { %1973 = vmatmul.mubr.f32.gmra.mrb[26].mxu1 %v1773_v24  ;;  %v1836_v24 = vld [vmem:[%s13278_s27 + $0x2c8] sm:$0xff] }
 0x3a4   :  { %1977 = vmatprep.mubr.f32.mxu1 %v1776_v28  ;;  %v1835_v28 = vld [vmem:[%s13278_s27 + $0x2c0] sm:$0xff] }
 0x3a7   :  { %1978 = vmatmul.mubr.f32.gmra.mrb[28].mxu1 %v1775_v54  ;;  %v1838_v54 = vld [vmem:[%s13278_s27 + $0x2d8] sm:$0xff] }
 0x3a8   :  { %1982 = vmatprep.mubr.f32.mxu1 %v1778_v5  ;;  %v1837_v5 = vld [vmem:[%s13278_s27 + $0x2d0] sm:$0xff] }
 0x3ab   :  { %1983 = vmatmul.mubr.f32.gmra.mrb[30].mxu1 %v1777_v45  ;;  %v1840_v45 = vld [vmem:[%s13278_s27 + $0x2e8] sm:$0xff] }
 0x3ac   :  { %1987 = vmatprep.mubr.f32.mxu1 %v1780_v4  ;;  %v1839_v4 = vld [vmem:[%s13278_s27 + $0x2e0] sm:$0xff] }
 0x3af   :  { %1988 = vmatmul.mubr.f32.gmra.mrb[32].mxu1 %v1779_v55  ;;  %v1842_v55 = vld [vmem:[%s13278_s27 + $0x2f8] sm:$0xff] }
 0x3b0   :  { %1992 = vmatprep.mubr.f32.mxu1 %v1782_v14  ;;  %v1841_v14 = vld [vmem:[%s13278_s27 + $0x2f0] sm:$0xff]  ;;  %s13225_s27 = smov 32  }
 0x3b3   :  { %1993 = vmatmul.mubr.f32.gmra.mrb[34].mxu1 %v1781_v57 }
 0x3b4   :  { %1997 = vmatprep.mubr.f32.mxu1 %v1784_v33 }
 0x3b7   :  { %1998 = vmatmul.mubr.f32.gmra.mrb[36].mxu1 %v1783_v52 }
 0x3b8   :  { %2002 = vmatprep.mubr.f32.mxu1 %v1786_v17 }
 0x3bb   :  { %2003 = vmatmul.mubr.f32.gmra.mrb[38].mxu1 %v1785_v63 }
 0x3bc   :  { %2007 = vmatprep.mubr.f32.mxu1 %v1788_v10 }
 0x3bf   :  { %2008 = vmatmul.mubr.f32.gmra.mrb[40].mxu1 %v1787_v44 }
 0x3c0   :  { %2012 = vmatprep.mubr.f32.mxu1 %v1790_v43 }
 0x3c3   :  { %2013 = vmatmul.mubr.f32.gmra.mrb[42].mxu1 %v1789_v18 }
 0x3c4   :  { %2017 = vmatprep.mubr.f32.mxu1 %v1792_v0 }
 0x3c7   :  { %2018 = vmatmul.mubr.f32.gmra.mrb[44].mxu1 %v1791_v36 }
 0x3c8   :  { %2022 = vmatprep.mubr.f32.mxu1 %v1794_v58 }
 0x3cb   :  { %2023 = vmatmul.mubr.f32.gmra.mrb[46].mxu1 %v1793_v39 }
 0x3cc   :  { %2027 = vmatprep.mubr.f32.mxu1 %v1796_v48 }
 0x3cf   :  { %2028 = vmatmul.mubr.f32.gmra.mrb[48].mxu1 %v1795_v50 }
 0x3d0   :  { %2032 = vmatprep.mubr.f32.mxu1 %v1798_v37 }
 0x3d3   :  { %2033 = vmatmul.mubr.f32.gmra.mrb[50].mxu1 %v1797_v35 }
 0x3d4   :  { %2037 = vmatprep.mubr.f32.mxu1 %v1800_v19 }
 0x3d7   :  { %2038 = vmatmul.mubr.f32.gmra.mrb[52].mxu1 %v1799_v1 }
 0x3d8   :  { %2042 = vmatprep.mubr.f32.mxu1 %v1802_v29 }
 0x3db   :  { %2043 = vmatmul.mubr.f32.gmra.mrb[54].mxu1 %v1801_v22 }
 0x3dc   :  { %2047 = vmatprep.mubr.f32.mxu1 %v1804_v12 }
 0x3df   :  { %2048 = vmatmul.mubr.f32.gmra.mrb[56].mxu1 %v1803_v15 }
 0x3e0   :  { %2052 = vmatprep.mubr.f32.mxu1 %v1806_v13 }
 0x3e3   :  { %2053 = vmatmul.mubr.f32.gmra.mrb[58].mxu1 %v1805_v32 }
 0x3e4   :  { %2057 = vmatprep.mubr.f32.mxu1 %v1808_v56 }
 0x3e7   :  { %2058 = vmatmul.mubr.f32.gmra.mrb[60].mxu1 %v1807_v6 }
 0x3e8   :  { %2062 = vmatprep.mubr.f32.mxu1 %v1810_v62 }
 0x3eb   :  { %2063 = vmatmul.mubr.f32.gmra.mrb[62].mxu1 %v1809_v9 }
 0x3ec   :  { %2067 = vmatprep.mubr.f32.mxu1 %v1812_v49 }
 0x3ef   :  { %2068 = vmatmul.mubr.f32.gmra.mrb[64].mxu1 %v1811_v60 }
 0x3f0   :  { %2072 = vmatprep.mubr.f32.mxu1 %v1814_v11 }
 0x3f3   :  { %2073 = vmatmul.mubr.f32.gmra.mrb[66].mxu1 %v1813_v26 }
 0x3f4   :  { %2077 = vmatprep.mubr.f32.mxu1 %v1816_v8 }
 0x3f7   :  { %2078 = vmatmul.mubr.f32.gmra.mrb[68].mxu1 %v1815_v16 }
 0x3f8   :  { %2082 = vmatprep.mubr.f32.mxu1 %v1818_v3 }
 0x3fb   :  { %2083 = vmatmul.mubr.f32.gmra.mrb[70].mxu1 %v1817_v38 }
 0x3fc   :  { %2087 = vmatprep.mubr.f32.mxu1 %v1820_v59 }
 0x3ff   :  { %2088 = vmatmul.mubr.f32.gmra.mrb[72].mxu1 %v1819_v51 }
 0x400   :  { %2092 = vmatprep.mubr.f32.mxu1 %v1822_v23 }
 0x403   :  { %2093 = vmatmul.mubr.f32.gmra.mrb[74].mxu1 %v1821_v25 }
 0x404   :  { %2097 = vmatprep.mubr.f32.mxu1 %v1824_v34 }
 0x407   :  { %2098 = vmatmul.mubr.f32.gmra.mrb[76].mxu1 %v1823_v30 }
 0x408   :  { %2102 = vmatprep.mubr.f32.mxu1 %v1826_v2  ;;  %v2309_v2 = vld [vmem:[%s13289_s1] sm:$0xff] }
 0x40b   :  { %2103 = vmatmul.mubr.f32.gmra.mrb[78].mxu1 %v1825_v41  ;;  %v2310_v41 = vld [vmem:[%s13289_s1 + $0x8] sm:$0xff] }
 0x40c   :  { %2107 = vmatprep.mubr.f32.mxu1 %v1828_v40 }
 0x40f   :  { %2108 = vmatmul.mubr.f32.gmra.mrb[80].mxu1 %v1827_v27  ;;  %v8532_v27 = vpack.c.bf16 %v2310_v41, %v2309_v2 }
 0x410   :  { %2112 = vmatprep.mubr.f32.mxu1 %v1830_v20 }
 0x411   :  { %8533 = vmatprep.subr.bf16.mxu0 %v8532_v27 }
 0x412   :  { %8535 = vmatpush3.bf16.msra.mxu0 %v8532_v27 }
 0x413   :  { %2113 = vmatmul.mubr.f32.gmra.mrb[82].mxu1 %v1829_v46 }
 0x414   :  { %2117 = vmatprep.mubr.f32.mxu1 %v1832_v7 }
 0x417   :  { %2118 = vmatmul.mubr.f32.gmra.mrb[84].mxu1 %v1831_v61 }
 0x418   :  { %2122 = vmatprep.mubr.f32.mxu1 %v1834_v53 }
 0x41b   :  { %2123 = vmatmul.mubr.f32.gmra.mrb[86].mxu1 %v1833_v21  ;;  %v2311_v21 = vld [vmem:[%s13289_s1 + $0x10] sm:$0xff] }
 0x41c   :  { %2127 = vmatprep.mubr.f32.mxu1 %v1836_v24  ;;  %v2312_v24 = vld [vmem:[%s13289_s1 + $0x18] sm:$0xff] }
 0x41f   :  { %2128 = vmatmul.mubr.f32.gmra.mrb[88].mxu1 %v1835_v28 }
 0x420   :  { %2132 = vmatprep.mubr.f32.mxu1 %v1838_v54  ;;  %v8536_v54 = vpack.c.bf16 %v2312_v24, %v2311_v21 }
 0x422   :  { %8537 = vmatprep.subr.bf16.mxu0 %v8536_v54 }
 0x423   :  { %2133 = vmatmul.mubr.f32.gmra.mrb[90].mxu1 %v1837_v5  ;;  %8539 = vmatpush3.bf16.msra.mxu0 %v8536_v54 }
 0x424   :  { %2137 = vmatprep.mubr.f32.mxu1 %v1840_v45 }
 0x427   :  { %2138 = vmatmul.mubr.f32.gmra.mrb[92].mxu1 %v1839_v4 }
 0x428   :  { %2142 = vmatprep.mubr.f32.mxu1 %v1842_v55  ;;  %v2313_v55 = vld [vmem:[%s13289_s1 + $0x20] sm:$0xff] }
 0x42b   :  { %2143 = vmatmul.mubr.f32.gmra.mrb[94].mxu1 %v1841_v14  ;;  %v2314_v14 = vld [vmem:[%s13289_s1 + $0x28] sm:$0xff] }
 0x442   :  { %v11036_v57 = vpop.f32.mrb[0].mxu1 }
 0x443   :  { %v1911_v33 = vpop.f32.mrb[1].mxu1 }
 0x446   :  { %v11038_v52 = vpop.f32.mrb[2].mxu1 }
 0x447   :  { %v1916_v17 = vpop.f32.mrb[3].mxu1 }
 0x448   :  { %v8540_v17 = vpack.c.bf16 %v2314_v14, %v2313_v55 }
 0x44a   :  { %v11040_v63 = vpop.f32.mrb[4].mxu1  ;;  %8541 = vmatprep.subr.bf16.mxu0 %v8540_v17 }
 0x44b   :  { %v1921_v10 = vpop.f32.mrb[5].mxu1  ;;  %8543 = vmatpush3.bf16.msra.mxu0 %v8540_v17 }
 0x44e   :  { %v11042_v44 = vpop.f32.mrb[6].mxu1 }
 0x44f   :  { %v1926_v43 = vpop.f32.mrb[7].mxu1 }
 0x450   :  { %v2315_v43 = vld [vmem:[%s13289_s1 + $0x30] sm:$0xff] }
 0x452   :  { %v11044_v18 = vpop.f32.mrb[8].mxu1 }
 0x453   :  { %v1931_v0 = vpop.f32.mrb[9].mxu1 }
 0x454   :  { %v2316_v0 = vld [vmem:[%s13289_s1 + $0x38] sm:$0xff] }
 0x456   :  { %v11046_v36 = vpop.f32.mrb[10].mxu1 }
 0x457   :  { %v1936_v58 = vpop.f32.mrb[11].mxu1 }
 0x45a   :  { %v11048_v39 = vpop.f32.mrb[12].mxu1 }
 0x45b   :  { %v1941_v48 = vpop.f32.mrb[13].mxu1 }
 0x45c   :  { %v8544_v48 = vpack.c.bf16 %v2316_v0, %v2315_v43 }
 0x45e   :  { %v11050_v50 = vpop.f32.mrb[14].mxu1  ;;  %8545 = vmatprep.subr.bf16.mxu0 %v8544_v48 }
 0x45f   :  { %v1946_v37 = vpop.f32.mrb[15].mxu1  ;;  %8547 = vmatpush3.bf16.msra.mxu0 %v8544_v48 }
 0x462   :  { %v11052_v35 = vpop.f32.mrb[16].mxu1 }
 0x463   :  { %v1951_v19 = vpop.f32.mrb[17].mxu1 }
 0x464   :  { %v2317_v19 = vld [vmem:[%s13289_s1 + $0x40] sm:$0xff] }
 0x466   :  { %v11054_v1 = vpop.f32.mrb[18].mxu1 }
 0x467   :  { %v1956_v29 = vpop.f32.mrb[19].mxu1 }
 0x468   :  { %v2318_v29 = vld [vmem:[%s13289_s1 + $0x48] sm:$0xff] }
 0x46a   :  { %v11056_v22 = vpop.f32.mrb[20].mxu1 }
 0x46b   :  { %v1961_v12 = vpop.f32.mrb[21].mxu1 }
 0x46e   :  { %v11058_v15 = vpop.f32.mrb[22].mxu1 }
 0x46f   :  { %v1966_v13 = vpop.f32.mrb[23].mxu1 }
 0x470   :  { %v8548_v13 = vpack.c.bf16 %v2318_v29, %v2317_v19 }
 0x472   :  { %v11060_v32 = vpop.f32.mrb[24].mxu1  ;;  %8549 = vmatprep.subr.bf16.mxu0 %v8548_v13 }
 0x473   :  { %v1971_v56 = vpop.f32.mrb[25].mxu1  ;;  %8551 = vmatpush3.bf16.msra.mxu0 %v8548_v13 }
 0x476   :  { %v11062_v6 = vpop.f32.mrb[26].mxu1 }
 0x477   :  { %v1976_v62 = vpop.f32.mrb[27].mxu1 }
 0x478   :  { %v2319_v62 = vld [vmem:[%s13289_s1 + $0x50] sm:$0xff] }
 0x47a   :  { %v11064_v9 = vpop.f32.mrb[28].mxu1 }
 0x47b   :  { %v1981_v49 = vpop.f32.mrb[29].mxu1 }
 0x47c   :  { %v2320_v49 = vld [vmem:[%s13289_s1 + $0x58] sm:$0xff] }
 0x47e   :  { %v11066_v60 = vpop.f32.mrb[30].mxu1 }
 0x47f   :  { %v1986_v11 = vpop.f32.mrb[31].mxu1 }
 0x482   :  { %v1989_v26 = vpop.f32.mrb[32].mxu1 }
 0x483   :  { %2164 = vrot.lane.b32.xlu0 %v1989_v26, %s13225_s27  ;;  %v1991_v8 = vpop.f32.mrb[33].mxu1  ;;  %v8552_v26 = vpack.c.bf16 %v2320_v49, %v2319_v62 }
 0x485   :  { %8553 = vmatprep.subr.bf16.mxu0 %v8552_v26 }
 0x486   :  { %v1994_v16 = vpop.f32.mrb[34].mxu1  ;;  %8555 = vmatpush3.bf16.msra.mxu0 %v8552_v26 }
 0x487   :  { %2166 = vrot.lane.b32.xlu1 %v1994_v16, %s13225_s27  ;;  %v1996_v3 = vpop.f32.mrb[35].mxu1 }
 0x48a   :  { %v1999_v38 = vpop.f32.mrb[36].mxu1 }
 0x48b   :  { %2168 = vrot.lane.b32.xlu0 %v1999_v38, %s13225_s27  ;;  %v2001_v59 = vpop.f32.mrb[37].mxu1 }
 0x48e   :  { %v2004_v51 = vpop.f32.mrb[38].mxu1 }
 0x48f   :  { %2170 = vrot.lane.b32.xlu1 %v2004_v51, %s13225_s27  ;;  %v2006_v23 = vpop.f32.mrb[39].mxu1 }
 0x492   :  { %v2009_v25 = vpop.f32.mrb[40].mxu1 }
 0x493   :  { %2172 = vrot.lane.b32.xlu0 %v2009_v25, %s13225_s27  ;;  %v2011_v34 = vpop.f32.mrb[41].mxu1 }
 0x496   :  { %v2014_v30 = vpop.f32.mrb[42].mxu1 }
 0x497   :  { %2174 = vrot.lane.b32.xlu1 %v2014_v30, %s13225_s27  ;;  %v2016_v40 = vpop.f32.mrb[43].mxu1 }
 0x49a   :  { %v2019_v20 = vpop.f32.mrb[44].mxu1 }
 0x49b   :  { %2176 = vrot.lane.b32.xlu0 %v2019_v20, %s13225_s27  ;;  %v2021_v46 = vpop.f32.mrb[45].mxu1 }
 0x49e   :  { %v2024_v7 = vpop.f32.mrb[46].mxu1 }
 0x49f   :  { %2178 = vrot.lane.b32.xlu1 %v2024_v7, %s13225_s27  ;;  %v2026_v61 = vpop.f32.mrb[47].mxu1 }
 0x4a2   :  { %v2029_v53 = vpop.f32.mrb[48].mxu1 }
 0x4a3   :  { %2180 = vrot.lane.b32.xlu0 %v2029_v53, %s13225_s27  ;;  %v2031_v28 = vpop.f32.mrb[49].mxu1 }
 0x4a6   :  { %v2034_v5 = vpop.f32.mrb[50].mxu1 }
 0x4a7   :  { %2182 = vrot.lane.b32.xlu1 %v2034_v5, %s13225_s27  ;;  %v2036_v45 = vpop.f32.mrb[51].mxu1 }
 0x4aa   :  { %v2039_v4 = vpop.f32.mrb[52].mxu1 }
 0x4ab   :  { %2184 = vrot.lane.b32.xlu0 %v2039_v4, %s13225_s27  ;;  %v2041_v33 = vpop.f32.mrb[53].mxu1 }
 0x4ae   :  { %v2044_v10 = vpop.f32.mrb[54].mxu1 }
 0x4af   :  { %2186 = vrot.lane.b32.xlu1 %v2044_v10, %s13225_s27  ;;  %v2046_v58 = vpop.f32.mrb[55].mxu1 }
 0x4b2   :  { %v2049_v37 = vpop.f32.mrb[56].mxu1 }
 0x4b3   :  { %2188 = vrot.lane.b32.xlu0 %v2049_v37, %s13225_s27  ;;  %v2051_v12 = vpop.f32.mrb[57].mxu1 }
 0x4b6   :  { %v2054_v56 = vpop.f32.mrb[58].mxu1 }
 0x4b7   :  { %2190 = vrot.lane.b32.xlu1 %v2054_v56, %s13225_s27  ;;  %v2056_v11 = vpop.f32.mrb[59].mxu1 }
 0x4ba   :  { %v2059_v8 = vpop.f32.mrb[60].mxu1 }
 0x4bb   :  { %2192 = vrot.lane.b32.xlu0 %v2059_v8, %s13225_s27  ;;  %v2061_v16 = vpop.f32.mrb[61].mxu1 }
 0x4be   :  { %v2064_v3 = vpop.f32.mrb[62].mxu1 }
 0x4bf   :  { %2194 = vrot.lane.b32.xlu1 %v2064_v3, %s13225_s27  ;;  %v2066_v38 = vpop.f32.mrb[63].mxu1 }
 0x4c2   :  { %v2069_v59 = vpop.f32.mrb[64].mxu1 }
 0x4c3   :  { %2228 = vrot.lane.b32.xlu0 %v2069_v59, %s13223_s26  ;;  %v2071_v51 = vpop.f32.mrb[65].mxu1 }
 0x4c6   :  { %v2074_v23 = vpop.f32.mrb[66].mxu1 }
 0x4c7   :  { %2230 = vrot.lane.b32.xlu1 %v2074_v23, %s13223_s26  ;;  %v2076_v25 = vpop.f32.mrb[67].mxu1 }
 0x4ca   :  { %v2079_v34 = vpop.f32.mrb[68].mxu1 }
 0x4cb   :  { %2232 = vrot.lane.b32.xlu0 %v2079_v34, %s13223_s26  ;;  %v2081_v30 = vpop.f32.mrb[69].mxu1 }
 0x4ce   :  { %v2084_v2 = vpop.f32.mrb[70].mxu1 }
 0x4cf   :  { %2234 = vrot.lane.b32.xlu1 %v2084_v2, %s13223_s26  ;;  %v2086_v41 = vpop.f32.mrb[71].mxu1 }
 0x4d2   :  { %v2089_v40 = vpop.f32.mrb[72].mxu1 }
 0x4d3   :  { %2236 = vrot.lane.b32.xlu0 %v2089_v40, %s13223_s26  ;;  %v2091_v27 = vpop.f32.mrb[73].mxu1 }
 0x4d6   :  { %v2094_v20 = vpop.f32.mrb[74].mxu1 }
 0x4d7   :  { %2238 = vrot.lane.b32.xlu1 %v2094_v20, %s13223_s26  ;;  %v2096_v46 = vpop.f32.mrb[75].mxu1 }
 0x4da   :  { %v2099_v7 = vpop.f32.mrb[76].mxu1 }
 0x4db   :  { %2240 = vrot.lane.b32.xlu0 %v2099_v7, %s13223_s26  ;;  %v2101_v61 = vpop.f32.mrb[77].mxu1 }
 0x4de   :  { %v2104_v53 = vpop.f32.mrb[78].mxu1 }
 0x4df   :  { %2242 = vrot.lane.b32.xlu1 %v2104_v53, %s13223_s26  ;;  %v2106_v21 = vpop.f32.mrb[79].mxu1 }
 0x4e2   :  { %v2109_v24 = vpop.f32.mrb[80].mxu1 }
 0x4e3   :  { %2244 = vrot.lane.b32.xlu0 %v2109_v24, %s13223_s26  ;;  %v2111_v28 = vpop.f32.mrb[81].mxu1 }
 0x4e6   :  { %v2114_v54 = vpop.f32.mrb[82].mxu1 }
 0x4e7   :  { %2246 = vrot.lane.b32.xlu1 %v2114_v54, %s13223_s26  ;;  %v2116_v5 = vpop.f32.mrb[83].mxu1 }
 0x4ea   :  { %v2119_v45 = vpop.f32.mrb[84].mxu1 }
 0x4eb   :  { %2248 = vrot.lane.b32.xlu0 %v2119_v45, %s13223_s26  ;;  %v2121_v4 = vpop.f32.mrb[85].mxu1 }
 0x4ee   :  { %v2124_v55 = vpop.f32.mrb[86].mxu1 }
 0x4ef   :  { %2250 = vrot.lane.b32.xlu1 %v2124_v55, %s13223_s26  ;;  %v2126_v14 = vpop.f32.mrb[87].mxu1 }
 0x4f2   :  { %v2129_v33 = vpop.f32.mrb[88].mxu1 }
 0x4f3   :  { %2252 = vrot.lane.b32.xlu0 %v2129_v33, %s13223_s26  ;;  %v2131_v17 = vpop.f32.mrb[89].mxu1 }
 0x4f5   :  { %v2165_v19 = vpop.permute.xlu0 %2164 }
 0x4f6   :  { %v2134_v10 = vpop.f32.mrb[90].mxu1  ;;  %v2276_v23 = vsel %vm450_vm4, %v11036_v57, %v2165_v19 }
 0x4f7   :  { %2254 = vrot.lane.b32.xlu1 %v2134_v10, %s13223_s26  ;;  %v2136_v43 = vpop.f32.mrb[91].mxu1 }
 0x4f9   :  { %v2167_v29 = vpop.permute.xlu1 %2166 }
 0x4fa   :  { %v2139_v0 = vpop.f32.mrb[92].mxu1  ;;  %v2277_v2 = vsel %vm450_vm4, %v11038_v52, %v2167_v29 }
 0x4fb   :  { %2256 = vrot.lane.b32.xlu0 %v2139_v0, %s13223_s26  ;;  %v2141_v58 = vpop.f32.mrb[93].mxu1 }
 0x4fd   :  { %v2169_v12 = vpop.permute.xlu0 %2168 }
 0x4fe   :  { %v2144_v48 = vpop.f32.mrb[94].mxu1  ;;  %v2278_v27 = vsel %vm450_vm4, %v11040_v63, %v2169_v12 }
 0x4ff   :  { %2258 = vrot.lane.b32.xlu1 %v2144_v48, %s13223_s26  ;;  %v2146_v37 = vpop.f32.mrb[95].mxu1  ;;  %s13298_s26 = sld [smem:[#allocation30_spill]] }
 0x501   :  { %v2171_v13 = vpop.permute.xlu1 %2170 }
 0x502   :  { %v2279_v46 = vsel %vm450_vm4, %v11042_v44, %v2171_v13 }
 0x505   :  { %v2173_v56 = vpop.permute.xlu0 %2172 }
 0x506   :  { %v2280_v52 = vsel %vm450_vm4, %v11044_v18, %v2173_v56 }
 0x509   :  { %v2175_v62 = vpop.permute.xlu1 %2174 }
 0x50a   :  { %v2281_v63 = vsel %vm450_vm4, %v11046_v36, %v2175_v62 }
 0x50d   :  { %v2177_v49 = vpop.permute.xlu0 %2176 }
 0x50e   :  { %v2282_v44 = vsel %vm450_vm4, %v11048_v39, %v2177_v49 }
 0x511   :  { %v2179_v11 = vpop.permute.xlu1 %2178 }
 0x512   :  { %v2283_v18 = vsel %vm450_vm4, %v11050_v50, %v2179_v11  ;;  %v11203_v11 = vld [vmem:[%s13247_s2 + $0x1] ss:$0 sm:$0xff] }
 0x515   :  { %v2181_v26 = vpop.permute.xlu0 %2180 }
 0x516   :  { %v2284_v36 = vsel %vm450_vm4, %v11052_v35, %v2181_v26 }
 0x519   :  { %v2183_v8 = vpop.permute.xlu1 %2182 }
 0x51a   :  { %v2285_v39 = vsel %vm450_vm4, %v11054_v1, %v2183_v8 }
 0x51d   :  { %v2185_v16 = vpop.permute.xlu0 %2184 }
 0x51e   :  { %v2286_v50 = vsel %vm450_vm4, %v11056_v22, %v2185_v16 }
 0x521   :  { %v2187_v3 = vpop.permute.xlu1 %2186 }
 0x522   :  { %v2287_v35 = vsel %vm450_vm4, %v11058_v15, %v2187_v3 }
 0x525   :  { %v2189_v38 = vpop.permute.xlu0 %2188 }
 0x526   :  { %v2288_v1 = vsel %vm450_vm4, %v11060_v32, %v2189_v38 }
 0x529   :  { %v2191_v59 = vpop.permute.xlu1 %2190 }
 0x52a   :  { %v2289_v22 = vsel %vm450_vm4, %v11062_v6, %v2191_v59 }
 0x52d   :  { %v2193_v51 = vpop.permute.xlu0 %2192 }
 0x52e   :  { %v2290_v15 = vsel %vm450_vm4, %v11064_v9, %v2193_v51 }
 0x531   :  { %v2195_v25 = vpop.permute.xlu1 %2194 }
 0x532   :  { %v2291_v32 = vsel %vm450_vm4, %v11066_v60, %v2195_v25 }
 0x535   :  { %v2229_v34 = vpop.permute.xlu0 %2228 }
 0x536   :  { %v2293_v30 = vsel %vm2292_vm11, %v2276_v23, %v2229_v34 }
 0x537   :  { %7928 = vmatprep.mubr.msk.f32.mxu0 %vm2329_vm12, %v2293_v30 }
 0x539   :  { %v2231_v41 = vpop.permute.xlu1 %2230 }
 0x53a   :  { %v2294_v40 = vsel %vm2292_vm11, %v2277_v2, %v2231_v41 }
 0x53b   :  { %7929 = vmatmul.mubr.msk.f32.vlgmr.msra.gmra.mrb[32].mxu0 %vm2329_vm12, %v2294_v40 }
 0x53d   :  { %v2233_v20 = vpop.permute.xlu0 %2232 }
 0x53e   :  { %v2295_v57 = vsel %vm2292_vm11, %v2278_v27, %v2233_v20 }
 0x53f   :  { %7931 = vmatprep.mubr.msk.f32.mxu0 %vm2329_vm12, %v2295_v57 }
 0x541   :  { %v2235_v7 = vpop.permute.xlu1 %2234 }
 0x542   :  { %v2296_v61 = vsel %vm2292_vm11, %v2279_v46, %v2235_v7 }
 0x543   :  { %7932 = vmatmul.mubr.msk.f32.gmra.mrb[34].mxu0 %vm2329_vm12, %v2296_v61 }
 0x545   :  { %v2237_v53 = vpop.permute.xlu0 %2236 }
 0x546   :  { %v2297_v21 = vsel %vm2292_vm11, %v2280_v52, %v2237_v53 }
 0x547   :  { %7934 = vmatprep.mubr.msk.f32.mxu0 %vm2329_vm12, %v2297_v21 }
 0x549   :  { %v2239_v24 = vpop.permute.xlu1 %2238 }
 0x54a   :  { %v2298_v28 = vsel %vm2292_vm11, %v2281_v63, %v2239_v24 }
 0x54b   :  { %7935 = vmatmul.mubr.msk.f32.gmra.mrb[36].mxu0 %vm2329_vm12, %v2298_v28 }
 0x54d   :  { %v2241_v54 = vpop.permute.xlu0 %2240 }
 0x54e   :  { %v2299_v5 = vsel %vm2292_vm11, %v2282_v44, %v2241_v54 }
 0x54f   :  { %7937 = vmatprep.mubr.msk.f32.mxu0 %vm2329_vm12, %v2299_v5 }
 0x551   :  { %v2243_v45 = vpop.permute.xlu1 %2242 }
 0x552   :  { %v2300_v4 = vsel %vm2292_vm11, %v2283_v18, %v2243_v45 }
 0x553   :  { %7938 = vmatmul.mubr.msk.f32.gmra.mrb[38].mxu0 %vm2329_vm12, %v2300_v4 }
 0x555   :  { %v2245_v55 = vpop.permute.xlu0 %2244 }
 0x556   :  { %v2301_v14 = vsel %vm2292_vm11, %v2284_v36, %v2245_v55 }
 0x557   :  { %7940 = vmatprep.mubr.msk.f32.mxu0 %vm2329_vm12, %v2301_v14 }
 0x559   :  { %v2247_v33 = vpop.permute.xlu1 %2246 }
 0x55a   :  { %v2302_v17 = vsel %vm2292_vm11, %v2285_v39, %v2247_v33 }
 0x55b   :  { %7941 = vmatmul.mubr.msk.f32.gmra.mrb[40].mxu0 %vm2329_vm12, %v2302_v17 }
 0x55d   :  { %v2249_v10 = vpop.permute.xlu0 %2248 }
 0x55e   :  { %v2303_v43 = vsel %vm2292_vm11, %v2286_v50, %v2249_v10 }
 0x55f   :  { %7943 = vmatprep.mubr.msk.f32.mxu0 %vm2329_vm12, %v2303_v43 }
 0x561   :  { %v2251_v0 = vpop.permute.xlu1 %2250 }
 0x562   :  { %v2304_v58 = vsel %vm2292_vm11, %v2287_v35, %v2251_v0 }
 0x563   :  { %7944 = vmatmul.mubr.msk.f32.gmra.mrb[42].mxu0 %vm2329_vm12, %v2304_v58 }
 0x565   :  { %v2253_v48 = vpop.permute.xlu0 %2252 }
 0x566   :  { %v2305_v37 = vsel %vm2292_vm11, %v2288_v1, %v2253_v48 }
 0x567   :  { %7946 = vmatprep.mubr.msk.f32.mxu0 %vm2329_vm12, %v2305_v37 }
 0x569   :  { %v2255_v19 = vpop.permute.xlu1 %2254 }
 0x56a   :  { %v2306_v29 = vsel %vm2292_vm11, %v2289_v22, %v2255_v19 }
 0x56b   :  { %7947 = vmatmul.mubr.msk.f32.gmra.mrb[44].mxu0 %vm2329_vm12, %v2306_v29 }
 0x56d   :  { %v2257_v12 = vpop.permute.xlu0 %2256 }
 0x56e   :  { %v2307_v13 = vsel %vm2292_vm11, %v2290_v15, %v2257_v12 }
 0x56f   :  { %7949 = vmatprep.mubr.msk.f32.mxu0 %vm2329_vm12, %v2307_v13 }
 0x571   :  { %v2259_v56 = vpop.permute.xlu1 %2258 }
 0x572   :  { %v2308_v62 = vsel %vm2292_vm11, %v2291_v32, %v2259_v56 }
 0x573   :  { %7950 = vmatmul.mubr.msk.f32.gmra.mrb[46].mxu0 %vm2329_vm12, %v2308_v62 }
 0x60e   :  { %v7930_v6 = vpop.f32.mrb[32].mxu0 }
 0x60f   :  { %v2444_v49 = vpop.f32.mrb[33].mxu0  ;;  %v11206_v9 = vadd.f32 %v7930_v6, %v11203_v11 }
 0x610   :  { %v11209_v26 = vadd.f32 %v11203_v11, %v2444_v49 }
 0x611   :  { %v2528_v3 = vsel %vm450_vm4, %v11206_v9, 0.0 }
 0x612   :  { %v2527_v38 = vsel %vm450_vm4, %v11209_v26, 0.0 }
 0x613   :  { %v2529_v51 = vadd.f32 %v2528_v3, %v2527_v38 }
 0x616   :  { %v7933_v8 = vpop.f32.mrb[34].mxu0 }
 0x617   :  { %v2454_v60 = vpop.f32.mrb[35].mxu0  ;;  %v11221_v23 = vadd.f32 %v7933_v8, %v11203_v11 }
 0x618   :  { %v11212_v16 = vadd.f32 %v11203_v11, %v2454_v60 }
 0x619   :  { %v2532_v41 = vsel %vm450_vm4, %v11221_v23, 0.0 }
 0x61a   :  { %v2530_v59 = vsel %vm450_vm4, %v11212_v16, 0.0 }
 0x61b   :  { %v2531_v34 = vadd.f32 %v2530_v59, %v2529_v51 }
 0x61d   :  { %v2533_v27 = vadd.f32 %v2532_v41, %v2531_v34 }
 0x61e   :  { %v7936_v25 = vpop.f32.mrb[36].mxu0 }
 0x61f   :  { %v2464_v30 = vpop.f32.mrb[37].mxu0  ;;  %v11231_v20 = vadd.f32 %v7936_v25, %v11203_v11 }
 0x620   :  { %v11224_v2 = vadd.f32 %v11203_v11, %v2464_v30 }
 0x621   :  { %v2536_v61 = vsel %vm450_vm4, %v11231_v20, 0.0 }
 0x622   :  { %v2534_v40 = vsel %vm450_vm4, %v11224_v2, 0.0 }
 0x623   :  { %v2535_v57 = vadd.f32 %v2534_v40, %v2533_v27 }
 0x625   :  { %v2537_v21 = vadd.f32 %v2536_v61, %v2535_v57 }
 0x626   :  { %v7939_v46 = vpop.f32.mrb[38].mxu0 }
 0x627   :  { %v2474_v7 = vpop.f32.mrb[39].mxu0  ;;  %v11236_v52 = vadd.f32 %v7939_v46, %v11203_v11 }
 0x628   :  { %v11239_v53 = vadd.f32 %v11203_v11, %v2474_v7 }
 0x629   :  { %v2540_v28 = vsel %vm450_vm4, %v11236_v52, 0.0 }
 0x62a   :  { %v2538_v63 = vsel %vm450_vm4, %v11239_v53, 0.0 }
 0x62b   :  { %v2539_v24 = vadd.f32 %v2538_v63, %v2537_v21 }
 0x62d   :  { %v2541_v44 = vadd.f32 %v2540_v28, %v2539_v24 }
 0x62e   :  { %v7942_v54 = vpop.f32.mrb[40].mxu0 }
 0x62f   :  { %v2542_v5 = vrot.slane %v2541_v44, 4  ;;  %v2484_v18 = vpop.f32.mrb[41].mxu0  ;;  %v11246_v55 = vadd.f32 %v7942_v54, %v11203_v11 }
 0x630   :  { %v11249_v14 = vadd.f32 %v11203_v11, %v2484_v18 }
 0x631   :  { %v2543_v45 = vadd.f32 %v2542_v5, %v2541_v44  ;;  %v2891_v43 = vsel %vm450_vm4, %v11246_v55, 0.0 }
 0x632   :  { %v2890_v35 = vsel %vm450_vm4, %v11249_v14, 0.0 }
 0x633   :  { %v2544_v4 = vrot.slane %v2543_v45, 2  ;;  %v2892_v58 = vadd.f32 %v2891_v43, %v2890_v35 }
 0x635   :  { %v2545_v36 = vadd.f32 %v2544_v4, %v2543_v45 }
 0x636   :  { %v7945_v39 = vpop.f32.mrb[42].mxu0 }
 0x637   :  { %v2546_v33 = vrot.slane %v2545_v36, 1  ;;  %v2494_v17 = vpop.f32.mrb[43].mxu0  ;;  %v11263_v1 = vadd.f32 %v7945_v39, %v11203_v11 }
 0x638   :  { %v11252_v50 = vadd.f32 %v11203_v11, %v2494_v17 }
 0x639   :  { %v2547_v10 = vadd.f32 %v2546_v33, %v2545_v36  ;;  %v2895_v29 = vsel %vm450_vm4, %v11263_v1, 0.0 }
 0x63a   :  { %v2893_v0 = vsel %vm450_vm4, %v11252_v50, 0.0 }
 0x63b   :  { %2549 = vrot.lane.b32.xlu0 %v2547_v10, %s13221_s6  ;;  %2552 = vrot.lane.b32.xlu1 %v2547_v10, %s13290_s5  ;;  %v2894_v37 = vadd.f32 %v2893_v0, %v2892_v58 }
 0x63d   :  { %v2896_v12 = vadd.f32 %v2895_v29, %v2894_v37 }
 0x63e   :  { %v7948_v48 = vpop.f32.mrb[44].mxu0 }
 0x63f   :  { %v2504_v22 = vpop.f32.mrb[45].mxu0  ;;  %2556 = vrot.lane.b32.xlu0 %v2547_v10, %s13291_s0  ;;  %2559 = vrot.lane.b32.xlu1 %v2547_v10, %s13292_s7  ;;  %v11275_v13 = vadd.f32 %v7948_v48, %v11203_v11 }
 0x640   :  { %v11268_v19 = vadd.f32 %v11203_v11, %v2504_v22 }
 0x641   :  { %v2899_v6 = vsel %vm450_vm4, %v11275_v13, 0.0 }
 0x642   :  { %v2897_v15 = vsel %vm450_vm4, %v11268_v19, 0.0 }
 0x643   :  { %v2898_v32 = vadd.f32 %v2897_v15, %v2896_v12 }
 0x645   :  { %v2900_v60 = vadd.f32 %v2899_v6, %v2898_v32 }
 0x646   :  { %v7951_v56 = vpop.f32.mrb[46].mxu0 }
 0x647   :  { %v2514_v62 = vpop.f32.mrb[47].mxu0  ;;  %v11280_v49 = vadd.f32 %v7951_v56, %v11203_v11 }
 0x648   :  { %v11283_v8 = vadd.f32 %v11203_v11, %v2514_v62 }
 0x649   :  { %v2903_v59 = vsel %vm450_vm4, %v11280_v49, 0.0 }
 0x64a   :  { %v2901_v3 = vsel %vm450_vm4, %v11283_v8, 0.0 }
 0x64b   :  { %v2902_v38 = vadd.f32 %v2901_v3, %v2900_v60 }
 0x64d   :  { %v2904_v51 = vadd.f32 %v2903_v59, %v2902_v38 }
 0x64f   :  { %v2905_v25 = vrot.slane %v2904_v51, 4 }
 0x651   :  { %v2906_v34 = vadd.f32 %v2905_v25, %v2904_v51 }
 0x653   :  { %v2907_v30 = vrot.slane %v2906_v34, 2 }
 0x655   :  { %v2908_v41 = vadd.f32 %v2907_v30, %v2906_v34 }
 0x657   :  { %v2909_v40 = vrot.slane %v2908_v41, 1 }
 0x659   :  { %v2910_v27 = vadd.f32 %v2909_v40, %v2908_v41 }
 0x65b   :  { %2915 = vrot.lane.b32.xlu1 %v2910_v27, %s13290_s5  ;;  %2912 = vrot.lane.b32.xlu0 %v2910_v27, %s13221_s6 }
 0x65f   :  { %2922 = vrot.lane.b32.xlu1 %v2910_v27, %s13292_s7  ;;  %2919 = vrot.lane.b32.xlu0 %v2910_v27, %s13291_s0 }
 0x6ad   :  { %v2550_v11 = vpop.permute.xlu0 %2549  ;;  %v2553_v57 = vpop.permute.xlu1 %2552 }
 0x6ae   :  { %v2555_v61 = vsel %vm495_vm6, %v2550_v11, %v2553_v57 }
 0x6b1   :  { %v2557_v46 = vpop.permute.xlu0 %2556  ;;  %v2560_v7 = vpop.permute.xlu1 %2559 }
 0x6b2   :  { %v2562_v21 = vsel %vm503_vm5, %v2557_v46, %v2560_v7 }
 0x6b3   :  { %v2563_v24 = vsel %vm9661_vm7, %v2555_v61, %v2562_v21 }
 0x6b4   :  { %v2564_v28 = vadd.f32 %v2563_v24, %v2547_v10 }
 0x6b6   :  { %v2565_v44 = vmul.f32 0.0078125, %v2564_v28 }
 0x6b8   :  { %v2569_v54 = vrot.slane %v2565_v44, %v9669_v47 }
 0x6ba   :  { %v11299_v5 = vsub.f32 %v11209_v26, %v2569_v54  ;;  %v11302_v18 = vsub.f32 %v11206_v9, %v2569_v54  ;;  %v11305_v45 = vsub.f32 %v11212_v16, %v2569_v54  ;;  %v11308_v4 = vsub.f32 %v11221_v23, %v2569_v54 }
 0x6bb   :  { %v11311_v36 = vsub.f32 %v11224_v2, %v2569_v54  ;;  %v11320_v9 = vsub.f32 %v11231_v20, %v2569_v54  ;;  %v11327_v10 = vsub.f32 %v11239_v53, %v2569_v54  ;;  %v11333_v20 = vsub.f32 %v11236_v52, %v2569_v54 }
 0x6bc   :  { %v2578_v39 = vmul.f32 %v11299_v5, %v11299_v5  ;;  %v2579_v33 = vmul.f32 %v11302_v18, %v11302_v18  ;;  %v2580_v26 = vmul.f32 %v11305_v45, %v11305_v45  ;;  %v2581_v16 = vmul.f32 %v11308_v4, %v11308_v4 }
 0x6bd   :  { %v2582_v43 = vmul.f32 %v11311_v36, %v11311_v36  ;;  %v2583_v58 = vmul.f32 %v11320_v9, %v11320_v9  ;;  %v2584_v22 = vmul.f32 %v11327_v10, %v11327_v10  ;;  %v2585_v15 = vmul.f32 %v11333_v20, %v11333_v20 }
 0x6be   :  { %v2586_v23 = vsel %vm450_vm4, %v2578_v39, 0.0  ;;  %v2587_v2 = vsel %vm450_vm4, %v2579_v33, 0.0  ;;  %v2589_v35 = vsel %vm450_vm4, %v2580_v26, 0.0  ;;  %v2591_v48 = vsel %vm450_vm4, %v2581_v16, 0.0 }
 0x6bf   :  { %v2588_v17 = vadd.f32 %v2587_v2, %v2586_v23  ;;  %v2593_v53 = vsel %vm450_vm4, %v2582_v43, 0.0  ;;  %v2595_v12 = vsel %vm450_vm4, %v2583_v58, 0.0  ;;  %v2597_v52 = vsel %vm450_vm4, %v2584_v22, 0.0 }
 0x6c0   :  { %v2599_v62 = vsel %vm450_vm4, %v2585_v15, 0.0 }
 0x6c1   :  { %v2590_v0 = vadd.f32 %v2589_v35, %v2588_v17 }
 0x6c3   :  { %v2592_v37 = vadd.f32 %v2591_v48, %v2590_v0 }
 0x6c5   :  { %v2594_v29 = vadd.f32 %v2593_v53, %v2592_v37 }
 0x6c7   :  { %v2596_v32 = vadd.f32 %v2595_v12, %v2594_v29 }
 0x6c9   :  { %v2598_v56 = vadd.f32 %v2597_v52, %v2596_v32 }
 0x6cb   :  { %v2600_v6 = vadd.f32 %v2599_v62, %v2598_v56 }
 0x6cd   :  { %v2913_v60 = vpop.permute.xlu0 %2912  ;;  %v2916_v3 = vpop.permute.xlu1 %2915  ;;  %v2601_v38 = vrot.slane %v2600_v6, 4 }
 0x6ce   :  { %v2918_v30 = vsel %vm495_vm6, %v2913_v60, %v2916_v3 }
 0x6cf   :  { %v2602_v59 = vadd.f32 %v2601_v38, %v2600_v6 }
 0x6d1   :  { %v2920_v51 = vpop.permute.xlu0 %2919  ;;  %v2923_v25 = vpop.permute.xlu1 %2922  ;;  %v2603_v34 = vrot.slane %v2602_v59, 2 }
 0x6d2   :  { %v2925_v41 = vsel %vm503_vm5, %v2920_v51, %v2923_v25 }
 0x6d3   :  { %v2926_v40 = vsel %vm9661_vm7, %v2918_v30, %v2925_v41  ;;  %v2604_v11 = vadd.f32 %v2603_v34, %v2602_v59 }
 0x6d4   :  { %v2927_v57 = vadd.f32 %v2926_v40, %v2910_v27 }
 0x6d5   :  { %v2605_v46 = vrot.slane %v2604_v11, 1 }
 0x6d6   :  { %v2928_v7 = vmul.f32 0.0078125, %v2927_v57 }
 0x6d7   :  { %v2606_v61 = vadd.f32 %v2605_v46, %v2604_v11 }
 0x6d8   :  { %v2932_v21 = vrot.slane %v2928_v7, %v9669_v47 }
 0x6d9   :  { %2611 = vrot.lane.b32.xlu1 %v2606_v61, %s13290_s5  ;;  %2608 = vrot.lane.b32.xlu0 %v2606_v61, %s13221_s6 }
 0x6da   :  { %v11354_v24 = vsub.f32 %v11249_v14, %v2932_v21  ;;  %v11357_v28 = vsub.f32 %v11246_v55, %v2932_v21  ;;  %v11360_v44 = vsub.f32 %v11252_v50, %v2932_v21  ;;  %v11363_v27 = vsub.f32 %v11263_v1, %v2932_v21 }
 0x6db   :  { %v11366_v54 = vsub.f32 %v11268_v19, %v2932_v21  ;;  %v11377_v55 = vsub.f32 %v11275_v13, %v2932_v21  ;;  %v11384_v16 = vsub.f32 %v11283_v8, %v2932_v21  ;;  %v11390_v13 = vsub.f32 %v11280_v49, %v2932_v21 }
 0x6dc   :  { %v2941_v39 = vmul.f32 %v11354_v24, %v11354_v24  ;;  %v2942_v33 = vmul.f32 %v11357_v28, %v11357_v28  ;;  %v2943_v14 = vmul.f32 %v11360_v44, %v11360_v44  ;;  %v2944_v50 = vmul.f32 %v11363_v27, %v11363_v27 }
 0x6dd   :  { %2618 = vrot.lane.b32.xlu1 %v2606_v61, %s13292_s7  ;;  %2615 = vrot.lane.b32.xlu0 %v2606_v61, %s13291_s0  ;;  %v2945_v23 = vmul.f32 %v11366_v54, %v11366_v54  ;;  %v2946_v43 = vmul.f32 %v11377_v55, %v11377_v55  ;;  %v2947_v58 = vmul.f32 %v11384_v16, %v11384_v16 }
 0x6de   :  { %v2949_v1 = vsel %vm450_vm4, %v2941_v39, 0.0  ;;  %v2950_v19 = vsel %vm450_vm4, %v2942_v33, 0.0  ;;  %v2952_v2 = vsel %vm450_vm4, %v2943_v14, 0.0  ;;  %v2954_v35 = vsel %vm450_vm4, %v2944_v50, 0.0 }
 0x6df   :  { %v2951_v26 = vadd.f32 %v2950_v19, %v2949_v1  ;;  %v2956_v8 = vsel %vm450_vm4, %v2945_v23, 0.0  ;;  %v2948_v37 = vmul.f32 %v11390_v13, %v11390_v13  ;;  %v2958_v22 = vsel %vm450_vm4, %v2946_v43, 0.0  ;;  %v11419_v43 = vld [vmem:[%s13267_s8 + $0x1] ss:$0 sm:$0xff] }
 0x6e0   :  { %v2960_v49 = vsel %vm450_vm4, %v2947_v58, 0.0 }
 0x6e1   :  { %v2953_v17 = vadd.f32 %v2952_v2, %v2951_v26  ;;  %v2962_v15 = vsel %vm450_vm4, %v2948_v37, 0.0 }
 0x6e3   :  { %v2955_v0 = vadd.f32 %v2954_v35, %v2953_v17 }
 0x6e5   :  { %v2957_v48 = vadd.f32 %v2956_v8, %v2955_v0 }
 0x6e7   :  { %v2959_v53 = vadd.f32 %v2958_v22, %v2957_v48  ;;  %v11428_v22 = vld [vmem:[%s13268_s28 + $0x1] ss:$0 sm:$0xff] }
 0x6e9   :  { %v2961_v29 = vadd.f32 %v2960_v49, %v2959_v53 }
 0x6eb   :  { %v2963_v12 = vadd.f32 %v2962_v15, %v2961_v29 }
 0x6ed   :  { %v2964_v32 = vrot.slane %v2963_v12, 4 }
 0x6ef   :  { %v2965_v52 = vadd.f32 %v2964_v32, %v2963_v12 }
 0x6f1   :  { %v2966_v56 = vrot.slane %v2965_v52, 2 }
 0x6f3   :  { %v2967_v62 = vadd.f32 %v2966_v56, %v2965_v52 }
 0x6f5   :  { %v2968_v6 = vrot.slane %v2967_v62, 1 }
 0x6f7   :  { %v2969_v60 = vadd.f32 %v2968_v6, %v2967_v62 }
 0x6f9   :  { %2974 = vrot.lane.b32.xlu1 %v2969_v60, %s13290_s5  ;;  %2971 = vrot.lane.b32.xlu0 %v2969_v60, %s13221_s6  ;;  %s13295_s6 = smov 32  }
 0x6fd   :  { %2981 = vrot.lane.b32.xlu1 %v2969_v60, %s13292_s7  ;;  %2978 = vrot.lane.b32.xlu0 %v2969_v60, %s13291_s0 }
 0x74b   :  { %v2609_v3 = vpop.permute.xlu0 %2608  ;;  %v2612_v38 = vpop.permute.xlu1 %2611 }
 0x74c   :  { %v2614_v25 = vsel %vm495_vm6, %v2609_v3, %v2612_v38 }
 0x74f   :  { %v2616_v59 = vpop.permute.xlu0 %2615  ;;  %v2619_v51 = vpop.permute.xlu1 %2618 }
 0x750   :  { %v2621_v34 = vsel %vm503_vm5, %v2616_v59, %v2619_v51 }
 0x751   :  { %v2622_v30 = vsel %vm9661_vm7, %v2614_v25, %v2621_v34 }
 0x752   :  { %v2623_v41 = vadd.f32 %v2622_v30, %v2606_v61 }
 0x754   :  { %v2624_v40 = vmul.f32 0.0078125, %v2623_v41 }
 0x756   :  { %v2625_v11 = vadd.f32 1e-05, %v2624_v40 }
 0x758   :  { %8997 = vrsqrt.f32 %v2625_v11  ;;  %vm2628_vm13 = vcmp.eq.f32.partialorder %v2625_v11, inf  ;;  %v2631_v7 = vand.u32 2147483648, %v2625_v11  ;;  %vm2630_vm14 = vcmp.eq.f32.partialorder %v2625_v11, 0.0 }
 0x762   :  { %v8998_v57 = vpop.eup %8997 }
 0x763   :  { %v2627_v46 = vmul.f32 %v8998_v57, %v2625_v11 }
 0x765   :  { %v2629_v21 = vsel %vm2628_vm13, %v2625_v11, %v2627_v46 }
 0x766   :  { %v2632_v39 = vsel %vm2630_vm14, %v2631_v7, %v2629_v21 }
 0x767   :  { %v2636_v33 = vrot.slane %v2632_v39, %v9669_v47 }
 0x769   :  { %8999 = vrcp.f32 %v2636_v33 }
 0x76b   :  { %v2972_v14 = vpop.permute.xlu0 %2971  ;;  %v2975_v50 = vpop.permute.xlu1 %2974 }
 0x76c   :  { %v2977_v26 = vsel %vm495_vm6, %v2972_v14, %v2975_v50 }
 0x76f   :  { %v2979_v1 = vpop.permute.xlu0 %2978  ;;  %v2982_v19 = vpop.permute.xlu1 %2981 }
 0x770   :  { %v2984_v61 = vsel %vm503_vm5, %v2979_v1, %v2982_v19  ;;  %v3241_v19 = vld [vmem:[%s13294_s3] sm:$0xff] }
 0x771   :  { %v2985_v23 = vsel %vm9661_vm7, %v2977_v26, %v2984_v61  ;;  %7984 = vmatprep.mubr.f32.mxu0 %v3241_v19 }
 0x772   :  { %v2986_v2 = vadd.f32 %v2985_v23, %v2969_v60 }
 0x773   :  { %v9000_v17 = vpop.eup %8999 }
 0x774   :  { %v2987_v35 = vmul.f32 0.0078125, %v2986_v2  ;;  %v2638_v0 = vmul.f32 %v9000_v17, %v11299_v5  ;;  %v2639_v58 = vmul.f32 %v9000_v17, %v11302_v18  ;;  %v2640_v8 = vmul.f32 %v9000_v17, %v11305_v45 }
 0x775   :  { %v2641_v48 = vmul.f32 %v9000_v17, %v11308_v4  ;;  %v2642_v18 = vmul.f32 %v9000_v17, %v11311_v36  ;;  %v2643_v32 = vmul.f32 %v9000_v17, %v11320_v9  ;;  %v2644_v59 = vmul.f32 %v9000_v17, %v11327_v10 }
 0x776   :  { %v2988_v37 = vadd.f32 1e-05, %v2987_v35  ;;  %v2652_v53 = vmul.f32 %v11419_v43, %v2638_v0  ;;  %v2653_v49 = vmul.f32 %v11419_v43, %v2639_v58  ;;  %v2654_v29 = vmul.f32 %v11419_v43, %v2640_v8 }
 0x777   :  { %v2655_v5 = vmul.f32 %v11419_v43, %v2641_v48  ;;  %v2656_v3 = vmul.f32 %v11419_v43, %v2642_v18  ;;  %v2657_v38 = vmul.f32 %v11419_v43, %v2643_v32  ;;  %v2645_v9 = vmul.f32 %v9000_v17, %v11333_v20 }
 0x778   :  { %9001 = vrsqrt.f32 %v2988_v37  ;;  %v2666_v45 = vadd.f32 %v11428_v22, %v2652_v53  ;;  %v2667_v4 = vadd.f32 %v11428_v22, %v2653_v49  ;;  %v2668_v15 = vadd.f32 %v11428_v22, %v2654_v29 }
 0x779   :  { %v2669_v12 = vadd.f32 %v11428_v22, %v2655_v5  ;;  %vm2991_vm15 = vcmp.eq.f32.partialorder %v2988_v37, inf  ;;  %vm2993_vm1 = vcmp.eq.f32.partialorder %v2988_v37, 0.0  ;;  %v2994_v11 = vand.u32 2147483648, %v2988_v37 }
 0x77a   :  { %v11440_v52 = vmul.f32 0.70710677, %v2666_v45  ;;  %v11442_v56 = vmul.f32 0.70710677, %v2667_v4  ;;  %v11444_v62 = vmul.f32 0.70710677, %v2668_v15  ;;  %v11457_v7 = vadd.f32 %v11428_v22, %v2656_v3 }
 0x77b   :  { %v11446_v6 = vmul.f32 0.70710677, %v2669_v12  ;;  %v11460_v33 = vadd.f32 %v11428_v22, %v2657_v38  ;;  %v2658_v1 = vmul.f32 %v11419_v43, %v2644_v59  ;;  %v2659_v0 = vmul.f32 %v11419_v43, %v2645_v9 }
 0x77c   :  { %v2706_v36 = vand.u32 2147483647, %v11440_v52  ;;  %v2707_v60 = vand.u32 2147483647, %v11442_v56  ;;  %v2708_v41 = vand.u32 2147483647, %v11444_v62 }
 0x77d   :  { %v2709_v40 = vand.u32 2147483647, %v11446_v6  ;;  %v11469_v8 = vmul.f32 0.5, %v2666_v45  ;;  %v11471_v48 = vmul.f32 0.5, %v2667_v4  ;;  %v11473_v53 = vmul.f32 0.5, %v2668_v15 }
 0x77e   :  { %v2714_v51 = vmul.f32 0.3275911, %v2706_v36  ;;  %v2715_v25 = vmul.f32 0.3275911, %v2707_v60  ;;  %v2818_v34 = vsub.f32 0.0, %v2706_v36  ;;  %v2819_v30 = vsub.f32 0.0, %v2707_v60 }
 0x77f   :  { %v2716_v10 = vmul.f32 0.3275911, %v2708_v41  ;;  %v2717_v39 = vmul.f32 0.3275911, %v2709_v40  ;;  %v2820_v20 = vsub.f32 0.0, %v2708_v41  ;;  %v2821_v17 = vsub.f32 0.0, %v2709_v40 }
 0x780   :  { %v2722_v57 = vadd.f32 1.0, %v2714_v51  ;;  %v2723_v46 = vadd.f32 1.0, %v2715_v25  ;;  %v2826_v50 = vmul.f32 %v2818_v34, %v2706_v36  ;;  %v2827_v26 = vmul.f32 %v2819_v30, %v2707_v60 }
 0x781   :  { %v2724_v61 = vadd.f32 1.0, %v2716_v10  ;;  %v2725_v23 = vadd.f32 1.0, %v2717_v39  ;;  %v2828_v35 = vmul.f32 %v2820_v20, %v2708_v41  ;;  %v11477_v5 = vmul.f32 0.70710677, %v11457_v7 }
 0x782   :  { %v9002_v21 = vpop.eup %9001  ;;  %9003 = vrcp.f32 %v2722_v57  ;;  %v2834_v29 = vmul.f32 1.442695, %v2826_v50  ;;  %v2836_v18 = vmul.f32 1.442695, %v2827_v26  ;;  %v11479_v32 = vmul.f32 0.5, %v2669_v12 }
 0x783   :  { %v2990_v14 = vmul.f32 %v9002_v21, %v2988_v37  ;;  %9005 = vrcp.f32 %v2723_v46  ;;  %v2829_v45 = vmul.f32 %v2821_v17, %v2709_v40  ;;  %v2838_v4 = vmul.f32 1.442695, %v2828_v35 }
 0x784   :  { %9007 = vrcp.f32 %v2724_v61  ;;  %v2710_v15 = vand.u32 2147483647, %v11477_v5  ;;  %vm2690_vm2 = vcmp.ge.f32.partialorder %v11440_v52, 0.0  ;;  %vm2691_vm3 = vcmp.ge.f32.partialorder %v11442_v56, 0.0 }
 0x785   :  { %v2992_v2 = vsel %vm2991_vm15, %v2988_v37, %v2990_v14  ;;  %9009 = vrcp.f32 %v2725_v23  ;;  %v11482_v37 = vmul.f32 0.70710677, %v11460_v33  ;;  %v11489_v60 = vadd.f32 %v11428_v22, %v2658_v1 }
 0x786   :  { %v2995_v58 = vsel %vm2993_vm1, %v2994_v11, %v2992_v2  ;;  %v2718_v12 = vmul.f32 0.3275911, %v2710_v15  ;;  %v2822_v3 = vsub.f32 0.0, %v2710_v15  ;;  %v11492_v38 = vadd.f32 %v11428_v22, %v2659_v0 }
 0x787   :  { %v2999_v49 = vrot.slane %v2995_v58, %v9669_v47  ;;  %v2711_v36 = vand.u32 2147483647, %v11482_v37  ;;  %vm2692_vm8 = vcmp.ge.f32.partialorder %v11444_v62, 0.0  ;;  %vm2693_vm9 = vcmp.ge.f32.partialorder %v11446_v6, 0.0 }
 0x788   :  { %v2840_v25 = vmul.f32 1.442695, %v2829_v45  ;;  %v2726_v34 = vadd.f32 1.0, %v2718_v12  ;;  %v2830_v11 = vmul.f32 %v2822_v3, %v2710_v15  ;;  %v11502_v57 = vmul.f32 0.70710677, %v11489_v60 }
 0x789   :  { %9011 = vrcp.f32 %v2999_v49  ;;  %v2719_v59 = vmul.f32 0.3275911, %v2711_v36  ;;  %v2823_v9 = vsub.f32 0.0, %v2711_v36  ;;  %v11506_v10 = vmul.f32 0.70710677, %v11492_v38 }
 0x78a   :  { %9013 = vpow2.f32 %v2834_v29  ;;  %v11511_v39 = vsel %vm2690_vm2, 1.0, %v13269_v31  ;;  %v11516_v20 = vsel %vm2691_vm3, 1.0, %v13269_v31  ;;  %v11523_v19 = vsel %vm2692_vm8, 1.0, %v13269_v31 }
 0x78b   :  { %9015 = vpow2.f32 %v2836_v18  ;;  %v2727_v40 = vadd.f32 1.0, %v2719_v59  ;;  %v2831_v21 = vmul.f32 %v2823_v9, %v2711_v36  ;;  %v11528_v52 = vsel %vm2693_vm9, 1.0, %v13269_v31 }
 0x78c   :  { %v11495_v51 = vpop.eup %9003  ;;  %9017 = vpow2.f32 %v2838_v4  ;;  %v2842_v23 = vmul.f32 1.442695, %v2830_v11  ;;  %v2712_v2 = vand.u32 2147483647, %v11502_v57  ;;  %v2713_v6 = vand.u32 2147483647, %v11506_v10 }
 0x78d   :  { %v11498_v30 = vpop.eup %9005  ;;  %v2746_v41 = vmul.f32 1.0614054, %v11495_v51  ;;  %9019 = vrcp.f32 %v2726_v34  ;;  %v2844_v0 = vmul.f32 1.442695, %v2831_v21  ;;  %vm2694_vm10 = vcmp.ge.f32.partialorder %v11477_v5, 0.0 }
 0x78e   :  { %v2747_v46 = vmul.f32 1.0614054, %v11498_v30  ;;  %9021 = vrcp.f32 %v2727_v40  ;;  %v11518_v50 = vpop.eup %9007  ;;  %v2720_v29 = vmul.f32 0.3275911, %v2712_v2  ;;  %v2721_v36 = vmul.f32 0.3275911, %v2713_v6 }
 0x78f   :  { %v7322_v14 = vadd.f32 -1.4531521, %v2746_v41  ;;  %9023 = vpow2.f32 %v2840_v25  ;;  %v11530_v26 = vpop.eup %9009  ;;  %v2748_v61 = vmul.f32 1.0614054, %v11518_v50  ;;  %v2824_v34 = vsub.f32 0.0, %v2712_v2 }
 0x790   :  { %v7323_v1 = vadd.f32 -1.4531521, %v2747_v46  ;;  %v2749_v35 = vmul.f32 1.0614054, %v11530_v26  ;;  %v2728_v25 = vadd.f32 1.0, %v2720_v29  ;;  %v2825_v46 = vsub.f32 0.0, %v2713_v6 }
 0x791   :  { %v2762_v56 = vmul.f32 %v11495_v51, %v7322_v14  ;;  %v7324_v49 = vadd.f32 -1.4531521, %v2748_v61  ;;  %vm2695_vm13 = vcmp.ge.f32.partialorder %v11482_v37, 0.0  ;;  %vm2696_vm14 = vcmp.ge.f32.partialorder %v11502_v57, 0.0 }
 0x792   :  { %v2763_v62 = vmul.f32 %v11498_v30, %v7323_v1  ;;  %v7325_v15 = vadd.f32 -1.4531521, %v2749_v35  ;;  %9025 = vrcp.f32 %v2728_v25  ;;  %v2832_v1 = vmul.f32 %v2824_v34, %v2712_v2 }
 0x793   :  { %v11535_v17 = vpop.eup %9011  ;;  %v2770_v58 = vadd.f32 1.4214138, %v2762_v56  ;;  %v2764_v9 = vmul.f32 %v11518_v50, %v7324_v49  ;;  %vm2697_vm15 = vcmp.ge.f32.partialorder %v11506_v10, 0.0 }
 0x794   :  { %v3001_v18 = vmul.f32 %v11535_v17, %v11354_v24  ;;  %v9014_v45 = vpop.eup %9013  ;;  %v2771_v4 = vadd.f32 1.4214138, %v2763_v62  ;;  %v3002_v12 = vmul.f32 %v11535_v17, %v11357_v28  ;;  %v2765_v11 = vmul.f32 %v11530_v26, %v7325_v15 }
 0x795   :  { %v9016_v3 = vpop.eup %9015  ;;  %v2778_v59 = vmul.f32 %v11495_v51, %v2770_v58  ;;  %v2729_v24 = vadd.f32 1.0, %v2721_v36  ;;  %v2772_v14 = vadd.f32 1.4214138, %v2764_v9  ;;  %v2833_v62 = vmul.f32 %v2825_v46, %v2713_v6 }
 0x796   :  { %v9018_v41 = vpop.eup %9017  ;;  %v2779_v40 = vmul.f32 %v11498_v30, %v2771_v4  ;;  %v2773_v61 = vadd.f32 1.4214138, %v2765_v11  ;;  %v2846_v4 = vmul.f32 1.442695, %v2832_v1  ;;  %v3009_v1 = vmul.f32 %v11419_v43, %v3001_v18 }
 0x797   :  { %v7330_v21 = vadd.f32 -0.28449672, %v2778_v59  ;;  %v11548_v56 = vpop.eup %9019  ;;  %9027 = vrcp.f32 %v2729_v24  ;;  %v2780_v49 = vmul.f32 %v11518_v50, %v2772_v14  ;;  %v11558_v9 = vmul.f32 1.442695, %v2833_v62 }
 0x798   :  { %v7331_v28 = vadd.f32 -0.28449672, %v2779_v40  ;;  %v11550_v35 = vpop.eup %9021  ;;  %v2750_v29 = vmul.f32 1.0614054, %v11548_v56  ;;  %v2781_v2 = vmul.f32 %v11530_v26, %v2773_v61  ;;  %9029 = vpow2.f32 %v2842_v23 }
 0x799   :  { %v2794_v58 = vmul.f32 %v11495_v51, %v7330_v21  ;;  %v9024_v15 = vpop.eup %9023  ;;  %v2751_v59 = vmul.f32 1.0614054, %v11550_v35  ;;  %v7332_v6 = vadd.f32 -0.28449672, %v2780_v49  ;;  %9031 = vpow2.f32 %v2844_v0 }
 0x79a   :  { %v2795_v36 = vmul.f32 %v11498_v30, %v7331_v28  ;;  %v7326_v34 = vadd.f32 -1.4531521, %v2750_v29  ;;  %v7333_v11 = vadd.f32 -0.28449672, %v2781_v2  ;;  %v3010_v23 = vmul.f32 %v11419_v43, %v3002_v12 }
 0x79b   :  { %v2802_v25 = vadd.f32 0.2548296, %v2794_v58  ;;  %v7327_v24 = vadd.f32 -1.4531521, %v2751_v59  ;;  %v2796_v21 = vmul.f32 %v11518_v50, %v7332_v6  ;;  %9033 = vpow2.f32 %v2846_v4 }
 0x79c   :  { %v2803_v40 = vadd.f32 0.2548296, %v2795_v36  ;;  %v2766_v14 = vmul.f32 %v11548_v56, %v7326_v34  ;;  %v2797_v61 = vmul.f32 %v11530_v26, %v7333_v11  ;;  %v11569_v2 = vadd.f32 %v11428_v22, %v3009_v1  ;;  %v11571_v59 = vpop.eup %9025 }
 0x79d   :  { %v2810_v46 = vmul.f32 %v11495_v51, %v2802_v25  ;;  %v2767_v62 = vmul.f32 %v11550_v35, %v7327_v24  ;;  %v2804_v49 = vadd.f32 0.2548296, %v2796_v21  ;;  %v11576_v6 = vadd.f32 %v11428_v22, %v3010_v23 }
 0x79e   :  { %v2811_v28 = vmul.f32 %v11498_v30, %v2803_v40  ;;  %v2774_v29 = vadd.f32 1.4214138, %v2766_v14  ;;  %v2805_v51 = vadd.f32 0.2548296, %v2797_v61  ;;  %v2752_v34 = vmul.f32 1.0614054, %v11571_v59 }
 0x79f   :  { %v2850_v58 = vmul.f32 %v9014_v45, %v2810_v46  ;;  %v2775_v36 = vadd.f32 1.4214138, %v2767_v62  ;;  %v2812_v30 = vmul.f32 %v11518_v50, %v2804_v49  ;;  %9035 = vpow2.f32 %v11558_v9 }
 0x7a0   :  { %v2851_v0 = vmul.f32 %v9016_v3, %v2811_v28  ;;  %v2782_v25 = vmul.f32 %v11548_v56, %v2774_v29  ;;  %v2813_v3 = vmul.f32 %v11530_v26, %v2805_v51  ;;  %v7328_v1 = vadd.f32 -1.4531521, %v2752_v34 }
 0x7a1   :  { %v2858_v18 = vsub.f32 1.0, %v2850_v58  ;;  %v11578_v45 = vpop.eup %9027  ;;  %v2783_v4 = vmul.f32 %v11550_v35, %v2775_v36  ;;  %v2852_v11 = vmul.f32 %v9018_v41, %v2812_v30  ;;  %v11607_v9 = vmul.f32 0.70710677, %v11576_v6 }
 0x7a2   :  { %v2859_v12 = vsub.f32 1.0, %v2851_v0  ;;  %v7334_v50 = vadd.f32 -0.28449672, %v2782_v25  ;;  %v2753_v24 = vmul.f32 1.0614054, %v11578_v45  ;;  %v2853_v21 = vmul.f32 %v9024_v15, %v2813_v3  ;;  %v9030_v26 = vpop.eup %9029 }
 0x7a3   :  { %v2866_v40 = vmul.f32 %v2858_v18, %v11511_v39  ;;  %v7335_v14 = vadd.f32 -0.28449672, %v2783_v4  ;;  %v2860_v61 = vsub.f32 1.0, %v2852_v11  ;;  %v9032_v39 = vpop.eup %9031  ;;  %v2768_v29 = vmul.f32 %v11571_v59, %v7328_v1 }
 0x7a4   :  { %v2867_v46 = vmul.f32 %v2859_v12, %v11516_v20  ;;  %v2798_v62 = vmul.f32 %v11548_v56, %v7334_v50  ;;  %v7329_v23 = vadd.f32 -1.4531521, %v2753_v24  ;;  %v2861_v58 = vsub.f32 1.0, %v2853_v21 }
 0x7a5   :  { %v2874_v28 = vadd.f32 1.0, %v2866_v40  ;;  %v2799_v49 = vmul.f32 %v11550_v35, %v7335_v14  ;;  %v2868_v15 = vmul.f32 %v2860_v61, %v11523_v19  ;;  %v2776_v25 = vadd.f32 1.4214138, %v2768_v29  ;;  %v9034_v12 = vpop.eup %9033 }
 0x7a6   :  { %v2875_v41 = vadd.f32 1.0, %v2867_v46  ;;  %v2806_v0 = vadd.f32 0.2548296, %v2798_v62  ;;  %v2769_v51 = vmul.f32 %v11578_v45, %v7329_v23  ;;  %v2869_v18 = vmul.f32 %v2861_v58, %v11528_v52 }
 0x7a7   :  { %v2882_v20 = vmul.f32 %v2874_v28, %v11469_v8  ;;  %v2807_v30 = vadd.f32 0.2548296, %v2799_v49  ;;  %v2876_v3 = vadd.f32 1.0, %v2868_v15  ;;  %v2784_v11 = vmul.f32 %v11571_v59, %v2776_v25 }
 0x7a8   :  { %v2883_v36 = vmul.f32 %v2875_v41, %v11471_v48  ;;  %v2814_v4 = vmul.f32 %v11548_v56, %v2806_v0  ;;  %v2777_v34 = vadd.f32 1.4214138, %v2769_v51  ;;  %v2877_v8 = vadd.f32 1.0, %v2869_v18 }
 0x7a9   :  { %v2815_v19 = vmul.f32 %v11550_v35, %v2807_v30  ;;  %v2884_v50 = vmul.f32 %v2876_v3, %v11473_v53  ;;  %v11603_v24 = vmul.f32 0.70710677, %v11569_v2  ;;  %v7336_v21 = vadd.f32 -0.28449672, %v2784_v11  ;;  %v9036_v18 = vpop.eup %9035 }
 0x7aa   :  { %v8556_v40 = vpack.c.bf16 %v2883_v36, %v2882_v20  ;;  %v2854_v48 = vmul.f32 %v9030_v26, %v2814_v4  ;;  %v2785_v52 = vmul.f32 %v11578_v45, %v2777_v34  ;;  %v2885_v56 = vmul.f32 %v2877_v8, %v11479_v32 }
 0x7ab   :  { %v2855_v46 = vmul.f32 %v9032_v39, %v2815_v19  ;;  %v11610_v1 = vand.u32 2147483647, %v11603_v24  ;;  %v2702_v26 = vsel %vm2694_vm10, 1.0, %v13269_v31  ;;  %v2800_v61 = vmul.f32 %v11571_v59, %v7336_v21 }
 0x7ac   :  { %8557 = vmatprep.subr.bf16.mxu0 %v8556_v40  ;;  %v2862_v35 = vsub.f32 1.0, %v2854_v48  ;;  %v7337_v14 = vadd.f32 -0.28449672, %v2785_v52  ;;  %v8560_v53 = vpack.c.bf16 %v2885_v56, %v2884_v50  ;;  %v2678_v32 = vmul.f32 0.5, %v11457_v7 }
 0x7ad   :  { %8559 = vmatpush3.bf16.msra.mxu0 %v8556_v40  ;;  %v2863_v28 = vsub.f32 1.0, %v2855_v46  ;;  %v2703_v62 = vsel %vm2695_vm13, 1.0, %v13269_v31  ;;  %v2808_v58 = vadd.f32 0.2548296, %v2800_v61  ;;  %v3058_v49 = vand.u32 2147483647, %v11607_v9 }
 0x7ae   :  { %v2870_v23 = vmul.f32 %v2862_v35, %v2702_v26  ;;  %v2801_v39 = vmul.f32 %v11578_v45, %v7337_v14  ;;  %8561 = vmatprep.subr.bf16.mxu0 %v8560_v53  ;;  %v3065_v5 = vmul.f32 0.3275911, %v11610_v1  ;;  %v2679_v29 = vmul.f32 0.5, %v11460_v33 }
 0x7af   :  { %v2871_v41 = vmul.f32 %v2863_v28, %v2703_v62  ;;  %v3003_v7 = vmul.f32 %v11535_v17, %v11360_v44  ;;  %v2816_v0 = vmul.f32 %v11571_v59, %v2808_v58  ;;  %v3066_v51 = vmul.f32 0.3275911, %v3058_v49 }
 0x7b0   :  { %v2878_v20 = vadd.f32 1.0, %v2870_v23  ;;  %v2809_v15 = vadd.f32 0.2548296, %v2801_v39  ;;  %v3073_v36 = vadd.f32 1.0, %v3065_v5  ;;  %v3004_v44 = vmul.f32 %v11535_v17, %v11363_v27 }
 0x7b1   :  { %8563 = vmatpush3.bf16.msra.mxu0 %v8560_v53  ;;  %v2879_v37 = vadd.f32 1.0, %v2871_v41  ;;  %v2856_v33 = vmul.f32 %v9034_v12, %v2816_v0  ;;  %v3074_v4 = vadd.f32 1.0, %v3066_v51  ;;  %v3011_v8 = vmul.f32 %v11419_v43, %v3003_v7 }
 0x7b2   :  { %v2886_v30 = vmul.f32 %v2878_v20, %v2678_v32  ;;  %v2817_v25 = vmul.f32 %v11578_v45, %v2809_v15  ;;  %9037 = vrcp.f32 %v3073_v36  ;;  %v2704_v19 = vsel %vm2696_vm14, 1.0, %v13269_v31 }
 0x7b3   :  { %v2887_v3 = vmul.f32 %v2879_v37, %v2679_v29  ;;  %v2864_v59 = vsub.f32 1.0, %v2856_v33  ;;  %9039 = vrcp.f32 %v3074_v4  ;;  %v2705_v57 = vsel %vm2697_vm15, 1.0, %v13269_v31 }
 0x7b4   :  { %v2857_v34 = vmul.f32 %v9036_v18, %v2817_v25  ;;  %v3012_v45 = vmul.f32 %v11419_v43, %v3004_v44  ;;  %v11637_v11 = vadd.f32 %v11428_v22, %v3011_v8  ;;  %v3005_v27 = vmul.f32 %v11535_v17, %v11366_v54 }
 0x7b5   :  { %v8564_v40 = vpack.c.bf16 %v2887_v3, %v2886_v30  ;;  %v2872_v12 = vmul.f32 %v2864_v59, %v2704_v19  ;;  %v3006_v50 = vmul.f32 %v11535_v17, %v11377_v55  ;;  %v2680_v48 = vmul.f32 0.5, %v11489_v60 }
 0x7b6   :  { %v2865_v10 = vsub.f32 1.0, %v2857_v34  ;;  %v11645_v56 = vadd.f32 %v11428_v22, %v3012_v45  ;;  %v3169_v21 = vsub.f32 0.0, %v11610_v1  ;;  %v11649_v35 = vmul.f32 0.70710677, %v11637_v11 }
 0x7b7   :  { %8565 = vmatprep.subr.bf16.mxu0 %v8564_v40  ;;  %v2880_v46 = vadd.f32 1.0, %v2872_v12  ;;  %v3013_v14 = vmul.f32 %v11419_v43, %v3005_v27  ;;  %v2681_v54 = vmul.f32 0.5, %v11492_v38  ;;  %v3014_v60 = vmul.f32 %v11419_v43, %v3006_v50 }
 0x7b8   :  { %8567 = vmatpush3.bf16.msra.mxu0 %v8564_v40  ;;  %v2873_v52 = vmul.f32 %v2865_v10, %v2705_v57  ;;  %v11654_v55 = vmul.f32 0.70710677, %v11645_v56  ;;  %v3170_v28 = vsub.f32 0.0, %v3058_v49  ;;  %v3059_v61 = vand.u32 2147483647, %v11649_v35 }
 0x7b9   :  { %v2888_v26 = vmul.f32 %v2880_v46, %v2680_v48  ;;  %v3177_v39 = vmul.f32 %v3169_v21, %v11610_v1  ;;  %v11663_v38 = vadd.f32 %v11428_v22, %v3013_v14  ;;  %v11666_v58 = vadd.f32 %v11428_v22, %v3014_v60 }
 0x7ba   :  { %v2881_v53 = vadd.f32 1.0, %v2873_v52  ;;  %v3060_v62 = vand.u32 2147483647, %v11654_v55  ;;  %v3067_v41 = vmul.f32 0.3275911, %v3059_v61  ;;  %v3178_v7 = vmul.f32 %v3170_v28, %v3058_v49 }
 0x7bb   :  { %v3185_v36 = vmul.f32 1.442695, %v3177_v39  ;;  %v11673_v18 = vmul.f32 0.70710677, %v11663_v38  ;;  %v11676_v30 = vmul.f32 0.70710677, %v11666_v58  ;;  %v3007_v49 = vmul.f32 %v11535_v17, %v11384_v16 }
 0x7bc   :  { %v2889_v32 = vmul.f32 %v2881_v53, %v2681_v54  ;;  %v11659_v23 = vpop.eup %9037  ;;  %v3068_v20 = vmul.f32 0.3275911, %v3060_v62  ;;  %v3075_v37 = vadd.f32 1.0, %v3067_v41  ;;  %v3187_v33 = vmul.f32 1.442695, %v3178_v7 }
 0x7bd   :  { %v3097_v29 = vmul.f32 1.0614054, %v11659_v23  ;;  %v11669_v15 = vpop.eup %9039  ;;  %v3171_v4 = vsub.f32 0.0, %v3059_v61  ;;  %v11682_v34 = vand.u32 2147483647, %v11673_v18  ;;  %v3172_v59 = vsub.f32 0.0, %v3060_v62 }
 0x7be   :  { %v8568_v5 = vpack.c.bf16 %v2889_v32, %v2888_v26  ;;  %v3098_v0 = vmul.f32 1.0614054, %v11669_v15  ;;  %v3076_v1 = vadd.f32 1.0, %v3068_v20  ;;  %9041 = vrcp.f32 %v3075_v37 }
 0x7bf   :  { %v7338_v51 = vadd.f32 -1.4531521, %v3097_v29  ;;  %v11686_v8 = vand.u32 2147483647, %v11676_v30  ;;  %v3069_v19 = vmul.f32 0.3275911, %v11682_v34  ;;  %v3008_v16 = vmul.f32 %v11535_v17, %v11390_v13 }
 0x7c0   :  { %8569 = vmatprep.subr.bf16.mxu0 %v8568_v5  ;;  %v7339_v25 = vadd.f32 -1.4531521, %v3098_v0  ;;  %9043 = vrcp.f32 %v3076_v1  ;;  %v3015_v45 = vmul.f32 %v11419_v43, %v3007_v49  ;;  %v3179_v12 = vmul.f32 %v3171_v4, %v3059_v61 }
 0x7c1   :  { %8571 = vmatpush3.bf16.msra.mxu0 %v8568_v5  ;;  %v3113_v3 = vmul.f32 %v11659_v23, %v7338_v51  ;;  %9045 = vpow2.f32 %v3185_v36  ;;  %v3070_v27 = vmul.f32 0.3275911, %v11686_v8  ;;  %v3077_v50 = vadd.f32 1.0, %v3069_v19 }
 0x7c2   :  { %v3114_v44 = vmul.f32 %v11669_v15, %v7339_v25  ;;  %9047 = vpow2.f32 %v3187_v33  ;;  %v3016_v46 = vmul.f32 %v11419_v43, %v3008_v16  ;;  %v11697_v21 = vadd.f32 %v11428_v22, %v3015_v45 }
 0x7c3   :  { %v3121_v40 = vadd.f32 1.4214138, %v3113_v3  ;;  %vm3041_vm1 = vcmp.ge.f32.partialorder %v11603_v24, 0.0  ;;  %v3078_v14 = vadd.f32 1.0, %v3070_v27  ;;  %9049 = vrcp.f32 %v3077_v50 }
 0x7c4   :  { %v3122_v57 = vadd.f32 1.4214138, %v3114_v44  ;;  %v3180_v54 = vmul.f32 %v3172_v59, %v3060_v62  ;;  %v11702_v53 = vadd.f32 %v11428_v22, %v3016_v46  ;;  %v3025_v26 = vmul.f32 0.5, %v11569_v2 }
 0x7c5   :  { %v3129_v10 = vmul.f32 %v11659_v23, %v3121_v40  ;;  %vm3042_vm2 = vcmp.ge.f32.partialorder %v11607_v9, 0.0  ;;  %9051 = vrcp.f32 %v3078_v14  ;;  %v11709_v43 = vmul.f32 0.70710677, %v11697_v21 }
 0x7c6   :  { %v3130_v48 = vmul.f32 %v11669_v15, %v3122_v57  ;;  %v3189_v39 = vmul.f32 1.442695, %v3179_v12  ;;  %v3026_v22 = vmul.f32 0.5, %v11576_v6  ;;  %v3049_v2 = vsel %vm3041_vm1, 1.0, %v13269_v31 }
 0x7c7   :  { %v7346_v52 = vadd.f32 -0.28449672, %v3129_v10  ;;  %v11721_v5 = vmul.f32 0.70710677, %v11702_v53  ;;  %v3191_v37 = vmul.f32 1.442695, %v3180_v54 }
 0x7c8   :  { %v7347_v13 = vadd.f32 -0.28449672, %v3130_v48  ;;  %v11704_v60 = vpop.eup %9041  ;;  %v3050_v51 = vsel %vm3042_vm2, 1.0, %v13269_v31  ;;  %v3173_v1 = vsub.f32 0.0, %v11682_v34  ;;  %v11729_v24 = vand.u32 2147483647, %v11709_v43 }
 0x7c9   :  { %v3145_v17 = vmul.f32 %v11659_v23, %v7346_v52  ;;  %v3099_v62 = vmul.f32 1.0614054, %v11704_v60  ;;  %9053 = vpow2.f32 %v3189_v39  ;;  %v3174_v33 = vsub.f32 0.0, %v11686_v8 }
 0x7ca   :  { %v11711_v28 = vpop.eup %9043  ;;  %v3146_v61 = vmul.f32 %v11669_v15, %v7347_v13  ;;  %v11736_v9 = vand.u32 2147483647, %v11721_v5  ;;  %v3071_v4 = vmul.f32 0.3275911, %v11729_v24  ;;  %9055 = vpow2.f32 %v3191_v37 }
 0x7cb   :  { %v3153_v32 = vadd.f32 0.2548296, %v3145_v17  ;;  %v3100_v41 = vmul.f32 1.0614054, %v11711_v28  ;;  %v7340_v7 = vadd.f32 -1.4531521, %v3099_v62  ;;  %v9046_v0 = vpop.eup %9045  ;;  %v3181_v57 = vmul.f32 %v3173_v1, %v11682_v34 }
 0x7cc   :  { %v3154_v29 = vadd.f32 0.2548296, %v3146_v61  ;;  %v3072_v10 = vmul.f32 0.3275911, %v11736_v9  ;;  %v3079_v16 = vadd.f32 1.0, %v3071_v4  ;;  %v3182_v46 = vmul.f32 %v3174_v33, %v11686_v8 }
 0x7cd   :  { %v3161_v20 = vmul.f32 %v11659_v23, %v3153_v32  ;;  %v7341_v6 = vadd.f32 -1.4531521, %v3100_v41  ;;  %v3115_v3 = vmul.f32 %v11704_v60, %v7340_v7  ;;  %v9048_v23 = vpop.eup %9047  ;;  %v3193_v62 = vmul.f32 1.442695, %v3181_v57 }
 0x7ce   :  { %v3162_v36 = vmul.f32 %v11669_v15, %v3154_v29  ;;  %v11739_v19 = vpop.eup %9049  ;;  %v3080_v14 = vadd.f32 1.0, %v3072_v10  ;;  %9057 = vrcp.f32 %v3079_v16  ;;  %v3195_v7 = vmul.f32 1.442695, %v3182_v46 }
 0x7cf   :  { %v3201_v25 = vmul.f32 %v9046_v0, %v3161_v20  ;;  %v3116_v49 = vmul.f32 %v11711_v28, %v7341_v6  ;;  %v3123_v59 = vadd.f32 1.4214138, %v3115_v3  ;;  %v3101_v50 = vmul.f32 1.0614054, %v11739_v19  ;;  %v11745_v48 = vpop.eup %9051 }
 0x7d0   :  { %v3202_v44 = vmul.f32 %v9048_v23, %v3162_v36  ;;  %v3102_v54 = vmul.f32 1.0614054, %v11745_v48  ;;  %9059 = vrcp.f32 %v3080_v14  ;;  %vm3043_vm3 = vcmp.ge.f32.partialorder %v11649_v35, 0.0 }
 0x7d1   :  { %v3209_v40 = vsub.f32 1.0, %v3201_v25  ;;  %v3124_v15 = vadd.f32 1.4214138, %v3116_v49  ;;  %v3131_v27 = vmul.f32 %v11704_v60, %v3123_v59  ;;  %v7342_v32 = vadd.f32 -1.4531521, %v3101_v50 }
 0x7d2   :  { %v3210_v45 = vsub.f32 1.0, %v3202_v44  ;;  %v7343_v29 = vadd.f32 -1.4531521, %v3102_v54  ;;  %v3175_v25 = vsub.f32 0.0, %v11729_v24  ;;  %9061 = vpow2.f32 %v3193_v62 }
 0x7d3   :  { %v3217_v12 = vmul.f32 %v3209_v40, %v3049_v2  ;;  %v3132_v52 = vmul.f32 %v11711_v28, %v3124_v15  ;;  %v7348_v34 = vadd.f32 -0.28449672, %v3131_v27  ;;  %v3117_v8 = vmul.f32 %v11739_v19, %v7342_v32  ;;  %v9054_v37 = vpop.eup %9053 }
 0x7d4   :  { %v3218_v13 = vmul.f32 %v3210_v45, %v3050_v51  ;;  %v3118_v6 = vmul.f32 %v11745_v48, %v7343_v29  ;;  %9063 = vpow2.f32 %v3195_v7  ;;  %vm3044_vm8 = vcmp.ge.f32.partialorder %v11654_v55, 0.0 }
 0x7d5   :  { %v3225_v17 = vadd.f32 1.0, %v3217_v12  ;;  %v7349_v61 = vadd.f32 -0.28449672, %v3132_v52  ;;  %v3147_v41 = vmul.f32 %v11704_v60, %v7348_v34  ;;  %v3125_v36 = vadd.f32 1.4214138, %v3117_v8 }
 0x7d6   :  { %v3226_v39 = vadd.f32 1.0, %v3218_v13  ;;  %v3126_v49 = vadd.f32 1.4214138, %v3118_v6  ;;  %v3183_v57 = vmul.f32 %v3175_v25, %v11729_v24  ;;  %v3052_v55 = vsel %vm3044_vm8, 1.0, %v13269_v31 }
 0x7d7   :  { %v3233_v2 = vmul.f32 %v3225_v17, %v3025_v26  ;;  %v3148_v20 = vmul.f32 %v11711_v28, %v7349_v61  ;;  %v3155_v51 = vadd.f32 0.2548296, %v3147_v41  ;;  %v9056_v26 = vpop.eup %9055  ;;  %v3133_v4 = vmul.f32 %v11739_v19, %v3125_v36 }
 0x7d8   :  { %v3234_v0 = vmul.f32 %v3226_v39, %v3026_v22  ;;  %v3176_v22 = vsub.f32 0.0, %v11736_v9  ;;  %v3134_v40 = vmul.f32 %v11745_v48, %v3126_v49  ;;  %v11762_v59 = vpop.eup %9057  ;;  %v3027_v35 = vmul.f32 0.5, %v11637_v11 }
 0x7d9   :  { %v3156_v1 = vadd.f32 0.2548296, %v3148_v20  ;;  %v3163_v23 = vmul.f32 %v11704_v60, %v3155_v51  ;;  %v7350_v60 = vadd.f32 -0.28449672, %v3133_v4  ;;  %v3103_v45 = vmul.f32 1.0614054, %v11762_v59 }
 0x7da   :  { %v8572_v3 = vpack.c.bf16 %v3234_v0, %v3233_v2  ;;  %v7351_v16 = vadd.f32 -0.28449672, %v3134_v40  ;;  %v9060_v12 = vpop.eup %9059  ;;  %v3184_v52 = vmul.f32 %v3176_v22, %v11736_v9  ;;  %v3197_v54 = vmul.f32 1.442695, %v3183_v57 }
 0x7db   :  { %v3164_v33 = vmul.f32 %v11711_v28, %v3156_v1  ;;  %v3203_v44 = vmul.f32 %v9054_v37, %v3163_v23  ;;  %v3051_v28 = vsel %vm3043_vm3, 1.0, %v13269_v31  ;;  %v3149_v50 = vmul.f32 %v11739_v19, %v7350_v60 }
 0x7dc   :  { %8573 = vmatprep.subr.bf16.mxu0 %v8572_v3  ;;  %v3150_v14 = vmul.f32 %v11745_v48, %v7351_v16  ;;  %v3104_v24 = vmul.f32 1.0614054, %v9060_v12  ;;  %v7344_v13 = vadd.f32 -1.4531521, %v3103_v45  ;;  %v3028_v2 = vmul.f32 0.5, %v11645_v56  ;;  %v9062_v20 = vpop.eup %9061 }
 0x7dd   :  { %8575 = vmatpush3.bf16.msra.mxu0 %v8572_v3  ;;  %v3204_v15 = vmul.f32 %v9056_v26, %v3164_v33  ;;  %v3211_v10 = vsub.f32 1.0, %v3203_v44  ;;  %v3157_v34 = vadd.f32 0.2548296, %v3149_v50  ;;  %v3199_v29 = vmul.f32 1.442695, %v3184_v52 }
 0x7de   :  { %v3158_v32 = vadd.f32 0.2548296, %v3150_v14  ;;  %v7345_v62 = vadd.f32 -1.4531521, %v3104_v24  ;;  %v3119_v39 = vmul.f32 %v11762_v59, %v7344_v13  ;;  %v9064_v0 = vpop.eup %9063  ;;  %vm3045_vm9 = vcmp.ge.f32.partialorder %v11673_v18, 0.0 }
 0x7df   :  { %v3212_v27 = vsub.f32 1.0, %v3204_v15  ;;  %v3219_v46 = vmul.f32 %v3211_v10, %v3051_v28  ;;  %v3165_v9 = vmul.f32 %v11739_v19, %v3157_v34  ;;  %9065 = vpow2.f32 %v3197_v54 }
 0x7e0   :  { %v3166_v7 = vmul.f32 %v11745_v48, %v3158_v32  ;;  %v3120_v37 = vmul.f32 %v9060_v12, %v7345_v62  ;;  %v3127_v11 = vadd.f32 1.4214138, %v3119_v39  ;;  %vm3046_vm10 = vcmp.ge.f32.partialorder %v11676_v30, 0.0  ;;  %v3243_v62 = vld [vmem:[%s13294_s3 + $0x10] sm:$0xff]  ;;  %v3246_v39 = vld [vmem:[%s13294_s3 + $0x28] sm:$0xff] }
 0x7e1   :  { %v3220_v17 = vmul.f32 %v3212_v27, %v3052_v55  ;;  %v3227_v61 = vadd.f32 1.0, %v3219_v46  ;;  %v3205_v6 = vmul.f32 %v9062_v20, %v3165_v9  ;;  %9067 = vpow2.f32 %v3199_v29  ;;  %v3249_v9 = vld [vmem:[%s13294_s3 + $0x40] sm:$0xff]  ;;  %v3250_v29 = vld [vmem:[%s13294_s3 + $0x48] sm:$0xff]  ;;  %v3251_v20 = vld [vmem:[%s13294_s3 + $0x50] sm:$0xff] }
 0x7e2   :  { %v3206_v1 = vmul.f32 %v9064_v0, %v3166_v7  ;;  %v3128_v56 = vadd.f32 1.4214138, %v3120_v37  ;;  %v3135_v36 = vmul.f32 %v11762_v59, %v3127_v11  ;;  %v3053_v26 = vsel %vm3045_vm9, 1.0, %v13269_v31  ;;  %v3253_v7 = vld [vmem:[%s13294_s3 + $0x60] sm:$0xff]  ;;  %v3254_v37 = vld [vmem:[%s13294_s3 + $0x68] sm:$0xff]  ;;  %v3255_v11 = vld [vmem:[%s13294_s3 + $0x70] sm:$0xff] }
 0x7e3   :  { %v3228_v41 = vadd.f32 1.0, %v3220_v17  ;;  %v3235_v8 = vmul.f32 %v3227_v61, %v3027_v35  ;;  %v3213_v25 = vsub.f32 1.0, %v3205_v6  ;;  %v3054_v49 = vsel %vm3046_vm10, 1.0, %v13269_v31  ;;  %v3256_v0 = vld [vmem:[%s13294_s3 + $0x78] sm:$0xff]  ;;  %v3258_v6 = vld [vmem:[%s13294_s3 + $0x88] sm:$0xff] }
 0x7e4   :  { %v3214_v48 = vsub.f32 1.0, %v3206_v1  ;;  %v3136_v3 = vmul.f32 %v9060_v12, %v3128_v56  ;;  %v7352_v23 = vadd.f32 -0.28449672, %v3135_v36  ;;  %v3029_v22 = vmul.f32 0.5, %v11663_v38  ;;  %v3259_v1 = vld [vmem:[%s13294_s3 + $0x90] sm:$0xff]  ;;  %v3260_v56 = vld [vmem:[%s13294_s3 + $0x98] sm:$0xff] }
 0x7e5   :  { %v3236_v51 = vmul.f32 %v3228_v41, %v3028_v2  ;;  %v3221_v18 = vmul.f32 %v3213_v25, %v3053_v26  ;;  %v3030_v40 = vmul.f32 0.5, %v11666_v58  ;;  %vm3047_vm13 = vcmp.ge.f32.partialorder %v11709_v43, 0.0  ;;  %v3247_v2 = vld [vmem:[%s13294_s3 + $0x30] sm:$0xff]  ;;  %v3248_v41 = vld [vmem:[%s13294_s3 + $0x38] sm:$0xff]  ;;  %v3261_v36 = vld [vmem:[%s13294_s3 + $0xa0] sm:$0xff] }
 0x7e6   :  { %v3222_v33 = vmul.f32 %v3214_v48, %v3054_v49  ;;  %v7353_v4 = vadd.f32 -0.28449672, %v3136_v3  ;;  %v3151_v30 = vmul.f32 %v11762_v59, %v7352_v23  ;;  %vm3048_vm14 = vcmp.ge.f32.partialorder %v11721_v5, 0.0  ;;  %v3242_v5 = vld [vmem:[%s13294_s3 + $0x8] sm:$0xff]  ;;  %v3263_v25 = vld [vmem:[%s13294_s3 + $0xb0] sm:$0xff]  ;;  %v3264_v26 = vld [vmem:[%s13294_s3 + $0xb8] sm:$0xff] }
 0x7e7   :  { %v8576_v19 = vpack.c.bf16 %v3236_v51, %v3235_v8  ;;  %v3229_v44 = vadd.f32 1.0, %v3221_v18  ;;  %v3055_v14 = vsel %vm3047_vm13, 1.0, %v13269_v31  ;;  %v3056_v35 = vsel %vm3048_vm14, 1.0, %v13269_v31  ;;  %v3252_v8 = vld [vmem:[%s13294_s3 + $0x58] sm:$0xff]  ;;  %v3257_v51 = vld [vmem:[%s13294_s3 + $0x80] sm:$0xff]  ;;  %v7355_v3 = vld [vmem:[%s13289_s1 + $0x68] sm:$0xff] }
 0x7e8   :  { %v3230_v15 = vadd.f32 1.0, %v3222_v33  ;;  %v3152_v60 = vmul.f32 %v9060_v12, %v7353_v4  ;;  %v3159_v57 = vadd.f32 0.2548296, %v3151_v30  ;;  %v3032_v43 = vmul.f32 0.5, %v11702_v53  ;;  %v3245_v53 = vld [vmem:[%s13294_s3 + $0x20] sm:$0xff]  ;;  %v7356_v23 = vld [vmem:[%s13289_s1 + $0x70] sm:$0xff] }
 0x7e9   :  { %8577 = vmatprep.subr.bf16.mxu0 %v8576_v19  ;;  %v3237_v28 = vmul.f32 %v3229_v44, %v3029_v22  ;;  %v9066_v55 = vpop.eup %9065  ;;  %v7354_v48 = vld [vmem:[%s13289_s1 + $0x60] sm:$0xff]  ;;  %v7357_v18 = vld [vmem:[%s13289_s1 + $0x78] sm:$0xff]  ;;  %v7359_v30 = vld [vmem:[%s13289_s1 + $0x88] sm:$0xff] }
 0x7ea   :  { %8579 = vmatpush3.bf16.msra.mxu0 %v8576_v19  ;;  %v3238_v10 = vmul.f32 %v3230_v15, %v3030_v40  ;;  %v3160_v16 = vadd.f32 0.2548296, %v3152_v60  ;;  %v3167_v45 = vmul.f32 %v11762_v59, %v3159_v57  ;;  %v3031_v59 = vmul.f32 0.5, %v11697_v21  ;;  %v3244_v21 = vld [vmem:[%s13294_s3 + $0x18] sm:$0xff]  ;;  %v3262_v19 = vld [vmem:[%s13294_s3 + $0xa8] sm:$0xff]  ;;  %v7358_v4 = vld [vmem:[%s13289_s1 + $0x80] sm:$0xff] }
 0x7eb   :  { %v9068_v46 = vpop.eup %9067  ;;  %v8588_v49 = vpack.c.bf16 %v7355_v3, %v7354_v48  ;;  %v8592_v33 = vpack.c.bf16 %v7357_v18, %v7356_v23  ;;  %v8596_v22 = vpack.c.bf16 %v7359_v30, %v7358_v4  ;;  %v7360_v44 = vld [vmem:[%s13289_s1 + $0x90] sm:$0xff]  ;;  %v7361_v40 = vld [vmem:[%s13289_s1 + $0x98] sm:$0xff]  ;;  %s13299_s3 = sld [smem:[#allocation31_spill]] }
 0x7ec   :  { %v8580_v27 = vpack.c.bf16 %v3238_v10, %v3237_v28  ;;  %v3168_v50 = vmul.f32 %v9060_v12, %v3160_v16  ;;  %v3207_v52 = vmul.f32 %v9066_v55, %v3167_v45  ;;  %v8600_v15 = vpack.c.bf16 %v7361_v40, %v7360_v44  ;;  %v7362_v55 = vld [vmem:[%s13289_s1 + $0xa0] sm:$0xff] }
 0x7ee   :  { %8581 = vmatprep.subr.bf16.mxu0 %v8580_v27  ;;  %v3208_v38 = vmul.f32 %v9068_v46, %v3168_v50  ;;  %v3215_v58 = vsub.f32 1.0, %v3207_v52 }
 0x7ef   :  { %8583 = vmatpush3.bf16.msra.mxu0 %v8580_v27  ;;  %v7363_v27 = vld [vmem:[%s13289_s1 + $0xa8] sm:$0xff] }
 0x7f0   :  { %v3216_v24 = vsub.f32 1.0, %v3208_v38  ;;  %v3223_v13 = vmul.f32 %v3215_v58, %v3055_v14  ;;  %v8604_v50 = vpack.c.bf16 %v7363_v27, %v7362_v55  ;;  %v7364_v14 = vld [vmem:[%s13289_s1 + $0xb0] sm:$0xff] }
 0x7f2   :  { %v3224_v17 = vmul.f32 %v3216_v24, %v3056_v35  ;;  %v3231_v34 = vadd.f32 1.0, %v3223_v13  ;;  %v7365_v24 = vld [vmem:[%s13289_s1 + $0xb8] sm:$0xff] }
 0x7f3   :  { %v8608_v13 = vpack.c.bf16 %v7365_v24, %v7364_v14 }
 0x7f4   :  { %v3232_v12 = vadd.f32 1.0, %v3224_v17  ;;  %v3239_v54 = vmul.f32 %v3231_v34, %v3031_v59 }
 0x7f6   :  { %v3240_v61 = vmul.f32 %v3232_v12, %v3032_v43 }
 0x7f8   :  { %v8584_v32 = vpack.c.bf16 %v3240_v61, %v3239_v54 }
 0x7fa   :  { %8585 = vmatprep.subr.bf16.mxu0 %v8584_v32 }
 0x7fb   :  { %8587 = vmatpush3.bf16.msra.mxu0 %v8584_v32 }
 0x7fc   :  { %8589 = vmatprep.subr.bf16.mxu0 %v8588_v49 }
 0x7fe   :  { %7985 = vmatmul.mubr.f32.vlgmr.msra.gmra.mrb[48].mxu0 %v3242_v5 }
 0x7ff   :  { %7987 = vmatprep.mubr.f32.mxu0 %v3243_v62  ;;  %8591 = vmatpush3.bf16.msra.mxu0 %v8588_v49 }
 0x800   :  { %8593 = vmatprep.subr.bf16.mxu0 %v8592_v33 }
 0x802   :  { %7988 = vmatmul.mubr.f32.gmra.mrb[50].mxu0 %v3244_v21 }
 0x803   :  { %7990 = vmatprep.mubr.f32.mxu0 %v3245_v53  ;;  %8595 = vmatpush3.bf16.msra.mxu0 %v8592_v33 }
 0x804   :  { %8597 = vmatprep.subr.bf16.mxu0 %v8596_v22 }
 0x806   :  { %7991 = vmatmul.mubr.f32.gmra.mrb[52].mxu0 %v3246_v39 }
 0x807   :  { %7993 = vmatprep.mubr.f32.mxu0 %v3247_v2  ;;  %8599 = vmatpush3.bf16.msra.mxu0 %v8596_v22 }
 0x808   :  { %8601 = vmatprep.subr.bf16.mxu0 %v8600_v15 }
 0x80a   :  { %7994 = vmatmul.mubr.f32.gmra.mrb[54].mxu0 %v3248_v41 }
 0x80b   :  { %7996 = vmatprep.mubr.f32.mxu0 %v3249_v9  ;;  %8603 = vmatpush3.bf16.msra.mxu0 %v8600_v15 }
 0x80c   :  { %8605 = vmatprep.subr.bf16.mxu0 %v8604_v50 }
 0x80e   :  { %7997 = vmatmul.mubr.f32.gmra.mrb[56].mxu0 %v3250_v29 }
 0x80f   :  { %7999 = vmatprep.mubr.f32.mxu0 %v3251_v20  ;;  %8607 = vmatpush3.bf16.msra.mxu0 %v8604_v50 }
 0x810   :  { %8609 = vmatprep.subr.bf16.mxu0 %v8608_v13 }
 0x812   :  { %8000 = vmatmul.mubr.f32.gmra.mrb[58].mxu0 %v3252_v8 }
 0x813   :  { %8002 = vmatprep.mubr.f32.mxu0 %v3253_v7  ;;  %8611 = vmatpush3.bf16.msra.mxu0 %v8608_v13 }
 0x816   :  { %8003 = vmatmul.mubr.f32.gmra.mrb[60].mxu0 %v3254_v37 }
 0x817   :  { %8005 = vmatprep.mubr.f32.mxu0 %v3255_v11 }
 0x81a   :  { %8006 = vmatmul.mubr.f32.gmra.mrb[62].mxu0 %v3256_v0 }
 0x81b   :  { %8008 = vmatprep.mubr.f32.mxu0 %v3257_v51 }
 0x81e   :  { %8009 = vmatmul.mubr.f32.gmra.mrb[64].mxu0 %v3258_v6 }
 0x81f   :  { %8011 = vmatprep.mubr.f32.mxu0 %v3259_v1 }
 0x822   :  { %8012 = vmatmul.mubr.f32.gmra.mrb[66].mxu0 %v3260_v56 }
 0x823   :  { %8014 = vmatprep.mubr.f32.mxu0 %v3261_v36 }
 0x826   :  { %8015 = vmatmul.mubr.f32.gmra.mrb[68].mxu0 %v3262_v19 }
 0x827   :  { %8017 = vmatprep.mubr.f32.mxu0 %v3263_v25 }
 0x82a   :  { %8018 = vmatmul.mubr.f32.gmra.mrb[70].mxu0 %v3264_v26 }
 0x8d1   :  { %v7986_v60 = vpop.f32.mrb[48].mxu0 }
 0x8d2   :  { %v3331_v57 = vpop.f32.mrb[49].mxu0 }
 0x8d5   :  { %v11886_v28 = vpop.f32.mrb[50].mxu0 }
 0x8d6   :  { %v11888_v10 = vpop.f32.mrb[51].mxu0 }
 0x8d9   :  { %v11890_v16 = vpop.f32.mrb[52].mxu0 }
 0x8da   :  { %v11892_v45 = vpop.f32.mrb[53].mxu0 }
 0x8dd   :  { %v11900_v52 = vpop.f32.mrb[54].mxu0 }
 0x8de   :  { %v11902_v46 = vpop.f32.mrb[55].mxu0 }
 0x8e1   :  { %v7998_v38 = vpop.f32.mrb[56].mxu0 }
 0x8e2   :  { %3460 = vrot.lane.b32.xlu1 %v7998_v38, %s13295_s6  ;;  %v3371_v58 = vpop.f32.mrb[57].mxu0 }
 0x8e3   :  { %3458 = vrot.lane.b32.xlu0 %v3371_v58, %s13295_s6 }
 0x8e5   :  { %v8001_v35 = vpop.f32.mrb[58].mxu0 }
 0x8e6   :  { %3464 = vrot.lane.b32.xlu1 %v8001_v35, %s13295_s6  ;;  %v3381_v59 = vpop.f32.mrb[59].mxu0 }
 0x8e7   :  { %3462 = vrot.lane.b32.xlu0 %v3381_v59, %s13295_s6 }
 0x8e9   :  { %v8004_v17 = vpop.f32.mrb[60].mxu0 }
 0x8ea   :  { %3468 = vrot.lane.b32.xlu1 %v8004_v17, %s13295_s6  ;;  %v3391_v34 = vpop.f32.mrb[61].mxu0 }
 0x8eb   :  { %3466 = vrot.lane.b32.xlu0 %v3391_v34, %s13295_s6 }
 0x8ed   :  { %v8007_v43 = vpop.f32.mrb[62].mxu0 }
 0x8ee   :  { %3472 = vrot.lane.b32.xlu1 %v8007_v43, %s13295_s6  ;;  %v3401_v12 = vpop.f32.mrb[63].mxu0 }
 0x8ef   :  { %3470 = vrot.lane.b32.xlu0 %v3401_v12, %s13295_s6 }
 0x8f1   :  { %v8010_v54 = vpop.f32.mrb[64].mxu0 }
 0x8f2   :  { %3492 = vrot.lane.b32.xlu1 %v8010_v54, %s13296_s24  ;;  %v3411_v61 = vpop.f32.mrb[65].mxu0 }
 0x8f3   :  { %3490 = vrot.lane.b32.xlu0 %v3411_v61, %s13296_s24 }
 0x8f5   :  { %v8013_v32 = vpop.f32.mrb[66].mxu0 }
 0x8f6   :  { %3496 = vrot.lane.b32.xlu1 %v8013_v32, %s13296_s24  ;;  %v3421_v5 = vpop.f32.mrb[67].mxu0 }
 0x8f7   :  { %3494 = vrot.lane.b32.xlu0 %v3421_v5, %s13296_s24 }
 0x8f9   :  { %v8016_v62 = vpop.f32.mrb[68].mxu0 }
 0x8fa   :  { %3500 = vrot.lane.b32.xlu1 %v8016_v62, %s13296_s24  ;;  %v3431_v21 = vpop.f32.mrb[69].mxu0 }
 0x8fb   :  { %3498 = vrot.lane.b32.xlu0 %v3431_v21, %s13296_s24 }
 0x8fd   :  { %v8019_v53 = vpop.f32.mrb[70].mxu0 }
 0x8fe   :  { %3504 = vrot.lane.b32.xlu1 %v8019_v53, %s13296_s24  ;;  %v3441_v39 = vpop.f32.mrb[71].mxu0 }
 0x8ff   :  { %3502 = vrot.lane.b32.xlu0 %v3441_v39, %s13296_s24 }
 0x954   :  { %v3461_v2 = vpop.permute.xlu1 %3460 }
 0x955   :  { %v3459_v41 = vpop.permute.xlu0 %3458  ;;  %v3515_v6 = vsel %vm450_vm4, %v7986_v60, %v3461_v2 }
 0x956   :  { %v3514_v0 = vsel %vm450_vm4, %v3331_v57, %v3459_v41 }
 0x958   :  { %v3465_v9 = vpop.permute.xlu1 %3464 }
 0x959   :  { %v3463_v29 = vpop.permute.xlu0 %3462  ;;  %v3517_v26 = vsel %vm450_vm4, %v11886_v28, %v3465_v9  ;;  %v7367_v28 = vld [vmem:[%s13247_s2 + $0x2] ss:$0 sm:$0xff] }
 0x95a   :  { %v3516_v19 = vsel %vm450_vm4, %v11888_v10, %v3463_v29 }
 0x95c   :  { %v3469_v20 = vpop.permute.xlu1 %3468 }
 0x95d   :  { %v3467_v8 = vpop.permute.xlu0 %3466  ;;  %v3519_v33 = vsel %vm450_vm4, %v11890_v16, %v3469_v20 }
 0x95e   :  { %v3518_v49 = vsel %vm450_vm4, %v11892_v45, %v3467_v8 }
 0x960   :  { %v3473_v7 = vpop.permute.xlu1 %3472 }
 0x961   :  { %v3471_v37 = vpop.permute.xlu0 %3470  ;;  %v3521_v15 = vsel %vm450_vm4, %v11900_v52, %v3473_v7 }
 0x962   :  { %v3520_v44 = vsel %vm450_vm4, %v11902_v46, %v3471_v37 }
 0x964   :  { %v3493_v11 = vpop.permute.xlu1 %3492 }
 0x965   :  { %v3491_v51 = vpop.permute.xlu0 %3490  ;;  %v3523_v56 = vsel %vm2292_vm11, %v3515_v6, %v3493_v11 }
 0x966   :  { %v3522_v1 = vsel %vm2292_vm11, %v3514_v0, %v3491_v51 }
 0x967   :  { %8044 = vmatprep.mubr.msk.f32.mxu0 %vm2329_vm12, %v3522_v1 }
 0x968   :  { %8045 = vmatmul.mubr.msk.f32.vlgmr.msra.gmra.mrb[72].mxu0 %vm2329_vm12, %v3523_v56  ;;  %v3497_v36 = vpop.permute.xlu1 %3496 }
 0x969   :  { %v3495_v25 = vpop.permute.xlu0 %3494  ;;  %v3525_v3 = vsel %vm2292_vm11, %v3517_v26, %v3497_v36 }
 0x96a   :  { %v3524_v48 = vsel %vm2292_vm11, %v3516_v19, %v3495_v25 }
 0x96b   :  { %8047 = vmatprep.mubr.msk.f32.mxu0 %vm2329_vm12, %v3524_v48 }
 0x96c   :  { %8048 = vmatmul.mubr.msk.f32.gmra.mrb[74].mxu0 %vm2329_vm12, %v3525_v3  ;;  %v3501_v23 = vpop.permute.xlu1 %3500 }
 0x96d   :  { %v3499_v18 = vpop.permute.xlu0 %3498  ;;  %v3527_v30 = vsel %vm2292_vm11, %v3519_v33, %v3501_v23 }
 0x96e   :  { %v3526_v4 = vsel %vm2292_vm11, %v3518_v49, %v3499_v18 }
 0x96f   :  { %8050 = vmatprep.mubr.msk.f32.mxu0 %vm2329_vm12, %v3526_v4 }
 0x970   :  { %8051 = vmatmul.mubr.msk.f32.gmra.mrb[76].mxu0 %vm2329_vm12, %v3527_v30  ;;  %v3505_v22 = vpop.permute.xlu1 %3504 }
 0x971   :  { %v3503_v40 = vpop.permute.xlu0 %3502  ;;  %v3529_v57 = vsel %vm2292_vm11, %v3521_v15, %v3505_v22 }
 0x972   :  { %v3528_v60 = vsel %vm2292_vm11, %v3520_v44, %v3503_v40 }
 0x973   :  { %8053 = vmatprep.mubr.msk.f32.mxu0 %vm2329_vm12, %v3528_v60 }
 0x974   :  { %8054 = vmatmul.mubr.msk.f32.gmra.mrb[78].mxu0 %vm2329_vm12, %v3529_v57 }
 0xa3b   :  { %v8046_v10 = vpop.f32.mrb[72].mxu0 }
 0xa3c   :  { %v11959_v16 = vadd.f32 %v8046_v10, %v7367_v28  ;;  %v3641_v45 = vpop.f32.mrb[73].mxu0 }
 0xa3d   :  { %v3642_v55 = vadd.f32 %v7367_v28, %v3641_v45 }
 0xa3e   :  { %v3685_v27 = vsel %vm450_vm4, %v11959_v16, 0.0 }
 0xa3f   :  { %v3684_v50 = vsel %vm450_vm4, %v3642_v55, 0.0  ;;  %v8049_v52 = vpop.f32.mrb[74].mxu0 }
 0xa40   :  { %v3651_v46 = vpop.f32.mrb[75].mxu0  ;;  %v3657_v38 = vadd.f32 %v8049_v52, %v7367_v28  ;;  %v3686_v14 = vadd.f32 %v3685_v27, %v3684_v50 }
 0xa41   :  { %v3652_v58 = vadd.f32 %v7367_v28, %v3651_v46 }
 0xa42   :  { %v3689_v34 = vsel %vm450_vm4, %v3657_v38, 0.0 }
 0xa43   :  { %v3687_v24 = vsel %vm450_vm4, %v3652_v58, 0.0  ;;  %v8052_v13 = vpop.f32.mrb[76].mxu0 }
 0xa44   :  { %v3688_v35 = vadd.f32 %v3687_v24, %v3686_v14  ;;  %v11965_v59 = vadd.f32 %v8052_v13, %v7367_v28  ;;  %v3661_v17 = vpop.f32.mrb[77].mxu0 }
 0xa45   :  { %v11968_v43 = vadd.f32 %v7367_v28, %v3661_v17 }
 0xa46   :  { %v3690_v12 = vadd.f32 %v3689_v34, %v3688_v35  ;;  %v3904_v54 = vsel %vm450_vm4, %v11965_v59, 0.0 }
 0xa47   :  { %v3903_v61 = vsel %vm450_vm4, %v11968_v43, 0.0  ;;  %v8055_v32 = vpop.f32.mrb[78].mxu0 }
 0xa48   :  { %v3691_v5 = vrot.slane %v3690_v12, 4  ;;  %v3671_v62 = vpop.f32.mrb[79].mxu0  ;;  %v11974_v21 = vadd.f32 %v8055_v32, %v7367_v28  ;;  %v3905_v2 = vadd.f32 %v3904_v54, %v3903_v61 }
 0xa49   :  { %v3672_v53 = vadd.f32 %v7367_v28, %v3671_v62 }
 0xa4a   :  { %v3692_v39 = vadd.f32 %v3691_v5, %v3690_v12  ;;  %v3908_v20 = vsel %vm450_vm4, %v11974_v21, 0.0 }
 0xa4b   :  { %v3906_v41 = vsel %vm450_vm4, %v3672_v53, 0.0 }
 0xa4c   :  { %v3693_v9 = vrot.slane %v3692_v39, 2  ;;  %v3907_v29 = vadd.f32 %v3906_v41, %v3905_v2 }
 0xa4e   :  { %v3694_v8 = vadd.f32 %v3693_v9, %v3692_v39  ;;  %v3909_v7 = vadd.f32 %v3908_v20, %v3907_v29 }
 0xa50   :  { %v3695_v37 = vrot.slane %v3694_v8, 1  ;;  %v3910_v11 = vrot.slane %v3909_v7, 4 }
 0xa52   :  { %v3696_v0 = vadd.f32 %v3695_v37, %v3694_v8  ;;  %v3911_v51 = vadd.f32 %v3910_v11, %v3909_v7 }
 0xa54   :  { %v3912_v6 = vrot.slane %v3911_v51, 2  ;;  %3701 = vrot.lane.b32.xlu1 %v3696_v0, %s13290_s5  ;;  %3698 = vrot.lane.b32.xlu0 %v3696_v0, %s13297_s9 }
 0xa56   :  { %v3913_v1 = vadd.f32 %v3912_v6, %v3911_v51 }
 0xa58   :  { %v3914_v56 = vrot.slane %v3913_v1, 1  ;;  %3708 = vrot.lane.b32.xlu1 %v3696_v0, %s13292_s7  ;;  %3705 = vrot.lane.b32.xlu0 %v3696_v0, %s13291_s0 }
 0xa5a   :  { %v3915_v36 = vadd.f32 %v3914_v56, %v3913_v1 }
 0xa5c   :  { %3920 = vrot.lane.b32.xlu1 %v3915_v36, %s13290_s5  ;;  %3917 = vrot.lane.b32.xlu0 %v3915_v36, %s13297_s9 }
 0xa60   :  { %3927 = vrot.lane.b32.xlu1 %v3915_v36, %s13292_s7  ;;  %3924 = vrot.lane.b32.xlu0 %v3915_v36, %s13291_s0 }
 0xac6   :  { %v3702_v19 = vpop.permute.xlu1 %3701  ;;  %v3699_v25 = vpop.permute.xlu0 %3698 }
 0xac7   :  { %v3704_v3 = vsel %vm495_vm6, %v3699_v25, %v3702_v19 }
 0xaca   :  { %v3709_v26 = vpop.permute.xlu1 %3708  ;;  %v3706_v48 = vpop.permute.xlu0 %3705 }
 0xacb   :  { %v3711_v23 = vsel %vm503_vm5, %v3706_v48, %v3709_v26  ;;  %v4110_v26 = vld [vmem:[%s13298_s26] sm:$0xff] }
 0xacc   :  { %v3712_v49 = vsel %vm9661_vm7, %v3704_v3, %v3711_v23  ;;  %8072 = vmatprep.mubr.msk.f32.mxu0 %vm2292_vm11, %v4110_v26 }
 0xacd   :  { %v3713_v18 = vadd.f32 %v3712_v49, %v3696_v0 }
 0xace   :  { %v3921_v33 = vpop.permute.xlu1 %3920  ;;  %v3918_v4 = vpop.permute.xlu0 %3917 }
 0xacf   :  { %v3714_v30 = vmul.f32 0.015625, %v3713_v18 }
 0xad1   :  { %v3718_v22 = vrot.slane %v3714_v30, %v9669_v47 }
 0xad2   :  { %v3928_v44 = vpop.permute.xlu1 %3927  ;;  %v3925_v40 = vpop.permute.xlu0 %3924 }
 0xad3   :  { %v11992_v15 = vsub.f32 %v3642_v55, %v3718_v22  ;;  %v11995_v60 = vsub.f32 %v11959_v16, %v3718_v22  ;;  %v11997_v57 = vsub.f32 %v3652_v58, %v3718_v22  ;;  %v11999_v28 = vsub.f32 %v3657_v38, %v3718_v22 }
 0xad4   :  { %v3930_v10 = vsel %vm503_vm5, %v3925_v40, %v3928_v44  ;;  %v3923_v55 = vsel %vm495_vm6, %v3918_v4, %v3921_v33 }
 0xad5   :  { %v3723_v45 = vmul.f32 %v11992_v15, %v11992_v15  ;;  %v3724_v27 = vmul.f32 %v11995_v60, %v11995_v60  ;;  %v3725_v50 = vmul.f32 %v11997_v57, %v11997_v57  ;;  %v3931_v16 = vsel %vm9661_vm7, %v3923_v55, %v3930_v10 }
 0xad6   :  { %v3726_v52 = vmul.f32 %v11999_v28, %v11999_v28  ;;  %v3932_v58 = vadd.f32 %v3931_v16, %v3915_v36 }
 0xad7   :  { %v3727_v46 = vsel %vm450_vm4, %v3723_v45, 0.0  ;;  %v3728_v38 = vsel %vm450_vm4, %v3724_v27, 0.0  ;;  %v3730_v24 = vsel %vm450_vm4, %v3725_v50, 0.0 }
 0xad8   :  { %v3729_v14 = vadd.f32 %v3728_v38, %v3727_v46  ;;  %v3933_v13 = vmul.f32 0.015625, %v3932_v58  ;;  %v3732_v34 = vsel %vm450_vm4, %v3726_v52, 0.0 }
 0xada   :  { %v3731_v35 = vadd.f32 %v3730_v24, %v3729_v14  ;;  %v3937_v17 = vrot.slane %v3933_v13, %v9669_v47 }
 0xadc   :  { %v3733_v12 = vadd.f32 %v3732_v34, %v3731_v35  ;;  %v12019_v54 = vsub.f32 %v11968_v43, %v3937_v17  ;;  %v12022_v61 = vsub.f32 %v11965_v59, %v3937_v17  ;;  %v12024_v32 = vsub.f32 %v3672_v53, %v3937_v17 }
 0xadd   :  { %v12027_v5 = vsub.f32 %v11974_v21, %v3937_v17 }
 0xade   :  { %v3734_v62 = vrot.slane %v3733_v12, 4  ;;  %v3942_v39 = vmul.f32 %v12019_v54, %v12019_v54  ;;  %v3943_v2 = vmul.f32 %v12022_v61, %v12022_v61  ;;  %v3944_v41 = vmul.f32 %v12024_v32, %v12024_v32 }
 0xadf   :  { %v3945_v59 = vmul.f32 %v12027_v5, %v12027_v5 }
 0xae0   :  { %v3735_v43 = vadd.f32 %v3734_v62, %v3733_v12  ;;  %v3946_v53 = vsel %vm450_vm4, %v3942_v39, 0.0  ;;  %v3947_v9 = vsel %vm450_vm4, %v3943_v2, 0.0  ;;  %v3949_v20 = vsel %vm450_vm4, %v3944_v41, 0.0 }
 0xae1   :  { %v3948_v21 = vadd.f32 %v3947_v9, %v3946_v53  ;;  %v3951_v37 = vsel %vm450_vm4, %v3945_v59, 0.0  ;;  %v7378_v59 = vld [vmem:[%s13267_s8 + $0x2] ss:$0 sm:$0xff] }
 0xae2   :  { %v3736_v29 = vrot.slane %v3735_v43, 2 }
 0xae3   :  { %v3950_v7 = vadd.f32 %v3949_v20, %v3948_v21  ;;  %v7379_v20 = vld [vmem:[%s13268_s28 + $0x2] ss:$0 sm:$0xff] }
 0xae4   :  { %v3737_v8 = vadd.f32 %v3736_v29, %v3735_v43 }
 0xae5   :  { %v3952_v0 = vadd.f32 %v3951_v37, %v3950_v7 }
 0xae6   :  { %v3738_v11 = vrot.slane %v3737_v8, 1 }
 0xae7   :  { %v3953_v6 = vrot.slane %v3952_v0, 4 }
 0xae8   :  { %v3739_v51 = vadd.f32 %v3738_v11, %v3737_v8 }
 0xae9   :  { %v3954_v1 = vadd.f32 %v3953_v6, %v3952_v0 }
 0xaea   :  { %3744 = vrot.lane.b32.xlu1 %v3739_v51, %s13290_s5  ;;  %3741 = vrot.lane.b32.xlu0 %v3739_v51, %s13297_s9 }
 0xaeb   :  { %v3955_v56 = vrot.slane %v3954_v1, 2 }
 0xaed   :  { %v3956_v36 = vadd.f32 %v3955_v56, %v3954_v1 }
 0xaee   :  { %3751 = vrot.lane.b32.xlu1 %v3739_v51, %s13292_s7  ;;  %3748 = vrot.lane.b32.xlu0 %v3739_v51, %s13291_s0 }
 0xaef   :  { %v3957_v19 = vrot.slane %v3956_v36, 1 }
 0xaf1   :  { %v3958_v25 = vadd.f32 %v3957_v19, %v3956_v36 }
 0xaf3   :  { %3963 = vrot.lane.b32.xlu1 %v3958_v25, %s13290_s5  ;;  %3960 = vrot.lane.b32.xlu0 %v3958_v25, %s13297_s9 }
 0xaf7   :  { %3970 = vrot.lane.b32.xlu1 %v3958_v25, %s13292_s7  ;;  %3967 = vrot.lane.b32.xlu0 %v3958_v25, %s13291_s0 }
 0xb5c   :  { %v3745_v48 = vpop.permute.xlu1 %3744  ;;  %v3742_v3 = vpop.permute.xlu0 %3741 }
 0xb5d   :  { %v3747_v18 = vsel %vm495_vm6, %v3742_v3, %v3745_v48 }
 0xb60   :  { %v3752_v23 = vpop.permute.xlu1 %3751  ;;  %v3749_v49 = vpop.permute.xlu0 %3748 }
 0xb61   :  { %v3754_v33 = vsel %vm503_vm5, %v3749_v49, %v3752_v23 }
 0xb62   :  { %v3755_v4 = vsel %vm9661_vm7, %v3747_v18, %v3754_v33 }
 0xb63   :  { %v3756_v30 = vadd.f32 %v3755_v4, %v3739_v51 }
 0xb65   :  { %v3757_v22 = vmul.f32 0.015625, %v3756_v30  ;;  %v3964_v44 = vpop.permute.xlu1 %3963  ;;  %v3961_v40 = vpop.permute.xlu0 %3960 }
 0xb66   :  { %v3966_v50 = vsel %vm495_vm6, %v3961_v40, %v3964_v44 }
 0xb67   :  { %v3758_v10 = vadd.f32 1e-05, %v3757_v22 }
 0xb69   :  { %9069 = vrsqrt.f32 %v3758_v10  ;;  %v3971_v45 = vpop.permute.xlu1 %3970  ;;  %v3968_v27 = vpop.permute.xlu0 %3967  ;;  %vm3761_vm15 = vcmp.eq.f32.partialorder %v3758_v10, inf  ;;  %v3764_v24 = vand.u32 2147483648, %v3758_v10  ;;  %vm3763_vm1 = vcmp.eq.f32.partialorder %v3758_v10, 0.0 }
 0xb6a   :  { %v3973_v55 = vsel %vm503_vm5, %v3968_v27, %v3971_v45 }
 0xb6b   :  { %v3974_v16 = vsel %vm9661_vm7, %v3966_v50, %v3973_v55 }
 0xb6c   :  { %v3975_v52 = vadd.f32 %v3974_v16, %v3958_v25 }
 0xb6e   :  { %v3976_v46 = vmul.f32 0.015625, %v3975_v52 }
 0xb70   :  { %v3977_v38 = vadd.f32 1e-05, %v3976_v46 }
 0xb72   :  { %9071 = vrsqrt.f32 %v3977_v38  ;;  %vm3980_vm2 = vcmp.eq.f32.partialorder %v3977_v38, inf  ;;  %v3983_v62 = vand.u32 2147483648, %v3977_v38  ;;  %vm3982_vm3 = vcmp.eq.f32.partialorder %v3977_v38, 0.0 }
 0xb73   :  { %v9070_v58 = vpop.eup %9069 }
 0xb74   :  { %v3760_v14 = vmul.f32 %v9070_v58, %v3758_v10 }
 0xb76   :  { %v3762_v13 = vsel %vm3761_vm15, %v3758_v10, %v3760_v14 }
 0xb77   :  { %v3765_v35 = vsel %vm3763_vm1, %v3764_v24, %v3762_v13 }
 0xb78   :  { %v3769_v17 = vrot.slane %v3765_v35, %v9669_v47 }
 0xb7a   :  { %9073 = vrcp.f32 %v3769_v17 }
 0xb7c   :  { %v9072_v34 = vpop.eup %9071 }
 0xb7d   :  { %v3979_v12 = vmul.f32 %v9072_v34, %v3977_v38 }
 0xb7f   :  { %v3981_v39 = vsel %vm3980_vm2, %v3977_v38, %v3979_v12 }
 0xb80   :  { %v3984_v2 = vsel %vm3982_vm3, %v3983_v62, %v3981_v39 }
 0xb81   :  { %v3988_v41 = vrot.slane %v3984_v2, %v9669_v47 }
 0xb83   :  { %9075 = vrcp.f32 %v3988_v41 }
 0xb84   :  { %v9074_v43 = vpop.eup %9073 }
 0xb85   :  { %v3771_v53 = vmul.f32 %v9074_v43, %v11992_v15  ;;  %v3772_v9 = vmul.f32 %v9074_v43, %v11995_v60  ;;  %v3773_v21 = vmul.f32 %v9074_v43, %v11997_v57  ;;  %v3774_v29 = vmul.f32 %v9074_v43, %v11999_v28 }
 0xb87   :  { %v3781_v8 = vmul.f32 %v7378_v59, %v3771_v53  ;;  %v3782_v7 = vmul.f32 %v7378_v59, %v3772_v9  ;;  %v3783_v37 = vmul.f32 %v7378_v59, %v3773_v21  ;;  %v3784_v11 = vmul.f32 %v7378_v59, %v3774_v29 }
 0xb89   :  { %v3791_v0 = vadd.f32 %v7379_v20, %v3781_v8  ;;  %v3792_v51 = vadd.f32 %v7379_v20, %v3782_v7  ;;  %v3793_v6 = vadd.f32 %v7379_v20, %v3783_v37  ;;  %v3794_v1 = vadd.f32 %v7379_v20, %v3784_v11 }
 0xb8b   :  { %v3799_v15 = vmul.f32 0.70710677, %v3791_v0  ;;  %v3800_v56 = vmul.f32 0.70710677, %v3792_v51  ;;  %v3801_v60 = vmul.f32 0.70710677, %v3793_v6 }
 0xb8c   :  { %v12073_v36 = vmul.f32 0.70710677, %v3794_v1  ;;  %v12080_v50 = vmul.f32 0.5, %v3791_v0  ;;  %v12084_v52 = vmul.f32 0.5, %v3792_v51  ;;  %v12091_v24 = vmul.f32 0.5, %v3793_v6 }
 0xb8d   :  { %v3811_v57 = vand.u32 2147483647, %v3799_v15  ;;  %v3812_v28 = vand.u32 2147483647, %v3800_v56  ;;  %v9076_v26 = vpop.eup %9075  ;;  %v3813_v48 = vand.u32 2147483647, %v3801_v60 }
 0xb8e   :  { %v3814_v3 = vand.u32 2147483647, %v12073_v36  ;;  %v3990_v4 = vmul.f32 %v9076_v26, %v12019_v54  ;;  %v3991_v44 = vmul.f32 %v9076_v26, %v12022_v61  ;;  %v3992_v45 = vmul.f32 %v9076_v26, %v12024_v32 }
 0xb8f   :  { %v3815_v19 = vmul.f32 0.3275911, %v3811_v57  ;;  %v3816_v25 = vmul.f32 0.3275911, %v3812_v28  ;;  %v3817_v18 = vmul.f32 0.3275911, %v3813_v48  ;;  %v3993_v27 = vmul.f32 %v9076_v26, %v12027_v5 }
 0xb90   :  { %v3818_v33 = vmul.f32 0.3275911, %v3814_v3  ;;  %v3994_v40 = vmul.f32 %v7378_v59, %v3990_v4  ;;  %v3867_v10 = vsub.f32 0.0, %v3811_v57  ;;  %v3995_v55 = vmul.f32 %v7378_v59, %v3991_v44 }
 0xb91   :  { %v3819_v23 = vadd.f32 1.0, %v3815_v19  ;;  %v3820_v49 = vadd.f32 1.0, %v3816_v25  ;;  %v3821_v30 = vadd.f32 1.0, %v3817_v18  ;;  %v3868_v54 = vsub.f32 0.0, %v3812_v28 }
 0xb92   :  { %v3822_v22 = vadd.f32 1.0, %v3818_v33  ;;  %v12082_v16 = vadd.f32 %v7379_v20, %v3994_v40  ;;  %v3996_v46 = vmul.f32 %v7378_v59, %v3992_v45  ;;  %vm3803_vm8 = vcmp.ge.f32.partialorder %v3799_v15, 0.0 }
 0xb93   :  { %9077 = vrcp.f32 %v3819_v23  ;;  %v12086_v38 = vadd.f32 %v7379_v20, %v3995_v55  ;;  %v3997_v32 = vmul.f32 %v7378_v59, %v3993_v27  ;;  %vm3804_vm9 = vcmp.ge.f32.partialorder %v3800_v56, 0.0 }
 0xb94   :  { %9079 = vrcp.f32 %v3820_v49  ;;  %v12089_v61 = vmul.f32 0.70710677, %v12082_v16  ;;  %v3871_v5 = vmul.f32 %v3867_v10, %v3811_v57  ;;  %v3869_v58 = vsub.f32 0.0, %v3813_v48 }
 0xb95   :  { %9081 = vrcp.f32 %v3821_v30  ;;  %v3870_v14 = vsub.f32 0.0, %v3814_v3  ;;  %v12093_v13 = vmul.f32 0.5, %v3794_v1  ;;  %v12096_v35 = vmul.f32 0.70710677, %v12086_v38 }
 0xb96   :  { %9083 = vrcp.f32 %v3822_v22  ;;  %v4018_v17 = vand.u32 2147483647, %v12089_v61  ;;  %v12100_v34 = vsel %vm3803_vm8, 1.0, %v13269_v31  ;;  %v3872_v12 = vmul.f32 %v3868_v54, %v3812_v28 }
 0xb97   :  { %vm3805_vm10 = vcmp.ge.f32.partialorder %v3801_v60, 0.0  ;;  %v12102_v62 = vadd.f32 %v7379_v20, %v3996_v46  ;;  %v12107_v2 = vsel %vm3804_vm9, 1.0, %v13269_v31  ;;  %v4019_v41 = vand.u32 2147483647, %v12096_v35 }
 0xb98   :  { %v4022_v43 = vmul.f32 0.3275911, %v4018_v17  ;;  %v12110_v59 = vadd.f32 %v7379_v20, %v3997_v32  ;;  %v3875_v21 = vmul.f32 1.442695, %v3871_v5  ;;  %v3873_v29 = vmul.f32 %v3869_v58, %v3813_v48 }
 0xb99   :  { %v3874_v8 = vmul.f32 %v3870_v14, %v3814_v3  ;;  %v12117_v37 = vsel %vm3805_vm10, 1.0, %v13269_v31  ;;  %v4023_v11 = vmul.f32 0.3275911, %v4019_v41  ;;  %v3877_v6 = vmul.f32 1.442695, %v3872_v12 }
 0xb9a   :  { %v4026_v0 = vadd.f32 1.0, %v4022_v43  ;;  %v12120_v1 = vmul.f32 0.70710677, %v12102_v62  ;;  %v12125_v60 = vmul.f32 0.70710677, %v12110_v59  ;;  %vm3806_vm13 = vcmp.ge.f32.partialorder %v12073_v36, 0.0 }
 0xb9b   :  { %v4027_v56 = vadd.f32 1.0, %v4023_v11  ;;  %v3879_v25 = vmul.f32 1.442695, %v3873_v29  ;;  %v3881_v26 = vmul.f32 1.442695, %v3874_v8  ;;  %v4074_v23 = vsub.f32 0.0, %v4018_v17 }
 0xb9c   :  { %9085 = vrcp.f32 %v4026_v0  ;;  %v4020_v33 = vand.u32 2147483647, %v12120_v1  ;;  %v4021_v22 = vand.u32 2147483647, %v12125_v60  ;;  %v4075_v10 = vsub.f32 0.0, %v4019_v41 }
 0xb9d   :  { %v12104_v39 = vpop.eup %9077  ;;  %9087 = vrcp.f32 %v4027_v56  ;;  %v4078_v54 = vmul.f32 %v4074_v23, %v4018_v17  ;;  %vm4010_vm14 = vcmp.ge.f32.partialorder %v12089_v61, 0.0  ;;  %vm4011_vm15 = vcmp.ge.f32.partialorder %v12096_v35, 0.0 }
 0xb9e   :  { %v12112_v53 = vpop.eup %9079  ;;  %v3831_v9 = vmul.f32 1.0614054, %v12104_v39  ;;  %9089 = vpow2.f32 %v3875_v21  ;;  %v4024_v45 = vmul.f32 0.3275911, %v4020_v33  ;;  %v4025_v46 = vmul.f32 0.3275911, %v4021_v22 }
 0xb9f   :  { %v3832_v7 = vmul.f32 1.0614054, %v12112_v53  ;;  %v12122_v20 = vpop.eup %9081  ;;  %9091 = vpow2.f32 %v3877_v6  ;;  %v4079_v29 = vmul.f32 %v4075_v10, %v4019_v41  ;;  %v4082_v11 = vmul.f32 1.442695, %v4078_v54 }
 0xba0   :  { %v7380_v51 = vadd.f32 -1.4531521, %v3831_v9  ;;  %v12127_v57 = vpop.eup %9083  ;;  %v3833_v19 = vmul.f32 1.0614054, %v12122_v20  ;;  %9093 = vpow2.f32 %v3879_v25  ;;  %v4028_v58 = vadd.f32 1.0, %v4024_v45 }
 0xba1   :  { %v7381_v15 = vadd.f32 -1.4531521, %v3832_v7  ;;  %v3834_v3 = vmul.f32 1.0614054, %v12127_v57  ;;  %9095 = vpow2.f32 %v3881_v26  ;;  %v4029_v43 = vadd.f32 1.0, %v4025_v46 }
 0xba2   :  { %v3839_v28 = vmul.f32 %v12104_v39, %v7380_v51  ;;  %v7382_v18 = vadd.f32 -1.4531521, %v3833_v19  ;;  %9097 = vrcp.f32 %v4028_v58  ;;  %v3810_v41 = vsel %vm3806_vm13, 1.0, %v13269_v31 }
 0xba3   :  { %v3840_v48 = vmul.f32 %v12112_v53, %v7381_v15  ;;  %v7383_v30 = vadd.f32 -1.4531521, %v3834_v3  ;;  %9099 = vrcp.f32 %v4029_v43  ;;  %v4076_v19 = vsub.f32 0.0, %v4020_v33 }
 0xba4   :  { %v3843_v49 = vadd.f32 1.4214138, %v3839_v28  ;;  %v3841_v40 = vmul.f32 %v12122_v20, %v7382_v18  ;;  %9101 = vpow2.f32 %v4082_v11  ;;  %vm4012_vm1 = vcmp.ge.f32.partialorder %v12120_v1, 0.0 }
 0xba5   :  { %v3844_v4 = vadd.f32 1.4214138, %v3840_v48  ;;  %v3842_v55 = vmul.f32 %v12127_v57, %v7383_v30  ;;  %v4084_v30 = vmul.f32 1.442695, %v4079_v29  ;;  %vm4013_vm2 = vcmp.ge.f32.partialorder %v12125_v60, 0.0 }
 0xba6   :  { %v3847_v44 = vmul.f32 %v12104_v39, %v3843_v49  ;;  %v3845_v5 = vadd.f32 1.4214138, %v3841_v40  ;;  %v12142_v8 = vpop.eup %9085  ;;  %v4004_v1 = vmul.f32 0.5, %v12102_v62  ;;  %v4113_v62 = vld [vmem:[%s13298_s26 + $0x18] sm:$0xff] }
 0xba7   :  { %v3848_v27 = vmul.f32 %v12112_v53, %v3844_v4  ;;  %v3846_v12 = vadd.f32 1.4214138, %v3842_v55  ;;  %v4038_v6 = vmul.f32 1.0614054, %v12142_v8  ;;  %v12147_v15 = vpop.eup %9087  ;;  %9103 = vpow2.f32 %v4084_v30 }
 0xba8   :  { %v7384_v32 = vadd.f32 -0.28449672, %v3847_v44  ;;  %v3849_v21 = vmul.f32 %v12122_v20, %v3845_v5  ;;  %v9090_v25 = vpop.eup %9089  ;;  %v4039_v3 = vmul.f32 1.0614054, %v12147_v15  ;;  %v4077_v44 = vsub.f32 0.0, %v4021_v22 }
 0xba9   :  { %v7385_v14 = vadd.f32 -0.28449672, %v3848_v27  ;;  %v3850_v17 = vmul.f32 %v12127_v57, %v3846_v12  ;;  %v7388_v23 = vadd.f32 -1.4531521, %v4038_v6  ;;  %v9092_v49 = vpop.eup %9091 }
 0xbaa   :  { %v3855_v9 = vmul.f32 %v12104_v39, %v7384_v32  ;;  %v7386_v51 = vadd.f32 -0.28449672, %v3849_v21  ;;  %v7389_v10 = vadd.f32 -1.4531521, %v4039_v3  ;;  %v9094_v54 = vpop.eup %9093  ;;  %v4081_v43 = vmul.f32 %v4077_v44, %v4021_v22 }
 0xbab   :  { %v3856_v7 = vmul.f32 %v12112_v53, %v7385_v14  ;;  %v7387_v28 = vadd.f32 -0.28449672, %v3850_v17  ;;  %v4046_v45 = vmul.f32 %v12142_v8, %v7388_v23  ;;  %v9096_v58 = vpop.eup %9095 }
 0xbac   :  { %v3859_v0 = vadd.f32 0.2548296, %v3855_v9  ;;  %v3857_v48 = vmul.f32 %v12122_v20, %v7386_v51  ;;  %v4047_v5 = vmul.f32 %v12147_v15, %v7389_v10  ;;  %v12161_v9 = vpop.eup %9097 }
 0xbad   :  { %v3860_v56 = vadd.f32 0.2548296, %v3856_v7  ;;  %v3858_v4 = vmul.f32 %v12127_v57, %v7387_v28  ;;  %v12165_v17 = vpop.eup %9099 }
 0xbae   :  { %v3863_v26 = vmul.f32 %v12104_v39, %v3859_v0  ;;  %v3861_v36 = vadd.f32 0.2548296, %v3857_v48  ;;  %v4080_v39 = vmul.f32 %v4076_v19, %v4020_v33  ;;  %v4051_v7 = vadd.f32 1.4214138, %v4047_v5  ;;  %v9102_v10 = vpop.eup %9101 }
 0xbaf   :  { %v3864_v18 = vmul.f32 %v12112_v53, %v3860_v56  ;;  %v3862_v55 = vadd.f32 0.2548296, %v3858_v4  ;;  %v4050_v53 = vadd.f32 1.4214138, %v4046_v45  ;;  %v4040_v0 = vmul.f32 1.0614054, %v12161_v9 }
 0xbb0   :  { %v3883_v40 = vmul.f32 %v9090_v25, %v3863_v26  ;;  %v3865_v32 = vmul.f32 %v12122_v20, %v3861_v36  ;;  %v4086_v51 = vmul.f32 1.442695, %v4080_v39  ;;  %v4055_v22 = vmul.f32 %v12147_v15, %v4051_v7 }
 0xbb1   :  { %v3884_v27 = vmul.f32 %v9092_v49, %v3864_v18  ;;  %v3866_v12 = vmul.f32 %v12127_v57, %v3862_v55  ;;  %v4054_v33 = vmul.f32 %v12142_v8, %v4050_v53  ;;  %v7390_v25 = vadd.f32 -1.4531521, %v4040_v0 }
 0xbb2   :  { %v3887_v46 = vsub.f32 1.0, %v3883_v40  ;;  %v3885_v29 = vmul.f32 %v9094_v54, %v3865_v32  ;;  %v7393_v3 = vadd.f32 -0.28449672, %v4055_v22  ;;  %v4088_v36 = vmul.f32 1.442695, %v4081_v43 }
 0xbb3   :  { %v3888_v14 = vsub.f32 1.0, %v3884_v27  ;;  %v3886_v11 = vmul.f32 %v9096_v58, %v3866_v12  ;;  %v7392_v56 = vadd.f32 -0.28449672, %v4054_v33  ;;  %v4048_v4 = vmul.f32 %v12161_v9, %v7390_v25 }
 0xbb4   :  { %v3891_v21 = vmul.f32 %v3887_v46, %v12100_v34  ;;  %v3889_v57 = vsub.f32 1.0, %v3885_v29  ;;  %v4041_v34 = vmul.f32 1.0614054, %v12165_v17  ;;  %v4063_v44 = vmul.f32 %v12147_v15, %v7393_v3 }
 0xbb5   :  { %v3892_v20 = vmul.f32 %v3888_v14, %v12107_v2  ;;  %v3890_v19 = vsub.f32 1.0, %v3886_v11  ;;  %v4062_v2 = vmul.f32 %v12142_v8, %v7392_v56  ;;  %9105 = vpow2.f32 %v4086_v51 }
 0xbb6   :  { %v3895_v6 = vadd.f32 1.0, %v3891_v21  ;;  %v3893_v48 = vmul.f32 %v3889_v57, %v12117_v37  ;;  %v7391_v18 = vadd.f32 -1.4531521, %v4041_v34  ;;  %v4052_v37 = vadd.f32 1.4214138, %v4048_v4 }
 0xbb7   :  { %v3896_v28 = vadd.f32 1.0, %v3892_v20  ;;  %v3894_v49 = vmul.f32 %v3890_v19, %v3810_v41  ;;  %v4066_v40 = vadd.f32 0.2548296, %v4062_v2  ;;  %v4067_v39 = vadd.f32 0.2548296, %v4063_v44  ;;  %v9104_v41 = vpop.eup %9103  ;;  %v4111_v44 = vld [vmem:[%s13298_s26 + $0x8] sm:$0xff] }
 0xbb8   :  { %v3899_v26 = vmul.f32 %v3895_v6, %v12080_v50  ;;  %v3897_v30 = vadd.f32 1.0, %v3893_v48  ;;  %v4049_v50 = vmul.f32 %v12165_v17, %v7391_v18  ;;  %v4056_v32 = vmul.f32 %v12161_v9, %v4052_v37  ;;  %v4120_v37 = vld [vmem:[%s13298_s26 + $0x50] sm:$0xff] }
 0xbb9   :  { %v3900_v23 = vmul.f32 %v3896_v28, %v12084_v52  ;;  %v3898_v27 = vadd.f32 1.0, %v3894_v49  ;;  %v4070_v52 = vmul.f32 %v12142_v8, %v4066_v40  ;;  %v4071_v5 = vmul.f32 %v12147_v15, %v4067_v39  ;;  %v4112_v40 = vld [vmem:[%s13298_s26 + $0x10] sm:$0xff]  ;;  %v7408_v39 = vld [vmem:[%s13289_s1 + $0xc0] sm:$0xff] }
 0xbba   :  { %v3901_v55 = vmul.f32 %v3897_v30, %v12091_v24  ;;  %v4053_v46 = vadd.f32 1.4214138, %v4049_v50  ;;  %9107 = vpow2.f32 %v4088_v36  ;;  %v7394_v14 = vadd.f32 -0.28449672, %v4056_v32  ;;  %v4115_v36 = vld [vmem:[%s13298_s26 + $0x28] sm:$0xff] }
 0xbbb   :  { %v8612_v45 = vpack.c.bf16 %v3900_v23, %v3899_v26  ;;  %v3902_v54 = vmul.f32 %v3898_v27, %v12093_v13  ;;  %v4090_v53 = vmul.f32 %v9102_v10, %v4070_v52  ;;  %v4091_v8 = vmul.f32 %v9104_v41, %v4071_v5  ;;  %v4116_v10 = vld [vmem:[%s13298_s26 + $0x30] sm:$0xff]  ;;  %v4118_v27 = vld [vmem:[%s13298_s26 + $0x40] sm:$0xff]  ;;  %v4119_v50 = vld [vmem:[%s13298_s26 + $0x48] sm:$0xff] }
 0xbbc   :  { %v4057_v24 = vmul.f32 %v12165_v17, %v4053_v46  ;;  %v4014_v13 = vsel %vm4010_vm14, 1.0, %v13269_v31  ;;  %v4064_v21 = vmul.f32 %v12161_v9, %v7394_v14  ;;  %v4015_v15 = vsel %vm4011_vm15, 1.0, %v13269_v31  ;;  %v7409_v52 = vld [vmem:[%s13289_s1 + $0xc8] sm:$0xff]  ;;  %v7410_v41 = vld [vmem:[%s13289_s1 + $0xd0] sm:$0xff]  ;;  %v7411_v46 = vld [vmem:[%s13289_s1 + $0xd8] sm:$0xff] }
 0xbbd   :  { %8613 = vmatprep.subr.bf16.mxu0 %v8612_v45  ;;  %v8616_v58 = vpack.c.bf16 %v3902_v54, %v3901_v55  ;;  %v4094_v12 = vsub.f32 1.0, %v4090_v53  ;;  %v4095_v61 = vsub.f32 1.0, %v4091_v8  ;;  %v4002_v20 = vmul.f32 0.5, %v12082_v16  ;;  %v4121_v55 = vld [vmem:[%s13298_s26 + $0x58] sm:$0xff]  ;;  %v7412_v5 = vld [vmem:[%s13289_s1 + $0xe0] sm:$0xff]  ;;  %v7413_v53 = vld [vmem:[%s13289_s1 + $0xe8] sm:$0xff] }
 0xbbe   :  { %8615 = vmatpush3.bf16.msra.mxu0 %v8612_v45  ;;  %v7395_v43 = vadd.f32 -0.28449672, %v4057_v24  ;;  %v4068_v33 = vadd.f32 0.2548296, %v4064_v21  ;;  %v4003_v57 = vmul.f32 0.5, %v12086_v38  ;;  %v4016_v3 = vsel %vm4012_vm1, 1.0, %v13269_v31 }
 0xbbf   :  { %8617 = vmatprep.subr.bf16.mxu0 %v8616_v58  ;;  %v4098_v29 = vmul.f32 %v4094_v12, %v4014_v13  ;;  %v4099_v11 = vmul.f32 %v4095_v61, %v4015_v15  ;;  %v9106_v6 = vpop.eup %9105  ;;  %v4017_v38 = vsel %vm4013_vm2, 1.0, %v13269_v31  ;;  %v4005_v49 = vmul.f32 0.5, %v12110_v59  ;;  %v4114_v59 = vld [vmem:[%s13298_s26 + $0x20] sm:$0xff]  ;;  %v4117_v45 = vld [vmem:[%s13298_s26 + $0x38] sm:$0xff]  ;;  %v7414_v24 = vld [vmem:[%s13289_s1 + $0xf0] sm:$0xff]  ;;  %s13304_s26 = sld [smem:[#allocation36_spill]] }
 0xbc0   :  { %v4065_v7 = vmul.f32 %v12165_v17, %v7395_v43  ;;  %v4072_v51 = vmul.f32 %v12161_v9, %v4068_v33  ;;  %v8628_v54 = vpack.c.bf16 %v7409_v52, %v7408_v39  ;;  %v8632_v32 = vpack.c.bf16 %v7411_v46, %v7410_v41  ;;  %v7415_v14 = vld [vmem:[%s13289_s1 + $0xf8] sm:$0xff]  ;;  %v7416_v12 = vld [vmem:[%s13289_s1 + $0x100] sm:$0xff]  ;;  %v7417_v13 = vld [vmem:[%s13289_s1 + $0x108] sm:$0xff] }
 0xbc1   :  { %v4102_v35 = vadd.f32 1.0, %v4098_v29  ;;  %v4103_v22 = vadd.f32 1.0, %v4099_v11  ;;  %v8640_v8 = vpack.c.bf16 %v7415_v14, %v7414_v24  ;;  %v8644_v43 = vpack.c.bf16 %v7417_v13, %v7416_v12  ;;  %v7418_v29 = vld [vmem:[%s13289_s1 + $0x110] sm:$0xff]  ;;  %v7419_v15 = vld [vmem:[%s13289_s1 + $0x118] sm:$0xff] }
 0xbc2   :  { %8619 = vmatpush3.bf16.msra.mxu0 %v8616_v58  ;;  %v4069_v0 = vadd.f32 0.2548296, %v4065_v7  ;;  %v4092_v19 = vmul.f32 %v9106_v6, %v4072_v51  ;;  %v8636_v58 = vpack.c.bf16 %v7413_v53, %v7412_v5  ;;  %v8648_v7 = vpack.c.bf16 %v7419_v15, %v7418_v29 }
 0xbc3   :  { %v4106_v56 = vmul.f32 %v4102_v35, %v4002_v20  ;;  %v4107_v25 = vmul.f32 %v4103_v22, %v4003_v57  ;;  %vm9208_vm2 = vmmov 0  }
 0xbc4   :  { %v4073_v28 = vmul.f32 %v12165_v17, %v4069_v0  ;;  %v9108_v34 = vpop.eup %9107  ;;  %v4096_v26 = vsub.f32 1.0, %v4092_v19 }
 0xbc5   :  { %v8620_v48 = vpack.c.bf16 %v4107_v25, %v4106_v56 }
 0xbc6   :  { %v4093_v16 = vmul.f32 %v9108_v34, %v4073_v28  ;;  %v4100_v2 = vmul.f32 %v4096_v26, %v4016_v3 }
 0xbc7   :  { %8621 = vmatprep.subr.bf16.mxu0 %v8620_v48 }
 0xbc8   :  { %v4097_v9 = vsub.f32 1.0, %v4093_v16  ;;  %8623 = vmatpush3.bf16.msra.mxu0 %v8620_v48  ;;  %v4104_v17 = vadd.f32 1.0, %v4100_v2 }
 0xbca   :  { %v4101_v23 = vmul.f32 %v4097_v9, %v4017_v38  ;;  %v4108_v4 = vmul.f32 %v4104_v17, %v4004_v1 }
 0xbcc   :  { %v4105_v18 = vadd.f32 1.0, %v4101_v23 }
 0xbce   :  { %v4109_v60 = vmul.f32 %v4105_v18, %v4005_v49 }
 0xbd0   :  { %v8624_v30 = vpack.c.bf16 %v4109_v60, %v4108_v4  ;;  %v7421_v4 = vld [vmem:[%s13247_s2 + $0x3] ss:$0 sm:$0xff] }
 0xbd2   :  { %8625 = vmatprep.subr.bf16.mxu0 %v8624_v30 }
 0xbd3   :  { %8627 = vmatpush3.bf16.msra.mxu0 %v8624_v30 }
 0xbd4   :  { %8629 = vmatprep.subr.bf16.mxu0 %v8628_v54 }
 0xbd6   :  { %8073 = vmatmul.mubr.msk.f32.vlgmr.msra.gmra.mrb[80].mxu0 %vm2292_vm11, %v4111_v44 }
 0xbd7   :  { %8075 = vmatprep.mubr.msk.f32.mxu0 %vm2292_vm11, %v4112_v40  ;;  %8631 = vmatpush3.bf16.msra.mxu0 %v8628_v54 }
 0xbd8   :  { %8633 = vmatprep.subr.bf16.mxu0 %v8632_v32 }
 0xbda   :  { %8076 = vmatmul.mubr.msk.f32.gmra.mrb[82].mxu0 %vm2292_vm11, %v4113_v62 }
 0xbdb   :  { %8078 = vmatprep.mubr.msk.f32.mxu0 %vm2292_vm11, %v4114_v59  ;;  %8635 = vmatpush3.bf16.msra.mxu0 %v8632_v32 }
 0xbdc   :  { %8637 = vmatprep.subr.bf16.mxu0 %v8636_v58 }
 0xbde   :  { %8079 = vmatmul.mubr.msk.f32.gmra.mrb[84].mxu0 %vm2292_vm11, %v4115_v36 }
 0xbdf   :  { %8081 = vmatprep.mubr.msk.f32.mxu0 %vm2292_vm11, %v4116_v10  ;;  %8639 = vmatpush3.bf16.msra.mxu0 %v8636_v58 }
 0xbe0   :  { %8641 = vmatprep.subr.bf16.mxu0 %v8640_v8 }
 0xbe2   :  { %8082 = vmatmul.mubr.msk.f32.gmra.mrb[86].mxu0 %vm2292_vm11, %v4117_v45 }
 0xbe3   :  { %8084 = vmatprep.mubr.msk.f32.mxu0 %vm2292_vm11, %v4118_v27  ;;  %8643 = vmatpush3.bf16.msra.mxu0 %v8640_v8 }
 0xbe4   :  { %8645 = vmatprep.subr.bf16.mxu0 %v8644_v43 }
 0xbe6   :  { %8085 = vmatmul.mubr.msk.f32.gmra.mrb[88].mxu0 %vm2292_vm11, %v4119_v50 }
 0xbe7   :  { %8087 = vmatprep.mubr.msk.f32.mxu0 %vm2292_vm11, %v4120_v37  ;;  %8647 = vmatpush3.bf16.msra.mxu0 %v8644_v43 }
 0xbe8   :  { %8649 = vmatprep.subr.bf16.mxu0 %v8648_v7 }
 0xbea   :  { %8088 = vmatmul.mubr.msk.f32.gmra.mrb[90].mxu0 %vm2292_vm11, %v4121_v55 }
 0xbeb   :  { %8651 = vmatpush3.bf16.msra.mxu0 %v8648_v7 }
 0xca9   :  { %v8074_v21 = vpop.f32.mrb[80].mxu0 }
 0xcaa   :  { %v4224_v61 = vpop.f32.mrb[81].mxu0 }
 0xcad   :  { %v8077_v33 = vpop.f32.mrb[82].mxu0 }
 0xcae   :  { %v4234_v20 = vpop.f32.mrb[83].mxu0 }
 0xcb1   :  { %v8080_v11 = vpop.f32.mrb[84].mxu0 }
 0xcb2   :  { %4289 = vrot.lane.b32.xlu1 %v8080_v11, %s13295_s6  ;;  %v4244_v35 = vpop.f32.mrb[85].mxu0 }
 0xcb3   :  { %4287 = vrot.lane.b32.xlu0 %v4244_v35, %s13295_s6 }
 0xcb5   :  { %v8083_v0 = vpop.f32.mrb[86].mxu0 }
 0xcb6   :  { %4293 = vrot.lane.b32.xlu1 %v8083_v0, %s13295_s6  ;;  %v4254_v51 = vpop.f32.mrb[87].mxu0 }
 0xcb7   :  { %4291 = vrot.lane.b32.xlu0 %v4254_v51, %s13295_s6 }
 0xcb9   :  { %v8086_v6 = vpop.f32.mrb[88].mxu0 }
 0xcba   :  { %4305 = vrot.lane.b32.xlu1 %v8086_v6, %s13296_s24  ;;  %v4264_v57 = vpop.f32.mrb[89].mxu0 }
 0xcbb   :  { %4303 = vrot.lane.b32.xlu0 %v4264_v57, %s13296_s24 }
 0xcbd   :  { %v8089_v22 = vpop.f32.mrb[90].mxu0 }
 0xcbe   :  { %4309 = vrot.lane.b32.xlu1 %v8089_v22, %s13296_s24  ;;  %v4274_v56 = vpop.f32.mrb[91].mxu0 }
 0xcbf   :  { %4307 = vrot.lane.b32.xlu0 %v4274_v56, %s13296_s24 }
 0xd24   :  { %v4290_v28 = vpop.permute.xlu1 %4289 }
 0xd25   :  { %v4288_v19 = vpop.permute.xlu0 %4287  ;;  %v4316_v3 = vsel %vm450_vm4, %v8074_v21, %v4290_v28 }
 0xd26   :  { %v4315_v26 = vsel %vm450_vm4, %v4224_v61, %v4288_v19 }
 0xd28   :  { %v4294_v34 = vpop.permute.xlu1 %4293 }
 0xd29   :  { %v4292_v25 = vpop.permute.xlu0 %4291  ;;  %v4318_v17 = vsel %vm450_vm4, %v8077_v33, %v4294_v34 }
 0xd2a   :  { %v4317_v1 = vsel %vm450_vm4, %v4234_v20, %v4292_v25 }
 0xd2c   :  { %v4306_v16 = vpop.permute.xlu1 %4305 }
 0xd2d   :  { %v4304_v48 = vpop.permute.xlu0 %4303  ;;  %v4320_v2 = vsel %vm2292_vm11, %v4316_v3, %v4306_v16 }
 0xd2e   :  { %v4319_v9 = vsel %vm2292_vm11, %v4315_v26, %v4304_v48 }
 0xd2f   :  { %8114 = vmatprep.mubr.msk.f32.mxu0 %vm2329_vm12, %v4319_v9 }
 0xd30   :  { %8115 = vmatmul.mubr.msk.f32.vlgmr.msra.gmra.mrb[92].mxu0 %vm2329_vm12, %v4320_v2  ;;  %v4310_v38 = vpop.permute.xlu1 %4309 }
 0xd31   :  { %v4308_v23 = vpop.permute.xlu0 %4307  ;;  %v4322_v18 = vsel %vm2292_vm11, %v4318_v17, %v4310_v38 }
 0xd32   :  { %v4321_v49 = vsel %vm2292_vm11, %v4317_v1, %v4308_v23 }
 0xd33   :  { %8117 = vmatprep.mubr.msk.f32.mxu0 %vm2329_vm12, %v4321_v49 }
 0xd34   :  { %8118 = vmatmul.mubr.msk.f32.gmra.mrb[94].mxu0 %vm2329_vm12, %v4322_v18 }
 0xe03   :  { %v8116_v60 = vpop.f32.mrb[92].mxu0 }
 0xe04   :  { %v4428_v30 = vadd.f32 %v8116_v60, %v7421_v4  ;;  %v4422_v44 = vpop.f32.mrb[93].mxu0 }
 0xe05   :  { %v4423_v40 = vadd.f32 %v7421_v4, %v4422_v44 }
 0xe06   :  { %v4446_v62 = vsel %vm450_vm4, %v4428_v30, 0.0 }
 0xe07   :  { %v4445_v59 = vsel %vm450_vm4, %v4423_v40, 0.0  ;;  %v8119_v36 = vpop.f32.mrb[94].mxu0 }
 0xe08   :  { %v4447_v10 = vadd.f32 %v4446_v62, %v4445_v59  ;;  %v4438_v45 = vadd.f32 %v8119_v36, %v7421_v4  ;;  %v4432_v27 = vpop.f32.mrb[95].mxu0 }
 0xe09   :  { %v4433_v50 = vadd.f32 %v7421_v4, %v4432_v27 }
 0xe0a   :  { %v4448_v37 = vrot.slane %v4447_v10, 4  ;;  %v4593_v55 = vsel %vm450_vm4, %v4438_v45, 0.0 }
 0xe0b   :  { %v4592_v39 = vsel %vm450_vm4, %v4433_v50, 0.0 }
 0xe0c   :  { %v4449_v52 = vadd.f32 %v4448_v37, %v4447_v10  ;;  %v4594_v41 = vadd.f32 %v4593_v55, %v4592_v39  ;;  %v4727_v55 = vld [vmem:[%s13299_s3] sm:$0xff] }
 0xe0d   :  { %8128 = vmatprep.mubr.msk.f32.mxu0 %vm450_vm4, %v4727_v55 }
 0xe0e   :  { %v4450_v54 = vrot.slane %v4449_v52, 2  ;;  %v4595_v46 = vrot.slane %v4594_v41, 4 }
 0xe10   :  { %v4451_v32 = vadd.f32 %v4450_v54, %v4449_v52  ;;  %v4596_v5 = vadd.f32 %v4595_v46, %v4594_v41 }
 0xe12   :  { %v4452_v53 = vrot.slane %v4451_v32, 1  ;;  %v4597_v58 = vrot.slane %v4596_v5, 2 }
 0xe14   :  { %v4453_v24 = vadd.f32 %v4452_v53, %v4451_v32  ;;  %v4598_v14 = vadd.f32 %v4597_v58, %v4596_v5 }
 0xe16   :  { %4458 = vrot.lane.b32.xlu1 %v4453_v24, %s13290_s5  ;;  %4455 = vrot.lane.b32.xlu0 %v4453_v24, %s13297_s9  ;;  %v4599_v8 = vrot.slane %v4598_v14, 1 }
 0xe18   :  { %v4600_v12 = vadd.f32 %v4599_v8, %v4598_v14 }
 0xe1a   :  { %4465 = vrot.lane.b32.xlu1 %v4453_v24, %s13292_s7  ;;  %4462 = vrot.lane.b32.xlu0 %v4453_v24, %s13291_s0 }
 0xe1e   :  { %4605 = vrot.lane.b32.xlu1 %v4600_v12, %s13290_s5  ;;  %4602 = vrot.lane.b32.xlu0 %v4600_v12, %s13297_s9 }
 0xe22   :  { %4612 = vrot.lane.b32.xlu1 %v4600_v12, %s13292_s7  ;;  %4609 = vrot.lane.b32.xlu0 %v4600_v12, %s13291_s0 }
 0xe88   :  { %v4459_v13 = vpop.permute.xlu1 %4458  ;;  %v4456_v43 = vpop.permute.xlu0 %4455 }
 0xe89   :  { %v4461_v29 = vsel %vm495_vm6, %v4456_v43, %v4459_v13 }
 0xe8c   :  { %v4466_v21 = vpop.permute.xlu1 %4465  ;;  %v4463_v61 = vpop.permute.xlu0 %4462 }
 0xe8d   :  { %v4468_v15 = vsel %vm503_vm5, %v4463_v61, %v4466_v21 }
 0xe8e   :  { %v4469_v7 = vsel %vm9661_vm7, %v4461_v29, %v4468_v15 }
 0xe8f   :  { %v4470_v33 = vadd.f32 %v4469_v7, %v4453_v24 }
 0xe90   :  { %v4606_v20 = vpop.permute.xlu1 %4605  ;;  %v4603_v11 = vpop.permute.xlu0 %4602 }
 0xe91   :  { %v4471_v35 = vmul.f32 0.03125, %v4470_v33  ;;  %v4608_v56 = vsel %vm495_vm6, %v4603_v11, %v4606_v20 }
 0xe93   :  { %v4475_v0 = vrot.slane %v4471_v35, %v9669_v47 }
 0xe94   :  { %v4613_v51 = vpop.permute.xlu1 %4612  ;;  %v4610_v6 = vpop.permute.xlu0 %4609 }
 0xe95   :  { %v12320_v57 = vsub.f32 %v4423_v40, %v4475_v0  ;;  %v12322_v22 = vsub.f32 %v4428_v30, %v4475_v0  ;;  %v4615_v28 = vsel %vm503_vm5, %v4610_v6, %v4613_v51 }
 0xe96   :  { %v4616_v19 = vsel %vm9661_vm7, %v4608_v56, %v4615_v28 }
 0xe97   :  { %v4478_v34 = vmul.f32 %v12320_v57, %v12320_v57  ;;  %v4479_v25 = vmul.f32 %v12322_v22, %v12322_v22  ;;  %v4617_v16 = vadd.f32 %v4616_v19, %v4600_v12 }
 0xe99   :  { %v4480_v26 = vsel %vm450_vm4, %v4478_v34, 0.0  ;;  %v4481_v48 = vsel %vm450_vm4, %v4479_v25, 0.0  ;;  %v4618_v3 = vmul.f32 0.03125, %v4617_v16 }
 0xe9a   :  { %v4482_v9 = vadd.f32 %v4481_v48, %v4480_v26  ;;  %v7428_v26 = vld [vmem:[%s13267_s8 + $0x3] ss:$0 sm:$0xff] }
 0xe9b   :  { %v4622_v2 = vrot.slane %v4618_v3, %v9669_v47 }
 0xe9c   :  { %v4483_v38 = vrot.slane %v4482_v9, 4 }
 0xe9d   :  { %v12335_v1 = vsub.f32 %v4433_v50, %v4622_v2  ;;  %v12337_v23 = vsub.f32 %v4438_v45, %v4622_v2 }
 0xe9e   :  { %v4484_v17 = vadd.f32 %v4483_v38, %v4482_v9  ;;  %v7429_v9 = vld [vmem:[%s13268_s28 + $0x3] ss:$0 sm:$0xff] }
 0xe9f   :  { %v4625_v49 = vmul.f32 %v12335_v1, %v12335_v1  ;;  %v4626_v18 = vmul.f32 %v12337_v23, %v12337_v23 }
 0xea0   :  { %v4485_v4 = vrot.slane %v4484_v17, 2 }
 0xea1   :  { %v4627_v60 = vsel %vm450_vm4, %v4625_v49, 0.0  ;;  %v4628_v30 = vsel %vm450_vm4, %v4626_v18, 0.0 }
 0xea2   :  { %v4629_v44 = vadd.f32 %v4628_v30, %v4627_v60  ;;  %v4486_v40 = vadd.f32 %v4485_v4, %v4484_v17 }
 0xea4   :  { %v4630_v62 = vrot.slane %v4629_v44, 4  ;;  %v4487_v59 = vrot.slane %v4486_v40, 1 }
 0xea6   :  { %v4488_v36 = vadd.f32 %v4487_v59, %v4486_v40  ;;  %v4631_v10 = vadd.f32 %v4630_v62, %v4629_v44 }
 0xea8   :  { %4493 = vrot.lane.b32.xlu1 %v4488_v36, %s13290_s5  ;;  %4490 = vrot.lane.b32.xlu0 %v4488_v36, %s13297_s9  ;;  %v4632_v45 = vrot.slane %v4631_v10, 2 }
 0xeaa   :  { %v4633_v27 = vadd.f32 %v4632_v45, %v4631_v10 }
 0xeac   :  { %4500 = vrot.lane.b32.xlu1 %v4488_v36, %s13292_s7  ;;  %4497 = vrot.lane.b32.xlu0 %v4488_v36, %s13291_s0  ;;  %v4634_v50 = vrot.slane %v4633_v27, 1 }
 0xeae   :  { %v4635_v37 = vadd.f32 %v4634_v50, %v4633_v27 }
 0xeb0   :  { %4640 = vrot.lane.b32.xlu1 %v4635_v37, %s13290_s5  ;;  %4637 = vrot.lane.b32.xlu0 %v4635_v37, %s13297_s9 }
 0xeb4   :  { %4647 = vrot.lane.b32.xlu1 %v4635_v37, %s13292_s7  ;;  %4644 = vrot.lane.b32.xlu0 %v4635_v37, %s13291_s0 }
 0xf1a   :  { %v4494_v39 = vpop.permute.xlu1 %4493  ;;  %v4491_v52 = vpop.permute.xlu0 %4490 }
 0xf1b   :  { %v4496_v46 = vsel %vm495_vm6, %v4491_v52, %v4494_v39 }
 0xf1e   :  { %v4501_v41 = vpop.permute.xlu1 %4500  ;;  %v4498_v54 = vpop.permute.xlu0 %4497 }
 0xf1f   :  { %v4503_v32 = vsel %vm503_vm5, %v4498_v54, %v4501_v41 }
 0xf20   :  { %v4504_v5 = vsel %vm9661_vm7, %v4496_v46, %v4503_v32 }
 0xf21   :  { %v4505_v53 = vadd.f32 %v4504_v5, %v4488_v36 }
 0xf22   :  { %v4641_v58 = vpop.permute.xlu1 %4640  ;;  %v4638_v24 = vpop.permute.xlu0 %4637 }
 0xf23   :  { %v4506_v14 = vmul.f32 0.03125, %v4505_v53  ;;  %v4643_v43 = vsel %vm495_vm6, %v4638_v24, %v4641_v58 }
 0xf25   :  { %v4507_v8 = vadd.f32 1e-05, %v4506_v14 }
 0xf26   :  { %v4648_v12 = vpop.permute.xlu1 %4647  ;;  %v4645_v13 = vpop.permute.xlu0 %4644 }
 0xf27   :  { %9109 = vrsqrt.f32 %v4507_v8  ;;  %v4650_v21 = vsel %vm503_vm5, %v4645_v13, %v4648_v12  ;;  %vm4510_vm3 = vcmp.eq.f32.partialorder %v4507_v8, inf  ;;  %v4513_v11 = vand.u32 2147483648, %v4507_v8 }
 0xf28   :  { %v4651_v61 = vsel %vm9661_vm7, %v4643_v43, %v4650_v21  ;;  %vm4512_vm8 = vcmp.eq.f32.partialorder %v4507_v8, 0.0 }
 0xf29   :  { %v4652_v29 = vadd.f32 %v4651_v61, %v4635_v37 }
 0xf2b   :  { %v4653_v15 = vmul.f32 0.03125, %v4652_v29 }
 0xf2d   :  { %v4654_v7 = vadd.f32 1e-05, %v4653_v15 }
 0xf2f   :  { %9111 = vrsqrt.f32 %v4654_v7  ;;  %vm4657_vm9 = vcmp.eq.f32.partialorder %v4654_v7, inf  ;;  %v4660_v28 = vand.u32 2147483648, %v4654_v7  ;;  %vm4659_vm10 = vcmp.eq.f32.partialorder %v4654_v7, 0.0 }
 0xf31   :  { %v9110_v33 = vpop.eup %9109 }
 0xf32   :  { %v4509_v20 = vmul.f32 %v9110_v33, %v4507_v8 }
 0xf34   :  { %v4511_v35 = vsel %vm4510_vm3, %v4507_v8, %v4509_v20 }
 0xf35   :  { %v4514_v0 = vsel %vm4512_vm8, %v4513_v11, %v4511_v35 }
 0xf36   :  { %v4518_v51 = vrot.slane %v4514_v0, %v9669_v47 }
 0xf38   :  { %9113 = vrcp.f32 %v4518_v51 }
 0xf39   :  { %v9112_v6 = vpop.eup %9111 }
 0xf3a   :  { %v4656_v56 = vmul.f32 %v9112_v6, %v4654_v7 }
 0xf3c   :  { %v4658_v19 = vsel %vm4657_vm9, %v4654_v7, %v4656_v56 }
 0xf3d   :  { %v4661_v34 = vsel %vm4659_vm10, %v4660_v28, %v4658_v19 }
 0xf3e   :  { %v4665_v25 = vrot.slane %v4661_v34, %v9669_v47 }
 0xf40   :  { %9115 = vrcp.f32 %v4665_v25 }
 0xf42   :  { %v9114_v16 = vpop.eup %9113 }
 0xf43   :  { %v4520_v48 = vmul.f32 %v9114_v16, %v12320_v57  ;;  %v4521_v3 = vmul.f32 %v9114_v16, %v12322_v22 }
 0xf45   :  { %v4528_v2 = vmul.f32 %v7428_v26, %v4520_v48  ;;  %v4529_v38 = vmul.f32 %v7428_v26, %v4521_v3 }
 0xf47   :  { %v12375_v17 = vadd.f32 %v7429_v9, %v4528_v2  ;;  %v12377_v49 = vadd.f32 %v7429_v9, %v4529_v38 }
 0xf49   :  { %v12380_v18 = vmul.f32 0.70710677, %v12375_v17  ;;  %v12383_v4 = vmul.f32 0.70710677, %v12377_v49 }
 0xf4a   :  { %v9116_v60 = vpop.eup %9115 }
 0xf4b   :  { %v4546_v57 = vand.u32 2147483647, %v12380_v18  ;;  %v4547_v22 = vand.u32 2147483647, %v12383_v4  ;;  %v4667_v30 = vmul.f32 %v9116_v60, %v12335_v1  ;;  %v4668_v44 = vmul.f32 %v9116_v60, %v12337_v23 }
 0xf4c   :  { %vm4542_vm13 = vcmp.ge.f32.partialorder %v12380_v18, 0.0  ;;  %vm4543_vm14 = vcmp.ge.f32.partialorder %v12383_v4, 0.0  ;;  %v4538_v18 = vmul.f32 0.5, %v12375_v17  ;;  %v4539_v4 = vmul.f32 0.5, %v12377_v49 }
 0xf4d   :  { %v4548_v40 = vmul.f32 0.3275911, %v4546_v57  ;;  %v4549_v62 = vmul.f32 0.3275911, %v4547_v22  ;;  %v4669_v59 = vmul.f32 %v7428_v26, %v4667_v30  ;;  %v4670_v36 = vmul.f32 %v7428_v26, %v4668_v44 }
 0xf4e   :  { %v4574_v52 = vsub.f32 0.0, %v4546_v57  ;;  %v4575_v54 = vsub.f32 0.0, %v4547_v22 }
 0xf4f   :  { %v4550_v10 = vadd.f32 1.0, %v4548_v40  ;;  %v4551_v45 = vadd.f32 1.0, %v4549_v62  ;;  %v12389_v27 = vadd.f32 %v7429_v9, %v4669_v59  ;;  %v12391_v50 = vadd.f32 %v7429_v9, %v4670_v36 }
 0xf50   :  { %v4576_v53 = vmul.f32 %v4574_v52, %v4546_v57  ;;  %v4577_v14 = vmul.f32 %v4575_v54, %v4547_v22  ;;  %v4544_v54 = vsel %vm4542_vm13, 1.0, %v13269_v31 }
 0xf51   :  { %9117 = vrcp.f32 %v4550_v10  ;;  %v12394_v37 = vmul.f32 0.70710677, %v12389_v27  ;;  %v12397_v55 = vmul.f32 0.70710677, %v12391_v50 }
 0xf52   :  { %9119 = vrcp.f32 %v4551_v45  ;;  %v4578_v43 = vmul.f32 1.442695, %v4576_v53  ;;  %v4580_v61 = vmul.f32 1.442695, %v4577_v14 }
 0xf53   :  { %v4681_v1 = vand.u32 2147483647, %v12394_v37  ;;  %v4682_v23 = vand.u32 2147483647, %v12397_v55  ;;  %vm4677_vm15 = vcmp.ge.f32.partialorder %v12394_v37, 0.0  ;;  %vm4678_vm1 = vcmp.ge.f32.partialorder %v12397_v55, 0.0 }
 0xf54   :  { %v4679_v17 = vsel %vm4677_vm15, 1.0, %v13269_v31  ;;  %v4680_v49 = vsel %vm4678_vm1, 1.0, %v13269_v31  ;;  %v4674_v37 = vmul.f32 0.5, %v12391_v50  ;;  %v4731_v50 = vld [vmem:[%s13299_s3 + $0x20] sm:$0xff]  ;;  %vm5185_vm15 = vcmask 130048  }
 0xf55   :  { %v4683_v39 = vmul.f32 0.3275911, %v4681_v1  ;;  %v4684_v41 = vmul.f32 0.3275911, %v4682_v23  ;;  %v4709_v29 = vsub.f32 0.0, %v4681_v1  ;;  %v4710_v7 = vsub.f32 0.0, %v4682_v23 }
 0xf56   :  { %vm5383_vm1 = vcmask 257024  }
 0xf57   :  { %v4685_v46 = vadd.f32 1.0, %v4683_v39  ;;  %v4686_v32 = vadd.f32 1.0, %v4684_v41  ;;  %v4711_v0 = vmul.f32 %v4709_v29, %v4681_v1  ;;  %v4712_v28 = vmul.f32 %v4710_v7, %v4682_v23 }
 0xf59   :  { %9121 = vrcp.f32 %v4685_v46  ;;  %v4713_v3 = vmul.f32 1.442695, %v4711_v0  ;;  %v4715_v38 = vmul.f32 1.442695, %v4712_v28 }
 0xf5a   :  { %9123 = vrcp.f32 %v4686_v32 }
 0xf5b   :  { %v9118_v5 = vpop.eup %9117  ;;  %9125 = vpow2.f32 %v4578_v43 }
 0xf5c   :  { %v9120_v58 = vpop.eup %9119  ;;  %v4556_v24 = vmul.f32 1.0614054, %v9118_v5  ;;  %9127 = vpow2.f32 %v4580_v61 }
 0xf5d   :  { %v4557_v8 = vmul.f32 1.0614054, %v9120_v58  ;;  %9129 = vpow2.f32 %v4713_v3  ;;  %v7444_v3 = vld [vmem:[%s13289_s1 + $0x120] sm:$0xff] }
 0xf5e   :  { %v7430_v12 = vadd.f32 -1.4531521, %v4556_v24  ;;  %9131 = vpow2.f32 %v4715_v38 }
 0xf5f   :  { %v7431_v13 = vadd.f32 -1.4531521, %v4557_v8 }
 0xf60   :  { %v4560_v21 = vmul.f32 %v9118_v5, %v7430_v12 }
 0xf61   :  { %v4561_v15 = vmul.f32 %v9120_v58, %v7431_v13 }
 0xf62   :  { %v4562_v33 = vadd.f32 1.4214138, %v4560_v21 }
 0xf63   :  { %v4563_v20 = vadd.f32 1.4214138, %v4561_v15  ;;  %v9122_v11 = vpop.eup %9121 }
 0xf64   :  { %v4564_v35 = vmul.f32 %v9118_v5, %v4562_v33  ;;  %v9124_v51 = vpop.eup %9123  ;;  %v4691_v56 = vmul.f32 1.0614054, %v9122_v11 }
 0xf65   :  { %v4565_v6 = vmul.f32 %v9120_v58, %v4563_v20  ;;  %v4692_v34 = vmul.f32 1.0614054, %v9124_v51  ;;  %v9126_v62 = vpop.eup %9125 }
 0xf66   :  { %v7432_v19 = vadd.f32 -0.28449672, %v4564_v35  ;;  %v7434_v16 = vadd.f32 -1.4531521, %v4691_v56  ;;  %v9128_v10 = vpop.eup %9127 }
 0xf67   :  { %v7433_v25 = vadd.f32 -0.28449672, %v4565_v6  ;;  %v7435_v48 = vadd.f32 -1.4531521, %v4692_v34  ;;  %v9130_v21 = vpop.eup %9129 }
 0xf68   :  { %v4568_v26 = vmul.f32 %v9118_v5, %v7432_v19  ;;  %v4695_v2 = vmul.f32 %v9122_v11, %v7434_v16  ;;  %v9132_v15 = vpop.eup %9131  ;;  %v4728_v16 = vld [vmem:[%s13299_s3 + $0x8] sm:$0xff] }
 0xf69   :  { %v4569_v9 = vmul.f32 %v9120_v58, %v7433_v25  ;;  %v4696_v57 = vmul.f32 %v9124_v51, %v7435_v48  ;;  %v4732_v48 = vld [vmem:[%s13299_s3 + $0x28] sm:$0xff] }
 0xf6a   :  { %v4570_v60 = vadd.f32 0.2548296, %v4568_v26  ;;  %v4697_v30 = vadd.f32 1.4214138, %v4695_v2  ;;  %v4729_v26 = vld [vmem:[%s13299_s3 + $0x10] sm:$0xff] }
 0xf6b   :  { %v4571_v22 = vadd.f32 0.2548296, %v4569_v9  ;;  %v4698_v40 = vadd.f32 1.4214138, %v4696_v57  ;;  %v7445_v9 = vld [vmem:[%s13289_s1 + $0x128] sm:$0xff]  ;;  %v7446_v2 = vld [vmem:[%s13289_s1 + $0x130] sm:$0xff] }
 0xf6c   :  { %v4572_v44 = vmul.f32 %v9118_v5, %v4570_v60  ;;  %v4699_v36 = vmul.f32 %v9122_v11, %v4697_v30  ;;  %v4545_v5 = vsel %vm4543_vm14, 1.0, %v13269_v31  ;;  %v8660_v38 = vpack.c.bf16 %v7445_v9, %v7444_v3  ;;  %v7447_v60 = vld [vmem:[%s13289_s1 + $0x138] sm:$0xff]  ;;  %v7449_v30 = vld [vmem:[%s13289_s1 + $0x148] sm:$0xff] }
 0xf6d   :  { %v4573_v59 = vmul.f32 %v9120_v58, %v4571_v22  ;;  %v4700_v1 = vmul.f32 %v9124_v51, %v4698_v40  ;;  %v8664_v57 = vpack.c.bf16 %v7447_v60, %v7446_v2  ;;  %v7448_v22 = vld [vmem:[%s13289_s1 + $0x140] sm:$0xff]  ;;  %v7450_v40 = vld [vmem:[%s13289_s1 + $0x150] sm:$0xff] }
 0xf6e   :  { %v4582_v45 = vmul.f32 %v9126_v62, %v4572_v44  ;;  %v7436_v39 = vadd.f32 -0.28449672, %v4699_v36  ;;  %v8668_v44 = vpack.c.bf16 %v7449_v30, %v7448_v22  ;;  %v7451_v62 = vld [vmem:[%s13289_s1 + $0x158] sm:$0xff]  ;;  %v7452_v36 = vld [vmem:[%s13289_s1 + $0x160] sm:$0xff] }
 0xf6f   :  { %v4583_v23 = vmul.f32 %v9128_v10, %v4573_v59  ;;  %v7437_v41 = vadd.f32 -0.28449672, %v4700_v1  ;;  %v8672_v59 = vpack.c.bf16 %v7451_v62, %v7450_v40  ;;  %v7453_v10 = vld [vmem:[%s13289_s1 + $0x168] sm:$0xff]  ;;  %v7454_v1 = vld [vmem:[%s13289_s1 + $0x170] sm:$0xff] }
 0xf70   :  { %v4584_v52 = vsub.f32 1.0, %v4582_v45  ;;  %v4703_v32 = vmul.f32 %v9122_v11, %v7436_v39  ;;  %v8676_v45 = vpack.c.bf16 %v7453_v10, %v7452_v36 }
 0xf71   :  { %v4585_v46 = vsub.f32 1.0, %v4583_v23  ;;  %v4704_v58 = vmul.f32 %v9124_v51, %v7437_v41  ;;  %v7455_v23 = vld [vmem:[%s13289_s1 + $0x178] sm:$0xff] }
 0xf72   :  { %v4586_v53 = vmul.f32 %v4584_v52, %v4544_v54  ;;  %v4705_v14 = vadd.f32 0.2548296, %v4703_v32  ;;  %v8680_v39 = vpack.c.bf16 %v7455_v23, %v7454_v1 }
 0xf73   :  { %v4587_v24 = vmul.f32 %v4585_v46, %v4545_v5  ;;  %v4706_v12 = vadd.f32 0.2548296, %v4704_v58 }
 0xf74   :  { %v4588_v8 = vadd.f32 1.0, %v4586_v53  ;;  %v4707_v43 = vmul.f32 %v9122_v11, %v4705_v14 }
 0xf75   :  { %v4589_v13 = vadd.f32 1.0, %v4587_v24  ;;  %v4708_v29 = vmul.f32 %v9124_v51, %v4706_v12  ;;  %v4673_v51 = vmul.f32 0.5, %v12389_v27  ;;  %v4730_v27 = vld [vmem:[%s13299_s3 + $0x18] sm:$0xff]  ;;  %s9210_s3 = smov [#allocation2]  }
 0xf76   :  { %v4590_v61 = vmul.f32 %v4588_v8, %v4538_v18  ;;  %v4717_v33 = vmul.f32 %v9130_v21, %v4707_v43 }
 0xf77   :  { %v4591_v7 = vmul.f32 %v4589_v13, %v4539_v4  ;;  %v4718_v20 = vmul.f32 %v9132_v15, %v4708_v29  ;;  %v7457_v13 = vld [vmem:[%s13247_s2 + $0x4] ss:$0 sm:$0xff] }
 0xf78   :  { %v4719_v0 = vsub.f32 1.0, %v4717_v33 }
 0xf79   :  { %v8652_v35 = vpack.c.bf16 %v4591_v7, %v4590_v61  ;;  %v4720_v6 = vsub.f32 1.0, %v4718_v20 }
 0xf7a   :  { %v4721_v11 = vmul.f32 %v4719_v0, %v4679_v17 }
 0xf7b   :  { %8653 = vmatprep.subr.bf16.mxu0 %v8652_v35  ;;  %v4722_v56 = vmul.f32 %v4720_v6, %v4680_v49 }
 0xf7c   :  { %8655 = vmatpush3.bf16.msra.mxu0 %v8652_v35  ;;  %v4723_v28 = vadd.f32 1.0, %v4721_v11 }
 0xf7d   :  { %v4724_v19 = vadd.f32 1.0, %v4722_v56 }
 0xf7e   :  { %v4725_v34 = vmul.f32 %v4723_v28, %v4673_v51 }
 0xf7f   :  { %v4726_v55 = vmul.f32 %v4724_v19, %v4674_v37 }
 0xf81   :  { %v8656_v25 = vpack.c.bf16 %v4726_v55, %v4725_v34 }
 0xf83   :  { %8657 = vmatprep.subr.bf16.mxu0 %v8656_v25 }
 0xf84   :  { %8659 = vmatpush3.bf16.msra.mxu0 %v8656_v25 }
 0xf85   :  { %8661 = vmatprep.subr.bf16.mxu0 %v8660_v38 }
 0xf87   :  { %8129 = vmatmul.mubr.msk.f32.vlgmr.msra.gmra.mrb[96].mxu0 %vm450_vm4, %v4728_v16 }
 0xf88   :  { %8131 = vmatprep.mubr.msk.f32.mxu0 %vm450_vm4, %v4729_v26  ;;  %8663 = vmatpush3.bf16.msra.mxu0 %v8660_v38 }
 0xf89   :  { %8665 = vmatprep.subr.bf16.mxu0 %v8664_v57 }
 0xf8b   :  { %8132 = vmatmul.mubr.msk.f32.gmra.mrb[98].mxu0 %vm450_vm4, %v4730_v27 }
 0xf8c   :  { %8134 = vmatprep.mubr.msk.f32.mxu0 %vm450_vm4, %v4731_v50  ;;  %8667 = vmatpush3.bf16.msra.mxu0 %v8664_v57 }
 0xf8d   :  { %8669 = vmatprep.subr.bf16.mxu0 %v8668_v44 }
 0xf8f   :  { %8135 = vmatmul.mubr.msk.f32.gmra.mrb[100].mxu0 %vm450_vm4, %v4732_v48 }
 0xf90   :  { %8671 = vmatpush3.bf16.msra.mxu0 %v8668_v44 }
 0xf91   :  { %8673 = vmatprep.subr.bf16.mxu0 %v8672_v59 }
 0xf94   :  { %8675 = vmatpush3.bf16.msra.mxu0 %v8672_v59 }
 0xf95   :  { %8677 = vmatprep.subr.bf16.mxu0 %v8676_v45 }
 0xf98   :  { %8679 = vmatpush3.bf16.msra.mxu0 %v8676_v45 }
 0xf99   :  { %8681 = vmatprep.subr.bf16.mxu0 %v8680_v39 }
 0xf9c   :  { %8683 = vmatpush3.bf16.msra.mxu0 %v8680_v39 }
 0xf9d   :  { %8684 = vmatprep.subr.bf16.mxu0 %v13270_v42 }
0x105a   :  { %v8130_v52 = vpop.f32.mrb[96].mxu0 }
0x105b   :  { %v4817_v41 = vpop.f32.mrb[97].mxu0 }
0x105e   :  { %v8133_v54 = vpop.f32.mrb[98].mxu0 }
0x105f   :  { %4850 = vrot.lane.b32.xlu1 %v8133_v54, %s13295_s6  ;;  %v4827_v46 = vpop.f32.mrb[99].mxu0 }
0x1060   :  { %4848 = vrot.lane.b32.xlu0 %v4827_v46, %s13295_s6 }
0x1062   :  { %v8136_v32 = vpop.f32.mrb[100].mxu0 }
0x1063   :  { %4858 = vrot.lane.b32.xlu1 %v8136_v32, %s13296_s24  ;;  %v4837_v5 = vpop.f32.mrb[101].mxu0 }
0x1064   :  { %4856 = vrot.lane.b32.xlu0 %v4837_v5, %s13296_s24 }
0x10d1   :  { %v4851_v53 = vpop.permute.xlu1 %4850 }
0x10d2   :  { %v4849_v58 = vpop.permute.xlu0 %4848  ;;  %v4863_v8 = vsel %vm450_vm4, %v8130_v52, %v4851_v53 }
0x10d3   :  { %v4862_v14 = vsel %vm450_vm4, %v4817_v41, %v4849_v58 }
0x10d5   :  { %v4859_v24 = vpop.permute.xlu1 %4858 }
0x10d6   :  { %v4857_v18 = vpop.permute.xlu0 %4856  ;;  %v4865_v4 = vsel %vm2292_vm11, %v4863_v8, %v4859_v24  ;;  %v9209_v8 = vmov 0.0  }
0x10d7   :  { %v4864_v12 = vsel %vm2292_vm11, %v4862_v14, %v4857_v18  ;;  %8246 = vmatprep.mubr.msk.f32.mxu1 %vm9208_vm2, %v9209_v8 }
0x10d8   :  { %8161 = vmatprep.mubr.msk.f32.mxu0 %vm2329_vm12, %v4864_v12 }
0x10d9   :  { %8162 = vmatmul.mubr.msk.f32.vlgmr.msra.gmra.mrb[102].mxu0 %vm2329_vm12, %v4865_v4 }
0x10da   :  { %8168 = vmatprep.mubr.msk.f32.mxu0 %vm9208_vm2, %v9209_v8 }
0x11ac   :  { %v8163_v43 = vpop.f32.mrb[102].mxu0 }
0x11ad   :  { %v4965_v21 = vadd.f32 %v8163_v43, %v7457_v13  ;;  %v4959_v61 = vpop.f32.mrb[103].mxu0 }
0x11ae   :  { %v4960_v29 = vadd.f32 %v7457_v13, %v4959_v61 }
0x11af   :  { %v5083_v15 = vsel %vm450_vm4, %v4965_v21, 0.0 }
0x11b0   :  { %v5084_v7 = vrot.slane %v5083_v15, 4  ;;  %v4972_v33 = vsel %vm450_vm4, %v4960_v29, 0.0 }
0x11b1   :  { %v4973_v20 = vrot.slane %v4972_v33, 4 }
0x11b2   :  { %v5085_v35 = vadd.f32 %v5084_v7, %v5083_v15 }
0x11b3   :  { %v4974_v0 = vadd.f32 %v4973_v20, %v4972_v33 }
0x11b4   :  { %v5086_v17 = vrot.slane %v5085_v35, 2 }
0x11b5   :  { %v4975_v6 = vrot.slane %v4974_v0, 2 }
0x11b6   :  { %v5087_v49 = vadd.f32 %v5086_v17, %v5085_v35 }
0x11b7   :  { %v4976_v11 = vadd.f32 %v4975_v6, %v4974_v0 }
0x11b8   :  { %v5088_v56 = vrot.slane %v5087_v49, 1 }
0x11b9   :  { %v4977_v28 = vrot.slane %v4976_v11, 1 }
0x11ba   :  { %v5089_v51 = vadd.f32 %v5088_v56, %v5087_v49 }
0x11bb   :  { %v4978_v37 = vadd.f32 %v4977_v28, %v4976_v11 }
0x11bc   :  { %5094 = vrot.lane.b32.xlu1 %v5089_v51, %s13290_s5  ;;  %5091 = vrot.lane.b32.xlu0 %v5089_v51, %s13297_s9 }
0x11c0   :  { %4983 = vrot.lane.b32.xlu1 %v4978_v37, %s13290_s5  ;;  %4980 = vrot.lane.b32.xlu0 %v4978_v37, %s13297_s9 }
0x11c4   :  { %4990 = vrot.lane.b32.xlu1 %v4978_v37, %s13292_s7  ;;  %4987 = vrot.lane.b32.xlu0 %v4978_v37, %s13291_s0 }
0x11c8   :  { %5101 = vrot.lane.b32.xlu1 %v5089_v51, %s13292_s7  ;;  %5098 = vrot.lane.b32.xlu0 %v5089_v51, %s13291_s0 }
0x122e   :  { %v5095_v19 = vpop.permute.xlu1 %5094  ;;  %v5092_v34 = vpop.permute.xlu0 %5091 }
0x122f   :  { %v5097_v38 = vsel %vm495_vm6, %v5092_v34, %v5095_v19 }
0x1232   :  { %v4984_v55 = vpop.permute.xlu1 %4983  ;;  %v4981_v25 = vpop.permute.xlu0 %4980 }
0x1233   :  { %v4986_v27 = vsel %vm495_vm6, %v4981_v25, %v4984_v55 }
0x1236   :  { %v4991_v16 = vpop.permute.xlu1 %4990  ;;  %v4988_v26 = vpop.permute.xlu0 %4987 }
0x1237   :  { %v4993_v50 = vsel %vm503_vm5, %v4988_v26, %v4991_v16 }
0x1238   :  { %v4994_v48 = vsel %vm9661_vm7, %v4986_v27, %v4993_v50 }
0x1239   :  { %v4995_v3 = vadd.f32 %v4994_v48, %v4978_v37 }
0x123a   :  { %v5102_v9 = vpop.permute.xlu1 %5101  ;;  %v5099_v2 = vpop.permute.xlu0 %5098 }
0x123b   :  { %v4996_v60 = vmul.f32 0.0625, %v4995_v3  ;;  %v5104_v57 = vsel %vm503_vm5, %v5099_v2, %v5102_v9 }
0x123c   :  { %v5105_v22 = vsel %vm9661_vm7, %v5097_v38, %v5104_v57  ;;  %v7462_v38 = vld [vmem:[%s13267_s8 + $0x4] ss:$0 sm:$0xff] }
0x123d   :  { %v5000_v30 = vrot.slane %v4996_v60, %v9669_v47  ;;  %v5106_v44 = vadd.f32 %v5105_v22, %v5089_v51  ;;  %v7463_v57 = vld [vmem:[%s13268_s28 + $0x4] ss:$0 sm:$0xff] }
0x123f   :  { %v12502_v40 = vsub.f32 %v4960_v29, %v5000_v30  ;;  %v5107_v62 = vmul.f32 0.0625, %v5106_v44 }
0x1241   :  { %v5002_v59 = vmul.f32 %v12502_v40, %v12502_v40  ;;  %v5111_v36 = vrot.slane %v5107_v62, %v9669_v47 }
0x1243   :  { %v5003_v10 = vsel %vm450_vm4, %v5002_v59, 0.0  ;;  %v12508_v45 = vsub.f32 %v4965_v21, %v5111_v36 }
0x1244   :  { %v5004_v1 = vrot.slane %v5003_v10, 4 }
0x1245   :  { %v5113_v23 = vmul.f32 %v12508_v45, %v12508_v45 }
0x1246   :  { %v5005_v39 = vadd.f32 %v5004_v1, %v5003_v10 }
0x1247   :  { %v5114_v52 = vsel %vm450_vm4, %v5113_v23, 0.0 }
0x1248   :  { %v5115_v41 = vrot.slane %v5114_v52, 4  ;;  %v5006_v46 = vrot.slane %v5005_v39, 2 }
0x124a   :  { %v5116_v54 = vadd.f32 %v5115_v41, %v5114_v52  ;;  %v5007_v53 = vadd.f32 %v5006_v46, %v5005_v39 }
0x124c   :  { %v5117_v32 = vrot.slane %v5116_v54, 2  ;;  %v5008_v14 = vrot.slane %v5007_v53, 1 }
0x124e   :  { %v5118_v5 = vadd.f32 %v5117_v32, %v5116_v54  ;;  %v5009_v18 = vadd.f32 %v5008_v14, %v5007_v53 }
0x1250   :  { %v5119_v58 = vrot.slane %v5118_v5, 1 }
0x1252   :  { %v5120_v24 = vadd.f32 %v5119_v58, %v5118_v5 }
0x1254   :  { %5125 = vrot.lane.b32.xlu1 %v5120_v24, %s13290_s5  ;;  %5122 = vrot.lane.b32.xlu0 %v5120_v24, %s13297_s9 }
0x1258   :  { %5014 = vrot.lane.b32.xlu1 %v5009_v18, %s13290_s5  ;;  %5011 = vrot.lane.b32.xlu0 %v5009_v18, %s13297_s9 }
0x125c   :  { %5021 = vrot.lane.b32.xlu1 %v5009_v18, %s13292_s7  ;;  %5018 = vrot.lane.b32.xlu0 %v5009_v18, %s13291_s0 }
0x1260   :  { %5132 = vrot.lane.b32.xlu1 %v5120_v24, %s13292_s7  ;;  %5129 = vrot.lane.b32.xlu0 %v5120_v24, %s13291_s0 }
0x12c6   :  { %v5126_v12 = vpop.permute.xlu1 %5125  ;;  %v5123_v4 = vpop.permute.xlu0 %5122 }
0x12c7   :  { %v5128_v0 = vsel %vm495_vm6, %v5123_v4, %v5126_v12 }
0x12ca   :  { %v5015_v13 = vpop.permute.xlu1 %5014  ;;  %v5012_v43 = vpop.permute.xlu0 %5011 }
0x12cb   :  { %v5017_v29 = vsel %vm495_vm6, %v5012_v43, %v5015_v13 }
0x12ce   :  { %v5022_v21 = vpop.permute.xlu1 %5021  ;;  %v5019_v61 = vpop.permute.xlu0 %5018 }
0x12cf   :  { %v5024_v15 = vsel %vm503_vm5, %v5019_v61, %v5022_v21 }
0x12d0   :  { %v5025_v7 = vsel %vm9661_vm7, %v5017_v29, %v5024_v15 }
0x12d1   :  { %v5026_v33 = vadd.f32 %v5025_v7, %v5009_v18 }
0x12d2   :  { %v5133_v20 = vpop.permute.xlu1 %5132  ;;  %v5130_v35 = vpop.permute.xlu0 %5129 }
0x12d3   :  { %v5027_v17 = vmul.f32 0.0625, %v5026_v33  ;;  %v5135_v6 = vsel %vm503_vm5, %v5130_v35, %v5133_v20 }
0x12d4   :  { %v5136_v49 = vsel %vm9661_vm7, %v5128_v0, %v5135_v6 }
0x12d5   :  { %v5028_v11 = vadd.f32 1e-05, %v5027_v17  ;;  %v5137_v56 = vadd.f32 %v5136_v49, %v5120_v24 }
0x12d7   :  { %9133 = vrsqrt.f32 %v5028_v11  ;;  %v5138_v51 = vmul.f32 0.0625, %v5137_v56  ;;  %vm5031_vm3 = vcmp.eq.f32.partialorder %v5028_v11, inf  ;;  %v5034_v34 = vand.u32 2147483648, %v5028_v11 }
0x12d8   :  { %vm5033_vm8 = vcmp.eq.f32.partialorder %v5028_v11, 0.0 }
0x12d9   :  { %v5139_v28 = vadd.f32 1e-05, %v5138_v51 }
0x12db   :  { %9135 = vrsqrt.f32 %v5139_v28  ;;  %vm5142_vm9 = vcmp.eq.f32.partialorder %v5139_v28, inf  ;;  %v5145_v50 = vand.u32 2147483648, %v5139_v28  ;;  %vm5144_vm10 = vcmp.eq.f32.partialorder %v5139_v28, 0.0 }
0x12e1   :  { %v9134_v37 = vpop.eup %9133 }
0x12e2   :  { %v5030_v19 = vmul.f32 %v9134_v37, %v5028_v11 }
0x12e4   :  { %v5032_v55 = vsel %vm5031_vm3, %v5028_v11, %v5030_v19 }
0x12e5   :  { %v5035_v25 = vsel %vm5033_vm8, %v5034_v34, %v5032_v55  ;;  %v9136_v16 = vpop.eup %9135 }
0x12e6   :  { %v5039_v26 = vrot.slane %v5035_v25, %v9669_v47  ;;  %v5141_v27 = vmul.f32 %v9136_v16, %v5139_v28 }
0x12e8   :  { %9137 = vrcp.f32 %v5039_v26  ;;  %v5143_v48 = vsel %vm5142_vm9, %v5139_v28, %v5141_v27  ;;  %vm5608_vm9 = vcmask 64512  }
0x12e9   :  { %v5146_v3 = vsel %vm5144_vm10, %v5145_v50, %v5143_v48 }
0x12ea   :  { %v5150_v9 = vrot.slane %v5146_v3, %v9669_v47 }
0x12ec   :  { %9139 = vrcp.f32 %v5150_v9 }
0x12f2   :  { %v9138_v2 = vpop.eup %9137 }
0x12f3   :  { %v5041_v60 = vmul.f32 %v9138_v2, %v12502_v40 }
0x12f5   :  { %v5048_v22 = vmul.f32 %v7462_v38, %v5041_v60  ;;  %v5182_v60 = vld [vmem:[%s13167_s10] sm:$0xff] }
0x12f6   :  { %v9140_v30 = vpop.eup %9139 }
0x12f7   :  { %v5055_v44 = vadd.f32 %v7463_v57, %v5048_v22  ;;  %v5152_v62 = vmul.f32 %v9140_v30, %v12508_v45  ;;  %v5184_v22 = vld [vmem:[%s13167_s10 + $0x10] sm:$0xff]  ;;  %v7471_v30 = vld [vmem:[%s13289_s1 + $0x180] sm:$0xff] }
0x12f9   :  { %v5057_v59 = vmul.f32 0.70710677, %v5055_v44  ;;  %v5153_v36 = vmul.f32 %v7462_v38, %v5152_v62  ;;  %v5056_v50 = vmul.f32 0.5, %v5055_v44  ;;  %v7472_v44 = vld [vmem:[%s13289_s1 + $0x188] sm:$0xff]  ;;  %v7473_v62 = vld [vmem:[%s13289_s1 + $0x190] sm:$0xff] }
0x12fb   :  { %v5060_v10 = vand.u32 2147483647, %v5057_v59  ;;  %v5154_v1 = vadd.f32 %v7463_v57, %v5153_v36  ;;  %vm5058_vm13 = vcmp.ge.f32.partialorder %v5057_v59, 0.0  ;;  %v5183_v57 = vld [vmem:[%s13167_s10 + $0x8] sm:$0xff]  ;;  %v8688_v59 = vpack.c.bf16 %v7472_v44, %v7471_v30  ;;  %v7474_v36 = vld [vmem:[%s13289_s1 + $0x198] sm:$0xff] }
0x12fc   :  { %v5059_v19 = vsel %vm5058_vm13, 1.0, %v13269_v31 }
0x12fd   :  { %v5061_v23 = vmul.f32 0.3275911, %v5060_v10  ;;  %v5156_v39 = vmul.f32 0.70710677, %v5154_v1  ;;  %v5074_v46 = vsub.f32 0.0, %v5060_v10  ;;  %v5155_v48 = vmul.f32 0.5, %v5154_v1 }
0x12fe   :  { %v7475_v1 = vld [vmem:[%s13289_s1 + $0x1a0] sm:$0xff] }
0x12ff   :  { %v5062_v52 = vadd.f32 1.0, %v5061_v23  ;;  %v5159_v41 = vand.u32 2147483647, %v5156_v39  ;;  %v5075_v5 = vmul.f32 %v5074_v46, %v5060_v10  ;;  %vm5157_vm14 = vcmp.ge.f32.partialorder %v5156_v39, 0.0  ;;  %v7476_v23 = vld [vmem:[%s13289_s1 + $0x1a8] sm:$0xff] }
0x1300   :  { %v5158_v16 = vsel %vm5157_vm14, 1.0, %v13269_v31  ;;  %v8691_v10 = vpack.c.bf16 %v7474_v36, %v7473_v62  ;;  %v8694_v39 = vpack.c.bf16 %v7476_v23, %v7475_v1  ;;  %v7480_v46 = vld [vmem:[%s13289_s1 + $0x1c8] sm:$0xff] }
0x1301   :  { %9141 = vrcp.f32 %v5062_v52  ;;  %v5160_v54 = vmul.f32 0.3275911, %v5159_v41  ;;  %v5173_v58 = vsub.f32 0.0, %v5159_v41  ;;  %v5076_v14 = vmul.f32 1.442695, %v5075_v5  ;;  %v7477_v52 = vld [vmem:[%s13289_s1 + $0x1b0] sm:$0xff] }
0x1302   :  { %v7481_v5 = vld [vmem:[%s13289_s1 + $0x1d0] sm:$0xff] }
0x1303   :  { %v5161_v40 = vadd.f32 1.0, %v5160_v54  ;;  %v5174_v12 = vmul.f32 %v5173_v58, %v5159_v41  ;;  %v7478_v41 = vld [vmem:[%s13289_s1 + $0x1b8] sm:$0xff] }
0x1304   :  { %v8697_v54 = vpack.c.bf16 %v7478_v41, %v7477_v52 }
0x1305   :  { %9143 = vrcp.f32 %v5161_v40  ;;  %v5175_v61 = vmul.f32 1.442695, %v5174_v12  ;;  %v7479_v40 = vld [vmem:[%s13289_s1 + $0x1c0] sm:$0xff] }
0x1306   :  { %9145 = vpow2.f32 %v5076_v14 }
0x1307   :  { %9147 = vpow2.f32 %v5175_v61 }
0x130b   :  { %v9142_v32 = vpop.eup %9141 }
0x130c   :  { %v5065_v53 = vmul.f32 1.0614054, %v9142_v32 }
0x130e   :  { %v7464_v24 = vadd.f32 -1.4531521, %v5065_v53  ;;  %v7482_v53 = vld [vmem:[%s13289_s1 + $0x1d8] sm:$0xff] }
0x130f   :  { %v9144_v45 = vpop.eup %9143  ;;  %v8703_v58 = vpack.c.bf16 %v7482_v53, %v7481_v5 }
0x1310   :  { %v5067_v18 = vmul.f32 %v9142_v32, %v7464_v24  ;;  %v5164_v4 = vmul.f32 1.0614054, %v9144_v45  ;;  %v9146_v6 = vpop.eup %9145 }
0x1311   :  { %v9148_v37 = vpop.eup %9147 }
0x1312   :  { %v5068_v13 = vadd.f32 1.4214138, %v5067_v18  ;;  %v7466_v43 = vadd.f32 -1.4531521, %v5164_v4 }
0x1314   :  { %v5069_v21 = vmul.f32 %v9142_v32, %v5068_v13  ;;  %v5166_v29 = vmul.f32 %v9144_v45, %v7466_v43 }
0x1316   :  { %v7465_v15 = vadd.f32 -0.28449672, %v5069_v21  ;;  %v5167_v7 = vadd.f32 1.4214138, %v5166_v29  ;;  %v7484_v29 = vld [vmem:[%s13247_s2 + $0x5] ss:$0 sm:$0xff] }
0x1318   :  { %v5071_v33 = vmul.f32 %v9142_v32, %v7465_v15  ;;  %v5168_v20 = vmul.f32 %v9144_v45, %v5167_v7 }
0x131a   :  { %v5072_v35 = vadd.f32 0.2548296, %v5071_v33  ;;  %v7467_v0 = vadd.f32 -0.28449672, %v5168_v20 }
0x131c   :  { %v5073_v17 = vmul.f32 %v9142_v32, %v5072_v35  ;;  %v5170_v49 = vmul.f32 %v9144_v45, %v7467_v0  ;;  %v8700_v32 = vpack.c.bf16 %v7480_v46, %v7479_v40 }
0x131e   :  { %v5078_v11 = vmul.f32 %v9146_v6, %v5073_v17  ;;  %v5171_v56 = vadd.f32 0.2548296, %v5170_v49 }
0x1320   :  { %v5079_v51 = vsub.f32 1.0, %v5078_v11  ;;  %v5172_v28 = vmul.f32 %v9144_v45, %v5171_v56 }
0x1322   :  { %v5080_v34 = vmul.f32 %v5079_v51, %v5059_v19  ;;  %v5177_v55 = vmul.f32 %v9148_v37, %v5172_v28 }
0x1324   :  { %v5178_v25 = vsub.f32 1.0, %v5177_v55  ;;  %v5081_v26 = vadd.f32 1.0, %v5080_v34 }
0x1326   :  { %v5179_v27 = vmul.f32 %v5178_v25, %v5158_v16  ;;  %v5082_v9 = vmul.f32 %v5081_v26, %v5056_v50 }
0x1328   :  { %v5180_v3 = vadd.f32 1.0, %v5179_v27 }
0x132a   :  { %v5181_v2 = vmul.f32 %v5180_v3, %v5155_v48 }
0x132c   :  { %v8685_v38 = vpack.c.bf16 %v5181_v2, %v5082_v9 }
0x132e   :  { %8686 = vmatpush3.bf16.msra.mxu0 %v8685_v38 }
0x132f   :  { %8687 = vmatprep.subr.bf16.mxu0 %v13270_v42 }
0x1331   :  { %8169 = vmatmul.mubr.msk.f32.vlgmr.msra.gmra.mrb[104].mxu0 %vm5185_vm15, %v5182_v60 }
0x1332   :  { %8171 = vmatprep.mubr.msk.f32.mxu0 %vm9208_vm2, %v9209_v8  ;;  %8689 = vmatpush3.bf16.msra.mxu0 %v8688_v59 }
0x1333   :  { %8690 = vmatprep.subr.bf16.mxu0 %v13270_v42 }
0x1335   :  { %8172 = vmatmul.mubr.msk.f32.gmra.mrb[106].mxu0 %vm5185_vm15, %v5183_v57 }
0x1336   :  { %8174 = vmatprep.mubr.msk.f32.mxu0 %vm9208_vm2, %v9209_v8  ;;  %8692 = vmatpush3.bf16.msra.mxu0 %v8691_v10 }
0x1337   :  { %8693 = vmatprep.subr.bf16.mxu0 %v13270_v42 }
0x1339   :  { %8175 = vmatmul.mubr.msk.f32.gmra.mrb[108].mxu0 %vm5185_vm15, %v5184_v22 }
0x133a   :  { %8201 = vmatprep.mubr.msk.f32.mxu0 %vm9208_vm2, %v9209_v8  ;;  %8695 = vmatpush3.bf16.msra.mxu0 %v8694_v39 }
0x133b   :  { %8696 = vmatprep.subr.bf16.mxu0 %v13270_v42 }
0x133e   :  { %8698 = vmatpush3.bf16.msra.mxu0 %v8697_v54 }
0x133f   :  { %8699 = vmatprep.subr.bf16.mxu0 %v13270_v42 }
0x1342   :  { %8701 = vmatpush3.bf16.msra.mxu0 %v8700_v32 }
0x1343   :  { %8702 = vmatprep.subr.bf16.mxu0 %v13270_v42 }
0x1346   :  { %8704 = vmatpush3.bf16.msra.mxu0 %v8703_v58 }
0x1347   :  { %8204 = vmatprep.subr.mxu0 %v9209_v8 }
0x1404   :  { %v5261_v24 = vpop.f32.mrb[104].mxu0 }
0x1405   :  { %v8170_v14 = vpop.f32.mrb[105].mxu0 }
0x1408   :  { %v5266_v45 = vpop.f32.mrb[106].mxu0 }
0x1409   :  { %5276 = vrot.lane.b32.xlu0 %v5266_v45, %s13295_s6  ;;  %v8173_v18 = vpop.f32.mrb[107].mxu0 }
0x140c   :  { %v5271_v12 = vpop.f32.mrb[108].mxu0 }
0x140d   :  { %5280 = vrot.lane.b32.xlu1 %v5271_v12, %s13296_s24  ;;  %v8176_v4 = vpop.f32.mrb[109].mxu0 }
0x147b   :  { %v5277_v13 = vpop.permute.xlu0 %5276 }
0x147c   :  { %v5283_v43 = vsel %vm450_vm4, %v5261_v24, %v5277_v13 }
0x147f   :  { %v5281_v21 = vpop.permute.xlu1 %5280 }
0x1480   :  { %v5284_v61 = vsel %vm2292_vm11, %v5283_v43, %v5281_v21 }
0x1481   :  { %8202 = vmatmul.mubr.msk.f32.vlgmr.msra.gmra.mrb[110].mxu0 %vm2329_vm12, %v5284_v61 }
0x1482   :  { %8206 = vmatprep.mubr.msk.f32.mxu0 %vm9208_vm2, %v9209_v8 }
0x1554   :  { %v5375_v15 = vpop.f32.mrb[110].mxu0 }
0x1555   :  { %v5376_v7 = vadd.f32 %v7484_v29, %v5375_v15  ;;  %v8203_v33 = vpop.f32.mrb[111].mxu0  ;;  %v5730_v15 = vld [vmem:[%s13169_s12] sm:$0xff] }
0x1556   :  { %v5732_v33 = vld [vmem:[%s13169_s12 + $0x10] sm:$0xff] }
0x1557   :  { %v5384_v20 = vsel %vm5383_vm1, %v5376_v7, 0.0  ;;  %v5496_v35 = vrot.slane %v5376_v7, 4 }
0x1558   :  { %v5385_v0 = vrot.slane %v5384_v20, 4 }
0x1559   :  { %v5498_v17 = vsel %vm5383_vm1, %v5496_v35, 0.0  ;;  %v5733_v35 = vld [vmem:[%s13169_s12 + $0x18] sm:$0xff] }
0x155a   :  { %v5386_v6 = vadd.f32 %v5385_v0, %v5384_v20  ;;  %v5499_v49 = vrot.slane %v5498_v17, 4 }
0x155c   :  { %v5387_v11 = vrot.slane %v5386_v6, 2  ;;  %v5500_v56 = vadd.f32 %v5499_v49, %v5498_v17 }
0x155e   :  { %v5388_v51 = vadd.f32 %v5387_v11, %v5386_v6  ;;  %v5501_v28 = vrot.slane %v5500_v56, 2  ;;  %v8715_v6 = vpack.c.bf16 %v5733_v35, %v5732_v33 }
0x1560   :  { %v5389_v37 = vrot.slane %v5388_v51, 1  ;;  %v5502_v19 = vadd.f32 %v5501_v28, %v5500_v56 }
0x1562   :  { %v5390_v34 = vadd.f32 %v5389_v37, %v5388_v51  ;;  %v5503_v55 = vrot.slane %v5502_v19, 1 }
0x1564   :  { %5395 = vrot.lane.b32.xlu1 %v5390_v34, %s13290_s5  ;;  %5392 = vrot.lane.b32.xlu0 %v5390_v34, %s13297_s9  ;;  %v5504_v25 = vadd.f32 %v5503_v55, %v5502_v19 }
0x1568   :  { %5509 = vrot.lane.b32.xlu1 %v5504_v25, %s13290_s5  ;;  %5506 = vrot.lane.b32.xlu0 %v5504_v25, %s13297_s9 }
0x156c   :  { %5516 = vrot.lane.b32.xlu1 %v5504_v25, %s13292_s7  ;;  %5513 = vrot.lane.b32.xlu0 %v5504_v25, %s13291_s0 }
0x1570   :  { %5402 = vrot.lane.b32.xlu1 %v5390_v34, %s13292_s7  ;;  %5399 = vrot.lane.b32.xlu0 %v5390_v34, %s13291_s0 }
0x15d6   :  { %v5396_v16 = vpop.permute.xlu1 %5395  ;;  %v5393_v26 = vpop.permute.xlu0 %5392 }
0x15d7   :  { %v5398_v30 = vsel %vm495_vm6, %v5393_v26, %v5396_v16 }
0x15da   :  { %v5510_v27 = vpop.permute.xlu1 %5509  ;;  %v5507_v50 = vpop.permute.xlu0 %5506 }
0x15db   :  { %v5512_v9 = vsel %vm495_vm6, %v5507_v50, %v5510_v27 }
0x15de   :  { %v5517_v48 = vpop.permute.xlu1 %5516  ;;  %v5514_v3 = vpop.permute.xlu0 %5513 }
0x15df   :  { %v5519_v2 = vsel %vm503_vm5, %v5514_v3, %v5517_v48 }
0x15e0   :  { %v5520_v38 = vsel %vm9661_vm7, %v5512_v9, %v5519_v2 }
0x15e1   :  { %v5521_v60 = vadd.f32 %v5520_v38, %v5504_v25 }
0x15e2   :  { %v5403_v57 = vpop.permute.xlu1 %5402  ;;  %v5400_v22 = vpop.permute.xlu0 %5399 }
0x15e3   :  { %v5522_v44 = vmul.f32 0.125, %v5521_v60  ;;  %v5405_v62 = vsel %vm503_vm5, %v5400_v22, %v5403_v57 }
0x15e4   :  { %v5406_v59 = vsel %vm9661_vm7, %v5398_v30, %v5405_v62 }
0x15e5   :  { %v5526_v36 = vrot.slane %v5522_v44, %v9669_v47  ;;  %v5407_v10 = vadd.f32 %v5406_v59, %v5390_v34 }
0x15e7   :  { %v12632_v1 = vsub.f32 %v5376_v7, %v5526_v36  ;;  %v5408_v23 = vmul.f32 0.125, %v5407_v10 }
0x15e9   :  { %v5528_v39 = vmul.f32 %v12632_v1, %v12632_v1  ;;  %v5412_v52 = vrot.slane %v5408_v23, %v9669_v47  ;;  %v7488_v23 = vld [vmem:[%s13267_s8 + $0x5] ss:$0 sm:$0xff]  ;;  %s7192_s8 = sshll.u32 %s9210_s3, 4  ;;  %s7193_s8 = int_to_ptr.vmem [resolvable:$true] %s7192_s8 }
0x15ea   :  { %p9180_p1 = scmp.lt.s32.totalorder %s7193_s8, %s7193_s8 }
0x15eb   :  { %v5530_v41 = vrot.slane %v5528_v39, 4  ;;  %v12637_v54 = vsub.f32 %v5376_v7, %v5412_v52  ;;  %v5731_v7 = vld [vmem:[%s13169_s12 + $0x8] sm:$0xff]  ;;  %v7489_v52 = vld [vmem:[%s13268_s28 + $0x5] ss:$0 sm:$0xff]  ;;  %s9175_s28 = scalar_lea.vmem %s7193_s8, 32 }
0x15ec   :  { %v8712_v20 = vpack.c.bf16 %v5731_v7, %v5730_v15  ;;  %p9176_p0 = scmp.ne.s32.totalorder %s7193_s8, %s9175_s28  ;;  %p9181_p2 = scmp.lt.s32.totalorder %s9175_s28, %s9175_s28 }
0x15ed   :  { %v5532_v40 = vsel %vm5383_vm1, %v5530_v41, 0.0  ;;  %v5414_v46 = vmul.f32 %v12637_v54, %v12637_v54 }
0x15ee   :  { %v5533_v32 = vrot.slane %v5532_v40, 4  ;;  %8713 = vmatpush3.bf16.msra.mxu1 %v8712_v20  ;;  %p9182_p3 = por %p9181_p2, %p9180_p1 }
0x15ef   :  { %v5415_v5 = vsel %vm5383_vm1, %v5414_v46, 0.0  ;;  %8714 = vmatprep.subr.bf16.mxu1 %v13270_v42 }
0x15f0   :  { %v5416_v53 = vrot.slane %v5415_v5, 4  ;;  %v5534_v58 = vadd.f32 %v5533_v32, %v5532_v40  ;;  %p9183_p4 = pnand %p9182_p3, %p9176_p0 }
0x15f2   :  { %v5417_v24 = vadd.f32 %v5416_v53, %v5415_v5  ;;  %v5535_v18 = vrot.slane %v5534_v58, 2  ;;  %8716 = vmatpush3.bf16.msra.mxu1 %v8715_v6 }
0x15f3   :  { %8717 = vmatprep.subr.bf16.mxu1 %v13270_v42 }
0x15f4   :  { %v5418_v14 = vrot.slane %v5417_v24, 2  ;;  %v5536_v13 = vadd.f32 %v5535_v18, %v5534_v58 }
0x15f6   :  { %v5419_v45 = vadd.f32 %v5418_v14, %v5417_v24  ;;  %v5537_v43 = vrot.slane %v5536_v13, 1 }
0x15f8   :  { %v5420_v12 = vrot.slane %v5419_v45, 1  ;;  %v5538_v21 = vadd.f32 %v5537_v43, %v5536_v13 }
0x15fa   :  { %v5421_v4 = vadd.f32 %v5420_v12, %v5419_v45 }
0x15fc   :  { %5426 = vrot.lane.b32.xlu1 %v5421_v4, %s13290_s5  ;;  %5423 = vrot.lane.b32.xlu0 %v5421_v4, %s13297_s9 }
0x1600   :  { %5433 = vrot.lane.b32.xlu1 %v5421_v4, %s13292_s7  ;;  %5430 = vrot.lane.b32.xlu0 %v5421_v4, %s13291_s0 }
0x1604   :  { %5543 = vrot.lane.b32.xlu1 %v5538_v21, %s13290_s5  ;;  %5540 = vrot.lane.b32.xlu0 %v5538_v21, %s13297_s9  ;;  %s13302_s5 = sld [smem:[#allocation33_spill]]  ;;  %s13303_s9 = sld [smem:[#allocation34_spill]] }
0x1608   :  { %5550 = vrot.lane.b32.xlu1 %v5538_v21, %s13292_s7  ;;  %5547 = vrot.lane.b32.xlu0 %v5538_v21, %s13291_s0 }
0x166e   :  { %v5427_v61 = vpop.permute.xlu1 %5426  ;;  %v5424_v29 = vpop.permute.xlu0 %5423 }
0x166f   :  { %v5429_v49 = vsel %vm495_vm6, %v5424_v29, %v5427_v61 }
0x1672   :  { %v5434_v0 = vpop.permute.xlu1 %5433  ;;  %v5431_v17 = vpop.permute.xlu0 %5430 }
0x1673   :  { %v5436_v11 = vsel %vm503_vm5, %v5431_v17, %v5434_v0 }
0x1674   :  { %v5437_v56 = vsel %vm9661_vm7, %v5429_v49, %v5436_v11 }
0x1675   :  { %v5438_v51 = vadd.f32 %v5437_v56, %v5421_v4 }
0x1676   :  { %v5544_v28 = vpop.permute.xlu1 %5543  ;;  %v5541_v37 = vpop.permute.xlu0 %5540 }
0x1677   :  { %v5439_v19 = vmul.f32 0.125, %v5438_v51  ;;  %v5546_v16 = vsel %vm495_vm6, %v5541_v37, %v5544_v28 }
0x1679   :  { %v5440_v34 = vadd.f32 1e-05, %v5439_v19 }
0x167a   :  { %v5551_v55 = vpop.permute.xlu1 %5550  ;;  %v5548_v25 = vpop.permute.xlu0 %5547 }
0x167b   :  { %9149 = vrsqrt.f32 %v5440_v34  ;;  %v5553_v26 = vsel %vm503_vm5, %v5548_v25, %v5551_v55  ;;  %vm5443_vm11 = vcmp.eq.f32.partialorder %v5440_v34, inf  ;;  %v5446_v38 = vand.u32 2147483648, %v5440_v34 }
0x167c   :  { %v5554_v27 = vsel %vm9661_vm7, %v5546_v16, %v5553_v26  ;;  %vm5445_vm3 = vcmp.eq.f32.partialorder %v5440_v34, 0.0 }
0x167d   :  { %v5555_v50 = vadd.f32 %v5554_v27, %v5538_v21 }
0x167f   :  { %v5556_v48 = vmul.f32 0.125, %v5555_v50 }
0x1681   :  { %v5557_v3 = vadd.f32 1e-05, %v5556_v48 }
0x1683   :  { %9151 = vrsqrt.f32 %v5557_v3  ;;  %vm5560_vm5 = vcmp.eq.f32.partialorder %v5557_v3, inf  ;;  %v5563_v62 = vand.u32 2147483648, %v5557_v3  ;;  %vm5562_vm6 = vcmp.eq.f32.partialorder %v5557_v3, 0.0 }
0x1685   :  { %v9150_v9 = vpop.eup %9149 }
0x1686   :  { %v5442_v2 = vmul.f32 %v9150_v9, %v5440_v34 }
0x1688   :  { %v5444_v60 = vsel %vm5443_vm11, %v5440_v34, %v5442_v2 }
0x1689   :  { %v5447_v57 = vsel %vm5445_vm3, %v5446_v38, %v5444_v60 }
0x168a   :  { %v5451_v22 = vrot.slane %v5447_v57, %v9669_v47 }
0x168c   :  { %9153 = vrcp.f32 %v5451_v22 }
0x168d   :  { %v9152_v30 = vpop.eup %9151 }
0x168e   :  { %v5559_v44 = vmul.f32 %v9152_v30, %v5557_v3 }
0x1690   :  { %v5561_v63 = vsel %vm5560_vm5, %v5557_v3, %v5559_v44 }
0x1691   :  { %v5564_v59 = vsel %vm5562_vm6, %v5563_v62, %v5561_v63  ;;  %v5734_v63 = vld [vmem:[%s13169_s12 + $0x20] sm:$0xff] }
0x1692   :  { %v5568_v36 = vrot.slane %v5564_v59, %v9669_v47  ;;  %v5735_v59 = vld [vmem:[%s13169_s12 + $0x28] sm:$0xff] }
0x1694   :  { %9155 = vrcp.f32 %v5568_v36 }
0x1696   :  { %v9154_v10 = vpop.eup %9153 }
0x1697   :  { %v5453_v39 = vmul.f32 %v9154_v10, %v12637_v54 }
0x1699   :  { %v5460_v41 = vmul.f32 %v7488_v23, %v5453_v39  ;;  %v8706_v39 = vpack.c.bf16 %v5735_v59, %v5734_v63 }
0x169b   :  { %v5467_v40 = vadd.f32 %v7489_v52, %v5460_v41  ;;  %v5736_v41 = vld [vmem:[%s13169_s12 + $0x30] sm:$0xff] }
0x169d   :  { %v5469_v46 = vmul.f32 0.70710677, %v5467_v40  ;;  %v5468_v30 = vmul.f32 0.5, %v5467_v40  ;;  %v5737_v40 = vld [vmem:[%s13169_s12 + $0x38] sm:$0xff] }
0x169e   :  { %v9156_v32 = vpop.eup %9155 }
0x169f   :  { %v5472_v5 = vand.u32 2147483647, %v5469_v46  ;;  %v5570_v53 = vmul.f32 %v9156_v32, %v12632_v1  ;;  %vm5470_vm7 = vcmp.ge.f32.partialorder %v5469_v46, 0.0  ;;  %v5602_v46 = vld [vmem:[%s13168_s11 + $0x8] sm:$0xff]  ;;  %v8709_v32 = vpack.c.bf16 %v5737_v40, %v5736_v41 }
0x16a0   :  { %v5471_v3 = vsel %vm5470_vm7, 1.0, %v13269_v31 }
0x16a1   :  { %v5473_v47 = vmul.f32 0.3275911, %v5472_v5  ;;  %v5571_v58 = vmul.f32 %v7488_v23, %v5570_v53  ;;  %v5486_v54 = vsub.f32 0.0, %v5472_v5  ;;  %v5601_v23 = vld [vmem:[%s13168_s11] sm:$0xff]  ;;  %v5604_v53 = vld [vmem:[%s13168_s11 + $0x18] sm:$0xff] }
0x16a3   :  { %v5474_v24 = vadd.f32 1.0, %v5473_v47  ;;  %v5572_v14 = vadd.f32 %v7489_v52, %v5571_v58  ;;  %v5487_v21 = vmul.f32 %v5486_v54, %v5472_v5  ;;  %v5603_v5 = vld [vmem:[%s13168_s11 + $0x10] sm:$0xff]  ;;  %v5605_v47 = vld [vmem:[%s13168_s11 + $0x20] sm:$0xff]  ;;  %v5606_v58 = vld [vmem:[%s13168_s11 + $0x28] sm:$0xff] }
0x16a4   :  { %v5741_v54 = vld [vmem:[%s13169_s12 + $0x58] sm:$0xff] }
0x16a5   :  { %9157 = vrcp.f32 %v5474_v24  ;;  %v5574_v45 = vmul.f32 0.70710677, %v5572_v14  ;;  %v5488_v15 = vmul.f32 1.442695, %v5487_v21  ;;  %v5573_v44 = vmul.f32 0.5, %v5572_v14  ;;  %v5607_v24 = vld [vmem:[%s13168_s11 + $0x30] sm:$0xff] }
0x16a6   :  { %v5738_v14 = vld [vmem:[%s13169_s12 + $0x40] sm:$0xff] }
0x16a7   :  { %v5577_v18 = vand.u32 2147483647, %v5574_v45  ;;  %vm5575_vm8 = vcmp.ge.f32.partialorder %v5574_v45, 0.0  ;;  %v5739_v45 = vld [vmem:[%s13169_s12 + $0x48] sm:$0xff] }
0x16a8   :  { %v5576_v60 = vsel %vm5575_vm8, 1.0, %v13269_v31 }
0x16a9   :  { %v5578_v12 = vmul.f32 0.3275911, %v5577_v18  ;;  %v5591_v7 = vsub.f32 0.0, %v5577_v18 }
0x16ab   :  { %v5579_v4 = vadd.f32 1.0, %v5578_v12  ;;  %v5592_v35 = vmul.f32 %v5591_v7, %v5577_v18  ;;  %v8718_v18 = vpack.c.bf16 %v5739_v45, %v5738_v14  ;;  %v5740_v12 = vld [vmem:[%s13169_s12 + $0x50] sm:$0xff]  ;;  %v5745_v7 = vld [vmem:[%s13169_s12 + $0x78] sm:$0xff] }
0x16ad   :  { %9159 = vrcp.f32 %v5579_v4  ;;  %v5593_v11 = vmul.f32 1.442695, %v5592_v35  ;;  %v5742_v4 = vld [vmem:[%s13169_s12 + $0x60] sm:$0xff] }
0x16ae   :  { %9161 = vpow2.f32 %v5488_v15  ;;  %v5744_v15 = vld [vmem:[%s13169_s12 + $0x70] sm:$0xff] }
0x16af   :  { %v9158_v13 = vpop.eup %9157  ;;  %9163 = vpow2.f32 %v5593_v11  ;;  %v5750_v11 = vld [vmem:[%s13169_s12 + $0xa0] sm:$0xff] }
0x16b0   :  { %v5477_v43 = vmul.f32 1.0614054, %v9158_v13 }
0x16b2   :  { %v7490_v61 = vadd.f32 -1.4531521, %v5477_v43 }
0x16b4   :  { %v5479_v29 = vmul.f32 %v9158_v13, %v7490_v61  ;;  %v8721_v61 = vpack.c.bf16 %v5741_v54, %v5740_v12 }
0x16b6   :  { %v5480_v33 = vadd.f32 1.4214138, %v5479_v29 }
0x16b7   :  { %v9160_v1 = vpop.eup %9159 }
0x16b8   :  { %v5481_v20 = vmul.f32 %v9158_v13, %v5480_v33  ;;  %v5582_v0 = vmul.f32 1.0614054, %v9160_v1  ;;  %v9162_v34 = vpop.eup %9161  ;;  %v5746_v33 = vld [vmem:[%s13169_s12 + $0x80] sm:$0xff] }
0x16b9   :  { %v9164_v48 = vpop.eup %9163 }
0x16ba   :  { %v7491_v17 = vadd.f32 -0.28449672, %v5481_v20  ;;  %v7492_v6 = vadd.f32 -1.4531521, %v5582_v0  ;;  %v8727_v0 = vpack.c.bf16 %v5745_v7, %v5744_v15 }
0x16bc   :  { %v5483_v49 = vmul.f32 %v9158_v13, %v7491_v17  ;;  %v5584_v56 = vmul.f32 %v9160_v1, %v7492_v6  ;;  %v5748_v6 = vld [vmem:[%s13169_s12 + $0x90] sm:$0xff] }
0x16be   :  { %v5484_v51 = vadd.f32 0.2548296, %v5483_v49  ;;  %v5585_v28 = vadd.f32 1.4214138, %v5584_v56  ;;  %v5749_v49 = vld [vmem:[%s13169_s12 + $0x98] sm:$0xff]  ;;  %v5751_v56 = vld [vmem:[%s13169_s12 + $0xa8] sm:$0xff] }
0x16c0   :  { %v5485_v37 = vmul.f32 %v9158_v13, %v5484_v51  ;;  %v5586_v19 = vmul.f32 %v9160_v1, %v5585_v28  ;;  %v5743_v13 = vld [vmem:[%s13169_s12 + $0x68] sm:$0xff] }
0x16c1   :  { %v8724_v29 = vpack.c.bf16 %v5743_v13, %v5742_v4 }
0x16c2   :  { %v5490_v55 = vmul.f32 %v9162_v34, %v5485_v37  ;;  %v7493_v25 = vadd.f32 -0.28449672, %v5586_v19  ;;  %v8733_v37 = vpack.c.bf16 %v5749_v49, %v5748_v6  ;;  %v8736_v19 = vpack.c.bf16 %v5751_v56, %v5750_v11  ;;  %v5752_v34 = vld [vmem:[%s13169_s12 + $0xb0] sm:$0xff] }
0x16c4   :  { %v5588_v16 = vmul.f32 %v9160_v1, %v7493_v25  ;;  %v5491_v26 = vsub.f32 1.0, %v5490_v55  ;;  %v5753_v55 = vld [vmem:[%s13169_s12 + $0xb8] sm:$0xff]  ;;  %v5754_v25 = vld [vmem:[%s13169_s12 + $0xc0] sm:$0xff] }
0x16c6   :  { %v5589_v27 = vadd.f32 0.2548296, %v5588_v16  ;;  %v5492_v9 = vmul.f32 %v5491_v26, %v5471_v3  ;;  %v5755_v16 = vld [vmem:[%s13169_s12 + $0xc8] sm:$0xff]  ;;  %v5756_v3 = vld [vmem:[%s13169_s12 + $0xd0] sm:$0xff] }
0x16c8   :  { %v5590_v50 = vmul.f32 %v9160_v1, %v5589_v27  ;;  %v5493_v57 = vadd.f32 1.0, %v5492_v9  ;;  %v5747_v1 = vld [vmem:[%s13169_s12 + $0x88] sm:$0xff]  ;;  %v5757_v9 = vld [vmem:[%s13169_s12 + $0xd8] sm:$0xff] }
0x16c9   :  { %v8730_v17 = vpack.c.bf16 %v5747_v1, %v5746_v33 }
0x16ca   :  { %v5595_v2 = vmul.f32 %v9164_v48, %v5590_v50  ;;  %v5494_v36 = vmul.f32 %v5493_v57, %v5468_v30  ;;  %v8739_v50 = vpack.c.bf16 %v5753_v55, %v5752_v34  ;;  %v8742_v48 = vpack.c.bf16 %v5755_v16, %v5754_v25 }
0x16cc   :  { %v5596_v38 = vsub.f32 1.0, %v5595_v2 }
0x16ce   :  { %v5597_v22 = vmul.f32 %v5596_v38, %v5576_v60  ;;  %v8745_v60 = vpack.c.bf16 %v5757_v9, %v5756_v3 }
0x16d0   :  { %v5598_v62 = vadd.f32 1.0, %v5597_v22 }
0x16d2   :  { %v5599_v10 = vmul.f32 %v5598_v62, %v5573_v44 }
0x16d4   :  { %v12695_v52 = vsel %vm219_vm0, %v5494_v36, %v5599_v10 }
0x16d5   :  { %8205 = vmatpush3.msra.mxu0 %v12695_v52 }
0x16d6   :  { %8207 = vmatmul.mubr.msk.f32.vlgmr.msra.gmra.mrb[112].mxu0 %vm5608_vm9, %v5601_v23  ;;  %8705 = vmatprep.subr.bf16.mxu0 %v13270_v42 }
0x16d7   :  { %8209 = vmatprep.mubr.msk.f32.mxu0 %vm9208_vm2, %v9209_v8  ;;  %8707 = vmatpush3.bf16.msra.mxu0 %v8706_v39 }
0x16d8   :  { %8708 = vmatprep.subr.bf16.mxu0 %v13270_v42 }
0x16da   :  { %8210 = vmatmul.mubr.msk.f32.gmra.mrb[114].mxu0 %vm5608_vm9, %v5602_v46 }
0x16db   :  { %8212 = vmatprep.mubr.msk.f32.mxu0 %vm9208_vm2, %v9209_v8  ;;  %8710 = vmatpush3.bf16.msra.mxu0 %v8709_v32 }
0x16dc   :  { %8723 = vmatprep.subr.bf16.mxu0 %v13270_v42 }
0x16de   :  { %8213 = vmatmul.mubr.msk.f32.gmra.mrb[116].mxu0 %vm5608_vm9, %v5603_v5 }
0x16df   :  { %8215 = vmatprep.mubr.msk.f32.mxu0 %vm9208_vm2, %v9209_v8 }
0x16e2   :  { %8216 = vmatmul.mubr.msk.f32.gmra.mrb[118].mxu0 %vm5608_vm9, %v5604_v53 }
0x16e3   :  { %8218 = vmatprep.mubr.msk.f32.mxu0 %vm9208_vm2, %v9209_v8 }
0x16e6   :  { %8219 = vmatmul.mubr.msk.f32.gmra.mrb[120].mxu0 %vm5608_vm9, %v5605_v47 }
0x16e7   :  { %8221 = vmatprep.mubr.msk.f32.mxu0 %vm9208_vm2, %v9209_v8 }
0x16ea   :  { %8222 = vmatmul.mubr.msk.f32.gmra.mrb[122].mxu0 %vm5608_vm9, %v5606_v58 }
0x16eb   :  { %8224 = vmatprep.mubr.msk.f32.mxu0 %vm9208_vm2, %v9209_v8 }
0x16ee   :  { %8225 = vmatmul.mubr.msk.f32.gmra.mrb[124].mxu0 %vm5608_vm9, %v5607_v24 }
0x16ef   :  { %8235 = vmatprep.mubr.msk.f32.mxu0 %vm9208_vm2, %v9209_v8 }
0x17a9   :  { %v5696_v43 = vpop.f32.mrb[112].mxu0 }
0x17aa   :  { %v8208_v21 = vpop.f32.mrb[113].mxu0  ;;  %8247 = vmatmul.mubr.msk.f32.vlgmr.msra.gmra.mrb[96].mxu1 %vm450_vm4, %v5696_v43 }
0x17ab   :  { %8719 = vmatpush3.bf16.msra.mxu1 %v8718_v18  ;;  %8257 = vmatprep.mubr.msk.f32.mxu1 %vm9208_vm2, %v9209_v8  ;;  %v7508_v18 = vld [vmem:[%s13170_s13] ss:$0 sm:$0xff] }
0x17ac   :  { %8720 = vmatprep.subr.bf16.mxu1 %v13270_v42 }
0x17ad   :  { %v5701_v20 = vpop.f32.mrb[114].mxu0 }
0x17ae   :  { %v8211_v35 = vpop.f32.mrb[115].mxu0  ;;  %8236 = vmatmul.mubr.msk.f32.vlgmr.msra.gmra.mrb[126].mxu0 %vm450_vm4, %v5701_v20 }
0x17af   :  { %8722 = vmatpush3.bf16.msra.mxu1 %v8721_v61  ;;  %8725 = vmatpush3.bf16.msra.mxu0 %v8724_v29 }
0x17b0   :  { %8726 = vmatprep.subr.bf16.mxu0 %v13270_v42  ;;  %8729 = vmatprep.subr.bf16.mxu1 %v13270_v42 }
0x17b1   :  { %v5706_v51 = vpop.f32.mrb[116].mxu0  ;;  %8268 = vmatprep.mubr.msk.f32.mxu0 %vm9208_vm2, %v9209_v8 }
0x17b2   :  { %v8214_v28 = vpop.f32.mrb[117].mxu0  ;;  %8258 = vmatmul.mubr.msk.f32.vlgmr.msra.gmra.mrb[98].mxu1 %vm450_vm4, %v5706_v51 }
0x17b3   :  { %8728 = vmatpush3.bf16.msra.mxu0 %v8727_v0  ;;  %8731 = vmatpush3.bf16.msra.mxu1 %v8730_v17 }
0x17b4   :  { %8732 = vmatprep.subr.bf16.mxu1 %v13270_v42  ;;  %8735 = vmatprep.subr.bf16.mxu0 %v13270_v42 }
0x17b5   :  { %v5711_v26 = vpop.f32.mrb[118].mxu0  ;;  %8279 = vmatprep.mubr.msk.f32.mxu1 %vm9208_vm2, %v9209_v8 }
0x17b6   :  { %v8217_v27 = vpop.f32.mrb[119].mxu0  ;;  %8269 = vmatmul.mubr.msk.f32.vlgmr.msra.gmra.mrb[128].mxu0 %vm450_vm4, %v5711_v26 }
0x17b7   :  { %8734 = vmatpush3.bf16.msra.mxu1 %v8733_v37  ;;  %8737 = vmatpush3.bf16.msra.mxu0 %v8736_v19 }
0x17b8   :  { %8738 = vmatprep.subr.bf16.mxu0 %v13270_v42  ;;  %8741 = vmatprep.subr.bf16.mxu1 %v13270_v42 }
0x17b9   :  { %v5716_v2 = vpop.f32.mrb[120].mxu0  ;;  %8290 = vmatprep.mubr.msk.f32.mxu0 %vm9208_vm2, %v9209_v8 }
0x17ba   :  { %v8220_v38 = vpop.f32.mrb[121].mxu0  ;;  %8280 = vmatmul.mubr.msk.f32.vlgmr.msra.gmra.mrb[100].mxu1 %vm450_vm4, %v5716_v2 }
0x17bb   :  { %8740 = vmatpush3.bf16.msra.mxu0 %v8739_v50  ;;  %8743 = vmatpush3.bf16.msra.mxu1 %v8742_v48  ;;  %v6348_v38 = vld [vmem:[%s13173_s16 + $0x8] sm:$0xff] }
0x17bc   :  { %8744 = vmatprep.subr.bf16.mxu1 %v13270_v42  ;;  %8301 = vmatprep.mubr.msk.f32.mxu1 %vm9208_vm2, %v9209_v8 }
0x17bd   :  { %v5721_v57 = vpop.f32.mrb[122].mxu0  ;;  %8747 = vmatprep.subr.bf16.mxu0 %v13270_v42 }
0x17be   :  { %v8223_v22 = vpop.f32.mrb[123].mxu0  ;;  %8291 = vmatmul.mubr.msk.f32.vlgmr.msra.gmra.mrb[130].mxu0 %vm450_vm4, %v5721_v57  ;;  %v6350_v57 = vld [vmem:[%s13173_s16 + $0x18] sm:$0xff] }
0x17bf   :  { %8746 = vmatpush3.bf16.msra.mxu1 %v8745_v60  ;;  %8312 = vmatprep.mubr.msk.f32.mxu0 %vm9208_vm2, %v9209_v8 }
0x17c0   :  { %8320 = vmatprep.subr.mxu1 %v9209_v8 }
0x17c1   :  { %v5726_v30 = vpop.f32.mrb[124].mxu0 }
0x17c2   :  { %v8226_v44 = vpop.f32.mrb[125].mxu0  ;;  %8302 = vmatmul.mubr.msk.f32.vlgmr.msra.gmra.mrb[102].mxu1 %vm450_vm4, %v5726_v30 }
0x17c3   :  { %8322 = vmatprep.mubr.msk.f32.mxu1 %vm9208_vm2, %v9209_v8 }
0x187d   :  { %v5900_v62 = vpop.f32.mrb[96].mxu1 }
0x187e   :  { %v8248_v63 = vpop.f32.mrb[97].mxu1 }
0x1881   :  { %v5827_v59 = vpop.f32.mrb[126].mxu0 }
0x1882   :  { %v5901_v36 = vadd.f32 %v5900_v62, %v5827_v59  ;;  %v8237_v10 = vpop.f32.mrb[127].mxu0 }
0x1885   :  { %v5973_v23 = vpop.f32.mrb[98].mxu1 }
0x1886   :  { %v5977_v39 = vadd.f32 %v5973_v23, %v5901_v36  ;;  %v8259_v41 = vpop.f32.mrb[99].mxu1 }
0x1887   :  { %v7511_v41 = vld [vmem:[%s13171_s14] ss:$0 sm:$0xff] }
0x1889   :  { %v6047_v40 = vpop.f32.mrb[128].mxu0 }
0x188a   :  { %v6051_v46 = vadd.f32 %v6047_v40, %v5977_v39  ;;  %v8270_v32 = vpop.f32.mrb[129].mxu0 }
0x188d   :  { %v6121_v5 = vpop.f32.mrb[100].mxu1 }
0x188e   :  { %v6125_v53 = vadd.f32 %v6121_v5, %v6051_v46  ;;  %v8281_v47 = vpop.f32.mrb[101].mxu1  ;;  %v7512_v46 = vld [vmem:[%s13172_s15] ss:$0 sm:$0xff] }
0x188f   :  { %v7513_v47 = vld [vmem:[%s13174_s17] ss:$0 sm:$0xff]  ;;  %s13300_s17 = sld [smem:[#allocation35_spill]] }
0x1891   :  { %v6195_v58 = vpop.f32.mrb[130].mxu0 }
0x1892   :  { %v6199_v24 = vadd.f32 %v6195_v58, %v6125_v53  ;;  %v8292_v14 = vpop.f32.mrb[131].mxu0  ;;  %v12870_v53 = vld [vmem:[%s13175_s18] sm:$0xff] }
0x1893   :  { %v6444_v58 = vld [vmem:[%s13176_s19 + $0x60] sm:$0xff] }
0x1894   :  { %v6432_v14 = vld [vmem:[%s13176_s19] sm:$0xff] }
0x1895   :  { %v6269_v45 = vpop.f32.mrb[102].mxu1 }
0x1896   :  { %v6273_v12 = vadd.f32 %v6269_v45, %v6199_v24  ;;  %v8303_v54 = vpop.f32.mrb[103].mxu1  ;;  %v6445_v24 = vld [vmem:[%s13176_s19 + $0x68] sm:$0xff] }
0x1897   :  { %v6433_v45 = vld [vmem:[%s13176_s19 + $0x8] sm:$0xff] }
0x1898   :  { %v6281_v4 = vadd.f32 %v7508_v18, %v6273_v12  ;;  %v6553_v12 = vrot.slane %v12870_v53, 2 }
0x189a   :  { %v6283_v13 = vmul.f32 0.70710677, %v6281_v4  ;;  %v6282_v55 = vmul.f32 0.5, %v6281_v4 }
0x189c   :  { %v6286_v43 = vand.u32 2147483647, %v6283_v13  ;;  %vm6284_vm0 = vcmp.ge.f32.partialorder %v6283_v13, 0.0  ;;  %v8754_v13 = vpack.c.bf16 %v6445_v24, %v6444_v58 }
0x189d   :  { %v6285_v19 = vsel %vm6284_vm0, 1.0, %v13269_v31  ;;  %v6347_v31 = vld [vmem:[%s13173_s16] sm:$0xff] }
0x189e   :  { %v6287_v21 = vmul.f32 0.3275911, %v6286_v43  ;;  %v6300_v29 = vsub.f32 0.0, %v6286_v43  ;;  %v8748_v60 = vpack.c.bf16 %v6348_v38, %v6347_v31  ;;  %v6456_v31 = vld [vmem:[%s13176_s19 + $0xc0] sm:$0xff]  ;;  %v6457_v38 = vld [vmem:[%s13176_s19 + $0xc8] sm:$0xff] }
0x18a0   :  { %v6288_v61 = vadd.f32 1.0, %v6287_v21  ;;  %v6301_v7 = vmul.f32 %v6300_v29, %v6286_v43  ;;  %8749 = vmatpush3.bf16.msra.mxu0 %v8748_v60  ;;  %v6446_v43 = vld [vmem:[%s13176_s19 + $0x70] sm:$0xff]  ;;  %v8772_v21 = vpack.c.bf16 %v6433_v45, %v6432_v14  ;;  %v6472_v14 = vld [vmem:[%s13176_s19 + $0x140] sm:$0xff]  ;;  %v6473_v45 = vld [vmem:[%s13176_s19 + $0x148] sm:$0xff] }
0x18a1   :  { %8750 = vmatprep.subr.bf16.mxu0 %v13270_v42  ;;  %v6434_v29 = vld [vmem:[%s13176_s19 + $0x10] sm:$0xff] }
0x18a2   :  { %9165 = vrcp.f32 %v6288_v61  ;;  %v6302_v20 = vmul.f32 1.442695, %v6301_v7  ;;  %v6447_v61 = vld [vmem:[%s13176_s19 + $0x78] sm:$0xff] }
0x18a3   :  { %v8757_v7 = vpack.c.bf16 %v6447_v61, %v6446_v43  ;;  %v6475_v43 = vld [vmem:[%s13176_s19 + $0x158] sm:$0xff]  ;;  %v6466_v61 = vld [vmem:[%s13176_s19 + $0x110] sm:$0xff] }
0x18a4   :  { %9167 = vpow2.f32 %v6302_v20  ;;  %v6449_v20 = vld [vmem:[%s13176_s19 + $0x88] sm:$0xff] }
0x18ac   :  { %v9166_v15 = vpop.eup %9165 }
0x18ad   :  { %v6291_v33 = vmul.f32 1.0614054, %v9166_v15 }
0x18ae   :  { %v9168_v51 = vpop.eup %9167 }
0x18af   :  { %v7509_v1 = vadd.f32 -1.4531521, %v6291_v33  ;;  %v6448_v33 = vld [vmem:[%s13176_s19 + $0x80] sm:$0xff] }
0x18b1   :  { %v6293_v35 = vmul.f32 %v9166_v15, %v7509_v1 }
0x18b3   :  { %v6294_v0 = vadd.f32 1.4214138, %v6293_v35  ;;  %v6436_v35 = vld [vmem:[%s13176_s19 + $0x20] sm:$0xff] }
0x18b5   :  { %v6295_v17 = vmul.f32 %v9166_v15, %v6294_v0  ;;  %v6437_v0 = vld [vmem:[%s13176_s19 + $0x28] sm:$0xff] }
0x18b7   :  { %v7510_v6 = vadd.f32 -0.28449672, %v6295_v17  ;;  %v8760_v17 = vpack.c.bf16 %v6449_v20, %v6448_v33  ;;  %v6477_v33 = vld [vmem:[%s13176_s19 + $0x168] sm:$0xff]  ;;  %v6478_v20 = vld [vmem:[%s13176_s19 + $0x170] sm:$0xff] }
0x18b9   :  { %v6297_v49 = vmul.f32 %v9166_v15, %v7510_v6  ;;  %v6450_v6 = vld [vmem:[%s13176_s19 + $0x90] sm:$0xff] }
0x18bb   :  { %v6298_v11 = vadd.f32 0.2548296, %v6297_v49  ;;  %v8778_v49 = vpack.c.bf16 %v6437_v0, %v6436_v35  ;;  %v6479_v35 = vld [vmem:[%s13176_s19 + $0x178] sm:$0xff] }
0x18bc   :  { %v8823_v0 = vpack.c.bf16 %v6479_v35, %v6478_v20 }
0x18bd   :  { %v6299_v56 = vmul.f32 %v9166_v15, %v6298_v11  ;;  %v6435_v15 = vld [vmem:[%s13176_s19 + $0x18] sm:$0xff] }
0x18be   :  { %v8775_v1 = vpack.c.bf16 %v6435_v15, %v6434_v29  ;;  %v6451_v11 = vld [vmem:[%s13176_s19 + $0x98] sm:$0xff]  ;;  %v6476_v15 = vld [vmem:[%s13176_s19 + $0x160] sm:$0xff] }
0x18bf   :  { %v6304_v28 = vmul.f32 %v9168_v51, %v6299_v56  ;;  %v6438_v56 = vld [vmem:[%s13176_s19 + $0x30] sm:$0xff]  ;;  %v6439_v51 = vld [vmem:[%s13176_s19 + $0x38] sm:$0xff] }
0x18c0   :  { %v6467_v29 = vld [vmem:[%s13176_s19 + $0x118] sm:$0xff] }
0x18c1   :  { %v6305_v37 = vsub.f32 1.0, %v6304_v28  ;;  %v8763_v28 = vpack.c.bf16 %v6451_v11, %v6450_v6  ;;  %v7092_v6 = vld [vmem:[%s13300_s17 + $0x8] sm:$0xff] }
0x18c3   :  { %v6306_v34 = vmul.f32 %v6305_v37, %v6285_v19  ;;  %v6452_v37 = vld [vmem:[%s13176_s19 + $0xa0] sm:$0xff]  ;;  %v8781_v19 = vpack.c.bf16 %v6439_v51, %v6438_v56 }
0x18c5   :  { %v6307_v25 = vadd.f32 1.0, %v6306_v34  ;;  %v6453_v34 = vld [vmem:[%s13176_s19 + $0xa8] sm:$0xff] }
0x18c7   :  { %v6308_v16 = vmul.f32 %v6307_v25, %v6282_v55  ;;  %v6440_v55 = vld [vmem:[%s13176_s19 + $0x40] sm:$0xff]  ;;  %v6441_v25 = vld [vmem:[%s13176_s19 + $0x48] sm:$0xff] }
0x18c9   :  { %v6309_v26 = vadd.f32 %v6308_v16, %v12695_v52  ;;  %v6349_v52 = vld [vmem:[%s13173_s16 + $0x10] sm:$0xff]  ;;  %v8766_v16 = vpack.c.bf16 %v6453_v34, %v6452_v37  ;;  %v7094_v34 = vld [vmem:[%s13300_s17 + $0x18] sm:$0xff] }
0x18ca   :  { %v8751_v22 = vpack.c.bf16 %v6350_v57, %v6349_v52  ;;  %v8790_v52 = vpack.c.bf16 %v6457_v38, %v6456_v31  ;;  %v7099_v31 = vld [vmem:[%s13300_s17 + $0x40] sm:$0xff]  ;;  %v7100_v38 = vld [vmem:[%s13300_s17 + $0x48] sm:$0xff] }
0x18cb   :  { %v6310_v27 = vsel %vm450_vm4, %v6309_v26, 0.0 }
0x18cc   :  { %6311 = vadd.xlane.f32.xlu0 %v6310_v27  ;;  %8752 = vmatpush3.bf16.msra.mxu0 %v8751_v22  ;;  %v6454_v27 = vld [vmem:[%s13176_s19 + $0xb0] sm:$0xff] }
0x18cd   :  { %8315 = vmatprep.subr.mxu0 %v9209_v8  ;;  %v6458_v22 = vld [vmem:[%s13176_s19 + $0xd0] sm:$0xff] }
0x1959   :  { %v6312_v50 = vpop.xlane.xlu0 %6311 }
0x195a   :  { %v6314_v48 = vmul.f32 0.03125, %v6312_v50  ;;  %v6455_v50 = vld [vmem:[%s13176_s19 + $0xb8] sm:$0xff] }
0x195c   :  { %v6315_v3 = vsub.f32 %v6309_v26, %v6314_v48  ;;  %v8784_v26 = vpack.c.bf16 %v6441_v25, %v6440_v55  ;;  %v8769_v48 = vpack.c.bf16 %v6455_v50, %v6454_v27  ;;  %v7096_v27 = vld [vmem:[%s13300_s17 + $0x28] sm:$0xff] }
0x195e   :  { %v6316_v9 = vmul.f32 %v6315_v3, %v6315_v3 }
0x1960   :  { %v6317_v2 = vsel %vm450_vm4, %v6316_v9, 0.0  ;;  %v6443_v9 = vld [vmem:[%s13176_s19 + $0x58] sm:$0xff] }
0x1961   :  { %6318 = vadd.xlane.f32.xlu1 %v6317_v2 }
0x19ee   :  { %v6319_v30 = vpop.xlane.xlu1 %6318 }
0x19ef   :  { %v6320_v44 = vmul.f32 0.03125, %v6319_v30  ;;  %v6459_v30 = vld [vmem:[%s13176_s19 + $0xd8] sm:$0xff] }
0x19f1   :  { %v6321_v62 = vadd.f32 1e-05, %v6320_v44 }
0x19f3   :  { %9169 = vrsqrt.f32 %v6321_v62  ;;  %vm6324_vm10 = vcmp.eq.f32.partialorder %v6321_v62, inf  ;;  %v6327_v36 = vand.u32 2147483648, %v6321_v62  ;;  %vm6326_vm13 = vcmp.eq.f32.partialorder %v6321_v62, 0.0 }
0x19fd   :  { %v9170_v63 = vpop.eup %9169 }
0x19fe   :  { %v6323_v59 = vmul.f32 %v9170_v63, %v6321_v62 }
0x1a00   :  { %v6325_v10 = vsel %vm6324_vm10, %v6321_v62, %v6323_v59  ;;  %v6772_v62 = vrot.slane %v12870_v53, 4  ;;  %v8793_v59 = vpack.c.bf16 %v6459_v30, %v6458_v22  ;;  %v7103_v30 = vld [vmem:[%s13300_s17 + $0x60] sm:$0xff] }
0x1a01   :  { %v6328_v23 = vsel %vm6326_vm13, %v6327_v36, %v6325_v10  ;;  %v6468_v36 = vld [vmem:[%s13176_s19 + $0x120] sm:$0xff]  ;;  %v6469_v10 = vld [vmem:[%s13176_s19 + $0x128] sm:$0xff] }
0x1a02   :  { %9171 = vrcp.f32 %v6328_v23  ;;  %v6460_v23 = vld [vmem:[%s13176_s19 + $0xe0] sm:$0xff] }
0x1a0c   :  { %v9172_v39 = vpop.eup %9171 }
0x1a0d   :  { %v6330_v40 = vmul.f32 %v9172_v39, %v6315_v3  ;;  %v6442_v3 = vld [vmem:[%s13176_s19 + $0x50] sm:$0xff]  ;;  %v6461_v39 = vld [vmem:[%s13176_s19 + $0xe8] sm:$0xff] }
0x1a0e   :  { %v8787_v2 = vpack.c.bf16 %v6443_v9, %v6442_v3  ;;  %v7098_v9 = vld [vmem:[%s13300_s17 + $0x38] sm:$0xff] }
0x1a0f   :  { %v6338_v32 = vmul.f32 %v7511_v41, %v6330_v40  ;;  %v6919_v41 = vrot.slane %v12870_v53, 6  ;;  %v8808_v40 = vpack.c.bf16 %v6469_v10, %v6468_v36 }
0x1a11   :  { %v6346_v5 = vadd.f32 %v7512_v46, %v6338_v32  ;;  %v8796_v46 = vpack.c.bf16 %v6461_v39, %v6460_v23  ;;  %v6470_v32 = vld [vmem:[%s13176_s19 + $0x130] sm:$0xff] }
0x1a13   :  { %8313 = vmatmul.mubr.msk.f32.vlgmr.msra.gmra.mrb[132].mxu0 %vm450_vm4, %v6346_v5  ;;  %v6471_v5 = vld [vmem:[%s13176_s19 + $0x138] sm:$0xff]  ;;  %vm7184_vm4 = vcmask 9216  }
0x1a14   :  { %8317 = vmatprep.mubr.msk.f32.mxu0 %vm9208_vm2, %v9209_v8  ;;  %v8811_v58 = vpack.c.bf16 %v6471_v5, %v6470_v32  ;;  %v7524_v5 = vld [vmem:[%s13302_s5] ss:$0 sm:$0xff] }
0x1ae6   :  { %v6427_v18 = vpop.f32.mrb[132].mxu0 }
0x1ae7   :  { %v12888_v54 = vadd.f32 %v7513_v47, %v6427_v18  ;;  %v8314_v4 = vpop.f32.mrb[133].mxu0  ;;  %v6463_v47 = vld [vmem:[%s13176_s19 + $0xf8] sm:$0xff]  ;;  %v6464_v18 = vld [vmem:[%s13176_s19 + $0x100] sm:$0xff] }
0x1ae9   :  { %8316 = vmatpush3.msra.mxu0 %v12888_v54  ;;  %8321 = vmatpush3.msra.mxu1 %v12888_v54 }
0x1aea   :  { %8323 = vmatmul.mubr.msk.f32.vlgmr.msra.gmra.mrb[104].mxu1 %vm5608_vm9, %v6553_v12  ;;  %8318 = vmatmul.mubr.msk.f32.vlgmr.msra.gmra.mrb[134].mxu0 %vm5608_vm9, %v12870_v53  ;;  %v6462_v53 = vld [vmem:[%s13176_s19 + $0xf0] sm:$0xff]  ;;  %v6465_v12 = vld [vmem:[%s13176_s19 + $0x108] sm:$0xff] }
0x1aeb   :  { %8753 = vmatprep.subr.bf16.mxu0 %v13270_v42  ;;  %8771 = vmatprep.subr.bf16.mxu1 %v13270_v42  ;;  %v8799_v24 = vpack.c.bf16 %v6463_v47, %v6462_v53  ;;  %v8802_v4 = vpack.c.bf16 %v6465_v12, %v6464_v18  ;;  %v7525_v47 = vld [vmem:[%s13303_s9] ss:$0 sm:$0xff] }
0x1aec   :  { %8755 = vmatpush3.bf16.msra.mxu0 %v8754_v13  ;;  %8773 = vmatpush3.bf16.msra.mxu1 %v8772_v21  ;;  %v6474_v13 = vld [vmem:[%s13176_s19 + $0x150] sm:$0xff]  ;;  %s13301_s19 = sld [smem:[#allocation32_spill]] }
0x1aed   :  { %8756 = vmatprep.subr.bf16.mxu0 %v13270_v42  ;;  %8774 = vmatprep.subr.bf16.mxu1 %v13270_v42  ;;  %v8817_v21 = vpack.c.bf16 %v6475_v43, %v6474_v13 }
0x1aee   :  { %8349 = vmatprep.mubr.msk.f32.mxu0 %vm9208_vm2, %v9209_v8  ;;  %8376 = vmatprep.mubr.msk.f32.mxu1 %vm9208_vm2, %v9209_v8 }
0x1af0   :  { %8758 = vmatpush3.bf16.msra.mxu0 %v8757_v7  ;;  %8776 = vmatpush3.bf16.msra.mxu1 %v8775_v1  ;;  %v8805_v7 = vpack.c.bf16 %v6467_v29, %v6466_v61  ;;  %v8820_v1 = vpack.c.bf16 %v6477_v33, %v6476_v15 }
0x1af1   :  { %8759 = vmatprep.subr.bf16.mxu0 %v13270_v42  ;;  %8777 = vmatprep.subr.bf16.mxu1 %v13270_v42 }
0x1af4   :  { %8761 = vmatpush3.bf16.msra.mxu0 %v8760_v17  ;;  %8779 = vmatpush3.bf16.msra.mxu1 %v8778_v49  ;;  %v7091_v17 = vld [vmem:[%s13300_s17] sm:$0xff] }
0x1af5   :  { %8762 = vmatprep.subr.bf16.mxu0 %v13270_v42  ;;  %8780 = vmatprep.subr.bf16.mxu1 %v13270_v42  ;;  %v8826_v37 = vpack.c.bf16 %v7092_v6, %v7091_v17 }
0x1af8   :  { %8764 = vmatpush3.bf16.msra.mxu0 %v8763_v28  ;;  %8782 = vmatpush3.bf16.msra.mxu1 %v8781_v19  ;;  %v7093_v19 = vld [vmem:[%s13300_s17 + $0x10] sm:$0xff] }
0x1af9   :  { %8765 = vmatprep.subr.bf16.mxu0 %v13270_v42  ;;  %8783 = vmatprep.subr.bf16.mxu1 %v13270_v42 }
0x1afc   :  { %8767 = vmatpush3.bf16.msra.mxu0 %v8766_v16  ;;  %8785 = vmatpush3.bf16.msra.mxu1 %v8784_v26  ;;  %v8829_v16 = vpack.c.bf16 %v7094_v34, %v7093_v19  ;;  %v7095_v26 = vld [vmem:[%s13300_s17 + $0x20] sm:$0xff] }
0x1afd   :  { %8768 = vmatprep.subr.bf16.mxu0 %v13270_v42  ;;  %8786 = vmatprep.subr.bf16.mxu1 %v13270_v42  ;;  %v8832_v3 = vpack.c.bf16 %v7096_v27, %v7095_v26 }
0x1b00   :  { %8770 = vmatpush3.bf16.msra.mxu0 %v8769_v48  ;;  %8788 = vmatpush3.bf16.msra.mxu1 %v8787_v2 }
0x1b01   :  { %8379 = vmatprep.subr.mxu0 %v9209_v8  ;;  %8789 = vmatprep.subr.bf16.mxu1 %v13270_v42 }
0x1bbd   :  { %v6622_v60 = vpop.f32.mrb[104].mxu1  ;;  %v6549_v57 = vpop.f32.mrb[134].mxu0 }
0x1bbe   :  { %8350 = vmatmul.mubr.msk.f32.vlgmr.msra.gmra.mrb[136].mxu0 %vm2329_vm12, %v6622_v60  ;;  %v8324_v44 = vpop.f32.mrb[105].mxu1  ;;  %8377 = vmatmul.mubr.msk.f32.vlgmr.msra.gmra.mrb[106].mxu1 %vm2329_vm12, %v6549_v57  ;;  %v8319_v63 = vpop.f32.mrb[135].mxu0  ;;  %v7101_v60 = vld [vmem:[%s13300_s17 + $0x50] sm:$0xff]  ;;  %v7102_v57 = vld [vmem:[%s13300_s17 + $0x58] sm:$0xff] }
0x1bbf   :  { %8380 = vmatpush3.msra.mxu0 %v12888_v54  ;;  %8381 = vmatprep.mubr.msk.f32.mxu0 %vm9208_vm2, %v9209_v8  ;;  %v8841_v22 = vpack.c.bf16 %v7102_v57, %v7101_v60  ;;  %v7104_v44 = vld [vmem:[%s13300_s17 + $0x68] sm:$0xff]  ;;  %v7105_v63 = vld [vmem:[%s13300_s17 + $0x70] sm:$0xff] }
0x1bc0   :  { %8411 = vmatprep.subr.mxu0 %v9209_v8  ;;  %8791 = vmatpush3.bf16.msra.mxu1 %v8790_v52  ;;  %v8838_v52 = vpack.c.bf16 %v7100_v38, %v7099_v31 }
0x1bc1   :  { %8792 = vmatprep.subr.bf16.mxu1 %v13270_v42  ;;  %8408 = vmatprep.mubr.msk.f32.mxu1 %vm9208_vm2, %v9209_v8 }
0x1bc2   :  { %8382 = vmatmul.mubr.msk.f32.vlgmr.msra.gmra.mrb[138].mxu0 %vm5608_vm9, %v6772_v62  ;;  %v8844_v62 = vpack.c.bf16 %v7104_v44, %v7103_v30 }
0x1bc3   :  { %8412 = vmatpush3.msra.mxu0 %v12888_v54  ;;  %8413 = vmatprep.mubr.msk.f32.mxu0 %vm9208_vm2, %v9209_v8  ;;  %v8814_v54 = vpack.c.bf16 %v6473_v45, %v6472_v14  ;;  %v7526_v14 = vld [vmem:[%s13304_s26] ss:$0 sm:$0xff] }
0x1bc4   :  { %8807 = vmatprep.subr.bf16.mxu0 %v13270_v42  ;;  %8794 = vmatpush3.bf16.msra.mxu1 %v8793_v59  ;;  %v7106_v59 = vld [vmem:[%s13300_s17 + $0x78] sm:$0xff] }
0x1bc5   :  { %8795 = vmatprep.subr.bf16.mxu1 %v13270_v42  ;;  %v8847_v36 = vpack.c.bf16 %v7106_v59, %v7105_v63 }
0x1bc6   :  { %8414 = vmatmul.mubr.msk.f32.vlgmr.msra.gmra.mrb[140].mxu0 %vm5608_vm9, %v6919_v41 }
0x1bc7   :  { %8809 = vmatpush3.bf16.msra.mxu0 %v8808_v40  ;;  %8440 = vmatprep.mubr.msk.f32.mxu0 %vm9208_vm2, %v9209_v8  ;;  %v7523_v40 = vld [vmem:[%s13301_s19] ss:$0 sm:$0xff] }
0x1bc8   :  { %8810 = vmatprep.subr.bf16.mxu0 %v13270_v42  ;;  %8797 = vmatpush3.bf16.msra.mxu1 %v8796_v46 }
0x1bc9   :  { %8798 = vmatprep.subr.bf16.mxu1 %v13270_v42 }
0x1bcb   :  { %8812 = vmatpush3.bf16.msra.mxu0 %v8811_v58 }
0x1bcc   :  { %8813 = vmatprep.subr.bf16.mxu0 %v13270_v42  ;;  %8800 = vmatpush3.bf16.msra.mxu1 %v8799_v24 }
0x1bcd   :  { %8801 = vmatprep.subr.bf16.mxu1 %v13270_v42 }
0x1bcf   :  { %8815 = vmatpush3.bf16.msra.mxu0 %v8814_v54 }
0x1bd0   :  { %8816 = vmatprep.subr.bf16.mxu0 %v13270_v42  ;;  %8803 = vmatpush3.bf16.msra.mxu1 %v8802_v4 }
0x1bd1   :  { %8804 = vmatprep.subr.bf16.mxu1 %v13270_v42 }
0x1bd3   :  { %8818 = vmatpush3.bf16.msra.mxu0 %v8817_v21 }
0x1bd4   :  { %8819 = vmatprep.subr.bf16.mxu0 %v13270_v42  ;;  %8806 = vmatpush3.bf16.msra.mxu1 %v8805_v7 }
0x1bd5   :  { %8825 = vmatprep.subr.bf16.mxu1 %v13270_v42 }
0x1bd7   :  { %8821 = vmatpush3.bf16.msra.mxu0 %v8820_v1 }
0x1bd8   :  { %8822 = vmatprep.subr.bf16.mxu0 %v13270_v42 }
0x1bdb   :  { %8824 = vmatpush3.bf16.msra.mxu0 %v8823_v0 }
0x1c91   :  { %v6695_v49 = vpop.f32.mrb[136].mxu0  ;;  %v6768_v11 = vpop.f32.mrb[106].mxu1 }
0x1c92   :  { %v8351_v56 = vpop.f32.mrb[137].mxu0  ;;  %v6769_v51 = vadd.f32 %v6768_v11, %v6695_v49  ;;  %v8378_v28 = vpop.f32.mrb[107].mxu1 }
0x1c95   :  { %v6841_v55 = vpop.f32.mrb[138].mxu0 }
0x1c96   :  { %8409 = vmatmul.mubr.msk.f32.vlgmr.msra.gmra.mrb[108].mxu1 %vm2329_vm12, %v6841_v55  ;;  %v8383_v25 = vpop.f32.mrb[139].mxu0 }
0x1c97   :  { %8827 = vmatpush3.bf16.msra.mxu1 %v8826_v37  ;;  %8475 = vmatprep.mubr.msk.f32.mxu1 %vm9208_vm2, %v9209_v8  ;;  %v7097_v8 = vld [vmem:[%s13300_s17 + $0x30] sm:$0xff] }
0x1c98   :  { %8828 = vmatprep.subr.bf16.mxu1 %v13270_v42  ;;  %v8835_v2 = vpack.c.bf16 %v7098_v9, %v7097_v8 }
0x1c99   :  { %v6988_v50 = vpop.f32.mrb[140].mxu0 }
0x1c9a   :  { %8441 = vmatmul.mubr.msk.f32.vlgmr.msra.gmra.mrb[142].mxu0 %vm2329_vm12, %v6988_v50  ;;  %v8415_v48 = vpop.f32.mrb[141].mxu0 }
0x1c9b   :  { %8830 = vmatpush3.bf16.msra.mxu1 %v8829_v16 }
0x1c9c   :  { %8831 = vmatprep.subr.bf16.mxu1 %v13270_v42 }
0x1c9f   :  { %8833 = vmatpush3.bf16.msra.mxu1 %v8832_v3 }
0x1ca0   :  { %8834 = vmatprep.subr.bf16.mxu1 %v13270_v42 }
0x1ca3   :  { %8836 = vmatpush3.bf16.msra.mxu1 %v8835_v2 }
0x1ca4   :  { %8837 = vmatprep.subr.bf16.mxu1 %v13270_v42 }
0x1ca7   :  { %8839 = vmatpush3.bf16.msra.mxu1 %v8838_v52 }
0x1ca8   :  { %8840 = vmatprep.subr.bf16.mxu1 %v13270_v42 }
0x1cab   :  { %8842 = vmatpush3.bf16.msra.mxu1 %v8841_v22 }
0x1cac   :  { %8843 = vmatprep.subr.bf16.mxu1 %v13270_v42 }
0x1caf   :  { %8845 = vmatpush3.bf16.msra.mxu1 %v8844_v62 }
0x1cb0   :  { %8846 = vmatprep.subr.bf16.mxu1 %v13270_v42 }
0x1cb3   :  { %8848 = vmatpush3.bf16.msra.mxu1 %v8847_v36 }
0x1d69   :  { %v6914_v10 = vpop.f32.mrb[108].mxu1 }
0x1d6a   :  { %v6918_v23 = vadd.f32 %v6914_v10, %v6769_v51  ;;  %v8410_v39 = vpop.f32.mrb[109].mxu1 }
0x1d6d   :  { %v7061_v41 = vpop.f32.mrb[142].mxu0 }
0x1d6e   :  { %v7065_v46 = vadd.f32 %v7061_v41, %v6918_v23  ;;  %v8442_v42 = vpop.f32.mrb[143].mxu0 }
0x1d70   :  { %v7073_v32 = vadd.f32 %v7523_v40, %v7065_v46 }
0x1d72   :  { %v7074_v53 = vmax.f32 %v7073_v32, 0.0 }
0x1d74   :  { %v7082_v58 = vmul.f32 %v7524_v5, %v7074_v53 }
0x1d76   :  { %v7090_v24 = vadd.f32 %v7525_v47, %v7082_v58 }
0x1d78   :  { %8476 = vmatmul.mubr.f32.vlgmr.msra.gmra.mrb[110].mxu1 %v7090_v24 }
0x1e4b   :  { %v7180_v45 = vpop.f32.mrb[110].mxu1 }
0x1e4c   :  { %v7181_v18 = vadd.f32 %v7526_v14, %v7180_v45  ;;  %v8477_v12 = vpop.f32.mrb[111].mxu1 }
0x1e4e   :  { %7185 = vst.msk [vmem:[#allocation2] sm:$0x3] %vm7184_vm4, %v7181_v18 }
0x1e4f   :  { %9186 = shalt.err (!%p9183_p4)
}
0x1e50   :  { %s13305_s22 = sld [smem:[#allocation37_spill]] }
0x1e56   :  { %s9187_s10 = scalar_lea.hbm %s13305_s22, 32 }
0x1e57   :  { %p9188_p5 = scmp.ne.s32.totalorder %s13305_s22, %s9187_s10  ;;  %p9191_p6 = scmp.lt.u32.totalorder %s9187_s10, %s13305_s22 }
0x1e59   :  { %p9193_p7 = pnand %p9191_p6, %p9188_p5 }
0x1e5b   :  { %9196 = shalt.err (!%p9193_p7)
}
0x1e5c   :  { %7195 = dma.vmem_to_hbm [thread:$0]  %s7193_s8, 32, %s13305_s22, [#allocation3]  }
0x1e5d   :  { %9197 = dma.done.wait [#allocation3], 32  }
0x1e5e   :  { %9198 = vsyncadd [#allocation3], 4294967264 }
0x1e5f   :  { %7199 = vsyncpa [#allocation3], 1 }

</bundles_post_ra>
